<compile_context>
chip_gen: v6e
topology: v6e:2x2x1
jax: 0.10.0
libtpu: 0.0.40
codegen_flags: <defaults>
</compile_context>

<pallas_src>
import math

import jax
import jax.numpy as jnp
from jax.experimental import pallas as pl
from jax.experimental.pallas import tpu as pltpu


# ----------------------------------------------------------------------------
# Kernel: entire simpleNet forward in one single-step, fully VMEM-resident call
# ----------------------------------------------------------------------------
def _simplenet_kernel(*refs):
    # refs = [x, (24 GRU weight refs), wa1, ba1, wa2, ba2, wf, bf,   <- inputs (31)
    #         out,                                                   <- output
    #         y0, y1, y2]                                            <- VMEM scratch
    *in_refs, out_ref, y0_ref, y1_ref, y2_ref = refs
    x_ref = in_refs[0]
    gru_refs = in_refs[1:-6]          # 3 layers x 2 dirs x (w_ih, w_hh, b_ih, b_hh)
    wa1_ref, ba1_ref, wa2_ref, ba2_ref, wf_ref, bf_ref = in_refs[-6:]

    B, S, _ = x_ref.shape
    H = y0_ref.shape[2] // 2          # hidden size (scratch buffers are (B, S, 2H))

    def run_direction(x_seq, w_ih, w_hh, b_ih, b_hh, reverse, out_buf, col):
        """One GRU direction; writes hidden states into out_buf[:, :, col:col+H]."""
        din = x_seq.shape[-1]
        # Input projection for ALL timesteps at once (single MXU matmul).
        gx = jnp.dot(x_seq.reshape(B * S, din), w_ih,
                     preferred_element_type=jnp.float32) + b_ih
        gx = gx.reshape(B, S, 3 * H)

        h = jnp.zeros((B, H), dtype=jnp.float32)        # PyTorch default h0 = 0
        steps = range(S - 1, -1, -1) if reverse else range(S)
        for t in steps:                                  # statically unrolled (S small)
            g = gx[:, t, :]                                              # (B, 3H)
            gh = jnp.dot(h, w_hh, preferred_element_type=jnp.float32) + b_hh
            r = jax.nn.sigmoid(g[:, 0:H] + gh[:, 0:H])                   # reset gate
            z = jax.nn.sigmoid(g[:, H:2 * H] + gh[:, H:2 * H])           # update gate
            n = jnp.tanh(g[:, 2 * H:3 * H] + r * gh[:, 2 * H:3 * H])     # candidate
            h = (1.0 - z) * n + z * h
            out_buf[:, t:t + 1, col:col + H] = h[:, None, :]

    # ---- 3 bidirectional GRU layers, each writing into its own VMEM buffer ----
    bufs = (y0_ref, y1_ref, y2_ref)
    seq = x_ref[...]
    for layer in range(3):
        base = 8 * layer
        fwd = tuple(gru_refs[base + i][...] for i in range(4))
        bwd = tuple(gru_refs[base + 4 + i][...] for i in range(4))
        run_direction(seq, *fwd, False, bufs[layer], 0)   # forward dir -> cols [0, H)
        run_direction(seq, *bwd, True, bufs[layer], H)    # reverse dir -> cols [H, 2H)
        seq = bufs[layer][...]                            # (B, S, 2H) next layer input

    # ---- SelfAttention: Linear(2H,H) -> tanh -> Linear(H,1) -> softmax(seq) ----
    hidden = jnp.tanh(jnp.dot(seq.reshape(B * S, 2 * H), wa1_ref[...],
                              preferred_element_type=jnp.float32) + ba1_ref[...])
    hidden = hidden.reshape(B, S, H)
    # Linear(H, 1) as broadcast-multiply + lane reduction (avoids a degenerate N=1 matmul).
    logits = jnp.sum(hidden * wa2_ref[...], axis=-1, keepdims=True) + ba2_ref[...]
    # TODO(synk): nn.Dropout() on the attention scores is identity at inference;
    #             training-mode (p=0.5) dropout is not implemented.
    m = jnp.max(logits, axis=1, keepdims=True)            # softmax over the seq dim
    e = jnp.exp(logits - m)
    attn = e / jnp.sum(e, axis=1, keepdims=True)           # (B, S, 1)
    pooled = jnp.sum(seq * attn, axis=1)                    # (B, 2H)

    # ---- Final Linear(2H, out_dim) ----
    out = jnp.dot(pooled, wf_ref[...],
                  preferred_element_type=jnp.float32) + bf_ref[...]
    out_ref[...] = out.astype(out_ref.dtype)


# ----------------------------------------------------------------------------
# Wrapper
# ----------------------------------------------------------------------------
def _flatten_params(params):
    flat = []
    for layer in params["gru"]:
        flat.extend(layer["fwd"])
        flat.extend(layer["bwd"])
    flat.extend([params["wa1"], params["ba1"], params["wa2"], params["ba2"],
                 params["wf"], params["bf"]])
    return flat


def simplenet_forward(x, params):
    """Pallas forward of simpleNet: x (B, S, E) float32 -> (B, out_dim) float32."""
    B, S, _ = x.shape
    H = params["wa2"].shape[1]
    out_dim = params["wf"].shape[1]
    flat = _flatten_params(params)

    vmem = pl.BlockSpec(memory_space=pltpu.MemorySpace.VMEM)   # whole array in VMEM
    return pl.pallas_call(
        _simplenet_kernel,
        out_shape=jax.ShapeDtypeStruct((B, out_dim), jnp.float32),
        in_specs=[vmem] * (1 + len(flat)),
        out_specs=vmem,
        # Per-layer bidirectional GRU outputs stay on-chip in these buffers
        # (3 x B*S*2H f32 = 12 KiB at the test shapes).
        scratch_shapes=[pltpu.VMEM((B, S, 2 * H), jnp.float32) for _ in range(3)],
    )(x, *flat)


# ----------------------------------------------------------------------------
# Parameter init (mirrors the PyTorch module; weights stored pre-transposed)
# ----------------------------------------------------------------------------
def init_simplenet_params(key, embed_dim, h_dim, out_dim):
    keys = iter(jax.random.split(key, 40))

    def uniform(shape, bound):
        return jax.random.uniform(next(keys), shape, jnp.float32, -bound, bound)

    k_gru = 1.0 / math.sqrt(h_dim)          # nn.GRU init: U(-1/sqrt(H), 1/sqrt(H))
    gru = []
    in_size = embed_dim
    for _ in range(3):
        layer = {}
        for d in ("fwd", "bwd"):
            layer[d] = (
                uniform((in_size, 3 * h_dim), k_gru),   # W_ih^T  (gate order r|z|n)
                uniform((h_dim, 3 * h_dim), k_gru),     # W_hh^T
                uniform((1, 3 * h_dim), k_gru),         # b_ih
                uniform((1, 3 * h_dim), k_gru),         # b_hh
            )
        gru.append(layer)
        in_size = 2 * h_dim                             # bidirectional output width

    k1 = 1.0 / math.sqrt(2 * h_dim)
    k2 = 1.0 / math.sqrt(h_dim)
    return {
        "gru": gru,
        "wa1": uniform((2 * h_dim, h_dim), k1),   # SelfAttention Linear(2H, H)
        "ba1": uniform((1, h_dim), k1),
        "wa2": uniform((1, h_dim), k2),           # SelfAttention Linear(H, 1) weight
        "ba2": uniform((1, 1), k2),
        "wf": uniform((2 * h_dim, out_dim), k1),  # simpleNet.fc Linear(2H, out_dim)
        "bf": uniform((1, out_dim), k1),
        # simpleNet.fc2 (Linear(embed_dim, out_dim)) is unused in forward() — omitted.
    }


# ----------------------------------------------------------------------------
# Pure-JAX (non-Pallas) reference of the same forward pass
# ----------------------------------------------------------------------------
def simplenet_reference(x, params):
    B, S, _ = x.shape
    H = params["wa2"].shape[1]
    hp = jax.lax.Precision.HIGHEST

    def gru_dir(seq, w_ih, w_hh, b_ih, b_hh, reverse):
        din = seq.shape[-1]
        gx = (jnp.dot(seq.reshape(B * S, din), w_ih, precision=hp) + b_ih)
        gx = gx.reshape(B, S, 3 * H)
        h = jnp.zeros((B, H), jnp.float32)
        outs = [None] * S
        steps = range(S - 1, -1, -1) if reverse else range(S)
        for t in steps:
            g = gx[:, t, :]
            gh = jnp.dot(h, w_hh, precision=hp) + b_hh
            r = jax.nn.sigmoid(g[:, :H] + gh[:, :H])
            z = jax.nn.sigmoid(g[:, H:2 * H] + gh[:, H:2 * H])
            n = jnp.tanh(g[:, 2 * H:] + r * gh[:, 2 * H:])
            h = (1.0 - z) * n + z * h
            outs[t] = h
        return jnp.stack(outs, axis=1)

    seq = x
    for layer in params["gru"]:
        f = gru_dir(seq, *layer["fwd"], False)
        b = gru_dir(seq, *layer["bwd"], True)
        seq = jnp.concatenate([f, b], axis=-1)

    hidden = jnp.tanh(jnp.dot(seq.reshape(B * S, 2 * H), params["wa1"],
                              precision=hp) + params["ba1"]).reshape(B, S, H)
    logits = jnp.sum(hidden * params["wa2"], axis=-1, keepdims=True) + params["ba2"]
    attn = jax.nn.softmax(logits, axis=1)
    pooled = jnp.sum(seq * attn, axis=1)
    return jnp.dot(pooled, params["wf"], precision=hp) + params["bf"]


if __name__ == "__main__":
    embed_dim, h_dim, out_dim = 32, 32, 8
    B, S = 2, 8

    key = jax.random.PRNGKey(0)
    k_params, k_x = jax.random.split(key)
    params = init_simplenet_params(k_params, embed_dim, h_dim, out_dim)
    x = jax.random.normal(k_x, (B, S, embed_dim), dtype=jnp.float32)

    out = simplenet_forward(x, params)
    out = jax.block_until_ready(out)

    ref = simplenet_reference(x, params)
    assert out.shape == (B, out_dim)
    assert out.dtype == jnp.float32
    max_diff = float(jnp.max(jnp.abs(out - ref)))
    assert max_diff < 5e-2, f"mismatch vs reference forward: max|diff|={max_diff}"

    print("KERNEL_OK")
</pallas_src>

<mosaic_0001>
module attributes {stable_mosaic.version = 11 : i64} {
  func.func @_simplenet_kernel(%arg0: memref<2x8x32xf32, #tpu.memory_space<vmem>>, %arg1: memref<32x96xf32, #tpu.memory_space<vmem>>, %arg2: memref<32x96xf32, #tpu.memory_space<vmem>>, %arg3: memref<1x96xf32, #tpu.memory_space<vmem>>, %arg4: memref<1x96xf32, #tpu.memory_space<vmem>>, %arg5: memref<32x96xf32, #tpu.memory_space<vmem>>, %arg6: memref<32x96xf32, #tpu.memory_space<vmem>>, %arg7: memref<1x96xf32, #tpu.memory_space<vmem>>, %arg8: memref<1x96xf32, #tpu.memory_space<vmem>>, %arg9: memref<64x96xf32, #tpu.memory_space<vmem>>, %arg10: memref<32x96xf32, #tpu.memory_space<vmem>>, %arg11: memref<1x96xf32, #tpu.memory_space<vmem>>, %arg12: memref<1x96xf32, #tpu.memory_space<vmem>>, %arg13: memref<64x96xf32, #tpu.memory_space<vmem>>, %arg14: memref<32x96xf32, #tpu.memory_space<vmem>>, %arg15: memref<1x96xf32, #tpu.memory_space<vmem>>, %arg16: memref<1x96xf32, #tpu.memory_space<vmem>>, %arg17: memref<64x96xf32, #tpu.memory_space<vmem>>, %arg18: memref<32x96xf32, #tpu.memory_space<vmem>>, %arg19: memref<1x96xf32, #tpu.memory_space<vmem>>, %arg20: memref<1x96xf32, #tpu.memory_space<vmem>>, %arg21: memref<64x96xf32, #tpu.memory_space<vmem>>, %arg22: memref<32x96xf32, #tpu.memory_space<vmem>>, %arg23: memref<1x96xf32, #tpu.memory_space<vmem>>, %arg24: memref<1x96xf32, #tpu.memory_space<vmem>>, %arg25: memref<64x32xf32, #tpu.memory_space<vmem>>, %arg26: memref<1x32xf32, #tpu.memory_space<vmem>>, %arg27: memref<1x32xf32, #tpu.memory_space<vmem>>, %arg28: memref<1x1xf32, #tpu.memory_space<vmem>>, %arg29: memref<64x8xf32, #tpu.memory_space<vmem>>, %arg30: memref<1x8xf32, #tpu.memory_space<vmem>>, %arg31: memref<2x8xf32, #tpu.memory_space<vmem>>, %arg32: memref<2x8x64xf32, #tpu.memory_space<vmem>>, %arg33: memref<2x8x64xf32, #tpu.memory_space<vmem>>, %arg34: memref<2x8x64xf32, #tpu.memory_space<vmem>>) attributes {dimension_semantics = [], scalar_prefetch = 0 : i64, scratch_operands = 3 : i64, tpu.core_type = #tpu.core_type<tc>} {
    %c0 = arith.constant 0 : index
    %c0_0 = arith.constant 0 : index
    %c0_1 = arith.constant 0 : index
    %0 = vector.load %arg0[%c0, %c0_0, %c0_1] : memref<2x8x32xf32, #tpu.memory_space<vmem>>, vector<2x8x32xf32>
    %c0_2 = arith.constant 0 : index
    %c0_3 = arith.constant 0 : index
    %1 = vector.load %arg1[%c0_2, %c0_3] : memref<32x96xf32, #tpu.memory_space<vmem>>, vector<32x96xf32>
    %c0_4 = arith.constant 0 : index
    %c0_5 = arith.constant 0 : index
    %2 = vector.load %arg2[%c0_4, %c0_5] : memref<32x96xf32, #tpu.memory_space<vmem>>, vector<32x96xf32>
    %c0_6 = arith.constant 0 : index
    %c0_7 = arith.constant 0 : index
    %3 = vector.load %arg3[%c0_6, %c0_7] : memref<1x96xf32, #tpu.memory_space<vmem>>, vector<1x96xf32>
    %c0_8 = arith.constant 0 : index
    %c0_9 = arith.constant 0 : index
    %4 = vector.load %arg4[%c0_8, %c0_9] : memref<1x96xf32, #tpu.memory_space<vmem>>, vector<1x96xf32>
    %c0_10 = arith.constant 0 : index
    %c0_11 = arith.constant 0 : index
    %5 = vector.load %arg5[%c0_10, %c0_11] : memref<32x96xf32, #tpu.memory_space<vmem>>, vector<32x96xf32>
    %c0_12 = arith.constant 0 : index
    %c0_13 = arith.constant 0 : index
    %6 = vector.load %arg6[%c0_12, %c0_13] : memref<32x96xf32, #tpu.memory_space<vmem>>, vector<32x96xf32>
    %c0_14 = arith.constant 0 : index
    %c0_15 = arith.constant 0 : index
    %7 = vector.load %arg7[%c0_14, %c0_15] : memref<1x96xf32, #tpu.memory_space<vmem>>, vector<1x96xf32>
    %c0_16 = arith.constant 0 : index
    %c0_17 = arith.constant 0 : index
    %8 = vector.load %arg8[%c0_16, %c0_17] : memref<1x96xf32, #tpu.memory_space<vmem>>, vector<1x96xf32>
    %9 = vector.shape_cast %0 : vector<2x8x32xf32> to vector<16x32xf32>
    %cst = arith.constant dense<0.000000e+00> : vector<16x96xf32>
    %10 = tpu.matmul %9, %1, %cst {dimension_numbers = #tpu.dot_dimension_numbers<[1], [0], [0], [1], [0, 0, 1, 1], [], []>} : vector<16x32xf32>, vector<32x96xf32>, vector<16x96xf32> -> vector<16x96xf32>
    %11 = vector.broadcast %3 : vector<1x96xf32> to vector<16x96xf32>
    %12 = arith.addf %10, %11 : vector<16x96xf32>
    %13 = vector.shape_cast %12 : vector<16x96xf32> to vector<2x8x96xf32>
    %cst_18 = arith.constant 0.000000e+00 : f32
    %14 = vector.broadcast %cst_18 : f32 to vector<2x32xf32>
    %15 = vector.extract_strided_slice %13 {offsets = [0, 0, 0], sizes = [2, 1, 96], strides = [1, 1, 1]} : vector<2x8x96xf32> to vector<2x1x96xf32>
    %16 = vector.shape_cast %15 : vector<2x1x96xf32> to vector<2x96xf32>
    %cst_19 = arith.constant dense<0.000000e+00> : vector<2x96xf32>
    %17 = tpu.matmul %14, %2, %cst_19 {dimension_numbers = #tpu.dot_dimension_numbers<[1], [0], [0], [1], [0, 0, 1, 1], [], []>} : vector<2x32xf32>, vector<32x96xf32>, vector<2x96xf32> -> vector<2x96xf32>
    %18 = vector.broadcast %4 : vector<1x96xf32> to vector<2x96xf32>
    %19 = arith.addf %17, %18 : vector<2x96xf32>
    %20 = vector.extract_strided_slice %16 {offsets = [0, 0], sizes = [2, 32], strides = [1, 1]} : vector<2x96xf32> to vector<2x32xf32>
    %21 = vector.extract_strided_slice %19 {offsets = [0, 0], sizes = [2, 32], strides = [1, 1]} : vector<2x96xf32> to vector<2x32xf32>
    %22 = arith.addf %20, %21 : vector<2x32xf32>
    %23 = arith.negf %22 : vector<2x32xf32>
    %24 = math.exp %23 : vector<2x32xf32>
    %cst_20 = arith.constant 1.000000e+00 : f32
    %25 = vector.broadcast %cst_20 : f32 to vector<2x32xf32>
    %26 = arith.addf %25, %24 : vector<2x32xf32>
    %27 = arith.divf %25, %26 : vector<2x32xf32>
    %28 = vector.extract_strided_slice %16 {offsets = [0, 32], sizes = [2, 32], strides = [1, 1]} : vector<2x96xf32> to vector<2x32xf32>
    %29 = vector.extract_strided_slice %19 {offsets = [0, 32], sizes = [2, 32], strides = [1, 1]} : vector<2x96xf32> to vector<2x32xf32>
    %30 = arith.addf %28, %29 : vector<2x32xf32>
    %31 = arith.negf %30 : vector<2x32xf32>
    %32 = math.exp %31 : vector<2x32xf32>
    %cst_21 = arith.constant 1.000000e+00 : f32
    %33 = vector.broadcast %cst_21 : f32 to vector<2x32xf32>
    %34 = arith.addf %33, %32 : vector<2x32xf32>
    %35 = arith.divf %33, %34 : vector<2x32xf32>
    %36 = vector.extract_strided_slice %16 {offsets = [0, 64], sizes = [2, 32], strides = [1, 1]} : vector<2x96xf32> to vector<2x32xf32>
    %37 = vector.extract_strided_slice %19 {offsets = [0, 64], sizes = [2, 32], strides = [1, 1]} : vector<2x96xf32> to vector<2x32xf32>
    %38 = arith.mulf %27, %37 : vector<2x32xf32>
    %39 = arith.addf %36, %38 : vector<2x32xf32>
    %40 = math.tanh %39 : vector<2x32xf32>
    %cst_22 = arith.constant 1.000000e+00 : f32
    %41 = vector.broadcast %cst_22 : f32 to vector<2x32xf32>
    %42 = arith.subf %41, %35 : vector<2x32xf32>
    %43 = arith.mulf %42, %40 : vector<2x32xf32>
    %44 = arith.mulf %35, %14 : vector<2x32xf32>
    %45 = arith.addf %43, %44 : vector<2x32xf32>
    %46 = vector.shape_cast %45 : vector<2x32xf32> to vector<2x1x32xf32>
    %c0_23 = arith.constant 0 : index
    %c0_24 = arith.constant 0 : index
    %c0_25 = arith.constant 0 : index
    %47 = vector.load %arg32[%c0_23, %c0_24, %c0_25] : memref<2x8x64xf32, #tpu.memory_space<vmem>>, vector<2x1x32xf32>
    tpu.vector_store %arg32[%c0_23, %c0_24, %c0_25], %46 {strides = array<i32>} : memref<2x8x64xf32, #tpu.memory_space<vmem>>, vector<2x1x32xf32>,
    %48 = vector.extract_strided_slice %13 {offsets = [0, 1, 0], sizes = [2, 1, 96], strides = [1, 1, 1]} : vector<2x8x96xf32> to vector<2x1x96xf32>
    %49 = vector.shape_cast %48 : vector<2x1x96xf32> to vector<2x96xf32>
    %cst_26 = arith.constant dense<0.000000e+00> : vector<2x96xf32>
    %50 = tpu.matmul %45, %2, %cst_26 {dimension_numbers = #tpu.dot_dimension_numbers<[1], [0], [0], [1], [0, 0, 1, 1], [], []>} : vector<2x32xf32>, vector<32x96xf32>, vector<2x96xf32> -> vector<2x96xf32>
    %51 = vector.broadcast %4 : vector<1x96xf32> to vector<2x96xf32>
    %52 = arith.addf %50, %51 : vector<2x96xf32>
    %53 = vector.extract_strided_slice %49 {offsets = [0, 0], sizes = [2, 32], strides = [1, 1]} : vector<2x96xf32> to vector<2x32xf32>
    %54 = vector.extract_strided_slice %52 {offsets = [0, 0], sizes = [2, 32], strides = [1, 1]} : vector<2x96xf32> to vector<2x32xf32>
    %55 = arith.addf %53, %54 : vector<2x32xf32>
    %56 = arith.negf %55 : vector<2x32xf32>
    %57 = math.exp %56 : vector<2x32xf32>
    %cst_27 = arith.constant 1.000000e+00 : f32
    %58 = vector.broadcast %cst_27 : f32 to vector<2x32xf32>
    %59 = arith.addf %58, %57 : vector<2x32xf32>
    %60 = arith.divf %58, %59 : vector<2x32xf32>
    %61 = vector.extract_strided_slice %49 {offsets = [0, 32], sizes = [2, 32], strides = [1, 1]} : vector<2x96xf32> to vector<2x32xf32>
    %62 = vector.extract_strided_slice %52 {offsets = [0, 32], sizes = [2, 32], strides = [1, 1]} : vector<2x96xf32> to vector<2x32xf32>
    %63 = arith.addf %61, %62 : vector<2x32xf32>
    %64 = arith.negf %63 : vector<2x32xf32>
    %65 = math.exp %64 : vector<2x32xf32>
    %cst_28 = arith.constant 1.000000e+00 : f32
    %66 = vector.broadcast %cst_28 : f32 to vector<2x32xf32>
    %67 = arith.addf %66, %65 : vector<2x32xf32>
    %68 = arith.divf %66, %67 : vector<2x32xf32>
    %69 = vector.extract_strided_slice %49 {offsets = [0, 64], sizes = [2, 32], strides = [1, 1]} : vector<2x96xf32> to vector<2x32xf32>
    %70 = vector.extract_strided_slice %52 {offsets = [0, 64], sizes = [2, 32], strides = [1, 1]} : vector<2x96xf32> to vector<2x32xf32>
    %71 = arith.mulf %60, %70 : vector<2x32xf32>
    %72 = arith.addf %69, %71 : vector<2x32xf32>
    %73 = math.tanh %72 : vector<2x32xf32>
    %cst_29 = arith.constant 1.000000e+00 : f32
    %74 = vector.broadcast %cst_29 : f32 to vector<2x32xf32>
    %75 = arith.subf %74, %68 : vector<2x32xf32>
    %76 = arith.mulf %75, %73 : vector<2x32xf32>
    %77 = arith.mulf %68, %45 : vector<2x32xf32>
    %78 = arith.addf %76, %77 : vector<2x32xf32>
    %79 = vector.shape_cast %78 : vector<2x32xf32> to vector<2x1x32xf32>
    %c0_30 = arith.constant 0 : index
    %c1 = arith.constant 1 : index
    %c0_31 = arith.constant 0 : index
    %80 = vector.load %arg32[%c0_30, %c1, %c0_31] : memref<2x8x64xf32, #tpu.memory_space<vmem>>, vector<2x1x32xf32>
    tpu.vector_store %arg32[%c0_30, %c1, %c0_31], %79 {strides = array<i32>} : memref<2x8x64xf32, #tpu.memory_space<vmem>>, vector<2x1x32xf32>,
    %81 = vector.extract_strided_slice %13 {offsets = [0, 2, 0], sizes = [2, 1, 96], strides = [1, 1, 1]} : vector<2x8x96xf32> to vector<2x1x96xf32>
    %82 = vector.shape_cast %81 : vector<2x1x96xf32> to vector<2x96xf32>
    %cst_32 = arith.constant dense<0.000000e+00> : vector<2x96xf32>
    %83 = tpu.matmul %78, %2, %cst_32 {dimension_numbers = #tpu.dot_dimension_numbers<[1], [0], [0], [1], [0, 0, 1, 1], [], []>} : vector<2x32xf32>, vector<32x96xf32>, vector<2x96xf32> -> vector<2x96xf32>
    %84 = vector.broadcast %4 : vector<1x96xf32> to vector<2x96xf32>
    %85 = arith.addf %83, %84 : vector<2x96xf32>
    %86 = vector.extract_strided_slice %82 {offsets = [0, 0], sizes = [2, 32], strides = [1, 1]} : vector<2x96xf32> to vector<2x32xf32>
    %87 = vector.extract_strided_slice %85 {offsets = [0, 0], sizes = [2, 32], strides = [1, 1]} : vector<2x96xf32> to vector<2x32xf32>
    %88 = arith.addf %86, %87 : vector<2x32xf32>
    %89 = arith.negf %88 : vector<2x32xf32>
    %90 = math.exp %89 : vector<2x32xf32>
    %cst_33 = arith.constant 1.000000e+00 : f32
    %91 = vector.broadcast %cst_33 : f32 to vector<2x32xf32>
    %92 = arith.addf %91, %90 : vector<2x32xf32>
    %93 = arith.divf %91, %92 : vector<2x32xf32>
    %94 = vector.extract_strided_slice %82 {offsets = [0, 32], sizes = [2, 32], strides = [1, 1]} : vector<2x96xf32> to vector<2x32xf32>
    %95 = vector.extract_strided_slice %85 {offsets = [0, 32], sizes = [2, 32], strides = [1, 1]} : vector<2x96xf32> to vector<2x32xf32>
    %96 = arith.addf %94, %95 : vector<2x32xf32>
    %97 = arith.negf %96 : vector<2x32xf32>
    %98 = math.exp %97 : vector<2x32xf32>
    %cst_34 = arith.constant 1.000000e+00 : f32
    %99 = vector.broadcast %cst_34 : f32 to vector<2x32xf32>
    %100 = arith.addf %99, %98 : vector<2x32xf32>
    %101 = arith.divf %99, %100 : vector<2x32xf32>
    %102 = vector.extract_strided_slice %82 {offsets = [0, 64], sizes = [2, 32], strides = [1, 1]} : vector<2x96xf32> to vector<2x32xf32>
    %103 = vector.extract_strided_slice %85 {offsets = [0, 64], sizes = [2, 32], strides = [1, 1]} : vector<2x96xf32> to vector<2x32xf32>
    %104 = arith.mulf %93, %103 : vector<2x32xf32>
    %105 = arith.addf %102, %104 : vector<2x32xf32>
    %106 = math.tanh %105 : vector<2x32xf32>
    %cst_35 = arith.constant 1.000000e+00 : f32
    %107 = vector.broadcast %cst_35 : f32 to vector<2x32xf32>
    %108 = arith.subf %107, %101 : vector<2x32xf32>
    %109 = arith.mulf %108, %106 : vector<2x32xf32>
    %110 = arith.mulf %101, %78 : vector<2x32xf32>
    %111 = arith.addf %109, %110 : vector<2x32xf32>
    %112 = vector.shape_cast %111 : vector<2x32xf32> to vector<2x1x32xf32>
    %c0_36 = arith.constant 0 : index
    %c2 = arith.constant 2 : index
    %c0_37 = arith.constant 0 : index
    %113 = vector.load %arg32[%c0_36, %c2, %c0_37] : memref<2x8x64xf32, #tpu.memory_space<vmem>>, vector<2x1x32xf32>
    tpu.vector_store %arg32[%c0_36, %c2, %c0_37], %112 {strides = array<i32>} : memref<2x8x64xf32, #tpu.memory_space<vmem>>, vector<2x1x32xf32>,
    %114 = vector.extract_strided_slice %13 {offsets = [0, 3, 0], sizes = [2, 1, 96], strides = [1, 1, 1]} : vector<2x8x96xf32> to vector<2x1x96xf32>
    %115 = vector.shape_cast %114 : vector<2x1x96xf32> to vector<2x96xf32>
    %cst_38 = arith.constant dense<0.000000e+00> : vector<2x96xf32>
    %116 = tpu.matmul %111, %2, %cst_38 {dimension_numbers = #tpu.dot_dimension_numbers<[1], [0], [0], [1], [0, 0, 1, 1], [], []>} : vector<2x32xf32>, vector<32x96xf32>, vector<2x96xf32> -> vector<2x96xf32>
    %117 = vector.broadcast %4 : vector<1x96xf32> to vector<2x96xf32>
    %118 = arith.addf %116, %117 : vector<2x96xf32>
    %119 = vector.extract_strided_slice %115 {offsets = [0, 0], sizes = [2, 32], strides = [1, 1]} : vector<2x96xf32> to vector<2x32xf32>
    %120 = vector.extract_strided_slice %118 {offsets = [0, 0], sizes = [2, 32], strides = [1, 1]} : vector<2x96xf32> to vector<2x32xf32>
    %121 = arith.addf %119, %120 : vector<2x32xf32>
    %122 = arith.negf %121 : vector<2x32xf32>
    %123 = math.exp %122 : vector<2x32xf32>
    %cst_39 = arith.constant 1.000000e+00 : f32
    %124 = vector.broadcast %cst_39 : f32 to vector<2x32xf32>
    %125 = arith.addf %124, %123 : vector<2x32xf32>
    %126 = arith.divf %124, %125 : vector<2x32xf32>
    %127 = vector.extract_strided_slice %115 {offsets = [0, 32], sizes = [2, 32], strides = [1, 1]} : vector<2x96xf32> to vector<2x32xf32>
    %128 = vector.extract_strided_slice %118 {offsets = [0, 32], sizes = [2, 32], strides = [1, 1]} : vector<2x96xf32> to vector<2x32xf32>
    %129 = arith.addf %127, %128 : vector<2x32xf32>
    %130 = arith.negf %129 : vector<2x32xf32>
    %131 = math.exp %130 : vector<2x32xf32>
    %cst_40 = arith.constant 1.000000e+00 : f32
    %132 = vector.broadcast %cst_40 : f32 to vector<2x32xf32>
    %133 = arith.addf %132, %131 : vector<2x32xf32>
    %134 = arith.divf %132, %133 : vector<2x32xf32>
    %135 = vector.extract_strided_slice %115 {offsets = [0, 64], sizes = [2, 32], strides = [1, 1]} : vector<2x96xf32> to vector<2x32xf32>
    %136 = vector.extract_strided_slice %118 {offsets = [0, 64], sizes = [2, 32], strides = [1, 1]} : vector<2x96xf32> to vector<2x32xf32>
    %137 = arith.mulf %126, %136 : vector<2x32xf32>
    %138 = arith.addf %135, %137 : vector<2x32xf32>
    %139 = math.tanh %138 : vector<2x32xf32>
    %cst_41 = arith.constant 1.000000e+00 : f32
    %140 = vector.broadcast %cst_41 : f32 to vector<2x32xf32>
    %141 = arith.subf %140, %134 : vector<2x32xf32>
    %142 = arith.mulf %141, %139 : vector<2x32xf32>
    %143 = arith.mulf %134, %111 : vector<2x32xf32>
    %144 = arith.addf %142, %143 : vector<2x32xf32>
    %145 = vector.shape_cast %144 : vector<2x32xf32> to vector<2x1x32xf32>
    %c0_42 = arith.constant 0 : index
    %c3 = arith.constant 3 : index
    %c0_43 = arith.constant 0 : index
    %146 = vector.load %arg32[%c0_42, %c3, %c0_43] : memref<2x8x64xf32, #tpu.memory_space<vmem>>, vector<2x1x32xf32>
    tpu.vector_store %arg32[%c0_42, %c3, %c0_43], %145 {strides = array<i32>} : memref<2x8x64xf32, #tpu.memory_space<vmem>>, vector<2x1x32xf32>,
    %147 = vector.extract_strided_slice %13 {offsets = [0, 4, 0], sizes = [2, 1, 96], strides = [1, 1, 1]} : vector<2x8x96xf32> to vector<2x1x96xf32>
    %148 = vector.shape_cast %147 : vector<2x1x96xf32> to vector<2x96xf32>
    %cst_44 = arith.constant dense<0.000000e+00> : vector<2x96xf32>
    %149 = tpu.matmul %144, %2, %cst_44 {dimension_numbers = #tpu.dot_dimension_numbers<[1], [0], [0], [1], [0, 0, 1, 1], [], []>} : vector<2x32xf32>, vector<32x96xf32>, vector<2x96xf32> -> vector<2x96xf32>
    %150 = vector.broadcast %4 : vector<1x96xf32> to vector<2x96xf32>
    %151 = arith.addf %149, %150 : vector<2x96xf32>
    %152 = vector.extract_strided_slice %148 {offsets = [0, 0], sizes = [2, 32], strides = [1, 1]} : vector<2x96xf32> to vector<2x32xf32>
    %153 = vector.extract_strided_slice %151 {offsets = [0, 0], sizes = [2, 32], strides = [1, 1]} : vector<2x96xf32> to vector<2x32xf32>
    %154 = arith.addf %152, %153 : vector<2x32xf32>
    %155 = arith.negf %154 : vector<2x32xf32>
    %156 = math.exp %155 : vector<2x32xf32>
    %cst_45 = arith.constant 1.000000e+00 : f32
    %157 = vector.broadcast %cst_45 : f32 to vector<2x32xf32>
    %158 = arith.addf %157, %156 : vector<2x32xf32>
    %159 = arith.divf %157, %158 : vector<2x32xf32>
    %160 = vector.extract_strided_slice %148 {offsets = [0, 32], sizes = [2, 32], strides = [1, 1]} : vector<2x96xf32> to vector<2x32xf32>
    %161 = vector.extract_strided_slice %151 {offsets = [0, 32], sizes = [2, 32], strides = [1, 1]} : vector<2x96xf32> to vector<2x32xf32>
    %162 = arith.addf %160, %161 : vector<2x32xf32>
    %163 = arith.negf %162 : vector<2x32xf32>
    %164 = math.exp %163 : vector<2x32xf32>
    %cst_46 = arith.constant 1.000000e+00 : f32
    %165 = vector.broadcast %cst_46 : f32 to vector<2x32xf32>
    %166 = arith.addf %165, %164 : vector<2x32xf32>
    %167 = arith.divf %165, %166 : vector<2x32xf32>
    %168 = vector.extract_strided_slice %148 {offsets = [0, 64], sizes = [2, 32], strides = [1, 1]} : vector<2x96xf32> to vector<2x32xf32>
    %169 = vector.extract_strided_slice %151 {offsets = [0, 64], sizes = [2, 32], strides = [1, 1]} : vector<2x96xf32> to vector<2x32xf32>
    %170 = arith.mulf %159, %169 : vector<2x32xf32>
    %171 = arith.addf %168, %170 : vector<2x32xf32>
    %172 = math.tanh %171 : vector<2x32xf32>
    %cst_47 = arith.constant 1.000000e+00 : f32
    %173 = vector.broadcast %cst_47 : f32 to vector<2x32xf32>
    %174 = arith.subf %173, %167 : vector<2x32xf32>
    %175 = arith.mulf %174, %172 : vector<2x32xf32>
    %176 = arith.mulf %167, %144 : vector<2x32xf32>
    %177 = arith.addf %175, %176 : vector<2x32xf32>
    %178 = vector.shape_cast %177 : vector<2x32xf32> to vector<2x1x32xf32>
    %c0_48 = arith.constant 0 : index
    %c4 = arith.constant 4 : index
    %c0_49 = arith.constant 0 : index
    %179 = vector.load %arg32[%c0_48, %c4, %c0_49] : memref<2x8x64xf32, #tpu.memory_space<vmem>>, vector<2x1x32xf32>
    tpu.vector_store %arg32[%c0_48, %c4, %c0_49], %178 {strides = array<i32>} : memref<2x8x64xf32, #tpu.memory_space<vmem>>, vector<2x1x32xf32>,
    %180 = vector.extract_strided_slice %13 {offsets = [0, 5, 0], sizes = [2, 1, 96], strides = [1, 1, 1]} : vector<2x8x96xf32> to vector<2x1x96xf32>
    %181 = vector.shape_cast %180 : vector<2x1x96xf32> to vector<2x96xf32>
    %cst_50 = arith.constant dense<0.000000e+00> : vector<2x96xf32>
    %182 = tpu.matmul %177, %2, %cst_50 {dimension_numbers = #tpu.dot_dimension_numbers<[1], [0], [0], [1], [0, 0, 1, 1], [], []>} : vector<2x32xf32>, vector<32x96xf32>, vector<2x96xf32> -> vector<2x96xf32>
    %183 = vector.broadcast %4 : vector<1x96xf32> to vector<2x96xf32>
    %184 = arith.addf %182, %183 : vector<2x96xf32>
    %185 = vector.extract_strided_slice %181 {offsets = [0, 0], sizes = [2, 32], strides = [1, 1]} : vector<2x96xf32> to vector<2x32xf32>
    %186 = vector.extract_strided_slice %184 {offsets = [0, 0], sizes = [2, 32], strides = [1, 1]} : vector<2x96xf32> to vector<2x32xf32>
    %187 = arith.addf %185, %186 : vector<2x32xf32>
    %188 = arith.negf %187 : vector<2x32xf32>
    %189 = math.exp %188 : vector<2x32xf32>
    %cst_51 = arith.constant 1.000000e+00 : f32
    %190 = vector.broadcast %cst_51 : f32 to vector<2x32xf32>
    %191 = arith.addf %190, %189 : vector<2x32xf32>
    %192 = arith.divf %190, %191 : vector<2x32xf32>
    %193 = vector.extract_strided_slice %181 {offsets = [0, 32], sizes = [2, 32], strides = [1, 1]} : vector<2x96xf32> to vector<2x32xf32>
    %194 = vector.extract_strided_slice %184 {offsets = [0, 32], sizes = [2, 32], strides = [1, 1]} : vector<2x96xf32> to vector<2x32xf32>
    %195 = arith.addf %193, %194 : vector<2x32xf32>
    %196 = arith.negf %195 : vector<2x32xf32>
    %197 = math.exp %196 : vector<2x32xf32>
    %cst_52 = arith.constant 1.000000e+00 : f32
    %198 = vector.broadcast %cst_52 : f32 to vector<2x32xf32>
    %199 = arith.addf %198, %197 : vector<2x32xf32>
    %200 = arith.divf %198, %199 : vector<2x32xf32>
    %201 = vector.extract_strided_slice %181 {offsets = [0, 64], sizes = [2, 32], strides = [1, 1]} : vector<2x96xf32> to vector<2x32xf32>
    %202 = vector.extract_strided_slice %184 {offsets = [0, 64], sizes = [2, 32], strides = [1, 1]} : vector<2x96xf32> to vector<2x32xf32>
    %203 = arith.mulf %192, %202 : vector<2x32xf32>
    %204 = arith.addf %201, %203 : vector<2x32xf32>
    %205 = math.tanh %204 : vector<2x32xf32>
    %cst_53 = arith.constant 1.000000e+00 : f32
    %206 = vector.broadcast %cst_53 : f32 to vector<2x32xf32>
    %207 = arith.subf %206, %200 : vector<2x32xf32>
    %208 = arith.mulf %207, %205 : vector<2x32xf32>
    %209 = arith.mulf %200, %177 : vector<2x32xf32>
    %210 = arith.addf %208, %209 : vector<2x32xf32>
    %211 = vector.shape_cast %210 : vector<2x32xf32> to vector<2x1x32xf32>
    %c0_54 = arith.constant 0 : index
    %c5 = arith.constant 5 : index
    %c0_55 = arith.constant 0 : index
    %212 = vector.load %arg32[%c0_54, %c5, %c0_55] : memref<2x8x64xf32, #tpu.memory_space<vmem>>, vector<2x1x32xf32>
    tpu.vector_store %arg32[%c0_54, %c5, %c0_55], %211 {strides = array<i32>} : memref<2x8x64xf32, #tpu.memory_space<vmem>>, vector<2x1x32xf32>,
    %213 = vector.extract_strided_slice %13 {offsets = [0, 6, 0], sizes = [2, 1, 96], strides = [1, 1, 1]} : vector<2x8x96xf32> to vector<2x1x96xf32>
    %214 = vector.shape_cast %213 : vector<2x1x96xf32> to vector<2x96xf32>
    %cst_56 = arith.constant dense<0.000000e+00> : vector<2x96xf32>
    %215 = tpu.matmul %210, %2, %cst_56 {dimension_numbers = #tpu.dot_dimension_numbers<[1], [0], [0], [1], [0, 0, 1, 1], [], []>} : vector<2x32xf32>, vector<32x96xf32>, vector<2x96xf32> -> vector<2x96xf32>
    %216 = vector.broadcast %4 : vector<1x96xf32> to vector<2x96xf32>
    %217 = arith.addf %215, %216 : vector<2x96xf32>
    %218 = vector.extract_strided_slice %214 {offsets = [0, 0], sizes = [2, 32], strides = [1, 1]} : vector<2x96xf32> to vector<2x32xf32>
    %219 = vector.extract_strided_slice %217 {offsets = [0, 0], sizes = [2, 32], strides = [1, 1]} : vector<2x96xf32> to vector<2x32xf32>
    %220 = arith.addf %218, %219 : vector<2x32xf32>
    %221 = arith.negf %220 : vector<2x32xf32>
    %222 = math.exp %221 : vector<2x32xf32>
    %cst_57 = arith.constant 1.000000e+00 : f32
    %223 = vector.broadcast %cst_57 : f32 to vector<2x32xf32>
    %224 = arith.addf %223, %222 : vector<2x32xf32>
    %225 = arith.divf %223, %224 : vector<2x32xf32>
    %226 = vector.extract_strided_slice %214 {offsets = [0, 32], sizes = [2, 32], strides = [1, 1]} : vector<2x96xf32> to vector<2x32xf32>
    %227 = vector.extract_strided_slice %217 {offsets = [0, 32], sizes = [2, 32], strides = [1, 1]} : vector<2x96xf32> to vector<2x32xf32>
    %228 = arith.addf %226, %227 : vector<2x32xf32>
    %229 = arith.negf %228 : vector<2x32xf32>
    %230 = math.exp %229 : vector<2x32xf32>
    %cst_58 = arith.constant 1.000000e+00 : f32
    %231 = vector.broadcast %cst_58 : f32 to vector<2x32xf32>
    %232 = arith.addf %231, %230 : vector<2x32xf32>
    %233 = arith.divf %231, %232 : vector<2x32xf32>
    %234 = vector.extract_strided_slice %214 {offsets = [0, 64], sizes = [2, 32], strides = [1, 1]} : vector<2x96xf32> to vector<2x32xf32>
    %235 = vector.extract_strided_slice %217 {offsets = [0, 64], sizes = [2, 32], strides = [1, 1]} : vector<2x96xf32> to vector<2x32xf32>
    %236 = arith.mulf %225, %235 : vector<2x32xf32>
    %237 = arith.addf %234, %236 : vector<2x32xf32>
    %238 = math.tanh %237 : vector<2x32xf32>
    %cst_59 = arith.constant 1.000000e+00 : f32
    %239 = vector.broadcast %cst_59 : f32 to vector<2x32xf32>
    %240 = arith.subf %239, %233 : vector<2x32xf32>
    %241 = arith.mulf %240, %238 : vector<2x32xf32>
    %242 = arith.mulf %233, %210 : vector<2x32xf32>
    %243 = arith.addf %241, %242 : vector<2x32xf32>
    %244 = vector.shape_cast %243 : vector<2x32xf32> to vector<2x1x32xf32>
    %c0_60 = arith.constant 0 : index
    %c6 = arith.constant 6 : index
    %c0_61 = arith.constant 0 : index
    %245 = vector.load %arg32[%c0_60, %c6, %c0_61] : memref<2x8x64xf32, #tpu.memory_space<vmem>>, vector<2x1x32xf32>
    tpu.vector_store %arg32[%c0_60, %c6, %c0_61], %244 {strides = array<i32>} : memref<2x8x64xf32, #tpu.memory_space<vmem>>, vector<2x1x32xf32>,
    %246 = vector.extract_strided_slice %13 {offsets = [0, 7, 0], sizes = [2, 1, 96], strides = [1, 1, 1]} : vector<2x8x96xf32> to vector<2x1x96xf32>
    %247 = vector.shape_cast %246 : vector<2x1x96xf32> to vector<2x96xf32>
    %cst_62 = arith.constant dense<0.000000e+00> : vector<2x96xf32>
    %248 = tpu.matmul %243, %2, %cst_62 {dimension_numbers = #tpu.dot_dimension_numbers<[1], [0], [0], [1], [0, 0, 1, 1], [], []>} : vector<2x32xf32>, vector<32x96xf32>, vector<2x96xf32> -> vector<2x96xf32>
    %249 = vector.broadcast %4 : vector<1x96xf32> to vector<2x96xf32>
    %250 = arith.addf %248, %249 : vector<2x96xf32>
    %251 = vector.extract_strided_slice %247 {offsets = [0, 0], sizes = [2, 32], strides = [1, 1]} : vector<2x96xf32> to vector<2x32xf32>
    %252 = vector.extract_strided_slice %250 {offsets = [0, 0], sizes = [2, 32], strides = [1, 1]} : vector<2x96xf32> to vector<2x32xf32>
    %253 = arith.addf %251, %252 : vector<2x32xf32>
    %254 = arith.negf %253 : vector<2x32xf32>
    %255 = math.exp %254 : vector<2x32xf32>
    %cst_63 = arith.constant 1.000000e+00 : f32
    %256 = vector.broadcast %cst_63 : f32 to vector<2x32xf32>
    %257 = arith.addf %256, %255 : vector<2x32xf32>
    %258 = arith.divf %256, %257 : vector<2x32xf32>
    %259 = vector.extract_strided_slice %247 {offsets = [0, 32], sizes = [2, 32], strides = [1, 1]} : vector<2x96xf32> to vector<2x32xf32>
    %260 = vector.extract_strided_slice %250 {offsets = [0, 32], sizes = [2, 32], strides = [1, 1]} : vector<2x96xf32> to vector<2x32xf32>
    %261 = arith.addf %259, %260 : vector<2x32xf32>
    %262 = arith.negf %261 : vector<2x32xf32>
    %263 = math.exp %262 : vector<2x32xf32>
    %cst_64 = arith.constant 1.000000e+00 : f32
    %264 = vector.broadcast %cst_64 : f32 to vector<2x32xf32>
    %265 = arith.addf %264, %263 : vector<2x32xf32>
    %266 = arith.divf %264, %265 : vector<2x32xf32>
    %267 = vector.extract_strided_slice %247 {offsets = [0, 64], sizes = [2, 32], strides = [1, 1]} : vector<2x96xf32> to vector<2x32xf32>
    %268 = vector.extract_strided_slice %250 {offsets = [0, 64], sizes = [2, 32], strides = [1, 1]} : vector<2x96xf32> to vector<2x32xf32>
    %269 = arith.mulf %258, %268 : vector<2x32xf32>
    %270 = arith.addf %267, %269 : vector<2x32xf32>
    %271 = math.tanh %270 : vector<2x32xf32>
    %cst_65 = arith.constant 1.000000e+00 : f32
    %272 = vector.broadcast %cst_65 : f32 to vector<2x32xf32>
    %273 = arith.subf %272, %266 : vector<2x32xf32>
    %274 = arith.mulf %273, %271 : vector<2x32xf32>
    %275 = arith.mulf %266, %243 : vector<2x32xf32>
    %276 = arith.addf %274, %275 : vector<2x32xf32>
    %277 = vector.shape_cast %276 : vector<2x32xf32> to vector<2x1x32xf32>
    %c0_66 = arith.constant 0 : index
    %c7 = arith.constant 7 : index
    %c0_67 = arith.constant 0 : index
    %278 = vector.load %arg32[%c0_66, %c7, %c0_67] : memref<2x8x64xf32, #tpu.memory_space<vmem>>, vector<2x1x32xf32>
    tpu.vector_store %arg32[%c0_66, %c7, %c0_67], %277 {strides = array<i32>} : memref<2x8x64xf32, #tpu.memory_space<vmem>>, vector<2x1x32xf32>,
    %279 = vector.shape_cast %0 : vector<2x8x32xf32> to vector<16x32xf32>
    %cst_68 = arith.constant dense<0.000000e+00> : vector<16x96xf32>
    %280 = tpu.matmul %279, %5, %cst_68 {dimension_numbers = #tpu.dot_dimension_numbers<[1], [0], [0], [1], [0, 0, 1, 1], [], []>} : vector<16x32xf32>, vector<32x96xf32>, vector<16x96xf32> -> vector<16x96xf32>
    %281 = vector.broadcast %7 : vector<1x96xf32> to vector<16x96xf32>
    %282 = arith.addf %280, %281 : vector<16x96xf32>
    %283 = vector.shape_cast %282 : vector<16x96xf32> to vector<2x8x96xf32>
    %cst_69 = arith.constant 0.000000e+00 : f32
    %284 = vector.broadcast %cst_69 : f32 to vector<2x32xf32>
    %285 = vector.extract_strided_slice %283 {offsets = [0, 7, 0], sizes = [2, 1, 96], strides = [1, 1, 1]} : vector<2x8x96xf32> to vector<2x1x96xf32>
    %286 = vector.shape_cast %285 : vector<2x1x96xf32> to vector<2x96xf32>
    %cst_70 = arith.constant dense<0.000000e+00> : vector<2x96xf32>
    %287 = tpu.matmul %284, %6, %cst_70 {dimension_numbers = #tpu.dot_dimension_numbers<[1], [0], [0], [1], [0, 0, 1, 1], [], []>} : vector<2x32xf32>, vector<32x96xf32>, vector<2x96xf32> -> vector<2x96xf32>
    %288 = vector.broadcast %8 : vector<1x96xf32> to vector<2x96xf32>
    %289 = arith.addf %287, %288 : vector<2x96xf32>
    %290 = vector.extract_strided_slice %286 {offsets = [0, 0], sizes = [2, 32], strides = [1, 1]} : vector<2x96xf32> to vector<2x32xf32>
    %291 = vector.extract_strided_slice %289 {offsets = [0, 0], sizes = [2, 32], strides = [1, 1]} : vector<2x96xf32> to vector<2x32xf32>
    %292 = arith.addf %290, %291 : vector<2x32xf32>
    %293 = arith.negf %292 : vector<2x32xf32>
    %294 = math.exp %293 : vector<2x32xf32>
    %cst_71 = arith.constant 1.000000e+00 : f32
    %295 = vector.broadcast %cst_71 : f32 to vector<2x32xf32>
    %296 = arith.addf %295, %294 : vector<2x32xf32>
    %297 = arith.divf %295, %296 : vector<2x32xf32>
    %298 = vector.extract_strided_slice %286 {offsets = [0, 32], sizes = [2, 32], strides = [1, 1]} : vector<2x96xf32> to vector<2x32xf32>
    %299 = vector.extract_strided_slice %289 {offsets = [0, 32], sizes = [2, 32], strides = [1, 1]} : vector<2x96xf32> to vector<2x32xf32>
    %300 = arith.addf %298, %299 : vector<2x32xf32>
    %301 = arith.negf %300 : vector<2x32xf32>
    %302 = math.exp %301 : vector<2x32xf32>
    %cst_72 = arith.constant 1.000000e+00 : f32
    %303 = vector.broadcast %cst_72 : f32 to vector<2x32xf32>
    %304 = arith.addf %303, %302 : vector<2x32xf32>
    %305 = arith.divf %303, %304 : vector<2x32xf32>
    %306 = vector.extract_strided_slice %286 {offsets = [0, 64], sizes = [2, 32], strides = [1, 1]} : vector<2x96xf32> to vector<2x32xf32>
    %307 = vector.extract_strided_slice %289 {offsets = [0, 64], sizes = [2, 32], strides = [1, 1]} : vector<2x96xf32> to vector<2x32xf32>
    %308 = arith.mulf %297, %307 : vector<2x32xf32>
    %309 = arith.addf %306, %308 : vector<2x32xf32>
    %310 = math.tanh %309 : vector<2x32xf32>
    %cst_73 = arith.constant 1.000000e+00 : f32
    %311 = vector.broadcast %cst_73 : f32 to vector<2x32xf32>
    %312 = arith.subf %311, %305 : vector<2x32xf32>
    %313 = arith.mulf %312, %310 : vector<2x32xf32>
    %314 = arith.mulf %305, %284 : vector<2x32xf32>
    %315 = arith.addf %313, %314 : vector<2x32xf32>
    %316 = vector.shape_cast %315 : vector<2x32xf32> to vector<2x1x32xf32>
    %c0_74 = arith.constant 0 : index
    %c7_75 = arith.constant 7 : index
    %c32 = arith.constant 32 : index
    %317 = vector.load %arg32[%c0_74, %c7_75, %c32] : memref<2x8x64xf32, #tpu.memory_space<vmem>>, vector<2x1x32xf32>
    tpu.vector_store %arg32[%c0_74, %c7_75, %c32], %316 {strides = array<i32>} : memref<2x8x64xf32, #tpu.memory_space<vmem>>, vector<2x1x32xf32>,
    %318 = vector.extract_strided_slice %283 {offsets = [0, 6, 0], sizes = [2, 1, 96], strides = [1, 1, 1]} : vector<2x8x96xf32> to vector<2x1x96xf32>
    %319 = vector.shape_cast %318 : vector<2x1x96xf32> to vector<2x96xf32>
    %cst_76 = arith.constant dense<0.000000e+00> : vector<2x96xf32>
    %320 = tpu.matmul %315, %6, %cst_76 {dimension_numbers = #tpu.dot_dimension_numbers<[1], [0], [0], [1], [0, 0, 1, 1], [], []>} : vector<2x32xf32>, vector<32x96xf32>, vector<2x96xf32> -> vector<2x96xf32>
    %321 = vector.broadcast %8 : vector<1x96xf32> to vector<2x96xf32>
    %322 = arith.addf %320, %321 : vector<2x96xf32>
    %323 = vector.extract_strided_slice %319 {offsets = [0, 0], sizes = [2, 32], strides = [1, 1]} : vector<2x96xf32> to vector<2x32xf32>
    %324 = vector.extract_strided_slice %322 {offsets = [0, 0], sizes = [2, 32], strides = [1, 1]} : vector<2x96xf32> to vector<2x32xf32>
    %325 = arith.addf %323, %324 : vector<2x32xf32>
    %326 = arith.negf %325 : vector<2x32xf32>
    %327 = math.exp %326 : vector<2x32xf32>
    %cst_77 = arith.constant 1.000000e+00 : f32
    %328 = vector.broadcast %cst_77 : f32 to vector<2x32xf32>
    %329 = arith.addf %328, %327 : vector<2x32xf32>
    %330 = arith.divf %328, %329 : vector<2x32xf32>
    %331 = vector.extract_strided_slice %319 {offsets = [0, 32], sizes = [2, 32], strides = [1, 1]} : vector<2x96xf32> to vector<2x32xf32>
    %332 = vector.extract_strided_slice %322 {offsets = [0, 32], sizes = [2, 32], strides = [1, 1]} : vector<2x96xf32> to vector<2x32xf32>
    %333 = arith.addf %331, %332 : vector<2x32xf32>
    %334 = arith.negf %333 : vector<2x32xf32>
    %335 = math.exp %334 : vector<2x32xf32>
    %cst_78 = arith.constant 1.000000e+00 : f32
    %336 = vector.broadcast %cst_78 : f32 to vector<2x32xf32>
    %337 = arith.addf %336, %335 : vector<2x32xf32>
    %338 = arith.divf %336, %337 : vector<2x32xf32>
    %339 = vector.extract_strided_slice %319 {offsets = [0, 64], sizes = [2, 32], strides = [1, 1]} : vector<2x96xf32> to vector<2x32xf32>
    %340 = vector.extract_strided_slice %322 {offsets = [0, 64], sizes = [2, 32], strides = [1, 1]} : vector<2x96xf32> to vector<2x32xf32>
    %341 = arith.mulf %330, %340 : vector<2x32xf32>
    %342 = arith.addf %339, %341 : vector<2x32xf32>
    %343 = math.tanh %342 : vector<2x32xf32>
    %cst_79 = arith.constant 1.000000e+00 : f32
    %344 = vector.broadcast %cst_79 : f32 to vector<2x32xf32>
    %345 = arith.subf %344, %338 : vector<2x32xf32>
    %346 = arith.mulf %345, %343 : vector<2x32xf32>
    %347 = arith.mulf %338, %315 : vector<2x32xf32>
    %348 = arith.addf %346, %347 : vector<2x32xf32>
    %349 = vector.shape_cast %348 : vector<2x32xf32> to vector<2x1x32xf32>
    %c0_80 = arith.constant 0 : index
    %c6_81 = arith.constant 6 : index
    %c32_82 = arith.constant 32 : index
    %350 = vector.load %arg32[%c0_80, %c6_81, %c32_82] : memref<2x8x64xf32, #tpu.memory_space<vmem>>, vector<2x1x32xf32>
    tpu.vector_store %arg32[%c0_80, %c6_81, %c32_82], %349 {strides = array<i32>} : memref<2x8x64xf32, #tpu.memory_space<vmem>>, vector<2x1x32xf32>,
    %351 = vector.extract_strided_slice %283 {offsets = [0, 5, 0], sizes = [2, 1, 96], strides = [1, 1, 1]} : vector<2x8x96xf32> to vector<2x1x96xf32>
    %352 = vector.shape_cast %351 : vector<2x1x96xf32> to vector<2x96xf32>
    %cst_83 = arith.constant dense<0.000000e+00> : vector<2x96xf32>
    %353 = tpu.matmul %348, %6, %cst_83 {dimension_numbers = #tpu.dot_dimension_numbers<[1], [0], [0], [1], [0, 0, 1, 1], [], []>} : vector<2x32xf32>, vector<32x96xf32>, vector<2x96xf32> -> vector<2x96xf32>
    %354 = vector.broadcast %8 : vector<1x96xf32> to vector<2x96xf32>
    %355 = arith.addf %353, %354 : vector<2x96xf32>
    %356 = vector.extract_strided_slice %352 {offsets = [0, 0], sizes = [2, 32], strides = [1, 1]} : vector<2x96xf32> to vector<2x32xf32>
    %357 = vector.extract_strided_slice %355 {offsets = [0, 0], sizes = [2, 32], strides = [1, 1]} : vector<2x96xf32> to vector<2x32xf32>
    %358 = arith.addf %356, %357 : vector<2x32xf32>
    %359 = arith.negf %358 : vector<2x32xf32>
    %360 = math.exp %359 : vector<2x32xf32>
    %cst_84 = arith.constant 1.000000e+00 : f32
    %361 = vector.broadcast %cst_84 : f32 to vector<2x32xf32>
    %362 = arith.addf %361, %360 : vector<2x32xf32>
    %363 = arith.divf %361, %362 : vector<2x32xf32>
    %364 = vector.extract_strided_slice %352 {offsets = [0, 32], sizes = [2, 32], strides = [1, 1]} : vector<2x96xf32> to vector<2x32xf32>
    %365 = vector.extract_strided_slice %355 {offsets = [0, 32], sizes = [2, 32], strides = [1, 1]} : vector<2x96xf32> to vector<2x32xf32>
    %366 = arith.addf %364, %365 : vector<2x32xf32>
    %367 = arith.negf %366 : vector<2x32xf32>
    %368 = math.exp %367 : vector<2x32xf32>
    %cst_85 = arith.constant 1.000000e+00 : f32
    %369 = vector.broadcast %cst_85 : f32 to vector<2x32xf32>
    %370 = arith.addf %369, %368 : vector<2x32xf32>
    %371 = arith.divf %369, %370 : vector<2x32xf32>
    %372 = vector.extract_strided_slice %352 {offsets = [0, 64], sizes = [2, 32], strides = [1, 1]} : vector<2x96xf32> to vector<2x32xf32>
    %373 = vector.extract_strided_slice %355 {offsets = [0, 64], sizes = [2, 32], strides = [1, 1]} : vector<2x96xf32> to vector<2x32xf32>
    %374 = arith.mulf %363, %373 : vector<2x32xf32>
    %375 = arith.addf %372, %374 : vector<2x32xf32>
    %376 = math.tanh %375 : vector<2x32xf32>
    %cst_86 = arith.constant 1.000000e+00 : f32
    %377 = vector.broadcast %cst_86 : f32 to vector<2x32xf32>
    %378 = arith.subf %377, %371 : vector<2x32xf32>
    %379 = arith.mulf %378, %376 : vector<2x32xf32>
    %380 = arith.mulf %371, %348 : vector<2x32xf32>
    %381 = arith.addf %379, %380 : vector<2x32xf32>
    %382 = vector.shape_cast %381 : vector<2x32xf32> to vector<2x1x32xf32>
    %c0_87 = arith.constant 0 : index
    %c5_88 = arith.constant 5 : index
    %c32_89 = arith.constant 32 : index
    %383 = vector.load %arg32[%c0_87, %c5_88, %c32_89] : memref<2x8x64xf32, #tpu.memory_space<vmem>>, vector<2x1x32xf32>
    tpu.vector_store %arg32[%c0_87, %c5_88, %c32_89], %382 {strides = array<i32>} : memref<2x8x64xf32, #tpu.memory_space<vmem>>, vector<2x1x32xf32>,
    %384 = vector.extract_strided_slice %283 {offsets = [0, 4, 0], sizes = [2, 1, 96], strides = [1, 1, 1]} : vector<2x8x96xf32> to vector<2x1x96xf32>
    %385 = vector.shape_cast %384 : vector<2x1x96xf32> to vector<2x96xf32>
    %cst_90 = arith.constant dense<0.000000e+00> : vector<2x96xf32>
    %386 = tpu.matmul %381, %6, %cst_90 {dimension_numbers = #tpu.dot_dimension_numbers<[1], [0], [0], [1], [0, 0, 1, 1], [], []>} : vector<2x32xf32>, vector<32x96xf32>, vector<2x96xf32> -> vector<2x96xf32>
    %387 = vector.broadcast %8 : vector<1x96xf32> to vector<2x96xf32>
    %388 = arith.addf %386, %387 : vector<2x96xf32>
    %389 = vector.extract_strided_slice %385 {offsets = [0, 0], sizes = [2, 32], strides = [1, 1]} : vector<2x96xf32> to vector<2x32xf32>
    %390 = vector.extract_strided_slice %388 {offsets = [0, 0], sizes = [2, 32], strides = [1, 1]} : vector<2x96xf32> to vector<2x32xf32>
    %391 = arith.addf %389, %390 : vector<2x32xf32>
    %392 = arith.negf %391 : vector<2x32xf32>
    %393 = math.exp %392 : vector<2x32xf32>
    %cst_91 = arith.constant 1.000000e+00 : f32
    %394 = vector.broadcast %cst_91 : f32 to vector<2x32xf32>
    %395 = arith.addf %394, %393 : vector<2x32xf32>
    %396 = arith.divf %394, %395 : vector<2x32xf32>
    %397 = vector.extract_strided_slice %385 {offsets = [0, 32], sizes = [2, 32], strides = [1, 1]} : vector<2x96xf32> to vector<2x32xf32>
    %398 = vector.extract_strided_slice %388 {offsets = [0, 32], sizes = [2, 32], strides = [1, 1]} : vector<2x96xf32> to vector<2x32xf32>
    %399 = arith.addf %397, %398 : vector<2x32xf32>
    %400 = arith.negf %399 : vector<2x32xf32>
    %401 = math.exp %400 : vector<2x32xf32>
    %cst_92 = arith.constant 1.000000e+00 : f32
    %402 = vector.broadcast %cst_92 : f32 to vector<2x32xf32>
    %403 = arith.addf %402, %401 : vector<2x32xf32>
    %404 = arith.divf %402, %403 : vector<2x32xf32>
    %405 = vector.extract_strided_slice %385 {offsets = [0, 64], sizes = [2, 32], strides = [1, 1]} : vector<2x96xf32> to vector<2x32xf32>
    %406 = vector.extract_strided_slice %388 {offsets = [0, 64], sizes = [2, 32], strides = [1, 1]} : vector<2x96xf32> to vector<2x32xf32>
    %407 = arith.mulf %396, %406 : vector<2x32xf32>
    %408 = arith.addf %405, %407 : vector<2x32xf32>
    %409 = math.tanh %408 : vector<2x32xf32>
    %cst_93 = arith.constant 1.000000e+00 : f32
    %410 = vector.broadcast %cst_93 : f32 to vector<2x32xf32>
    %411 = arith.subf %410, %404 : vector<2x32xf32>
    %412 = arith.mulf %411, %409 : vector<2x32xf32>
    %413 = arith.mulf %404, %381 : vector<2x32xf32>
    %414 = arith.addf %412, %413 : vector<2x32xf32>
    %415 = vector.shape_cast %414 : vector<2x32xf32> to vector<2x1x32xf32>
    %c0_94 = arith.constant 0 : index
    %c4_95 = arith.constant 4 : index
    %c32_96 = arith.constant 32 : index
    %416 = vector.load %arg32[%c0_94, %c4_95, %c32_96] : memref<2x8x64xf32, #tpu.memory_space<vmem>>, vector<2x1x32xf32>
    tpu.vector_store %arg32[%c0_94, %c4_95, %c32_96], %415 {strides = array<i32>} : memref<2x8x64xf32, #tpu.memory_space<vmem>>, vector<2x1x32xf32>,
    %417 = vector.extract_strided_slice %283 {offsets = [0, 3, 0], sizes = [2, 1, 96], strides = [1, 1, 1]} : vector<2x8x96xf32> to vector<2x1x96xf32>
    %418 = vector.shape_cast %417 : vector<2x1x96xf32> to vector<2x96xf32>
    %cst_97 = arith.constant dense<0.000000e+00> : vector<2x96xf32>
    %419 = tpu.matmul %414, %6, %cst_97 {dimension_numbers = #tpu.dot_dimension_numbers<[1], [0], [0], [1], [0, 0, 1, 1], [], []>} : vector<2x32xf32>, vector<32x96xf32>, vector<2x96xf32> -> vector<2x96xf32>
    %420 = vector.broadcast %8 : vector<1x96xf32> to vector<2x96xf32>
    %421 = arith.addf %419, %420 : vector<2x96xf32>
    %422 = vector.extract_strided_slice %418 {offsets = [0, 0], sizes = [2, 32], strides = [1, 1]} : vector<2x96xf32> to vector<2x32xf32>
    %423 = vector.extract_strided_slice %421 {offsets = [0, 0], sizes = [2, 32], strides = [1, 1]} : vector<2x96xf32> to vector<2x32xf32>
    %424 = arith.addf %422, %423 : vector<2x32xf32>
    %425 = arith.negf %424 : vector<2x32xf32>
    %426 = math.exp %425 : vector<2x32xf32>
    %cst_98 = arith.constant 1.000000e+00 : f32
    %427 = vector.broadcast %cst_98 : f32 to vector<2x32xf32>
    %428 = arith.addf %427, %426 : vector<2x32xf32>
    %429 = arith.divf %427, %428 : vector<2x32xf32>
    %430 = vector.extract_strided_slice %418 {offsets = [0, 32], sizes = [2, 32], strides = [1, 1]} : vector<2x96xf32> to vector<2x32xf32>
    %431 = vector.extract_strided_slice %421 {offsets = [0, 32], sizes = [2, 32], strides = [1, 1]} : vector<2x96xf32> to vector<2x32xf32>
    %432 = arith.addf %430, %431 : vector<2x32xf32>
    %433 = arith.negf %432 : vector<2x32xf32>
    %434 = math.exp %433 : vector<2x32xf32>
    %cst_99 = arith.constant 1.000000e+00 : f32
    %435 = vector.broadcast %cst_99 : f32 to vector<2x32xf32>
    %436 = arith.addf %435, %434 : vector<2x32xf32>
    %437 = arith.divf %435, %436 : vector<2x32xf32>
    %438 = vector.extract_strided_slice %418 {offsets = [0, 64], sizes = [2, 32], strides = [1, 1]} : vector<2x96xf32> to vector<2x32xf32>
    %439 = vector.extract_strided_slice %421 {offsets = [0, 64], sizes = [2, 32], strides = [1, 1]} : vector<2x96xf32> to vector<2x32xf32>
    %440 = arith.mulf %429, %439 : vector<2x32xf32>
    %441 = arith.addf %438, %440 : vector<2x32xf32>
    %442 = math.tanh %441 : vector<2x32xf32>
    %cst_100 = arith.constant 1.000000e+00 : f32
    %443 = vector.broadcast %cst_100 : f32 to vector<2x32xf32>
    %444 = arith.subf %443, %437 : vector<2x32xf32>
    %445 = arith.mulf %444, %442 : vector<2x32xf32>
    %446 = arith.mulf %437, %414 : vector<2x32xf32>
    %447 = arith.addf %445, %446 : vector<2x32xf32>
    %448 = vector.shape_cast %447 : vector<2x32xf32> to vector<2x1x32xf32>
    %c0_101 = arith.constant 0 : index
    %c3_102 = arith.constant 3 : index
    %c32_103 = arith.constant 32 : index
    %449 = vector.load %arg32[%c0_101, %c3_102, %c32_103] : memref<2x8x64xf32, #tpu.memory_space<vmem>>, vector<2x1x32xf32>
    tpu.vector_store %arg32[%c0_101, %c3_102, %c32_103], %448 {strides = array<i32>} : memref<2x8x64xf32, #tpu.memory_space<vmem>>, vector<2x1x32xf32>,
    %450 = vector.extract_strided_slice %283 {offsets = [0, 2, 0], sizes = [2, 1, 96], strides = [1, 1, 1]} : vector<2x8x96xf32> to vector<2x1x96xf32>
    %451 = vector.shape_cast %450 : vector<2x1x96xf32> to vector<2x96xf32>
    %cst_104 = arith.constant dense<0.000000e+00> : vector<2x96xf32>
    %452 = tpu.matmul %447, %6, %cst_104 {dimension_numbers = #tpu.dot_dimension_numbers<[1], [0], [0], [1], [0, 0, 1, 1], [], []>} : vector<2x32xf32>, vector<32x96xf32>, vector<2x96xf32> -> vector<2x96xf32>
    %453 = vector.broadcast %8 : vector<1x96xf32> to vector<2x96xf32>
    %454 = arith.addf %452, %453 : vector<2x96xf32>
    %455 = vector.extract_strided_slice %451 {offsets = [0, 0], sizes = [2, 32], strides = [1, 1]} : vector<2x96xf32> to vector<2x32xf32>
    %456 = vector.extract_strided_slice %454 {offsets = [0, 0], sizes = [2, 32], strides = [1, 1]} : vector<2x96xf32> to vector<2x32xf32>
    %457 = arith.addf %455, %456 : vector<2x32xf32>
    %458 = arith.negf %457 : vector<2x32xf32>
    %459 = math.exp %458 : vector<2x32xf32>
    %cst_105 = arith.constant 1.000000e+00 : f32
    %460 = vector.broadcast %cst_105 : f32 to vector<2x32xf32>
    %461 = arith.addf %460, %459 : vector<2x32xf32>
    %462 = arith.divf %460, %461 : vector<2x32xf32>
    %463 = vector.extract_strided_slice %451 {offsets = [0, 32], sizes = [2, 32], strides = [1, 1]} : vector<2x96xf32> to vector<2x32xf32>
    %464 = vector.extract_strided_slice %454 {offsets = [0, 32], sizes = [2, 32], strides = [1, 1]} : vector<2x96xf32> to vector<2x32xf32>
    %465 = arith.addf %463, %464 : vector<2x32xf32>
    %466 = arith.negf %465 : vector<2x32xf32>
    %467 = math.exp %466 : vector<2x32xf32>
    %cst_106 = arith.constant 1.000000e+00 : f32
    %468 = vector.broadcast %cst_106 : f32 to vector<2x32xf32>
    %469 = arith.addf %468, %467 : vector<2x32xf32>
    %470 = arith.divf %468, %469 : vector<2x32xf32>
    %471 = vector.extract_strided_slice %451 {offsets = [0, 64], sizes = [2, 32], strides = [1, 1]} : vector<2x96xf32> to vector<2x32xf32>
    %472 = vector.extract_strided_slice %454 {offsets = [0, 64], sizes = [2, 32], strides = [1, 1]} : vector<2x96xf32> to vector<2x32xf32>
    %473 = arith.mulf %462, %472 : vector<2x32xf32>
    %474 = arith.addf %471, %473 : vector<2x32xf32>
    %475 = math.tanh %474 : vector<2x32xf32>
    %cst_107 = arith.constant 1.000000e+00 : f32
    %476 = vector.broadcast %cst_107 : f32 to vector<2x32xf32>
    %477 = arith.subf %476, %470 : vector<2x32xf32>
    %478 = arith.mulf %477, %475 : vector<2x32xf32>
    %479 = arith.mulf %470, %447 : vector<2x32xf32>
    %480 = arith.addf %478, %479 : vector<2x32xf32>
    %481 = vector.shape_cast %480 : vector<2x32xf32> to vector<2x1x32xf32>
    %c0_108 = arith.constant 0 : index
    %c2_109 = arith.constant 2 : index
    %c32_110 = arith.constant 32 : index
    %482 = vector.load %arg32[%c0_108, %c2_109, %c32_110] : memref<2x8x64xf32, #tpu.memory_space<vmem>>, vector<2x1x32xf32>
    tpu.vector_store %arg32[%c0_108, %c2_109, %c32_110], %481 {strides = array<i32>} : memref<2x8x64xf32, #tpu.memory_space<vmem>>, vector<2x1x32xf32>,
    %483 = vector.extract_strided_slice %283 {offsets = [0, 1, 0], sizes = [2, 1, 96], strides = [1, 1, 1]} : vector<2x8x96xf32> to vector<2x1x96xf32>
    %484 = vector.shape_cast %483 : vector<2x1x96xf32> to vector<2x96xf32>
    %cst_111 = arith.constant dense<0.000000e+00> : vector<2x96xf32>
    %485 = tpu.matmul %480, %6, %cst_111 {dimension_numbers = #tpu.dot_dimension_numbers<[1], [0], [0], [1], [0, 0, 1, 1], [], []>} : vector<2x32xf32>, vector<32x96xf32>, vector<2x96xf32> -> vector<2x96xf32>
    %486 = vector.broadcast %8 : vector<1x96xf32> to vector<2x96xf32>
    %487 = arith.addf %485, %486 : vector<2x96xf32>
    %488 = vector.extract_strided_slice %484 {offsets = [0, 0], sizes = [2, 32], strides = [1, 1]} : vector<2x96xf32> to vector<2x32xf32>
    %489 = vector.extract_strided_slice %487 {offsets = [0, 0], sizes = [2, 32], strides = [1, 1]} : vector<2x96xf32> to vector<2x32xf32>
    %490 = arith.addf %488, %489 : vector<2x32xf32>
    %491 = arith.negf %490 : vector<2x32xf32>
    %492 = math.exp %491 : vector<2x32xf32>
    %cst_112 = arith.constant 1.000000e+00 : f32
    %493 = vector.broadcast %cst_112 : f32 to vector<2x32xf32>
    %494 = arith.addf %493, %492 : vector<2x32xf32>
    %495 = arith.divf %493, %494 : vector<2x32xf32>
    %496 = vector.extract_strided_slice %484 {offsets = [0, 32], sizes = [2, 32], strides = [1, 1]} : vector<2x96xf32> to vector<2x32xf32>
    %497 = vector.extract_strided_slice %487 {offsets = [0, 32], sizes = [2, 32], strides = [1, 1]} : vector<2x96xf32> to vector<2x32xf32>
    %498 = arith.addf %496, %497 : vector<2x32xf32>
    %499 = arith.negf %498 : vector<2x32xf32>
    %500 = math.exp %499 : vector<2x32xf32>
    %cst_113 = arith.constant 1.000000e+00 : f32
    %501 = vector.broadcast %cst_113 : f32 to vector<2x32xf32>
    %502 = arith.addf %501, %500 : vector<2x32xf32>
    %503 = arith.divf %501, %502 : vector<2x32xf32>
    %504 = vector.extract_strided_slice %484 {offsets = [0, 64], sizes = [2, 32], strides = [1, 1]} : vector<2x96xf32> to vector<2x32xf32>
    %505 = vector.extract_strided_slice %487 {offsets = [0, 64], sizes = [2, 32], strides = [1, 1]} : vector<2x96xf32> to vector<2x32xf32>
    %506 = arith.mulf %495, %505 : vector<2x32xf32>
    %507 = arith.addf %504, %506 : vector<2x32xf32>
    %508 = math.tanh %507 : vector<2x32xf32>
    %cst_114 = arith.constant 1.000000e+00 : f32
    %509 = vector.broadcast %cst_114 : f32 to vector<2x32xf32>
    %510 = arith.subf %509, %503 : vector<2x32xf32>
    %511 = arith.mulf %510, %508 : vector<2x32xf32>
    %512 = arith.mulf %503, %480 : vector<2x32xf32>
    %513 = arith.addf %511, %512 : vector<2x32xf32>
    %514 = vector.shape_cast %513 : vector<2x32xf32> to vector<2x1x32xf32>
    %c0_115 = arith.constant 0 : index
    %c1_116 = arith.constant 1 : index
    %c32_117 = arith.constant 32 : index
    %515 = vector.load %arg32[%c0_115, %c1_116, %c32_117] : memref<2x8x64xf32, #tpu.memory_space<vmem>>, vector<2x1x32xf32>
    tpu.vector_store %arg32[%c0_115, %c1_116, %c32_117], %514 {strides = array<i32>} : memref<2x8x64xf32, #tpu.memory_space<vmem>>, vector<2x1x32xf32>,
    %516 = vector.extract_strided_slice %283 {offsets = [0, 0, 0], sizes = [2, 1, 96], strides = [1, 1, 1]} : vector<2x8x96xf32> to vector<2x1x96xf32>
    %517 = vector.shape_cast %516 : vector<2x1x96xf32> to vector<2x96xf32>
    %cst_118 = arith.constant dense<0.000000e+00> : vector<2x96xf32>
    %518 = tpu.matmul %513, %6, %cst_118 {dimension_numbers = #tpu.dot_dimension_numbers<[1], [0], [0], [1], [0, 0, 1, 1], [], []>} : vector<2x32xf32>, vector<32x96xf32>, vector<2x96xf32> -> vector<2x96xf32>
    %519 = vector.broadcast %8 : vector<1x96xf32> to vector<2x96xf32>
    %520 = arith.addf %518, %519 : vector<2x96xf32>
    %521 = vector.extract_strided_slice %517 {offsets = [0, 0], sizes = [2, 32], strides = [1, 1]} : vector<2x96xf32> to vector<2x32xf32>
    %522 = vector.extract_strided_slice %520 {offsets = [0, 0], sizes = [2, 32], strides = [1, 1]} : vector<2x96xf32> to vector<2x32xf32>
    %523 = arith.addf %521, %522 : vector<2x32xf32>
    %524 = arith.negf %523 : vector<2x32xf32>
    %525 = math.exp %524 : vector<2x32xf32>
    %cst_119 = arith.constant 1.000000e+00 : f32
    %526 = vector.broadcast %cst_119 : f32 to vector<2x32xf32>
    %527 = arith.addf %526, %525 : vector<2x32xf32>
    %528 = arith.divf %526, %527 : vector<2x32xf32>
    %529 = vector.extract_strided_slice %517 {offsets = [0, 32], sizes = [2, 32], strides = [1, 1]} : vector<2x96xf32> to vector<2x32xf32>
    %530 = vector.extract_strided_slice %520 {offsets = [0, 32], sizes = [2, 32], strides = [1, 1]} : vector<2x96xf32> to vector<2x32xf32>
    %531 = arith.addf %529, %530 : vector<2x32xf32>
    %532 = arith.negf %531 : vector<2x32xf32>
    %533 = math.exp %532 : vector<2x32xf32>
    %cst_120 = arith.constant 1.000000e+00 : f32
    %534 = vector.broadcast %cst_120 : f32 to vector<2x32xf32>
    %535 = arith.addf %534, %533 : vector<2x32xf32>
    %536 = arith.divf %534, %535 : vector<2x32xf32>
    %537 = vector.extract_strided_slice %517 {offsets = [0, 64], sizes = [2, 32], strides = [1, 1]} : vector<2x96xf32> to vector<2x32xf32>
    %538 = vector.extract_strided_slice %520 {offsets = [0, 64], sizes = [2, 32], strides = [1, 1]} : vector<2x96xf32> to vector<2x32xf32>
    %539 = arith.mulf %528, %538 : vector<2x32xf32>
    %540 = arith.addf %537, %539 : vector<2x32xf32>
    %541 = math.tanh %540 : vector<2x32xf32>
    %cst_121 = arith.constant 1.000000e+00 : f32
    %542 = vector.broadcast %cst_121 : f32 to vector<2x32xf32>
    %543 = arith.subf %542, %536 : vector<2x32xf32>
    %544 = arith.mulf %543, %541 : vector<2x32xf32>
    %545 = arith.mulf %536, %513 : vector<2x32xf32>
    %546 = arith.addf %544, %545 : vector<2x32xf32>
    %547 = vector.shape_cast %546 : vector<2x32xf32> to vector<2x1x32xf32>
    %c0_122 = arith.constant 0 : index
    %c0_123 = arith.constant 0 : index
    %c32_124 = arith.constant 32 : index
    %548 = vector.load %arg32[%c0_122, %c0_123, %c32_124] : memref<2x8x64xf32, #tpu.memory_space<vmem>>, vector<2x1x32xf32>
    tpu.vector_store %arg32[%c0_122, %c0_123, %c32_124], %547 {strides = array<i32>} : memref<2x8x64xf32, #tpu.memory_space<vmem>>, vector<2x1x32xf32>,
    %c0_125 = arith.constant 0 : index
    %c0_126 = arith.constant 0 : index
    %c0_127 = arith.constant 0 : index
    %549 = vector.load %arg32[%c0_125, %c0_126, %c0_127] : memref<2x8x64xf32, #tpu.memory_space<vmem>>, vector<2x8x64xf32>
    %c0_128 = arith.constant 0 : index
    %c0_129 = arith.constant 0 : index
    %550 = vector.load %arg9[%c0_128, %c0_129] : memref<64x96xf32, #tpu.memory_space<vmem>>, vector<64x96xf32>
    %c0_130 = arith.constant 0 : index
    %c0_131 = arith.constant 0 : index
    %551 = vector.load %arg10[%c0_130, %c0_131] : memref<32x96xf32, #tpu.memory_space<vmem>>, vector<32x96xf32>
    %c0_132 = arith.constant 0 : index
    %c0_133 = arith.constant 0 : index
    %552 = vector.load %arg11[%c0_132, %c0_133] : memref<1x96xf32, #tpu.memory_space<vmem>>, vector<1x96xf32>
    %c0_134 = arith.constant 0 : index
    %c0_135 = arith.constant 0 : index
    %553 = vector.load %arg12[%c0_134, %c0_135] : memref<1x96xf32, #tpu.memory_space<vmem>>, vector<1x96xf32>
    %c0_136 = arith.constant 0 : index
    %c0_137 = arith.constant 0 : index
    %554 = vector.load %arg13[%c0_136, %c0_137] : memref<64x96xf32, #tpu.memory_space<vmem>>, vector<64x96xf32>
    %c0_138 = arith.constant 0 : index
    %c0_139 = arith.constant 0 : index
    %555 = vector.load %arg14[%c0_138, %c0_139] : memref<32x96xf32, #tpu.memory_space<vmem>>, vector<32x96xf32>
    %c0_140 = arith.constant 0 : index
    %c0_141 = arith.constant 0 : index
    %556 = vector.load %arg15[%c0_140, %c0_141] : memref<1x96xf32, #tpu.memory_space<vmem>>, vector<1x96xf32>
    %c0_142 = arith.constant 0 : index
    %c0_143 = arith.constant 0 : index
    %557 = vector.load %arg16[%c0_142, %c0_143] : memref<1x96xf32, #tpu.memory_space<vmem>>, vector<1x96xf32>
    %558 = vector.shape_cast %549 : vector<2x8x64xf32> to vector<16x64xf32>
    %cst_144 = arith.constant dense<0.000000e+00> : vector<16x96xf32>
    %559 = tpu.matmul %558, %550, %cst_144 {dimension_numbers = #tpu.dot_dimension_numbers<[1], [0], [0], [1], [0, 0, 1, 1], [], []>} : vector<16x64xf32>, vector<64x96xf32>, vector<16x96xf32> -> vector<16x96xf32>
    %560 = vector.broadcast %552 : vector<1x96xf32> to vector<16x96xf32>
    %561 = arith.addf %559, %560 : vector<16x96xf32>
    %562 = vector.shape_cast %561 : vector<16x96xf32> to vector<2x8x96xf32>
    %cst_145 = arith.constant 0.000000e+00 : f32
    %563 = vector.broadcast %cst_145 : f32 to vector<2x32xf32>
    %564 = vector.extract_strided_slice %562 {offsets = [0, 0, 0], sizes = [2, 1, 96], strides = [1, 1, 1]} : vector<2x8x96xf32> to vector<2x1x96xf32>
    %565 = vector.shape_cast %564 : vector<2x1x96xf32> to vector<2x96xf32>
    %cst_146 = arith.constant dense<0.000000e+00> : vector<2x96xf32>
    %566 = tpu.matmul %563, %551, %cst_146 {dimension_numbers = #tpu.dot_dimension_numbers<[1], [0], [0], [1], [0, 0, 1, 1], [], []>} : vector<2x32xf32>, vector<32x96xf32>, vector<2x96xf32> -> vector<2x96xf32>
    %567 = vector.broadcast %553 : vector<1x96xf32> to vector<2x96xf32>
    %568 = arith.addf %566, %567 : vector<2x96xf32>
    %569 = vector.extract_strided_slice %565 {offsets = [0, 0], sizes = [2, 32], strides = [1, 1]} : vector<2x96xf32> to vector<2x32xf32>
    %570 = vector.extract_strided_slice %568 {offsets = [0, 0], sizes = [2, 32], strides = [1, 1]} : vector<2x96xf32> to vector<2x32xf32>
    %571 = arith.addf %569, %570 : vector<2x32xf32>
    %572 = arith.negf %571 : vector<2x32xf32>
    %573 = math.exp %572 : vector<2x32xf32>
    %cst_147 = arith.constant 1.000000e+00 : f32
    %574 = vector.broadcast %cst_147 : f32 to vector<2x32xf32>
    %575 = arith.addf %574, %573 : vector<2x32xf32>
    %576 = arith.divf %574, %575 : vector<2x32xf32>
    %577 = vector.extract_strided_slice %565 {offsets = [0, 32], sizes = [2, 32], strides = [1, 1]} : vector<2x96xf32> to vector<2x32xf32>
    %578 = vector.extract_strided_slice %568 {offsets = [0, 32], sizes = [2, 32], strides = [1, 1]} : vector<2x96xf32> to vector<2x32xf32>
    %579 = arith.addf %577, %578 : vector<2x32xf32>
    %580 = arith.negf %579 : vector<2x32xf32>
    %581 = math.exp %580 : vector<2x32xf32>
    %cst_148 = arith.constant 1.000000e+00 : f32
    %582 = vector.broadcast %cst_148 : f32 to vector<2x32xf32>
    %583 = arith.addf %582, %581 : vector<2x32xf32>
    %584 = arith.divf %582, %583 : vector<2x32xf32>
    %585 = vector.extract_strided_slice %565 {offsets = [0, 64], sizes = [2, 32], strides = [1, 1]} : vector<2x96xf32> to vector<2x32xf32>
    %586 = vector.extract_strided_slice %568 {offsets = [0, 64], sizes = [2, 32], strides = [1, 1]} : vector<2x96xf32> to vector<2x32xf32>
    %587 = arith.mulf %576, %586 : vector<2x32xf32>
    %588 = arith.addf %585, %587 : vector<2x32xf32>
    %589 = math.tanh %588 : vector<2x32xf32>
    %cst_149 = arith.constant 1.000000e+00 : f32
    %590 = vector.broadcast %cst_149 : f32 to vector<2x32xf32>
    %591 = arith.subf %590, %584 : vector<2x32xf32>
    %592 = arith.mulf %591, %589 : vector<2x32xf32>
    %593 = arith.mulf %584, %563 : vector<2x32xf32>
    %594 = arith.addf %592, %593 : vector<2x32xf32>
    %595 = vector.shape_cast %594 : vector<2x32xf32> to vector<2x1x32xf32>
    %c0_150 = arith.constant 0 : index
    %c0_151 = arith.constant 0 : index
    %c0_152 = arith.constant 0 : index
    %596 = vector.load %arg33[%c0_150, %c0_151, %c0_152] : memref<2x8x64xf32, #tpu.memory_space<vmem>>, vector<2x1x32xf32>
    tpu.vector_store %arg33[%c0_150, %c0_151, %c0_152], %595 {strides = array<i32>} : memref<2x8x64xf32, #tpu.memory_space<vmem>>, vector<2x1x32xf32>,
    %597 = vector.extract_strided_slice %562 {offsets = [0, 1, 0], sizes = [2, 1, 96], strides = [1, 1, 1]} : vector<2x8x96xf32> to vector<2x1x96xf32>
    %598 = vector.shape_cast %597 : vector<2x1x96xf32> to vector<2x96xf32>
    %cst_153 = arith.constant dense<0.000000e+00> : vector<2x96xf32>
    %599 = tpu.matmul %594, %551, %cst_153 {dimension_numbers = #tpu.dot_dimension_numbers<[1], [0], [0], [1], [0, 0, 1, 1], [], []>} : vector<2x32xf32>, vector<32x96xf32>, vector<2x96xf32> -> vector<2x96xf32>
    %600 = vector.broadcast %553 : vector<1x96xf32> to vector<2x96xf32>
    %601 = arith.addf %599, %600 : vector<2x96xf32>
    %602 = vector.extract_strided_slice %598 {offsets = [0, 0], sizes = [2, 32], strides = [1, 1]} : vector<2x96xf32> to vector<2x32xf32>
    %603 = vector.extract_strided_slice %601 {offsets = [0, 0], sizes = [2, 32], strides = [1, 1]} : vector<2x96xf32> to vector<2x32xf32>
    %604 = arith.addf %602, %603 : vector<2x32xf32>
    %605 = arith.negf %604 : vector<2x32xf32>
    %606 = math.exp %605 : vector<2x32xf32>
    %cst_154 = arith.constant 1.000000e+00 : f32
    %607 = vector.broadcast %cst_154 : f32 to vector<2x32xf32>
    %608 = arith.addf %607, %606 : vector<2x32xf32>
    %609 = arith.divf %607, %608 : vector<2x32xf32>
    %610 = vector.extract_strided_slice %598 {offsets = [0, 32], sizes = [2, 32], strides = [1, 1]} : vector<2x96xf32> to vector<2x32xf32>
    %611 = vector.extract_strided_slice %601 {offsets = [0, 32], sizes = [2, 32], strides = [1, 1]} : vector<2x96xf32> to vector<2x32xf32>
    %612 = arith.addf %610, %611 : vector<2x32xf32>
    %613 = arith.negf %612 : vector<2x32xf32>
    %614 = math.exp %613 : vector<2x32xf32>
    %cst_155 = arith.constant 1.000000e+00 : f32
    %615 = vector.broadcast %cst_155 : f32 to vector<2x32xf32>
    %616 = arith.addf %615, %614 : vector<2x32xf32>
    %617 = arith.divf %615, %616 : vector<2x32xf32>
    %618 = vector.extract_strided_slice %598 {offsets = [0, 64], sizes = [2, 32], strides = [1, 1]} : vector<2x96xf32> to vector<2x32xf32>
    %619 = vector.extract_strided_slice %601 {offsets = [0, 64], sizes = [2, 32], strides = [1, 1]} : vector<2x96xf32> to vector<2x32xf32>
    %620 = arith.mulf %609, %619 : vector<2x32xf32>
    %621 = arith.addf %618, %620 : vector<2x32xf32>
    %622 = math.tanh %621 : vector<2x32xf32>
    %cst_156 = arith.constant 1.000000e+00 : f32
    %623 = vector.broadcast %cst_156 : f32 to vector<2x32xf32>
    %624 = arith.subf %623, %617 : vector<2x32xf32>
    %625 = arith.mulf %624, %622 : vector<2x32xf32>
    %626 = arith.mulf %617, %594 : vector<2x32xf32>
    %627 = arith.addf %625, %626 : vector<2x32xf32>
    %628 = vector.shape_cast %627 : vector<2x32xf32> to vector<2x1x32xf32>
    %c0_157 = arith.constant 0 : index
    %c1_158 = arith.constant 1 : index
    %c0_159 = arith.constant 0 : index
    %629 = vector.load %arg33[%c0_157, %c1_158, %c0_159] : memref<2x8x64xf32, #tpu.memory_space<vmem>>, vector<2x1x32xf32>
    tpu.vector_store %arg33[%c0_157, %c1_158, %c0_159], %628 {strides = array<i32>} : memref<2x8x64xf32, #tpu.memory_space<vmem>>, vector<2x1x32xf32>,
    %630 = vector.extract_strided_slice %562 {offsets = [0, 2, 0], sizes = [2, 1, 96], strides = [1, 1, 1]} : vector<2x8x96xf32> to vector<2x1x96xf32>
    %631 = vector.shape_cast %630 : vector<2x1x96xf32> to vector<2x96xf32>
    %cst_160 = arith.constant dense<0.000000e+00> : vector<2x96xf32>
    %632 = tpu.matmul %627, %551, %cst_160 {dimension_numbers = #tpu.dot_dimension_numbers<[1], [0], [0], [1], [0, 0, 1, 1], [], []>} : vector<2x32xf32>, vector<32x96xf32>, vector<2x96xf32> -> vector<2x96xf32>
    %633 = vector.broadcast %553 : vector<1x96xf32> to vector<2x96xf32>
    %634 = arith.addf %632, %633 : vector<2x96xf32>
    %635 = vector.extract_strided_slice %631 {offsets = [0, 0], sizes = [2, 32], strides = [1, 1]} : vector<2x96xf32> to vector<2x32xf32>
    %636 = vector.extract_strided_slice %634 {offsets = [0, 0], sizes = [2, 32], strides = [1, 1]} : vector<2x96xf32> to vector<2x32xf32>
    %637 = arith.addf %635, %636 : vector<2x32xf32>
    %638 = arith.negf %637 : vector<2x32xf32>
    %639 = math.exp %638 : vector<2x32xf32>
    %cst_161 = arith.constant 1.000000e+00 : f32
    %640 = vector.broadcast %cst_161 : f32 to vector<2x32xf32>
    %641 = arith.addf %640, %639 : vector<2x32xf32>
    %642 = arith.divf %640, %641 : vector<2x32xf32>
    %643 = vector.extract_strided_slice %631 {offsets = [0, 32], sizes = [2, 32], strides = [1, 1]} : vector<2x96xf32> to vector<2x32xf32>
    %644 = vector.extract_strided_slice %634 {offsets = [0, 32], sizes = [2, 32], strides = [1, 1]} : vector<2x96xf32> to vector<2x32xf32>
    %645 = arith.addf %643, %644 : vector<2x32xf32>
    %646 = arith.negf %645 : vector<2x32xf32>
    %647 = math.exp %646 : vector<2x32xf32>
    %cst_162 = arith.constant 1.000000e+00 : f32
    %648 = vector.broadcast %cst_162 : f32 to vector<2x32xf32>
    %649 = arith.addf %648, %647 : vector<2x32xf32>
    %650 = arith.divf %648, %649 : vector<2x32xf32>
    %651 = vector.extract_strided_slice %631 {offsets = [0, 64], sizes = [2, 32], strides = [1, 1]} : vector<2x96xf32> to vector<2x32xf32>
    %652 = vector.extract_strided_slice %634 {offsets = [0, 64], sizes = [2, 32], strides = [1, 1]} : vector<2x96xf32> to vector<2x32xf32>
    %653 = arith.mulf %642, %652 : vector<2x32xf32>
    %654 = arith.addf %651, %653 : vector<2x32xf32>
    %655 = math.tanh %654 : vector<2x32xf32>
    %cst_163 = arith.constant 1.000000e+00 : f32
    %656 = vector.broadcast %cst_163 : f32 to vector<2x32xf32>
    %657 = arith.subf %656, %650 : vector<2x32xf32>
    %658 = arith.mulf %657, %655 : vector<2x32xf32>
    %659 = arith.mulf %650, %627 : vector<2x32xf32>
    %660 = arith.addf %658, %659 : vector<2x32xf32>
    %661 = vector.shape_cast %660 : vector<2x32xf32> to vector<2x1x32xf32>
    %c0_164 = arith.constant 0 : index
    %c2_165 = arith.constant 2 : index
    %c0_166 = arith.constant 0 : index
    %662 = vector.load %arg33[%c0_164, %c2_165, %c0_166] : memref<2x8x64xf32, #tpu.memory_space<vmem>>, vector<2x1x32xf32>
    tpu.vector_store %arg33[%c0_164, %c2_165, %c0_166], %661 {strides = array<i32>} : memref<2x8x64xf32, #tpu.memory_space<vmem>>, vector<2x1x32xf32>,
    %663 = vector.extract_strided_slice %562 {offsets = [0, 3, 0], sizes = [2, 1, 96], strides = [1, 1, 1]} : vector<2x8x96xf32> to vector<2x1x96xf32>
    %664 = vector.shape_cast %663 : vector<2x1x96xf32> to vector<2x96xf32>
    %cst_167 = arith.constant dense<0.000000e+00> : vector<2x96xf32>
    %665 = tpu.matmul %660, %551, %cst_167 {dimension_numbers = #tpu.dot_dimension_numbers<[1], [0], [0], [1], [0, 0, 1, 1], [], []>} : vector<2x32xf32>, vector<32x96xf32>, vector<2x96xf32> -> vector<2x96xf32>
    %666 = vector.broadcast %553 : vector<1x96xf32> to vector<2x96xf32>
    %667 = arith.addf %665, %666 : vector<2x96xf32>
    %668 = vector.extract_strided_slice %664 {offsets = [0, 0], sizes = [2, 32], strides = [1, 1]} : vector<2x96xf32> to vector<2x32xf32>
    %669 = vector.extract_strided_slice %667 {offsets = [0, 0], sizes = [2, 32], strides = [1, 1]} : vector<2x96xf32> to vector<2x32xf32>
    %670 = arith.addf %668, %669 : vector<2x32xf32>
    %671 = arith.negf %670 : vector<2x32xf32>
    %672 = math.exp %671 : vector<2x32xf32>
    %cst_168 = arith.constant 1.000000e+00 : f32
    %673 = vector.broadcast %cst_168 : f32 to vector<2x32xf32>
    %674 = arith.addf %673, %672 : vector<2x32xf32>
    %675 = arith.divf %673, %674 : vector<2x32xf32>
    %676 = vector.extract_strided_slice %664 {offsets = [0, 32], sizes = [2, 32], strides = [1, 1]} : vector<2x96xf32> to vector<2x32xf32>
    %677 = vector.extract_strided_slice %667 {offsets = [0, 32], sizes = [2, 32], strides = [1, 1]} : vector<2x96xf32> to vector<2x32xf32>
    %678 = arith.addf %676, %677 : vector<2x32xf32>
    %679 = arith.negf %678 : vector<2x32xf32>
    %680 = math.exp %679 : vector<2x32xf32>
    %cst_169 = arith.constant 1.000000e+00 : f32
    %681 = vector.broadcast %cst_169 : f32 to vector<2x32xf32>
    %682 = arith.addf %681, %680 : vector<2x32xf32>
    %683 = arith.divf %681, %682 : vector<2x32xf32>
    %684 = vector.extract_strided_slice %664 {offsets = [0, 64], sizes = [2, 32], strides = [1, 1]} : vector<2x96xf32> to vector<2x32xf32>
    %685 = vector.extract_strided_slice %667 {offsets = [0, 64], sizes = [2, 32], strides = [1, 1]} : vector<2x96xf32> to vector<2x32xf32>
    %686 = arith.mulf %675, %685 : vector<2x32xf32>
    %687 = arith.addf %684, %686 : vector<2x32xf32>
    %688 = math.tanh %687 : vector<2x32xf32>
    %cst_170 = arith.constant 1.000000e+00 : f32
    %689 = vector.broadcast %cst_170 : f32 to vector<2x32xf32>
    %690 = arith.subf %689, %683 : vector<2x32xf32>
    %691 = arith.mulf %690, %688 : vector<2x32xf32>
    %692 = arith.mulf %683, %660 : vector<2x32xf32>
    %693 = arith.addf %691, %692 : vector<2x32xf32>
    %694 = vector.shape_cast %693 : vector<2x32xf32> to vector<2x1x32xf32>
    %c0_171 = arith.constant 0 : index
    %c3_172 = arith.constant 3 : index
    %c0_173 = arith.constant 0 : index
    %695 = vector.load %arg33[%c0_171, %c3_172, %c0_173] : memref<2x8x64xf32, #tpu.memory_space<vmem>>, vector<2x1x32xf32>
    tpu.vector_store %arg33[%c0_171, %c3_172, %c0_173], %694 {strides = array<i32>} : memref<2x8x64xf32, #tpu.memory_space<vmem>>, vector<2x1x32xf32>,
    %696 = vector.extract_strided_slice %562 {offsets = [0, 4, 0], sizes = [2, 1, 96], strides = [1, 1, 1]} : vector<2x8x96xf32> to vector<2x1x96xf32>
    %697 = vector.shape_cast %696 : vector<2x1x96xf32> to vector<2x96xf32>
    %cst_174 = arith.constant dense<0.000000e+00> : vector<2x96xf32>
    %698 = tpu.matmul %693, %551, %cst_174 {dimension_numbers = #tpu.dot_dimension_numbers<[1], [0], [0], [1], [0, 0, 1, 1], [], []>} : vector<2x32xf32>, vector<32x96xf32>, vector<2x96xf32> -> vector<2x96xf32>
    %699 = vector.broadcast %553 : vector<1x96xf32> to vector<2x96xf32>
    %700 = arith.addf %698, %699 : vector<2x96xf32>
    %701 = vector.extract_strided_slice %697 {offsets = [0, 0], sizes = [2, 32], strides = [1, 1]} : vector<2x96xf32> to vector<2x32xf32>
    %702 = vector.extract_strided_slice %700 {offsets = [0, 0], sizes = [2, 32], strides = [1, 1]} : vector<2x96xf32> to vector<2x32xf32>
    %703 = arith.addf %701, %702 : vector<2x32xf32>
    %704 = arith.negf %703 : vector<2x32xf32>
    %705 = math.exp %704 : vector<2x32xf32>
    %cst_175 = arith.constant 1.000000e+00 : f32
    %706 = vector.broadcast %cst_175 : f32 to vector<2x32xf32>
    %707 = arith.addf %706, %705 : vector<2x32xf32>
    %708 = arith.divf %706, %707 : vector<2x32xf32>
    %709 = vector.extract_strided_slice %697 {offsets = [0, 32], sizes = [2, 32], strides = [1, 1]} : vector<2x96xf32> to vector<2x32xf32>
    %710 = vector.extract_strided_slice %700 {offsets = [0, 32], sizes = [2, 32], strides = [1, 1]} : vector<2x96xf32> to vector<2x32xf32>
    %711 = arith.addf %709, %710 : vector<2x32xf32>
    %712 = arith.negf %711 : vector<2x32xf32>
    %713 = math.exp %712 : vector<2x32xf32>
    %cst_176 = arith.constant 1.000000e+00 : f32
    %714 = vector.broadcast %cst_176 : f32 to vector<2x32xf32>
    %715 = arith.addf %714, %713 : vector<2x32xf32>
    %716 = arith.divf %714, %715 : vector<2x32xf32>
    %717 = vector.extract_strided_slice %697 {offsets = [0, 64], sizes = [2, 32], strides = [1, 1]} : vector<2x96xf32> to vector<2x32xf32>
    %718 = vector.extract_strided_slice %700 {offsets = [0, 64], sizes = [2, 32], strides = [1, 1]} : vector<2x96xf32> to vector<2x32xf32>
    %719 = arith.mulf %708, %718 : vector<2x32xf32>
    %720 = arith.addf %717, %719 : vector<2x32xf32>
    %721 = math.tanh %720 : vector<2x32xf32>
    %cst_177 = arith.constant 1.000000e+00 : f32
    %722 = vector.broadcast %cst_177 : f32 to vector<2x32xf32>
    %723 = arith.subf %722, %716 : vector<2x32xf32>
    %724 = arith.mulf %723, %721 : vector<2x32xf32>
    %725 = arith.mulf %716, %693 : vector<2x32xf32>
    %726 = arith.addf %724, %725 : vector<2x32xf32>
    %727 = vector.shape_cast %726 : vector<2x32xf32> to vector<2x1x32xf32>
    %c0_178 = arith.constant 0 : index
    %c4_179 = arith.constant 4 : index
    %c0_180 = arith.constant 0 : index
    %728 = vector.load %arg33[%c0_178, %c4_179, %c0_180] : memref<2x8x64xf32, #tpu.memory_space<vmem>>, vector<2x1x32xf32>
    tpu.vector_store %arg33[%c0_178, %c4_179, %c0_180], %727 {strides = array<i32>} : memref<2x8x64xf32, #tpu.memory_space<vmem>>, vector<2x1x32xf32>,
    %729 = vector.extract_strided_slice %562 {offsets = [0, 5, 0], sizes = [2, 1, 96], strides = [1, 1, 1]} : vector<2x8x96xf32> to vector<2x1x96xf32>
    %730 = vector.shape_cast %729 : vector<2x1x96xf32> to vector<2x96xf32>
    %cst_181 = arith.constant dense<0.000000e+00> : vector<2x96xf32>
    %731 = tpu.matmul %726, %551, %cst_181 {dimension_numbers = #tpu.dot_dimension_numbers<[1], [0], [0], [1], [0, 0, 1, 1], [], []>} : vector<2x32xf32>, vector<32x96xf32>, vector<2x96xf32> -> vector<2x96xf32>
    %732 = vector.broadcast %553 : vector<1x96xf32> to vector<2x96xf32>
    %733 = arith.addf %731, %732 : vector<2x96xf32>
    %734 = vector.extract_strided_slice %730 {offsets = [0, 0], sizes = [2, 32], strides = [1, 1]} : vector<2x96xf32> to vector<2x32xf32>
    %735 = vector.extract_strided_slice %733 {offsets = [0, 0], sizes = [2, 32], strides = [1, 1]} : vector<2x96xf32> to vector<2x32xf32>
    %736 = arith.addf %734, %735 : vector<2x32xf32>
    %737 = arith.negf %736 : vector<2x32xf32>
    %738 = math.exp %737 : vector<2x32xf32>
    %cst_182 = arith.constant 1.000000e+00 : f32
    %739 = vector.broadcast %cst_182 : f32 to vector<2x32xf32>
    %740 = arith.addf %739, %738 : vector<2x32xf32>
    %741 = arith.divf %739, %740 : vector<2x32xf32>
    %742 = vector.extract_strided_slice %730 {offsets = [0, 32], sizes = [2, 32], strides = [1, 1]} : vector<2x96xf32> to vector<2x32xf32>
    %743 = vector.extract_strided_slice %733 {offsets = [0, 32], sizes = [2, 32], strides = [1, 1]} : vector<2x96xf32> to vector<2x32xf32>
    %744 = arith.addf %742, %743 : vector<2x32xf32>
    %745 = arith.negf %744 : vector<2x32xf32>
    %746 = math.exp %745 : vector<2x32xf32>
    %cst_183 = arith.constant 1.000000e+00 : f32
    %747 = vector.broadcast %cst_183 : f32 to vector<2x32xf32>
    %748 = arith.addf %747, %746 : vector<2x32xf32>
    %749 = arith.divf %747, %748 : vector<2x32xf32>
    %750 = vector.extract_strided_slice %730 {offsets = [0, 64], sizes = [2, 32], strides = [1, 1]} : vector<2x96xf32> to vector<2x32xf32>
    %751 = vector.extract_strided_slice %733 {offsets = [0, 64], sizes = [2, 32], strides = [1, 1]} : vector<2x96xf32> to vector<2x32xf32>
    %752 = arith.mulf %741, %751 : vector<2x32xf32>
    %753 = arith.addf %750, %752 : vector<2x32xf32>
    %754 = math.tanh %753 : vector<2x32xf32>
    %cst_184 = arith.constant 1.000000e+00 : f32
    %755 = vector.broadcast %cst_184 : f32 to vector<2x32xf32>
    %756 = arith.subf %755, %749 : vector<2x32xf32>
    %757 = arith.mulf %756, %754 : vector<2x32xf32>
    %758 = arith.mulf %749, %726 : vector<2x32xf32>
    %759 = arith.addf %757, %758 : vector<2x32xf32>
    %760 = vector.shape_cast %759 : vector<2x32xf32> to vector<2x1x32xf32>
    %c0_185 = arith.constant 0 : index
    %c5_186 = arith.constant 5 : index
    %c0_187 = arith.constant 0 : index
    %761 = vector.load %arg33[%c0_185, %c5_186, %c0_187] : memref<2x8x64xf32, #tpu.memory_space<vmem>>, vector<2x1x32xf32>
    tpu.vector_store %arg33[%c0_185, %c5_186, %c0_187], %760 {strides = array<i32>} : memref<2x8x64xf32, #tpu.memory_space<vmem>>, vector<2x1x32xf32>,
    %762 = vector.extract_strided_slice %562 {offsets = [0, 6, 0], sizes = [2, 1, 96], strides = [1, 1, 1]} : vector<2x8x96xf32> to vector<2x1x96xf32>
    %763 = vector.shape_cast %762 : vector<2x1x96xf32> to vector<2x96xf32>
    %cst_188 = arith.constant dense<0.000000e+00> : vector<2x96xf32>
    %764 = tpu.matmul %759, %551, %cst_188 {dimension_numbers = #tpu.dot_dimension_numbers<[1], [0], [0], [1], [0, 0, 1, 1], [], []>} : vector<2x32xf32>, vector<32x96xf32>, vector<2x96xf32> -> vector<2x96xf32>
    %765 = vector.broadcast %553 : vector<1x96xf32> to vector<2x96xf32>
    %766 = arith.addf %764, %765 : vector<2x96xf32>
    %767 = vector.extract_strided_slice %763 {offsets = [0, 0], sizes = [2, 32], strides = [1, 1]} : vector<2x96xf32> to vector<2x32xf32>
    %768 = vector.extract_strided_slice %766 {offsets = [0, 0], sizes = [2, 32], strides = [1, 1]} : vector<2x96xf32> to vector<2x32xf32>
    %769 = arith.addf %767, %768 : vector<2x32xf32>
    %770 = arith.negf %769 : vector<2x32xf32>
    %771 = math.exp %770 : vector<2x32xf32>
    %cst_189 = arith.constant 1.000000e+00 : f32
    %772 = vector.broadcast %cst_189 : f32 to vector<2x32xf32>
    %773 = arith.addf %772, %771 : vector<2x32xf32>
    %774 = arith.divf %772, %773 : vector<2x32xf32>
    %775 = vector.extract_strided_slice %763 {offsets = [0, 32], sizes = [2, 32], strides = [1, 1]} : vector<2x96xf32> to vector<2x32xf32>
    %776 = vector.extract_strided_slice %766 {offsets = [0, 32], sizes = [2, 32], strides = [1, 1]} : vector<2x96xf32> to vector<2x32xf32>
    %777 = arith.addf %775, %776 : vector<2x32xf32>
    %778 = arith.negf %777 : vector<2x32xf32>
    %779 = math.exp %778 : vector<2x32xf32>
    %cst_190 = arith.constant 1.000000e+00 : f32
    %780 = vector.broadcast %cst_190 : f32 to vector<2x32xf32>
    %781 = arith.addf %780, %779 : vector<2x32xf32>
    %782 = arith.divf %780, %781 : vector<2x32xf32>
    %783 = vector.extract_strided_slice %763 {offsets = [0, 64], sizes = [2, 32], strides = [1, 1]} : vector<2x96xf32> to vector<2x32xf32>
    %784 = vector.extract_strided_slice %766 {offsets = [0, 64], sizes = [2, 32], strides = [1, 1]} : vector<2x96xf32> to vector<2x32xf32>
    %785 = arith.mulf %774, %784 : vector<2x32xf32>
    %786 = arith.addf %783, %785 : vector<2x32xf32>
    %787 = math.tanh %786 : vector<2x32xf32>
    %cst_191 = arith.constant 1.000000e+00 : f32
    %788 = vector.broadcast %cst_191 : f32 to vector<2x32xf32>
    %789 = arith.subf %788, %782 : vector<2x32xf32>
    %790 = arith.mulf %789, %787 : vector<2x32xf32>
    %791 = arith.mulf %782, %759 : vector<2x32xf32>
    %792 = arith.addf %790, %791 : vector<2x32xf32>
    %793 = vector.shape_cast %792 : vector<2x32xf32> to vector<2x1x32xf32>
    %c0_192 = arith.constant 0 : index
    %c6_193 = arith.constant 6 : index
    %c0_194 = arith.constant 0 : index
    %794 = vector.load %arg33[%c0_192, %c6_193, %c0_194] : memref<2x8x64xf32, #tpu.memory_space<vmem>>, vector<2x1x32xf32>
    tpu.vector_store %arg33[%c0_192, %c6_193, %c0_194], %793 {strides = array<i32>} : memref<2x8x64xf32, #tpu.memory_space<vmem>>, vector<2x1x32xf32>,
    %795 = vector.extract_strided_slice %562 {offsets = [0, 7, 0], sizes = [2, 1, 96], strides = [1, 1, 1]} : vector<2x8x96xf32> to vector<2x1x96xf32>
    %796 = vector.shape_cast %795 : vector<2x1x96xf32> to vector<2x96xf32>
    %cst_195 = arith.constant dense<0.000000e+00> : vector<2x96xf32>
    %797 = tpu.matmul %792, %551, %cst_195 {dimension_numbers = #tpu.dot_dimension_numbers<[1], [0], [0], [1], [0, 0, 1, 1], [], []>} : vector<2x32xf32>, vector<32x96xf32>, vector<2x96xf32> -> vector<2x96xf32>
    %798 = vector.broadcast %553 : vector<1x96xf32> to vector<2x96xf32>
    %799 = arith.addf %797, %798 : vector<2x96xf32>
    %800 = vector.extract_strided_slice %796 {offsets = [0, 0], sizes = [2, 32], strides = [1, 1]} : vector<2x96xf32> to vector<2x32xf32>
    %801 = vector.extract_strided_slice %799 {offsets = [0, 0], sizes = [2, 32], strides = [1, 1]} : vector<2x96xf32> to vector<2x32xf32>
    %802 = arith.addf %800, %801 : vector<2x32xf32>
    %803 = arith.negf %802 : vector<2x32xf32>
    %804 = math.exp %803 : vector<2x32xf32>
    %cst_196 = arith.constant 1.000000e+00 : f32
    %805 = vector.broadcast %cst_196 : f32 to vector<2x32xf32>
    %806 = arith.addf %805, %804 : vector<2x32xf32>
    %807 = arith.divf %805, %806 : vector<2x32xf32>
    %808 = vector.extract_strided_slice %796 {offsets = [0, 32], sizes = [2, 32], strides = [1, 1]} : vector<2x96xf32> to vector<2x32xf32>
    %809 = vector.extract_strided_slice %799 {offsets = [0, 32], sizes = [2, 32], strides = [1, 1]} : vector<2x96xf32> to vector<2x32xf32>
    %810 = arith.addf %808, %809 : vector<2x32xf32>
    %811 = arith.negf %810 : vector<2x32xf32>
    %812 = math.exp %811 : vector<2x32xf32>
    %cst_197 = arith.constant 1.000000e+00 : f32
    %813 = vector.broadcast %cst_197 : f32 to vector<2x32xf32>
    %814 = arith.addf %813, %812 : vector<2x32xf32>
    %815 = arith.divf %813, %814 : vector<2x32xf32>
    %816 = vector.extract_strided_slice %796 {offsets = [0, 64], sizes = [2, 32], strides = [1, 1]} : vector<2x96xf32> to vector<2x32xf32>
    %817 = vector.extract_strided_slice %799 {offsets = [0, 64], sizes = [2, 32], strides = [1, 1]} : vector<2x96xf32> to vector<2x32xf32>
    %818 = arith.mulf %807, %817 : vector<2x32xf32>
    %819 = arith.addf %816, %818 : vector<2x32xf32>
    %820 = math.tanh %819 : vector<2x32xf32>
    %cst_198 = arith.constant 1.000000e+00 : f32
    %821 = vector.broadcast %cst_198 : f32 to vector<2x32xf32>
    %822 = arith.subf %821, %815 : vector<2x32xf32>
    %823 = arith.mulf %822, %820 : vector<2x32xf32>
    %824 = arith.mulf %815, %792 : vector<2x32xf32>
    %825 = arith.addf %823, %824 : vector<2x32xf32>
    %826 = vector.shape_cast %825 : vector<2x32xf32> to vector<2x1x32xf32>
    %c0_199 = arith.constant 0 : index
    %c7_200 = arith.constant 7 : index
    %c0_201 = arith.constant 0 : index
    %827 = vector.load %arg33[%c0_199, %c7_200, %c0_201] : memref<2x8x64xf32, #tpu.memory_space<vmem>>, vector<2x1x32xf32>
    tpu.vector_store %arg33[%c0_199, %c7_200, %c0_201], %826 {strides = array<i32>} : memref<2x8x64xf32, #tpu.memory_space<vmem>>, vector<2x1x32xf32>,
    %828 = vector.shape_cast %549 : vector<2x8x64xf32> to vector<16x64xf32>
    %cst_202 = arith.constant dense<0.000000e+00> : vector<16x96xf32>
    %829 = tpu.matmul %828, %554, %cst_202 {dimension_numbers = #tpu.dot_dimension_numbers<[1], [0], [0], [1], [0, 0, 1, 1], [], []>} : vector<16x64xf32>, vector<64x96xf32>, vector<16x96xf32> -> vector<16x96xf32>
    %830 = vector.broadcast %556 : vector<1x96xf32> to vector<16x96xf32>
    %831 = arith.addf %829, %830 : vector<16x96xf32>
    %832 = vector.shape_cast %831 : vector<16x96xf32> to vector<2x8x96xf32>
    %cst_203 = arith.constant 0.000000e+00 : f32
    %833 = vector.broadcast %cst_203 : f32 to vector<2x32xf32>
    %834 = vector.extract_strided_slice %832 {offsets = [0, 7, 0], sizes = [2, 1, 96], strides = [1, 1, 1]} : vector<2x8x96xf32> to vector<2x1x96xf32>
    %835 = vector.shape_cast %834 : vector<2x1x96xf32> to vector<2x96xf32>
    %cst_204 = arith.constant dense<0.000000e+00> : vector<2x96xf32>
    %836 = tpu.matmul %833, %555, %cst_204 {dimension_numbers = #tpu.dot_dimension_numbers<[1], [0], [0], [1], [0, 0, 1, 1], [], []>} : vector<2x32xf32>, vector<32x96xf32>, vector<2x96xf32> -> vector<2x96xf32>
    %837 = vector.broadcast %557 : vector<1x96xf32> to vector<2x96xf32>
    %838 = arith.addf %836, %837 : vector<2x96xf32>
    %839 = vector.extract_strided_slice %835 {offsets = [0, 0], sizes = [2, 32], strides = [1, 1]} : vector<2x96xf32> to vector<2x32xf32>
    %840 = vector.extract_strided_slice %838 {offsets = [0, 0], sizes = [2, 32], strides = [1, 1]} : vector<2x96xf32> to vector<2x32xf32>
    %841 = arith.addf %839, %840 : vector<2x32xf32>
    %842 = arith.negf %841 : vector<2x32xf32>
    %843 = math.exp %842 : vector<2x32xf32>
    %cst_205 = arith.constant 1.000000e+00 : f32
    %844 = vector.broadcast %cst_205 : f32 to vector<2x32xf32>
    %845 = arith.addf %844, %843 : vector<2x32xf32>
    %846 = arith.divf %844, %845 : vector<2x32xf32>
    %847 = vector.extract_strided_slice %835 {offsets = [0, 32], sizes = [2, 32], strides = [1, 1]} : vector<2x96xf32> to vector<2x32xf32>
    %848 = vector.extract_strided_slice %838 {offsets = [0, 32], sizes = [2, 32], strides = [1, 1]} : vector<2x96xf32> to vector<2x32xf32>
    %849 = arith.addf %847, %848 : vector<2x32xf32>
    %850 = arith.negf %849 : vector<2x32xf32>
    %851 = math.exp %850 : vector<2x32xf32>
    %cst_206 = arith.constant 1.000000e+00 : f32
    %852 = vector.broadcast %cst_206 : f32 to vector<2x32xf32>
    %853 = arith.addf %852, %851 : vector<2x32xf32>
    %854 = arith.divf %852, %853 : vector<2x32xf32>
    %855 = vector.extract_strided_slice %835 {offsets = [0, 64], sizes = [2, 32], strides = [1, 1]} : vector<2x96xf32> to vector<2x32xf32>
    %856 = vector.extract_strided_slice %838 {offsets = [0, 64], sizes = [2, 32], strides = [1, 1]} : vector<2x96xf32> to vector<2x32xf32>
    %857 = arith.mulf %846, %856 : vector<2x32xf32>
    %858 = arith.addf %855, %857 : vector<2x32xf32>
    %859 = math.tanh %858 : vector<2x32xf32>
    %cst_207 = arith.constant 1.000000e+00 : f32
    %860 = vector.broadcast %cst_207 : f32 to vector<2x32xf32>
    %861 = arith.subf %860, %854 : vector<2x32xf32>
    %862 = arith.mulf %861, %859 : vector<2x32xf32>
    %863 = arith.mulf %854, %833 : vector<2x32xf32>
    %864 = arith.addf %862, %863 : vector<2x32xf32>
    %865 = vector.shape_cast %864 : vector<2x32xf32> to vector<2x1x32xf32>
    %c0_208 = arith.constant 0 : index
    %c7_209 = arith.constant 7 : index
    %c32_210 = arith.constant 32 : index
    %866 = vector.load %arg33[%c0_208, %c7_209, %c32_210] : memref<2x8x64xf32, #tpu.memory_space<vmem>>, vector<2x1x32xf32>
    tpu.vector_store %arg33[%c0_208, %c7_209, %c32_210], %865 {strides = array<i32>} : memref<2x8x64xf32, #tpu.memory_space<vmem>>, vector<2x1x32xf32>,
    %867 = vector.extract_strided_slice %832 {offsets = [0, 6, 0], sizes = [2, 1, 96], strides = [1, 1, 1]} : vector<2x8x96xf32> to vector<2x1x96xf32>
    %868 = vector.shape_cast %867 : vector<2x1x96xf32> to vector<2x96xf32>
    %cst_211 = arith.constant dense<0.000000e+00> : vector<2x96xf32>
    %869 = tpu.matmul %864, %555, %cst_211 {dimension_numbers = #tpu.dot_dimension_numbers<[1], [0], [0], [1], [0, 0, 1, 1], [], []>} : vector<2x32xf32>, vector<32x96xf32>, vector<2x96xf32> -> vector<2x96xf32>
    %870 = vector.broadcast %557 : vector<1x96xf32> to vector<2x96xf32>
    %871 = arith.addf %869, %870 : vector<2x96xf32>
    %872 = vector.extract_strided_slice %868 {offsets = [0, 0], sizes = [2, 32], strides = [1, 1]} : vector<2x96xf32> to vector<2x32xf32>
    %873 = vector.extract_strided_slice %871 {offsets = [0, 0], sizes = [2, 32], strides = [1, 1]} : vector<2x96xf32> to vector<2x32xf32>
    %874 = arith.addf %872, %873 : vector<2x32xf32>
    %875 = arith.negf %874 : vector<2x32xf32>
    %876 = math.exp %875 : vector<2x32xf32>
    %cst_212 = arith.constant 1.000000e+00 : f32
    %877 = vector.broadcast %cst_212 : f32 to vector<2x32xf32>
    %878 = arith.addf %877, %876 : vector<2x32xf32>
    %879 = arith.divf %877, %878 : vector<2x32xf32>
    %880 = vector.extract_strided_slice %868 {offsets = [0, 32], sizes = [2, 32], strides = [1, 1]} : vector<2x96xf32> to vector<2x32xf32>
    %881 = vector.extract_strided_slice %871 {offsets = [0, 32], sizes = [2, 32], strides = [1, 1]} : vector<2x96xf32> to vector<2x32xf32>
    %882 = arith.addf %880, %881 : vector<2x32xf32>
    %883 = arith.negf %882 : vector<2x32xf32>
    %884 = math.exp %883 : vector<2x32xf32>
    %cst_213 = arith.constant 1.000000e+00 : f32
    %885 = vector.broadcast %cst_213 : f32 to vector<2x32xf32>
    %886 = arith.addf %885, %884 : vector<2x32xf32>
    %887 = arith.divf %885, %886 : vector<2x32xf32>
    %888 = vector.extract_strided_slice %868 {offsets = [0, 64], sizes = [2, 32], strides = [1, 1]} : vector<2x96xf32> to vector<2x32xf32>
    %889 = vector.extract_strided_slice %871 {offsets = [0, 64], sizes = [2, 32], strides = [1, 1]} : vector<2x96xf32> to vector<2x32xf32>
    %890 = arith.mulf %879, %889 : vector<2x32xf32>
    %891 = arith.addf %888, %890 : vector<2x32xf32>
    %892 = math.tanh %891 : vector<2x32xf32>
    %cst_214 = arith.constant 1.000000e+00 : f32
    %893 = vector.broadcast %cst_214 : f32 to vector<2x32xf32>
    %894 = arith.subf %893, %887 : vector<2x32xf32>
    %895 = arith.mulf %894, %892 : vector<2x32xf32>
    %896 = arith.mulf %887, %864 : vector<2x32xf32>
    %897 = arith.addf %895, %896 : vector<2x32xf32>
    %898 = vector.shape_cast %897 : vector<2x32xf32> to vector<2x1x32xf32>
    %c0_215 = arith.constant 0 : index
    %c6_216 = arith.constant 6 : index
    %c32_217 = arith.constant 32 : index
    %899 = vector.load %arg33[%c0_215, %c6_216, %c32_217] : memref<2x8x64xf32, #tpu.memory_space<vmem>>, vector<2x1x32xf32>
    tpu.vector_store %arg33[%c0_215, %c6_216, %c32_217], %898 {strides = array<i32>} : memref<2x8x64xf32, #tpu.memory_space<vmem>>, vector<2x1x32xf32>,
    %900 = vector.extract_strided_slice %832 {offsets = [0, 5, 0], sizes = [2, 1, 96], strides = [1, 1, 1]} : vector<2x8x96xf32> to vector<2x1x96xf32>
    %901 = vector.shape_cast %900 : vector<2x1x96xf32> to vector<2x96xf32>
    %cst_218 = arith.constant dense<0.000000e+00> : vector<2x96xf32>
    %902 = tpu.matmul %897, %555, %cst_218 {dimension_numbers = #tpu.dot_dimension_numbers<[1], [0], [0], [1], [0, 0, 1, 1], [], []>} : vector<2x32xf32>, vector<32x96xf32>, vector<2x96xf32> -> vector<2x96xf32>
    %903 = vector.broadcast %557 : vector<1x96xf32> to vector<2x96xf32>
    %904 = arith.addf %902, %903 : vector<2x96xf32>
    %905 = vector.extract_strided_slice %901 {offsets = [0, 0], sizes = [2, 32], strides = [1, 1]} : vector<2x96xf32> to vector<2x32xf32>
    %906 = vector.extract_strided_slice %904 {offsets = [0, 0], sizes = [2, 32], strides = [1, 1]} : vector<2x96xf32> to vector<2x32xf32>
    %907 = arith.addf %905, %906 : vector<2x32xf32>
    %908 = arith.negf %907 : vector<2x32xf32>
    %909 = math.exp %908 : vector<2x32xf32>
    %cst_219 = arith.constant 1.000000e+00 : f32
    %910 = vector.broadcast %cst_219 : f32 to vector<2x32xf32>
    %911 = arith.addf %910, %909 : vector<2x32xf32>
    %912 = arith.divf %910, %911 : vector<2x32xf32>
    %913 = vector.extract_strided_slice %901 {offsets = [0, 32], sizes = [2, 32], strides = [1, 1]} : vector<2x96xf32> to vector<2x32xf32>
    %914 = vector.extract_strided_slice %904 {offsets = [0, 32], sizes = [2, 32], strides = [1, 1]} : vector<2x96xf32> to vector<2x32xf32>
    %915 = arith.addf %913, %914 : vector<2x32xf32>
    %916 = arith.negf %915 : vector<2x32xf32>
    %917 = math.exp %916 : vector<2x32xf32>
    %cst_220 = arith.constant 1.000000e+00 : f32
    %918 = vector.broadcast %cst_220 : f32 to vector<2x32xf32>
    %919 = arith.addf %918, %917 : vector<2x32xf32>
    %920 = arith.divf %918, %919 : vector<2x32xf32>
    %921 = vector.extract_strided_slice %901 {offsets = [0, 64], sizes = [2, 32], strides = [1, 1]} : vector<2x96xf32> to vector<2x32xf32>
    %922 = vector.extract_strided_slice %904 {offsets = [0, 64], sizes = [2, 32], strides = [1, 1]} : vector<2x96xf32> to vector<2x32xf32>
    %923 = arith.mulf %912, %922 : vector<2x32xf32>
    %924 = arith.addf %921, %923 : vector<2x32xf32>
    %925 = math.tanh %924 : vector<2x32xf32>
    %cst_221 = arith.constant 1.000000e+00 : f32
    %926 = vector.broadcast %cst_221 : f32 to vector<2x32xf32>
    %927 = arith.subf %926, %920 : vector<2x32xf32>
    %928 = arith.mulf %927, %925 : vector<2x32xf32>
    %929 = arith.mulf %920, %897 : vector<2x32xf32>
    %930 = arith.addf %928, %929 : vector<2x32xf32>
    %931 = vector.shape_cast %930 : vector<2x32xf32> to vector<2x1x32xf32>
    %c0_222 = arith.constant 0 : index
    %c5_223 = arith.constant 5 : index
    %c32_224 = arith.constant 32 : index
    %932 = vector.load %arg33[%c0_222, %c5_223, %c32_224] : memref<2x8x64xf32, #tpu.memory_space<vmem>>, vector<2x1x32xf32>
    tpu.vector_store %arg33[%c0_222, %c5_223, %c32_224], %931 {strides = array<i32>} : memref<2x8x64xf32, #tpu.memory_space<vmem>>, vector<2x1x32xf32>,
    %933 = vector.extract_strided_slice %832 {offsets = [0, 4, 0], sizes = [2, 1, 96], strides = [1, 1, 1]} : vector<2x8x96xf32> to vector<2x1x96xf32>
    %934 = vector.shape_cast %933 : vector<2x1x96xf32> to vector<2x96xf32>
    %cst_225 = arith.constant dense<0.000000e+00> : vector<2x96xf32>
    %935 = tpu.matmul %930, %555, %cst_225 {dimension_numbers = #tpu.dot_dimension_numbers<[1], [0], [0], [1], [0, 0, 1, 1], [], []>} : vector<2x32xf32>, vector<32x96xf32>, vector<2x96xf32> -> vector<2x96xf32>
    %936 = vector.broadcast %557 : vector<1x96xf32> to vector<2x96xf32>
    %937 = arith.addf %935, %936 : vector<2x96xf32>
    %938 = vector.extract_strided_slice %934 {offsets = [0, 0], sizes = [2, 32], strides = [1, 1]} : vector<2x96xf32> to vector<2x32xf32>
    %939 = vector.extract_strided_slice %937 {offsets = [0, 0], sizes = [2, 32], strides = [1, 1]} : vector<2x96xf32> to vector<2x32xf32>
    %940 = arith.addf %938, %939 : vector<2x32xf32>
    %941 = arith.negf %940 : vector<2x32xf32>
    %942 = math.exp %941 : vector<2x32xf32>
    %cst_226 = arith.constant 1.000000e+00 : f32
    %943 = vector.broadcast %cst_226 : f32 to vector<2x32xf32>
    %944 = arith.addf %943, %942 : vector<2x32xf32>
    %945 = arith.divf %943, %944 : vector<2x32xf32>
    %946 = vector.extract_strided_slice %934 {offsets = [0, 32], sizes = [2, 32], strides = [1, 1]} : vector<2x96xf32> to vector<2x32xf32>
    %947 = vector.extract_strided_slice %937 {offsets = [0, 32], sizes = [2, 32], strides = [1, 1]} : vector<2x96xf32> to vector<2x32xf32>
    %948 = arith.addf %946, %947 : vector<2x32xf32>
    %949 = arith.negf %948 : vector<2x32xf32>
    %950 = math.exp %949 : vector<2x32xf32>
    %cst_227 = arith.constant 1.000000e+00 : f32
    %951 = vector.broadcast %cst_227 : f32 to vector<2x32xf32>
    %952 = arith.addf %951, %950 : vector<2x32xf32>
    %953 = arith.divf %951, %952 : vector<2x32xf32>
    %954 = vector.extract_strided_slice %934 {offsets = [0, 64], sizes = [2, 32], strides = [1, 1]} : vector<2x96xf32> to vector<2x32xf32>
    %955 = vector.extract_strided_slice %937 {offsets = [0, 64], sizes = [2, 32], strides = [1, 1]} : vector<2x96xf32> to vector<2x32xf32>
    %956 = arith.mulf %945, %955 : vector<2x32xf32>
    %957 = arith.addf %954, %956 : vector<2x32xf32>
    %958 = math.tanh %957 : vector<2x32xf32>
    %cst_228 = arith.constant 1.000000e+00 : f32
    %959 = vector.broadcast %cst_228 : f32 to vector<2x32xf32>
    %960 = arith.subf %959, %953 : vector<2x32xf32>
    %961 = arith.mulf %960, %958 : vector<2x32xf32>
    %962 = arith.mulf %953, %930 : vector<2x32xf32>
    %963 = arith.addf %961, %962 : vector<2x32xf32>
    %964 = vector.shape_cast %963 : vector<2x32xf32> to vector<2x1x32xf32>
    %c0_229 = arith.constant 0 : index
    %c4_230 = arith.constant 4 : index
    %c32_231 = arith.constant 32 : index
    %965 = vector.load %arg33[%c0_229, %c4_230, %c32_231] : memref<2x8x64xf32, #tpu.memory_space<vmem>>, vector<2x1x32xf32>
    tpu.vector_store %arg33[%c0_229, %c4_230, %c32_231], %964 {strides = array<i32>} : memref<2x8x64xf32, #tpu.memory_space<vmem>>, vector<2x1x32xf32>,
    %966 = vector.extract_strided_slice %832 {offsets = [0, 3, 0], sizes = [2, 1, 96], strides = [1, 1, 1]} : vector<2x8x96xf32> to vector<2x1x96xf32>
    %967 = vector.shape_cast %966 : vector<2x1x96xf32> to vector<2x96xf32>
    %cst_232 = arith.constant dense<0.000000e+00> : vector<2x96xf32>
    %968 = tpu.matmul %963, %555, %cst_232 {dimension_numbers = #tpu.dot_dimension_numbers<[1], [0], [0], [1], [0, 0, 1, 1], [], []>} : vector<2x32xf32>, vector<32x96xf32>, vector<2x96xf32> -> vector<2x96xf32>
    %969 = vector.broadcast %557 : vector<1x96xf32> to vector<2x96xf32>
    %970 = arith.addf %968, %969 : vector<2x96xf32>
    %971 = vector.extract_strided_slice %967 {offsets = [0, 0], sizes = [2, 32], strides = [1, 1]} : vector<2x96xf32> to vector<2x32xf32>
    %972 = vector.extract_strided_slice %970 {offsets = [0, 0], sizes = [2, 32], strides = [1, 1]} : vector<2x96xf32> to vector<2x32xf32>
    %973 = arith.addf %971, %972 : vector<2x32xf32>
    %974 = arith.negf %973 : vector<2x32xf32>
    %975 = math.exp %974 : vector<2x32xf32>
    %cst_233 = arith.constant 1.000000e+00 : f32
    %976 = vector.broadcast %cst_233 : f32 to vector<2x32xf32>
    %977 = arith.addf %976, %975 : vector<2x32xf32>
    %978 = arith.divf %976, %977 : vector<2x32xf32>
    %979 = vector.extract_strided_slice %967 {offsets = [0, 32], sizes = [2, 32], strides = [1, 1]} : vector<2x96xf32> to vector<2x32xf32>
    %980 = vector.extract_strided_slice %970 {offsets = [0, 32], sizes = [2, 32], strides = [1, 1]} : vector<2x96xf32> to vector<2x32xf32>
    %981 = arith.addf %979, %980 : vector<2x32xf32>
    %982 = arith.negf %981 : vector<2x32xf32>
    %983 = math.exp %982 : vector<2x32xf32>
    %cst_234 = arith.constant 1.000000e+00 : f32
    %984 = vector.broadcast %cst_234 : f32 to vector<2x32xf32>
    %985 = arith.addf %984, %983 : vector<2x32xf32>
    %986 = arith.divf %984, %985 : vector<2x32xf32>
    %987 = vector.extract_strided_slice %967 {offsets = [0, 64], sizes = [2, 32], strides = [1, 1]} : vector<2x96xf32> to vector<2x32xf32>
    %988 = vector.extract_strided_slice %970 {offsets = [0, 64], sizes = [2, 32], strides = [1, 1]} : vector<2x96xf32> to vector<2x32xf32>
    %989 = arith.mulf %978, %988 : vector<2x32xf32>
    %990 = arith.addf %987, %989 : vector<2x32xf32>
    %991 = math.tanh %990 : vector<2x32xf32>
    %cst_235 = arith.constant 1.000000e+00 : f32
    %992 = vector.broadcast %cst_235 : f32 to vector<2x32xf32>
    %993 = arith.subf %992, %986 : vector<2x32xf32>
    %994 = arith.mulf %993, %991 : vector<2x32xf32>
    %995 = arith.mulf %986, %963 : vector<2x32xf32>
    %996 = arith.addf %994, %995 : vector<2x32xf32>
    %997 = vector.shape_cast %996 : vector<2x32xf32> to vector<2x1x32xf32>
    %c0_236 = arith.constant 0 : index
    %c3_237 = arith.constant 3 : index
    %c32_238 = arith.constant 32 : index
    %998 = vector.load %arg33[%c0_236, %c3_237, %c32_238] : memref<2x8x64xf32, #tpu.memory_space<vmem>>, vector<2x1x32xf32>
    tpu.vector_store %arg33[%c0_236, %c3_237, %c32_238], %997 {strides = array<i32>} : memref<2x8x64xf32, #tpu.memory_space<vmem>>, vector<2x1x32xf32>,
    %999 = vector.extract_strided_slice %832 {offsets = [0, 2, 0], sizes = [2, 1, 96], strides = [1, 1, 1]} : vector<2x8x96xf32> to vector<2x1x96xf32>
    %1000 = vector.shape_cast %999 : vector<2x1x96xf32> to vector<2x96xf32>
    %cst_239 = arith.constant dense<0.000000e+00> : vector<2x96xf32>
    %1001 = tpu.matmul %996, %555, %cst_239 {dimension_numbers = #tpu.dot_dimension_numbers<[1], [0], [0], [1], [0, 0, 1, 1], [], []>} : vector<2x32xf32>, vector<32x96xf32>, vector<2x96xf32> -> vector<2x96xf32>
    %1002 = vector.broadcast %557 : vector<1x96xf32> to vector<2x96xf32>
    %1003 = arith.addf %1001, %1002 : vector<2x96xf32>
    %1004 = vector.extract_strided_slice %1000 {offsets = [0, 0], sizes = [2, 32], strides = [1, 1]} : vector<2x96xf32> to vector<2x32xf32>
    %1005 = vector.extract_strided_slice %1003 {offsets = [0, 0], sizes = [2, 32], strides = [1, 1]} : vector<2x96xf32> to vector<2x32xf32>
    %1006 = arith.addf %1004, %1005 : vector<2x32xf32>
    %1007 = arith.negf %1006 : vector<2x32xf32>
    %1008 = math.exp %1007 : vector<2x32xf32>
    %cst_240 = arith.constant 1.000000e+00 : f32
    %1009 = vector.broadcast %cst_240 : f32 to vector<2x32xf32>
    %1010 = arith.addf %1009, %1008 : vector<2x32xf32>
    %1011 = arith.divf %1009, %1010 : vector<2x32xf32>
    %1012 = vector.extract_strided_slice %1000 {offsets = [0, 32], sizes = [2, 32], strides = [1, 1]} : vector<2x96xf32> to vector<2x32xf32>
    %1013 = vector.extract_strided_slice %1003 {offsets = [0, 32], sizes = [2, 32], strides = [1, 1]} : vector<2x96xf32> to vector<2x32xf32>
    %1014 = arith.addf %1012, %1013 : vector<2x32xf32>
    %1015 = arith.negf %1014 : vector<2x32xf32>
    %1016 = math.exp %1015 : vector<2x32xf32>
    %cst_241 = arith.constant 1.000000e+00 : f32
    %1017 = vector.broadcast %cst_241 : f32 to vector<2x32xf32>
    %1018 = arith.addf %1017, %1016 : vector<2x32xf32>
    %1019 = arith.divf %1017, %1018 : vector<2x32xf32>
    %1020 = vector.extract_strided_slice %1000 {offsets = [0, 64], sizes = [2, 32], strides = [1, 1]} : vector<2x96xf32> to vector<2x32xf32>
    %1021 = vector.extract_strided_slice %1003 {offsets = [0, 64], sizes = [2, 32], strides = [1, 1]} : vector<2x96xf32> to vector<2x32xf32>
    %1022 = arith.mulf %1011, %1021 : vector<2x32xf32>
    %1023 = arith.addf %1020, %1022 : vector<2x32xf32>
    %1024 = math.tanh %1023 : vector<2x32xf32>
    %cst_242 = arith.constant 1.000000e+00 : f32
    %1025 = vector.broadcast %cst_242 : f32 to vector<2x32xf32>
    %1026 = arith.subf %1025, %1019 : vector<2x32xf32>
    %1027 = arith.mulf %1026, %1024 : vector<2x32xf32>
    %1028 = arith.mulf %1019, %996 : vector<2x32xf32>
    %1029 = arith.addf %1027, %1028 : vector<2x32xf32>
    %1030 = vector.shape_cast %1029 : vector<2x32xf32> to vector<2x1x32xf32>
    %c0_243 = arith.constant 0 : index
    %c2_244 = arith.constant 2 : index
    %c32_245 = arith.constant 32 : index
    %1031 = vector.load %arg33[%c0_243, %c2_244, %c32_245] : memref<2x8x64xf32, #tpu.memory_space<vmem>>, vector<2x1x32xf32>
    tpu.vector_store %arg33[%c0_243, %c2_244, %c32_245], %1030 {strides = array<i32>} : memref<2x8x64xf32, #tpu.memory_space<vmem>>, vector<2x1x32xf32>,
    %1032 = vector.extract_strided_slice %832 {offsets = [0, 1, 0], sizes = [2, 1, 96], strides = [1, 1, 1]} : vector<2x8x96xf32> to vector<2x1x96xf32>
    %1033 = vector.shape_cast %1032 : vector<2x1x96xf32> to vector<2x96xf32>
    %cst_246 = arith.constant dense<0.000000e+00> : vector<2x96xf32>
    %1034 = tpu.matmul %1029, %555, %cst_246 {dimension_numbers = #tpu.dot_dimension_numbers<[1], [0], [0], [1], [0, 0, 1, 1], [], []>} : vector<2x32xf32>, vector<32x96xf32>, vector<2x96xf32> -> vector<2x96xf32>
    %1035 = vector.broadcast %557 : vector<1x96xf32> to vector<2x96xf32>
    %1036 = arith.addf %1034, %1035 : vector<2x96xf32>
    %1037 = vector.extract_strided_slice %1033 {offsets = [0, 0], sizes = [2, 32], strides = [1, 1]} : vector<2x96xf32> to vector<2x32xf32>
    %1038 = vector.extract_strided_slice %1036 {offsets = [0, 0], sizes = [2, 32], strides = [1, 1]} : vector<2x96xf32> to vector<2x32xf32>
    %1039 = arith.addf %1037, %1038 : vector<2x32xf32>
    %1040 = arith.negf %1039 : vector<2x32xf32>
    %1041 = math.exp %1040 : vector<2x32xf32>
    %cst_247 = arith.constant 1.000000e+00 : f32
    %1042 = vector.broadcast %cst_247 : f32 to vector<2x32xf32>
    %1043 = arith.addf %1042, %1041 : vector<2x32xf32>
    %1044 = arith.divf %1042, %1043 : vector<2x32xf32>
    %1045 = vector.extract_strided_slice %1033 {offsets = [0, 32], sizes = [2, 32], strides = [1, 1]} : vector<2x96xf32> to vector<2x32xf32>
    %1046 = vector.extract_strided_slice %1036 {offsets = [0, 32], sizes = [2, 32], strides = [1, 1]} : vector<2x96xf32> to vector<2x32xf32>
    %1047 = arith.addf %1045, %1046 : vector<2x32xf32>
    %1048 = arith.negf %1047 : vector<2x32xf32>
    %1049 = math.exp %1048 : vector<2x32xf32>
    %cst_248 = arith.constant 1.000000e+00 : f32
    %1050 = vector.broadcast %cst_248 : f32 to vector<2x32xf32>
    %1051 = arith.addf %1050, %1049 : vector<2x32xf32>
    %1052 = arith.divf %1050, %1051 : vector<2x32xf32>
    %1053 = vector.extract_strided_slice %1033 {offsets = [0, 64], sizes = [2, 32], strides = [1, 1]} : vector<2x96xf32> to vector<2x32xf32>
    %1054 = vector.extract_strided_slice %1036 {offsets = [0, 64], sizes = [2, 32], strides = [1, 1]} : vector<2x96xf32> to vector<2x32xf32>
    %1055 = arith.mulf %1044, %1054 : vector<2x32xf32>
    %1056 = arith.addf %1053, %1055 : vector<2x32xf32>
    %1057 = math.tanh %1056 : vector<2x32xf32>
    %cst_249 = arith.constant 1.000000e+00 : f32
    %1058 = vector.broadcast %cst_249 : f32 to vector<2x32xf32>
    %1059 = arith.subf %1058, %1052 : vector<2x32xf32>
    %1060 = arith.mulf %1059, %1057 : vector<2x32xf32>
    %1061 = arith.mulf %1052, %1029 : vector<2x32xf32>
    %1062 = arith.addf %1060, %1061 : vector<2x32xf32>
    %1063 = vector.shape_cast %1062 : vector<2x32xf32> to vector<2x1x32xf32>
    %c0_250 = arith.constant 0 : index
    %c1_251 = arith.constant 1 : index
    %c32_252 = arith.constant 32 : index
    %1064 = vector.load %arg33[%c0_250, %c1_251, %c32_252] : memref<2x8x64xf32, #tpu.memory_space<vmem>>, vector<2x1x32xf32>
    tpu.vector_store %arg33[%c0_250, %c1_251, %c32_252], %1063 {strides = array<i32>} : memref<2x8x64xf32, #tpu.memory_space<vmem>>, vector<2x1x32xf32>,
    %1065 = vector.extract_strided_slice %832 {offsets = [0, 0, 0], sizes = [2, 1, 96], strides = [1, 1, 1]} : vector<2x8x96xf32> to vector<2x1x96xf32>
    %1066 = vector.shape_cast %1065 : vector<2x1x96xf32> to vector<2x96xf32>
    %cst_253 = arith.constant dense<0.000000e+00> : vector<2x96xf32>
    %1067 = tpu.matmul %1062, %555, %cst_253 {dimension_numbers = #tpu.dot_dimension_numbers<[1], [0], [0], [1], [0, 0, 1, 1], [], []>} : vector<2x32xf32>, vector<32x96xf32>, vector<2x96xf32> -> vector<2x96xf32>
    %1068 = vector.broadcast %557 : vector<1x96xf32> to vector<2x96xf32>
    %1069 = arith.addf %1067, %1068 : vector<2x96xf32>
    %1070 = vector.extract_strided_slice %1066 {offsets = [0, 0], sizes = [2, 32], strides = [1, 1]} : vector<2x96xf32> to vector<2x32xf32>
    %1071 = vector.extract_strided_slice %1069 {offsets = [0, 0], sizes = [2, 32], strides = [1, 1]} : vector<2x96xf32> to vector<2x32xf32>
    %1072 = arith.addf %1070, %1071 : vector<2x32xf32>
    %1073 = arith.negf %1072 : vector<2x32xf32>
    %1074 = math.exp %1073 : vector<2x32xf32>
    %cst_254 = arith.constant 1.000000e+00 : f32
    %1075 = vector.broadcast %cst_254 : f32 to vector<2x32xf32>
    %1076 = arith.addf %1075, %1074 : vector<2x32xf32>
    %1077 = arith.divf %1075, %1076 : vector<2x32xf32>
    %1078 = vector.extract_strided_slice %1066 {offsets = [0, 32], sizes = [2, 32], strides = [1, 1]} : vector<2x96xf32> to vector<2x32xf32>
    %1079 = vector.extract_strided_slice %1069 {offsets = [0, 32], sizes = [2, 32], strides = [1, 1]} : vector<2x96xf32> to vector<2x32xf32>
    %1080 = arith.addf %1078, %1079 : vector<2x32xf32>
    %1081 = arith.negf %1080 : vector<2x32xf32>
    %1082 = math.exp %1081 : vector<2x32xf32>
    %cst_255 = arith.constant 1.000000e+00 : f32
    %1083 = vector.broadcast %cst_255 : f32 to vector<2x32xf32>
    %1084 = arith.addf %1083, %1082 : vector<2x32xf32>
    %1085 = arith.divf %1083, %1084 : vector<2x32xf32>
    %1086 = vector.extract_strided_slice %1066 {offsets = [0, 64], sizes = [2, 32], strides = [1, 1]} : vector<2x96xf32> to vector<2x32xf32>
    %1087 = vector.extract_strided_slice %1069 {offsets = [0, 64], sizes = [2, 32], strides = [1, 1]} : vector<2x96xf32> to vector<2x32xf32>
    %1088 = arith.mulf %1077, %1087 : vector<2x32xf32>
    %1089 = arith.addf %1086, %1088 : vector<2x32xf32>
    %1090 = math.tanh %1089 : vector<2x32xf32>
    %cst_256 = arith.constant 1.000000e+00 : f32
    %1091 = vector.broadcast %cst_256 : f32 to vector<2x32xf32>
    %1092 = arith.subf %1091, %1085 : vector<2x32xf32>
    %1093 = arith.mulf %1092, %1090 : vector<2x32xf32>
    %1094 = arith.mulf %1085, %1062 : vector<2x32xf32>
    %1095 = arith.addf %1093, %1094 : vector<2x32xf32>
    %1096 = vector.shape_cast %1095 : vector<2x32xf32> to vector<2x1x32xf32>
    %c0_257 = arith.constant 0 : index
    %c0_258 = arith.constant 0 : index
    %c32_259 = arith.constant 32 : index
    %1097 = vector.load %arg33[%c0_257, %c0_258, %c32_259] : memref<2x8x64xf32, #tpu.memory_space<vmem>>, vector<2x1x32xf32>
    tpu.vector_store %arg33[%c0_257, %c0_258, %c32_259], %1096 {strides = array<i32>} : memref<2x8x64xf32, #tpu.memory_space<vmem>>, vector<2x1x32xf32>,
    %c0_260 = arith.constant 0 : index
    %c0_261 = arith.constant 0 : index
    %c0_262 = arith.constant 0 : index
    %1098 = vector.load %arg33[%c0_260, %c0_261, %c0_262] : memref<2x8x64xf32, #tpu.memory_space<vmem>>, vector<2x8x64xf32>
    %c0_263 = arith.constant 0 : index
    %c0_264 = arith.constant 0 : index
    %1099 = vector.load %arg17[%c0_263, %c0_264] : memref<64x96xf32, #tpu.memory_space<vmem>>, vector<64x96xf32>
    %c0_265 = arith.constant 0 : index
    %c0_266 = arith.constant 0 : index
    %1100 = vector.load %arg18[%c0_265, %c0_266] : memref<32x96xf32, #tpu.memory_space<vmem>>, vector<32x96xf32>
    %c0_267 = arith.constant 0 : index
    %c0_268 = arith.constant 0 : index
    %1101 = vector.load %arg19[%c0_267, %c0_268] : memref<1x96xf32, #tpu.memory_space<vmem>>, vector<1x96xf32>
    %c0_269 = arith.constant 0 : index
    %c0_270 = arith.constant 0 : index
    %1102 = vector.load %arg20[%c0_269, %c0_270] : memref<1x96xf32, #tpu.memory_space<vmem>>, vector<1x96xf32>
    %c0_271 = arith.constant 0 : index
    %c0_272 = arith.constant 0 : index
    %1103 = vector.load %arg21[%c0_271, %c0_272] : memref<64x96xf32, #tpu.memory_space<vmem>>, vector<64x96xf32>
    %c0_273 = arith.constant 0 : index
    %c0_274 = arith.constant 0 : index
    %1104 = vector.load %arg22[%c0_273, %c0_274] : memref<32x96xf32, #tpu.memory_space<vmem>>, vector<32x96xf32>
    %c0_275 = arith.constant 0 : index
    %c0_276 = arith.constant 0 : index
    %1105 = vector.load %arg23[%c0_275, %c0_276] : memref<1x96xf32, #tpu.memory_space<vmem>>, vector<1x96xf32>
    %c0_277 = arith.constant 0 : index
    %c0_278 = arith.constant 0 : index
    %1106 = vector.load %arg24[%c0_277, %c0_278] : memref<1x96xf32, #tpu.memory_space<vmem>>, vector<1x96xf32>
    %1107 = vector.shape_cast %1098 : vector<2x8x64xf32> to vector<16x64xf32>
    %cst_279 = arith.constant dense<0.000000e+00> : vector<16x96xf32>
    %1108 = tpu.matmul %1107, %1099, %cst_279 {dimension_numbers = #tpu.dot_dimension_numbers<[1], [0], [0], [1], [0, 0, 1, 1], [], []>} : vector<16x64xf32>, vector<64x96xf32>, vector<16x96xf32> -> vector<16x96xf32>
    %1109 = vector.broadcast %1101 : vector<1x96xf32> to vector<16x96xf32>
    %1110 = arith.addf %1108, %1109 : vector<16x96xf32>
    %1111 = vector.shape_cast %1110 : vector<16x96xf32> to vector<2x8x96xf32>
    %cst_280 = arith.constant 0.000000e+00 : f32
    %1112 = vector.broadcast %cst_280 : f32 to vector<2x32xf32>
    %1113 = vector.extract_strided_slice %1111 {offsets = [0, 0, 0], sizes = [2, 1, 96], strides = [1, 1, 1]} : vector<2x8x96xf32> to vector<2x1x96xf32>
    %1114 = vector.shape_cast %1113 : vector<2x1x96xf32> to vector<2x96xf32>
    %cst_281 = arith.constant dense<0.000000e+00> : vector<2x96xf32>
    %1115 = tpu.matmul %1112, %1100, %cst_281 {dimension_numbers = #tpu.dot_dimension_numbers<[1], [0], [0], [1], [0, 0, 1, 1], [], []>} : vector<2x32xf32>, vector<32x96xf32>, vector<2x96xf32> -> vector<2x96xf32>
    %1116 = vector.broadcast %1102 : vector<1x96xf32> to vector<2x96xf32>
    %1117 = arith.addf %1115, %1116 : vector<2x96xf32>
    %1118 = vector.extract_strided_slice %1114 {offsets = [0, 0], sizes = [2, 32], strides = [1, 1]} : vector<2x96xf32> to vector<2x32xf32>
    %1119 = vector.extract_strided_slice %1117 {offsets = [0, 0], sizes = [2, 32], strides = [1, 1]} : vector<2x96xf32> to vector<2x32xf32>
    %1120 = arith.addf %1118, %1119 : vector<2x32xf32>
    %1121 = arith.negf %1120 : vector<2x32xf32>
    %1122 = math.exp %1121 : vector<2x32xf32>
    %cst_282 = arith.constant 1.000000e+00 : f32
    %1123 = vector.broadcast %cst_282 : f32 to vector<2x32xf32>
    %1124 = arith.addf %1123, %1122 : vector<2x32xf32>
    %1125 = arith.divf %1123, %1124 : vector<2x32xf32>
    %1126 = vector.extract_strided_slice %1114 {offsets = [0, 32], sizes = [2, 32], strides = [1, 1]} : vector<2x96xf32> to vector<2x32xf32>
    %1127 = vector.extract_strided_slice %1117 {offsets = [0, 32], sizes = [2, 32], strides = [1, 1]} : vector<2x96xf32> to vector<2x32xf32>
    %1128 = arith.addf %1126, %1127 : vector<2x32xf32>
    %1129 = arith.negf %1128 : vector<2x32xf32>
    %1130 = math.exp %1129 : vector<2x32xf32>
    %cst_283 = arith.constant 1.000000e+00 : f32
    %1131 = vector.broadcast %cst_283 : f32 to vector<2x32xf32>
    %1132 = arith.addf %1131, %1130 : vector<2x32xf32>
    %1133 = arith.divf %1131, %1132 : vector<2x32xf32>
    %1134 = vector.extract_strided_slice %1114 {offsets = [0, 64], sizes = [2, 32], strides = [1, 1]} : vector<2x96xf32> to vector<2x32xf32>
    %1135 = vector.extract_strided_slice %1117 {offsets = [0, 64], sizes = [2, 32], strides = [1, 1]} : vector<2x96xf32> to vector<2x32xf32>
    %1136 = arith.mulf %1125, %1135 : vector<2x32xf32>
    %1137 = arith.addf %1134, %1136 : vector<2x32xf32>
    %1138 = math.tanh %1137 : vector<2x32xf32>
    %cst_284 = arith.constant 1.000000e+00 : f32
    %1139 = vector.broadcast %cst_284 : f32 to vector<2x32xf32>
    %1140 = arith.subf %1139, %1133 : vector<2x32xf32>
    %1141 = arith.mulf %1140, %1138 : vector<2x32xf32>
    %1142 = arith.mulf %1133, %1112 : vector<2x32xf32>
    %1143 = arith.addf %1141, %1142 : vector<2x32xf32>
    %1144 = vector.shape_cast %1143 : vector<2x32xf32> to vector<2x1x32xf32>
    %c0_285 = arith.constant 0 : index
    %c0_286 = arith.constant 0 : index
    %c0_287 = arith.constant 0 : index
    %1145 = vector.load %arg34[%c0_285, %c0_286, %c0_287] : memref<2x8x64xf32, #tpu.memory_space<vmem>>, vector<2x1x32xf32>
    tpu.vector_store %arg34[%c0_285, %c0_286, %c0_287], %1144 {strides = array<i32>} : memref<2x8x64xf32, #tpu.memory_space<vmem>>, vector<2x1x32xf32>,
    %1146 = vector.extract_strided_slice %1111 {offsets = [0, 1, 0], sizes = [2, 1, 96], strides = [1, 1, 1]} : vector<2x8x96xf32> to vector<2x1x96xf32>
    %1147 = vector.shape_cast %1146 : vector<2x1x96xf32> to vector<2x96xf32>
    %cst_288 = arith.constant dense<0.000000e+00> : vector<2x96xf32>
    %1148 = tpu.matmul %1143, %1100, %cst_288 {dimension_numbers = #tpu.dot_dimension_numbers<[1], [0], [0], [1], [0, 0, 1, 1], [], []>} : vector<2x32xf32>, vector<32x96xf32>, vector<2x96xf32> -> vector<2x96xf32>
    %1149 = vector.broadcast %1102 : vector<1x96xf32> to vector<2x96xf32>
    %1150 = arith.addf %1148, %1149 : vector<2x96xf32>
    %1151 = vector.extract_strided_slice %1147 {offsets = [0, 0], sizes = [2, 32], strides = [1, 1]} : vector<2x96xf32> to vector<2x32xf32>
    %1152 = vector.extract_strided_slice %1150 {offsets = [0, 0], sizes = [2, 32], strides = [1, 1]} : vector<2x96xf32> to vector<2x32xf32>
    %1153 = arith.addf %1151, %1152 : vector<2x32xf32>
    %1154 = arith.negf %1153 : vector<2x32xf32>
    %1155 = math.exp %1154 : vector<2x32xf32>
    %cst_289 = arith.constant 1.000000e+00 : f32
    %1156 = vector.broadcast %cst_289 : f32 to vector<2x32xf32>
    %1157 = arith.addf %1156, %1155 : vector<2x32xf32>
    %1158 = arith.divf %1156, %1157 : vector<2x32xf32>
    %1159 = vector.extract_strided_slice %1147 {offsets = [0, 32], sizes = [2, 32], strides = [1, 1]} : vector<2x96xf32> to vector<2x32xf32>
    %1160 = vector.extract_strided_slice %1150 {offsets = [0, 32], sizes = [2, 32], strides = [1, 1]} : vector<2x96xf32> to vector<2x32xf32>
    %1161 = arith.addf %1159, %1160 : vector<2x32xf32>
    %1162 = arith.negf %1161 : vector<2x32xf32>
    %1163 = math.exp %1162 : vector<2x32xf32>
    %cst_290 = arith.constant 1.000000e+00 : f32
    %1164 = vector.broadcast %cst_290 : f32 to vector<2x32xf32>
    %1165 = arith.addf %1164, %1163 : vector<2x32xf32>
    %1166 = arith.divf %1164, %1165 : vector<2x32xf32>
    %1167 = vector.extract_strided_slice %1147 {offsets = [0, 64], sizes = [2, 32], strides = [1, 1]} : vector<2x96xf32> to vector<2x32xf32>
    %1168 = vector.extract_strided_slice %1150 {offsets = [0, 64], sizes = [2, 32], strides = [1, 1]} : vector<2x96xf32> to vector<2x32xf32>
    %1169 = arith.mulf %1158, %1168 : vector<2x32xf32>
    %1170 = arith.addf %1167, %1169 : vector<2x32xf32>
    %1171 = math.tanh %1170 : vector<2x32xf32>
    %cst_291 = arith.constant 1.000000e+00 : f32
    %1172 = vector.broadcast %cst_291 : f32 to vector<2x32xf32>
    %1173 = arith.subf %1172, %1166 : vector<2x32xf32>
    %1174 = arith.mulf %1173, %1171 : vector<2x32xf32>
    %1175 = arith.mulf %1166, %1143 : vector<2x32xf32>
    %1176 = arith.addf %1174, %1175 : vector<2x32xf32>
    %1177 = vector.shape_cast %1176 : vector<2x32xf32> to vector<2x1x32xf32>
    %c0_292 = arith.constant 0 : index
    %c1_293 = arith.constant 1 : index
    %c0_294 = arith.constant 0 : index
    %1178 = vector.load %arg34[%c0_292, %c1_293, %c0_294] : memref<2x8x64xf32, #tpu.memory_space<vmem>>, vector<2x1x32xf32>
    tpu.vector_store %arg34[%c0_292, %c1_293, %c0_294], %1177 {strides = array<i32>} : memref<2x8x64xf32, #tpu.memory_space<vmem>>, vector<2x1x32xf32>,
    %1179 = vector.extract_strided_slice %1111 {offsets = [0, 2, 0], sizes = [2, 1, 96], strides = [1, 1, 1]} : vector<2x8x96xf32> to vector<2x1x96xf32>
    %1180 = vector.shape_cast %1179 : vector<2x1x96xf32> to vector<2x96xf32>
    %cst_295 = arith.constant dense<0.000000e+00> : vector<2x96xf32>
    %1181 = tpu.matmul %1176, %1100, %cst_295 {dimension_numbers = #tpu.dot_dimension_numbers<[1], [0], [0], [1], [0, 0, 1, 1], [], []>} : vector<2x32xf32>, vector<32x96xf32>, vector<2x96xf32> -> vector<2x96xf32>
    %1182 = vector.broadcast %1102 : vector<1x96xf32> to vector<2x96xf32>
    %1183 = arith.addf %1181, %1182 : vector<2x96xf32>
    %1184 = vector.extract_strided_slice %1180 {offsets = [0, 0], sizes = [2, 32], strides = [1, 1]} : vector<2x96xf32> to vector<2x32xf32>
    %1185 = vector.extract_strided_slice %1183 {offsets = [0, 0], sizes = [2, 32], strides = [1, 1]} : vector<2x96xf32> to vector<2x32xf32>
    %1186 = arith.addf %1184, %1185 : vector<2x32xf32>
    %1187 = arith.negf %1186 : vector<2x32xf32>
    %1188 = math.exp %1187 : vector<2x32xf32>
    %cst_296 = arith.constant 1.000000e+00 : f32
    %1189 = vector.broadcast %cst_296 : f32 to vector<2x32xf32>
    %1190 = arith.addf %1189, %1188 : vector<2x32xf32>
    %1191 = arith.divf %1189, %1190 : vector<2x32xf32>
    %1192 = vector.extract_strided_slice %1180 {offsets = [0, 32], sizes = [2, 32], strides = [1, 1]} : vector<2x96xf32> to vector<2x32xf32>
    %1193 = vector.extract_strided_slice %1183 {offsets = [0, 32], sizes = [2, 32], strides = [1, 1]} : vector<2x96xf32> to vector<2x32xf32>
    %1194 = arith.addf %1192, %1193 : vector<2x32xf32>
    %1195 = arith.negf %1194 : vector<2x32xf32>
    %1196 = math.exp %1195 : vector<2x32xf32>
    %cst_297 = arith.constant 1.000000e+00 : f32
    %1197 = vector.broadcast %cst_297 : f32 to vector<2x32xf32>
    %1198 = arith.addf %1197, %1196 : vector<2x32xf32>
    %1199 = arith.divf %1197, %1198 : vector<2x32xf32>
    %1200 = vector.extract_strided_slice %1180 {offsets = [0, 64], sizes = [2, 32], strides = [1, 1]} : vector<2x96xf32> to vector<2x32xf32>
    %1201 = vector.extract_strided_slice %1183 {offsets = [0, 64], sizes = [2, 32], strides = [1, 1]} : vector<2x96xf32> to vector<2x32xf32>
    %1202 = arith.mulf %1191, %1201 : vector<2x32xf32>
    %1203 = arith.addf %1200, %1202 : vector<2x32xf32>
    %1204 = math.tanh %1203 : vector<2x32xf32>
    %cst_298 = arith.constant 1.000000e+00 : f32
    %1205 = vector.broadcast %cst_298 : f32 to vector<2x32xf32>
    %1206 = arith.subf %1205, %1199 : vector<2x32xf32>
    %1207 = arith.mulf %1206, %1204 : vector<2x32xf32>
    %1208 = arith.mulf %1199, %1176 : vector<2x32xf32>
    %1209 = arith.addf %1207, %1208 : vector<2x32xf32>
    %1210 = vector.shape_cast %1209 : vector<2x32xf32> to vector<2x1x32xf32>
    %c0_299 = arith.constant 0 : index
    %c2_300 = arith.constant 2 : index
    %c0_301 = arith.constant 0 : index
    %1211 = vector.load %arg34[%c0_299, %c2_300, %c0_301] : memref<2x8x64xf32, #tpu.memory_space<vmem>>, vector<2x1x32xf32>
    tpu.vector_store %arg34[%c0_299, %c2_300, %c0_301], %1210 {strides = array<i32>} : memref<2x8x64xf32, #tpu.memory_space<vmem>>, vector<2x1x32xf32>,
    %1212 = vector.extract_strided_slice %1111 {offsets = [0, 3, 0], sizes = [2, 1, 96], strides = [1, 1, 1]} : vector<2x8x96xf32> to vector<2x1x96xf32>
    %1213 = vector.shape_cast %1212 : vector<2x1x96xf32> to vector<2x96xf32>
    %cst_302 = arith.constant dense<0.000000e+00> : vector<2x96xf32>
    %1214 = tpu.matmul %1209, %1100, %cst_302 {dimension_numbers = #tpu.dot_dimension_numbers<[1], [0], [0], [1], [0, 0, 1, 1], [], []>} : vector<2x32xf32>, vector<32x96xf32>, vector<2x96xf32> -> vector<2x96xf32>
    %1215 = vector.broadcast %1102 : vector<1x96xf32> to vector<2x96xf32>
    %1216 = arith.addf %1214, %1215 : vector<2x96xf32>
    %1217 = vector.extract_strided_slice %1213 {offsets = [0, 0], sizes = [2, 32], strides = [1, 1]} : vector<2x96xf32> to vector<2x32xf32>
    %1218 = vector.extract_strided_slice %1216 {offsets = [0, 0], sizes = [2, 32], strides = [1, 1]} : vector<2x96xf32> to vector<2x32xf32>
    %1219 = arith.addf %1217, %1218 : vector<2x32xf32>
    %1220 = arith.negf %1219 : vector<2x32xf32>
    %1221 = math.exp %1220 : vector<2x32xf32>
    %cst_303 = arith.constant 1.000000e+00 : f32
    %1222 = vector.broadcast %cst_303 : f32 to vector<2x32xf32>
    %1223 = arith.addf %1222, %1221 : vector<2x32xf32>
    %1224 = arith.divf %1222, %1223 : vector<2x32xf32>
    %1225 = vector.extract_strided_slice %1213 {offsets = [0, 32], sizes = [2, 32], strides = [1, 1]} : vector<2x96xf32> to vector<2x32xf32>
    %1226 = vector.extract_strided_slice %1216 {offsets = [0, 32], sizes = [2, 32], strides = [1, 1]} : vector<2x96xf32> to vector<2x32xf32>
    %1227 = arith.addf %1225, %1226 : vector<2x32xf32>
    %1228 = arith.negf %1227 : vector<2x32xf32>
    %1229 = math.exp %1228 : vector<2x32xf32>
    %cst_304 = arith.constant 1.000000e+00 : f32
    %1230 = vector.broadcast %cst_304 : f32 to vector<2x32xf32>
    %1231 = arith.addf %1230, %1229 : vector<2x32xf32>
    %1232 = arith.divf %1230, %1231 : vector<2x32xf32>
    %1233 = vector.extract_strided_slice %1213 {offsets = [0, 64], sizes = [2, 32], strides = [1, 1]} : vector<2x96xf32> to vector<2x32xf32>
    %1234 = vector.extract_strided_slice %1216 {offsets = [0, 64], sizes = [2, 32], strides = [1, 1]} : vector<2x96xf32> to vector<2x32xf32>
    %1235 = arith.mulf %1224, %1234 : vector<2x32xf32>
    %1236 = arith.addf %1233, %1235 : vector<2x32xf32>
    %1237 = math.tanh %1236 : vector<2x32xf32>
    %cst_305 = arith.constant 1.000000e+00 : f32
    %1238 = vector.broadcast %cst_305 : f32 to vector<2x32xf32>
    %1239 = arith.subf %1238, %1232 : vector<2x32xf32>
    %1240 = arith.mulf %1239, %1237 : vector<2x32xf32>
    %1241 = arith.mulf %1232, %1209 : vector<2x32xf32>
    %1242 = arith.addf %1240, %1241 : vector<2x32xf32>
    %1243 = vector.shape_cast %1242 : vector<2x32xf32> to vector<2x1x32xf32>
    %c0_306 = arith.constant 0 : index
    %c3_307 = arith.constant 3 : index
    %c0_308 = arith.constant 0 : index
    %1244 = vector.load %arg34[%c0_306, %c3_307, %c0_308] : memref<2x8x64xf32, #tpu.memory_space<vmem>>, vector<2x1x32xf32>
    tpu.vector_store %arg34[%c0_306, %c3_307, %c0_308], %1243 {strides = array<i32>} : memref<2x8x64xf32, #tpu.memory_space<vmem>>, vector<2x1x32xf32>,
    %1245 = vector.extract_strided_slice %1111 {offsets = [0, 4, 0], sizes = [2, 1, 96], strides = [1, 1, 1]} : vector<2x8x96xf32> to vector<2x1x96xf32>
    %1246 = vector.shape_cast %1245 : vector<2x1x96xf32> to vector<2x96xf32>
    %cst_309 = arith.constant dense<0.000000e+00> : vector<2x96xf32>
    %1247 = tpu.matmul %1242, %1100, %cst_309 {dimension_numbers = #tpu.dot_dimension_numbers<[1], [0], [0], [1], [0, 0, 1, 1], [], []>} : vector<2x32xf32>, vector<32x96xf32>, vector<2x96xf32> -> vector<2x96xf32>
    %1248 = vector.broadcast %1102 : vector<1x96xf32> to vector<2x96xf32>
    %1249 = arith.addf %1247, %1248 : vector<2x96xf32>
    %1250 = vector.extract_strided_slice %1246 {offsets = [0, 0], sizes = [2, 32], strides = [1, 1]} : vector<2x96xf32> to vector<2x32xf32>
    %1251 = vector.extract_strided_slice %1249 {offsets = [0, 0], sizes = [2, 32], strides = [1, 1]} : vector<2x96xf32> to vector<2x32xf32>
    %1252 = arith.addf %1250, %1251 : vector<2x32xf32>
    %1253 = arith.negf %1252 : vector<2x32xf32>
    %1254 = math.exp %1253 : vector<2x32xf32>
    %cst_310 = arith.constant 1.000000e+00 : f32
    %1255 = vector.broadcast %cst_310 : f32 to vector<2x32xf32>
    %1256 = arith.addf %1255, %1254 : vector<2x32xf32>
    %1257 = arith.divf %1255, %1256 : vector<2x32xf32>
    %1258 = vector.extract_strided_slice %1246 {offsets = [0, 32], sizes = [2, 32], strides = [1, 1]} : vector<2x96xf32> to vector<2x32xf32>
    %1259 = vector.extract_strided_slice %1249 {offsets = [0, 32], sizes = [2, 32], strides = [1, 1]} : vector<2x96xf32> to vector<2x32xf32>
    %1260 = arith.addf %1258, %1259 : vector<2x32xf32>
    %1261 = arith.negf %1260 : vector<2x32xf32>
    %1262 = math.exp %1261 : vector<2x32xf32>
    %cst_311 = arith.constant 1.000000e+00 : f32
    %1263 = vector.broadcast %cst_311 : f32 to vector<2x32xf32>
    %1264 = arith.addf %1263, %1262 : vector<2x32xf32>
    %1265 = arith.divf %1263, %1264 : vector<2x32xf32>
    %1266 = vector.extract_strided_slice %1246 {offsets = [0, 64], sizes = [2, 32], strides = [1, 1]} : vector<2x96xf32> to vector<2x32xf32>
    %1267 = vector.extract_strided_slice %1249 {offsets = [0, 64], sizes = [2, 32], strides = [1, 1]} : vector<2x96xf32> to vector<2x32xf32>
    %1268 = arith.mulf %1257, %1267 : vector<2x32xf32>
    %1269 = arith.addf %1266, %1268 : vector<2x32xf32>
    %1270 = math.tanh %1269 : vector<2x32xf32>
    %cst_312 = arith.constant 1.000000e+00 : f32
    %1271 = vector.broadcast %cst_312 : f32 to vector<2x32xf32>
    %1272 = arith.subf %1271, %1265 : vector<2x32xf32>
    %1273 = arith.mulf %1272, %1270 : vector<2x32xf32>
    %1274 = arith.mulf %1265, %1242 : vector<2x32xf32>
    %1275 = arith.addf %1273, %1274 : vector<2x32xf32>
    %1276 = vector.shape_cast %1275 : vector<2x32xf32> to vector<2x1x32xf32>
    %c0_313 = arith.constant 0 : index
    %c4_314 = arith.constant 4 : index
    %c0_315 = arith.constant 0 : index
    %1277 = vector.load %arg34[%c0_313, %c4_314, %c0_315] : memref<2x8x64xf32, #tpu.memory_space<vmem>>, vector<2x1x32xf32>
    tpu.vector_store %arg34[%c0_313, %c4_314, %c0_315], %1276 {strides = array<i32>} : memref<2x8x64xf32, #tpu.memory_space<vmem>>, vector<2x1x32xf32>,
    %1278 = vector.extract_strided_slice %1111 {offsets = [0, 5, 0], sizes = [2, 1, 96], strides = [1, 1, 1]} : vector<2x8x96xf32> to vector<2x1x96xf32>
    %1279 = vector.shape_cast %1278 : vector<2x1x96xf32> to vector<2x96xf32>
    %cst_316 = arith.constant dense<0.000000e+00> : vector<2x96xf32>
    %1280 = tpu.matmul %1275, %1100, %cst_316 {dimension_numbers = #tpu.dot_dimension_numbers<[1], [0], [0], [1], [0, 0, 1, 1], [], []>} : vector<2x32xf32>, vector<32x96xf32>, vector<2x96xf32> -> vector<2x96xf32>
    %1281 = vector.broadcast %1102 : vector<1x96xf32> to vector<2x96xf32>
    %1282 = arith.addf %1280, %1281 : vector<2x96xf32>
    %1283 = vector.extract_strided_slice %1279 {offsets = [0, 0], sizes = [2, 32], strides = [1, 1]} : vector<2x96xf32> to vector<2x32xf32>
    %1284 = vector.extract_strided_slice %1282 {offsets = [0, 0], sizes = [2, 32], strides = [1, 1]} : vector<2x96xf32> to vector<2x32xf32>
    %1285 = arith.addf %1283, %1284 : vector<2x32xf32>
    %1286 = arith.negf %1285 : vector<2x32xf32>
    %1287 = math.exp %1286 : vector<2x32xf32>
    %cst_317 = arith.constant 1.000000e+00 : f32
    %1288 = vector.broadcast %cst_317 : f32 to vector<2x32xf32>
    %1289 = arith.addf %1288, %1287 : vector<2x32xf32>
    %1290 = arith.divf %1288, %1289 : vector<2x32xf32>
    %1291 = vector.extract_strided_slice %1279 {offsets = [0, 32], sizes = [2, 32], strides = [1, 1]} : vector<2x96xf32> to vector<2x32xf32>
    %1292 = vector.extract_strided_slice %1282 {offsets = [0, 32], sizes = [2, 32], strides = [1, 1]} : vector<2x96xf32> to vector<2x32xf32>
    %1293 = arith.addf %1291, %1292 : vector<2x32xf32>
    %1294 = arith.negf %1293 : vector<2x32xf32>
    %1295 = math.exp %1294 : vector<2x32xf32>
    %cst_318 = arith.constant 1.000000e+00 : f32
    %1296 = vector.broadcast %cst_318 : f32 to vector<2x32xf32>
    %1297 = arith.addf %1296, %1295 : vector<2x32xf32>
    %1298 = arith.divf %1296, %1297 : vector<2x32xf32>
    %1299 = vector.extract_strided_slice %1279 {offsets = [0, 64], sizes = [2, 32], strides = [1, 1]} : vector<2x96xf32> to vector<2x32xf32>
    %1300 = vector.extract_strided_slice %1282 {offsets = [0, 64], sizes = [2, 32], strides = [1, 1]} : vector<2x96xf32> to vector<2x32xf32>
    %1301 = arith.mulf %1290, %1300 : vector<2x32xf32>
    %1302 = arith.addf %1299, %1301 : vector<2x32xf32>
    %1303 = math.tanh %1302 : vector<2x32xf32>
    %cst_319 = arith.constant 1.000000e+00 : f32
    %1304 = vector.broadcast %cst_319 : f32 to vector<2x32xf32>
    %1305 = arith.subf %1304, %1298 : vector<2x32xf32>
    %1306 = arith.mulf %1305, %1303 : vector<2x32xf32>
    %1307 = arith.mulf %1298, %1275 : vector<2x32xf32>
    %1308 = arith.addf %1306, %1307 : vector<2x32xf32>
    %1309 = vector.shape_cast %1308 : vector<2x32xf32> to vector<2x1x32xf32>
    %c0_320 = arith.constant 0 : index
    %c5_321 = arith.constant 5 : index
    %c0_322 = arith.constant 0 : index
    %1310 = vector.load %arg34[%c0_320, %c5_321, %c0_322] : memref<2x8x64xf32, #tpu.memory_space<vmem>>, vector<2x1x32xf32>
    tpu.vector_store %arg34[%c0_320, %c5_321, %c0_322], %1309 {strides = array<i32>} : memref<2x8x64xf32, #tpu.memory_space<vmem>>, vector<2x1x32xf32>,
    %1311 = vector.extract_strided_slice %1111 {offsets = [0, 6, 0], sizes = [2, 1, 96], strides = [1, 1, 1]} : vector<2x8x96xf32> to vector<2x1x96xf32>
    %1312 = vector.shape_cast %1311 : vector<2x1x96xf32> to vector<2x96xf32>
    %cst_323 = arith.constant dense<0.000000e+00> : vector<2x96xf32>
    %1313 = tpu.matmul %1308, %1100, %cst_323 {dimension_numbers = #tpu.dot_dimension_numbers<[1], [0], [0], [1], [0, 0, 1, 1], [], []>} : vector<2x32xf32>, vector<32x96xf32>, vector<2x96xf32> -> vector<2x96xf32>
    %1314 = vector.broadcast %1102 : vector<1x96xf32> to vector<2x96xf32>
    %1315 = arith.addf %1313, %1314 : vector<2x96xf32>
    %1316 = vector.extract_strided_slice %1312 {offsets = [0, 0], sizes = [2, 32], strides = [1, 1]} : vector<2x96xf32> to vector<2x32xf32>
    %1317 = vector.extract_strided_slice %1315 {offsets = [0, 0], sizes = [2, 32], strides = [1, 1]} : vector<2x96xf32> to vector<2x32xf32>
    %1318 = arith.addf %1316, %1317 : vector<2x32xf32>
    %1319 = arith.negf %1318 : vector<2x32xf32>
    %1320 = math.exp %1319 : vector<2x32xf32>
    %cst_324 = arith.constant 1.000000e+00 : f32
    %1321 = vector.broadcast %cst_324 : f32 to vector<2x32xf32>
    %1322 = arith.addf %1321, %1320 : vector<2x32xf32>
    %1323 = arith.divf %1321, %1322 : vector<2x32xf32>
    %1324 = vector.extract_strided_slice %1312 {offsets = [0, 32], sizes = [2, 32], strides = [1, 1]} : vector<2x96xf32> to vector<2x32xf32>
    %1325 = vector.extract_strided_slice %1315 {offsets = [0, 32], sizes = [2, 32], strides = [1, 1]} : vector<2x96xf32> to vector<2x32xf32>
    %1326 = arith.addf %1324, %1325 : vector<2x32xf32>
    %1327 = arith.negf %1326 : vector<2x32xf32>
    %1328 = math.exp %1327 : vector<2x32xf32>
    %cst_325 = arith.constant 1.000000e+00 : f32
    %1329 = vector.broadcast %cst_325 : f32 to vector<2x32xf32>
    %1330 = arith.addf %1329, %1328 : vector<2x32xf32>
    %1331 = arith.divf %1329, %1330 : vector<2x32xf32>
    %1332 = vector.extract_strided_slice %1312 {offsets = [0, 64], sizes = [2, 32], strides = [1, 1]} : vector<2x96xf32> to vector<2x32xf32>
    %1333 = vector.extract_strided_slice %1315 {offsets = [0, 64], sizes = [2, 32], strides = [1, 1]} : vector<2x96xf32> to vector<2x32xf32>
    %1334 = arith.mulf %1323, %1333 : vector<2x32xf32>
    %1335 = arith.addf %1332, %1334 : vector<2x32xf32>
    %1336 = math.tanh %1335 : vector<2x32xf32>
    %cst_326 = arith.constant 1.000000e+00 : f32
    %1337 = vector.broadcast %cst_326 : f32 to vector<2x32xf32>
    %1338 = arith.subf %1337, %1331 : vector<2x32xf32>
    %1339 = arith.mulf %1338, %1336 : vector<2x32xf32>
    %1340 = arith.mulf %1331, %1308 : vector<2x32xf32>
    %1341 = arith.addf %1339, %1340 : vector<2x32xf32>
    %1342 = vector.shape_cast %1341 : vector<2x32xf32> to vector<2x1x32xf32>
    %c0_327 = arith.constant 0 : index
    %c6_328 = arith.constant 6 : index
    %c0_329 = arith.constant 0 : index
    %1343 = vector.load %arg34[%c0_327, %c6_328, %c0_329] : memref<2x8x64xf32, #tpu.memory_space<vmem>>, vector<2x1x32xf32>
    tpu.vector_store %arg34[%c0_327, %c6_328, %c0_329], %1342 {strides = array<i32>} : memref<2x8x64xf32, #tpu.memory_space<vmem>>, vector<2x1x32xf32>,
    %1344 = vector.extract_strided_slice %1111 {offsets = [0, 7, 0], sizes = [2, 1, 96], strides = [1, 1, 1]} : vector<2x8x96xf32> to vector<2x1x96xf32>
    %1345 = vector.shape_cast %1344 : vector<2x1x96xf32> to vector<2x96xf32>
    %cst_330 = arith.constant dense<0.000000e+00> : vector<2x96xf32>
    %1346 = tpu.matmul %1341, %1100, %cst_330 {dimension_numbers = #tpu.dot_dimension_numbers<[1], [0], [0], [1], [0, 0, 1, 1], [], []>} : vector<2x32xf32>, vector<32x96xf32>, vector<2x96xf32> -> vector<2x96xf32>
    %1347 = vector.broadcast %1102 : vector<1x96xf32> to vector<2x96xf32>
    %1348 = arith.addf %1346, %1347 : vector<2x96xf32>
    %1349 = vector.extract_strided_slice %1345 {offsets = [0, 0], sizes = [2, 32], strides = [1, 1]} : vector<2x96xf32> to vector<2x32xf32>
    %1350 = vector.extract_strided_slice %1348 {offsets = [0, 0], sizes = [2, 32], strides = [1, 1]} : vector<2x96xf32> to vector<2x32xf32>
    %1351 = arith.addf %1349, %1350 : vector<2x32xf32>
    %1352 = arith.negf %1351 : vector<2x32xf32>
    %1353 = math.exp %1352 : vector<2x32xf32>
    %cst_331 = arith.constant 1.000000e+00 : f32
    %1354 = vector.broadcast %cst_331 : f32 to vector<2x32xf32>
    %1355 = arith.addf %1354, %1353 : vector<2x32xf32>
    %1356 = arith.divf %1354, %1355 : vector<2x32xf32>
    %1357 = vector.extract_strided_slice %1345 {offsets = [0, 32], sizes = [2, 32], strides = [1, 1]} : vector<2x96xf32> to vector<2x32xf32>
    %1358 = vector.extract_strided_slice %1348 {offsets = [0, 32], sizes = [2, 32], strides = [1, 1]} : vector<2x96xf32> to vector<2x32xf32>
    %1359 = arith.addf %1357, %1358 : vector<2x32xf32>
    %1360 = arith.negf %1359 : vector<2x32xf32>
    %1361 = math.exp %1360 : vector<2x32xf32>
    %cst_332 = arith.constant 1.000000e+00 : f32
    %1362 = vector.broadcast %cst_332 : f32 to vector<2x32xf32>
    %1363 = arith.addf %1362, %1361 : vector<2x32xf32>
    %1364 = arith.divf %1362, %1363 : vector<2x32xf32>
    %1365 = vector.extract_strided_slice %1345 {offsets = [0, 64], sizes = [2, 32], strides = [1, 1]} : vector<2x96xf32> to vector<2x32xf32>
    %1366 = vector.extract_strided_slice %1348 {offsets = [0, 64], sizes = [2, 32], strides = [1, 1]} : vector<2x96xf32> to vector<2x32xf32>
    %1367 = arith.mulf %1356, %1366 : vector<2x32xf32>
    %1368 = arith.addf %1365, %1367 : vector<2x32xf32>
    %1369 = math.tanh %1368 : vector<2x32xf32>
    %cst_333 = arith.constant 1.000000e+00 : f32
    %1370 = vector.broadcast %cst_333 : f32 to vector<2x32xf32>
    %1371 = arith.subf %1370, %1364 : vector<2x32xf32>
    %1372 = arith.mulf %1371, %1369 : vector<2x32xf32>
    %1373 = arith.mulf %1364, %1341 : vector<2x32xf32>
    %1374 = arith.addf %1372, %1373 : vector<2x32xf32>
    %1375 = vector.shape_cast %1374 : vector<2x32xf32> to vector<2x1x32xf32>
    %c0_334 = arith.constant 0 : index
    %c7_335 = arith.constant 7 : index
    %c0_336 = arith.constant 0 : index
    %1376 = vector.load %arg34[%c0_334, %c7_335, %c0_336] : memref<2x8x64xf32, #tpu.memory_space<vmem>>, vector<2x1x32xf32>
    tpu.vector_store %arg34[%c0_334, %c7_335, %c0_336], %1375 {strides = array<i32>} : memref<2x8x64xf32, #tpu.memory_space<vmem>>, vector<2x1x32xf32>,
    %1377 = vector.shape_cast %1098 : vector<2x8x64xf32> to vector<16x64xf32>
    %cst_337 = arith.constant dense<0.000000e+00> : vector<16x96xf32>
    %1378 = tpu.matmul %1377, %1103, %cst_337 {dimension_numbers = #tpu.dot_dimension_numbers<[1], [0], [0], [1], [0, 0, 1, 1], [], []>} : vector<16x64xf32>, vector<64x96xf32>, vector<16x96xf32> -> vector<16x96xf32>
    %1379 = vector.broadcast %1105 : vector<1x96xf32> to vector<16x96xf32>
    %1380 = arith.addf %1378, %1379 : vector<16x96xf32>
    %1381 = vector.shape_cast %1380 : vector<16x96xf32> to vector<2x8x96xf32>
    %cst_338 = arith.constant 0.000000e+00 : f32
    %1382 = vector.broadcast %cst_338 : f32 to vector<2x32xf32>
    %1383 = vector.extract_strided_slice %1381 {offsets = [0, 7, 0], sizes = [2, 1, 96], strides = [1, 1, 1]} : vector<2x8x96xf32> to vector<2x1x96xf32>
    %1384 = vector.shape_cast %1383 : vector<2x1x96xf32> to vector<2x96xf32>
    %cst_339 = arith.constant dense<0.000000e+00> : vector<2x96xf32>
    %1385 = tpu.matmul %1382, %1104, %cst_339 {dimension_numbers = #tpu.dot_dimension_numbers<[1], [0], [0], [1], [0, 0, 1, 1], [], []>} : vector<2x32xf32>, vector<32x96xf32>, vector<2x96xf32> -> vector<2x96xf32>
    %1386 = vector.broadcast %1106 : vector<1x96xf32> to vector<2x96xf32>
    %1387 = arith.addf %1385, %1386 : vector<2x96xf32>
    %1388 = vector.extract_strided_slice %1384 {offsets = [0, 0], sizes = [2, 32], strides = [1, 1]} : vector<2x96xf32> to vector<2x32xf32>
    %1389 = vector.extract_strided_slice %1387 {offsets = [0, 0], sizes = [2, 32], strides = [1, 1]} : vector<2x96xf32> to vector<2x32xf32>
    %1390 = arith.addf %1388, %1389 : vector<2x32xf32>
    %1391 = arith.negf %1390 : vector<2x32xf32>
    %1392 = math.exp %1391 : vector<2x32xf32>
    %cst_340 = arith.constant 1.000000e+00 : f32
    %1393 = vector.broadcast %cst_340 : f32 to vector<2x32xf32>
    %1394 = arith.addf %1393, %1392 : vector<2x32xf32>
    %1395 = arith.divf %1393, %1394 : vector<2x32xf32>
    %1396 = vector.extract_strided_slice %1384 {offsets = [0, 32], sizes = [2, 32], strides = [1, 1]} : vector<2x96xf32> to vector<2x32xf32>
    %1397 = vector.extract_strided_slice %1387 {offsets = [0, 32], sizes = [2, 32], strides = [1, 1]} : vector<2x96xf32> to vector<2x32xf32>
    %1398 = arith.addf %1396, %1397 : vector<2x32xf32>
    %1399 = arith.negf %1398 : vector<2x32xf32>
    %1400 = math.exp %1399 : vector<2x32xf32>
    %cst_341 = arith.constant 1.000000e+00 : f32
    %1401 = vector.broadcast %cst_341 : f32 to vector<2x32xf32>
    %1402 = arith.addf %1401, %1400 : vector<2x32xf32>
    %1403 = arith.divf %1401, %1402 : vector<2x32xf32>
    %1404 = vector.extract_strided_slice %1384 {offsets = [0, 64], sizes = [2, 32], strides = [1, 1]} : vector<2x96xf32> to vector<2x32xf32>
    %1405 = vector.extract_strided_slice %1387 {offsets = [0, 64], sizes = [2, 32], strides = [1, 1]} : vector<2x96xf32> to vector<2x32xf32>
    %1406 = arith.mulf %1395, %1405 : vector<2x32xf32>
    %1407 = arith.addf %1404, %1406 : vector<2x32xf32>
    %1408 = math.tanh %1407 : vector<2x32xf32>
    %cst_342 = arith.constant 1.000000e+00 : f32
    %1409 = vector.broadcast %cst_342 : f32 to vector<2x32xf32>
    %1410 = arith.subf %1409, %1403 : vector<2x32xf32>
    %1411 = arith.mulf %1410, %1408 : vector<2x32xf32>
    %1412 = arith.mulf %1403, %1382 : vector<2x32xf32>
    %1413 = arith.addf %1411, %1412 : vector<2x32xf32>
    %1414 = vector.shape_cast %1413 : vector<2x32xf32> to vector<2x1x32xf32>
    %c0_343 = arith.constant 0 : index
    %c7_344 = arith.constant 7 : index
    %c32_345 = arith.constant 32 : index
    %1415 = vector.load %arg34[%c0_343, %c7_344, %c32_345] : memref<2x8x64xf32, #tpu.memory_space<vmem>>, vector<2x1x32xf32>
    tpu.vector_store %arg34[%c0_343, %c7_344, %c32_345], %1414 {strides = array<i32>} : memref<2x8x64xf32, #tpu.memory_space<vmem>>, vector<2x1x32xf32>,
    %1416 = vector.extract_strided_slice %1381 {offsets = [0, 6, 0], sizes = [2, 1, 96], strides = [1, 1, 1]} : vector<2x8x96xf32> to vector<2x1x96xf32>
    %1417 = vector.shape_cast %1416 : vector<2x1x96xf32> to vector<2x96xf32>
    %cst_346 = arith.constant dense<0.000000e+00> : vector<2x96xf32>
    %1418 = tpu.matmul %1413, %1104, %cst_346 {dimension_numbers = #tpu.dot_dimension_numbers<[1], [0], [0], [1], [0, 0, 1, 1], [], []>} : vector<2x32xf32>, vector<32x96xf32>, vector<2x96xf32> -> vector<2x96xf32>
    %1419 = vector.broadcast %1106 : vector<1x96xf32> to vector<2x96xf32>
    %1420 = arith.addf %1418, %1419 : vector<2x96xf32>
    %1421 = vector.extract_strided_slice %1417 {offsets = [0, 0], sizes = [2, 32], strides = [1, 1]} : vector<2x96xf32> to vector<2x32xf32>
    %1422 = vector.extract_strided_slice %1420 {offsets = [0, 0], sizes = [2, 32], strides = [1, 1]} : vector<2x96xf32> to vector<2x32xf32>
    %1423 = arith.addf %1421, %1422 : vector<2x32xf32>
    %1424 = arith.negf %1423 : vector<2x32xf32>
    %1425 = math.exp %1424 : vector<2x32xf32>
    %cst_347 = arith.constant 1.000000e+00 : f32
    %1426 = vector.broadcast %cst_347 : f32 to vector<2x32xf32>
    %1427 = arith.addf %1426, %1425 : vector<2x32xf32>
    %1428 = arith.divf %1426, %1427 : vector<2x32xf32>
    %1429 = vector.extract_strided_slice %1417 {offsets = [0, 32], sizes = [2, 32], strides = [1, 1]} : vector<2x96xf32> to vector<2x32xf32>
    %1430 = vector.extract_strided_slice %1420 {offsets = [0, 32], sizes = [2, 32], strides = [1, 1]} : vector<2x96xf32> to vector<2x32xf32>
    %1431 = arith.addf %1429, %1430 : vector<2x32xf32>
    %1432 = arith.negf %1431 : vector<2x32xf32>
    %1433 = math.exp %1432 : vector<2x32xf32>
    %cst_348 = arith.constant 1.000000e+00 : f32
    %1434 = vector.broadcast %cst_348 : f32 to vector<2x32xf32>
    %1435 = arith.addf %1434, %1433 : vector<2x32xf32>
    %1436 = arith.divf %1434, %1435 : vector<2x32xf32>
    %1437 = vector.extract_strided_slice %1417 {offsets = [0, 64], sizes = [2, 32], strides = [1, 1]} : vector<2x96xf32> to vector<2x32xf32>
    %1438 = vector.extract_strided_slice %1420 {offsets = [0, 64], sizes = [2, 32], strides = [1, 1]} : vector<2x96xf32> to vector<2x32xf32>
    %1439 = arith.mulf %1428, %1438 : vector<2x32xf32>
    %1440 = arith.addf %1437, %1439 : vector<2x32xf32>
    %1441 = math.tanh %1440 : vector<2x32xf32>
    %cst_349 = arith.constant 1.000000e+00 : f32
    %1442 = vector.broadcast %cst_349 : f32 to vector<2x32xf32>
    %1443 = arith.subf %1442, %1436 : vector<2x32xf32>
    %1444 = arith.mulf %1443, %1441 : vector<2x32xf32>
    %1445 = arith.mulf %1436, %1413 : vector<2x32xf32>
    %1446 = arith.addf %1444, %1445 : vector<2x32xf32>
    %1447 = vector.shape_cast %1446 : vector<2x32xf32> to vector<2x1x32xf32>
    %c0_350 = arith.constant 0 : index
    %c6_351 = arith.constant 6 : index
    %c32_352 = arith.constant 32 : index
    %1448 = vector.load %arg34[%c0_350, %c6_351, %c32_352] : memref<2x8x64xf32, #tpu.memory_space<vmem>>, vector<2x1x32xf32>
    tpu.vector_store %arg34[%c0_350, %c6_351, %c32_352], %1447 {strides = array<i32>} : memref<2x8x64xf32, #tpu.memory_space<vmem>>, vector<2x1x32xf32>,
    %1449 = vector.extract_strided_slice %1381 {offsets = [0, 5, 0], sizes = [2, 1, 96], strides = [1, 1, 1]} : vector<2x8x96xf32> to vector<2x1x96xf32>
    %1450 = vector.shape_cast %1449 : vector<2x1x96xf32> to vector<2x96xf32>
    %cst_353 = arith.constant dense<0.000000e+00> : vector<2x96xf32>
    %1451 = tpu.matmul %1446, %1104, %cst_353 {dimension_numbers = #tpu.dot_dimension_numbers<[1], [0], [0], [1], [0, 0, 1, 1], [], []>} : vector<2x32xf32>, vector<32x96xf32>, vector<2x96xf32> -> vector<2x96xf32>
    %1452 = vector.broadcast %1106 : vector<1x96xf32> to vector<2x96xf32>
    %1453 = arith.addf %1451, %1452 : vector<2x96xf32>
    %1454 = vector.extract_strided_slice %1450 {offsets = [0, 0], sizes = [2, 32], strides = [1, 1]} : vector<2x96xf32> to vector<2x32xf32>
    %1455 = vector.extract_strided_slice %1453 {offsets = [0, 0], sizes = [2, 32], strides = [1, 1]} : vector<2x96xf32> to vector<2x32xf32>
    %1456 = arith.addf %1454, %1455 : vector<2x32xf32>
    %1457 = arith.negf %1456 : vector<2x32xf32>
    %1458 = math.exp %1457 : vector<2x32xf32>
    %cst_354 = arith.constant 1.000000e+00 : f32
    %1459 = vector.broadcast %cst_354 : f32 to vector<2x32xf32>
    %1460 = arith.addf %1459, %1458 : vector<2x32xf32>
    %1461 = arith.divf %1459, %1460 : vector<2x32xf32>
    %1462 = vector.extract_strided_slice %1450 {offsets = [0, 32], sizes = [2, 32], strides = [1, 1]} : vector<2x96xf32> to vector<2x32xf32>
    %1463 = vector.extract_strided_slice %1453 {offsets = [0, 32], sizes = [2, 32], strides = [1, 1]} : vector<2x96xf32> to vector<2x32xf32>
    %1464 = arith.addf %1462, %1463 : vector<2x32xf32>
    %1465 = arith.negf %1464 : vector<2x32xf32>
    %1466 = math.exp %1465 : vector<2x32xf32>
    %cst_355 = arith.constant 1.000000e+00 : f32
    %1467 = vector.broadcast %cst_355 : f32 to vector<2x32xf32>
    %1468 = arith.addf %1467, %1466 : vector<2x32xf32>
    %1469 = arith.divf %1467, %1468 : vector<2x32xf32>
    %1470 = vector.extract_strided_slice %1450 {offsets = [0, 64], sizes = [2, 32], strides = [1, 1]} : vector<2x96xf32> to vector<2x32xf32>
    %1471 = vector.extract_strided_slice %1453 {offsets = [0, 64], sizes = [2, 32], strides = [1, 1]} : vector<2x96xf32> to vector<2x32xf32>
    %1472 = arith.mulf %1461, %1471 : vector<2x32xf32>
    %1473 = arith.addf %1470, %1472 : vector<2x32xf32>
    %1474 = math.tanh %1473 : vector<2x32xf32>
    %cst_356 = arith.constant 1.000000e+00 : f32
    %1475 = vector.broadcast %cst_356 : f32 to vector<2x32xf32>
    %1476 = arith.subf %1475, %1469 : vector<2x32xf32>
    %1477 = arith.mulf %1476, %1474 : vector<2x32xf32>
    %1478 = arith.mulf %1469, %1446 : vector<2x32xf32>
    %1479 = arith.addf %1477, %1478 : vector<2x32xf32>
    %1480 = vector.shape_cast %1479 : vector<2x32xf32> to vector<2x1x32xf32>
    %c0_357 = arith.constant 0 : index
    %c5_358 = arith.constant 5 : index
    %c32_359 = arith.constant 32 : index
    %1481 = vector.load %arg34[%c0_357, %c5_358, %c32_359] : memref<2x8x64xf32, #tpu.memory_space<vmem>>, vector<2x1x32xf32>
    tpu.vector_store %arg34[%c0_357, %c5_358, %c32_359], %1480 {strides = array<i32>} : memref<2x8x64xf32, #tpu.memory_space<vmem>>, vector<2x1x32xf32>,
    %1482 = vector.extract_strided_slice %1381 {offsets = [0, 4, 0], sizes = [2, 1, 96], strides = [1, 1, 1]} : vector<2x8x96xf32> to vector<2x1x96xf32>
    %1483 = vector.shape_cast %1482 : vector<2x1x96xf32> to vector<2x96xf32>
    %cst_360 = arith.constant dense<0.000000e+00> : vector<2x96xf32>
    %1484 = tpu.matmul %1479, %1104, %cst_360 {dimension_numbers = #tpu.dot_dimension_numbers<[1], [0], [0], [1], [0, 0, 1, 1], [], []>} : vector<2x32xf32>, vector<32x96xf32>, vector<2x96xf32> -> vector<2x96xf32>
    %1485 = vector.broadcast %1106 : vector<1x96xf32> to vector<2x96xf32>
    %1486 = arith.addf %1484, %1485 : vector<2x96xf32>
    %1487 = vector.extract_strided_slice %1483 {offsets = [0, 0], sizes = [2, 32], strides = [1, 1]} : vector<2x96xf32> to vector<2x32xf32>
    %1488 = vector.extract_strided_slice %1486 {offsets = [0, 0], sizes = [2, 32], strides = [1, 1]} : vector<2x96xf32> to vector<2x32xf32>
    %1489 = arith.addf %1487, %1488 : vector<2x32xf32>
    %1490 = arith.negf %1489 : vector<2x32xf32>
    %1491 = math.exp %1490 : vector<2x32xf32>
    %cst_361 = arith.constant 1.000000e+00 : f32
    %1492 = vector.broadcast %cst_361 : f32 to vector<2x32xf32>
    %1493 = arith.addf %1492, %1491 : vector<2x32xf32>
    %1494 = arith.divf %1492, %1493 : vector<2x32xf32>
    %1495 = vector.extract_strided_slice %1483 {offsets = [0, 32], sizes = [2, 32], strides = [1, 1]} : vector<2x96xf32> to vector<2x32xf32>
    %1496 = vector.extract_strided_slice %1486 {offsets = [0, 32], sizes = [2, 32], strides = [1, 1]} : vector<2x96xf32> to vector<2x32xf32>
    %1497 = arith.addf %1495, %1496 : vector<2x32xf32>
    %1498 = arith.negf %1497 : vector<2x32xf32>
    %1499 = math.exp %1498 : vector<2x32xf32>
    %cst_362 = arith.constant 1.000000e+00 : f32
    %1500 = vector.broadcast %cst_362 : f32 to vector<2x32xf32>
    %1501 = arith.addf %1500, %1499 : vector<2x32xf32>
    %1502 = arith.divf %1500, %1501 : vector<2x32xf32>
    %1503 = vector.extract_strided_slice %1483 {offsets = [0, 64], sizes = [2, 32], strides = [1, 1]} : vector<2x96xf32> to vector<2x32xf32>
    %1504 = vector.extract_strided_slice %1486 {offsets = [0, 64], sizes = [2, 32], strides = [1, 1]} : vector<2x96xf32> to vector<2x32xf32>
    %1505 = arith.mulf %1494, %1504 : vector<2x32xf32>
    %1506 = arith.addf %1503, %1505 : vector<2x32xf32>
    %1507 = math.tanh %1506 : vector<2x32xf32>
    %cst_363 = arith.constant 1.000000e+00 : f32
    %1508 = vector.broadcast %cst_363 : f32 to vector<2x32xf32>
    %1509 = arith.subf %1508, %1502 : vector<2x32xf32>
    %1510 = arith.mulf %1509, %1507 : vector<2x32xf32>
    %1511 = arith.mulf %1502, %1479 : vector<2x32xf32>
    %1512 = arith.addf %1510, %1511 : vector<2x32xf32>
    %1513 = vector.shape_cast %1512 : vector<2x32xf32> to vector<2x1x32xf32>
    %c0_364 = arith.constant 0 : index
    %c4_365 = arith.constant 4 : index
    %c32_366 = arith.constant 32 : index
    %1514 = vector.load %arg34[%c0_364, %c4_365, %c32_366] : memref<2x8x64xf32, #tpu.memory_space<vmem>>, vector<2x1x32xf32>
    tpu.vector_store %arg34[%c0_364, %c4_365, %c32_366], %1513 {strides = array<i32>} : memref<2x8x64xf32, #tpu.memory_space<vmem>>, vector<2x1x32xf32>,
    %1515 = vector.extract_strided_slice %1381 {offsets = [0, 3, 0], sizes = [2, 1, 96], strides = [1, 1, 1]} : vector<2x8x96xf32> to vector<2x1x96xf32>
    %1516 = vector.shape_cast %1515 : vector<2x1x96xf32> to vector<2x96xf32>
    %cst_367 = arith.constant dense<0.000000e+00> : vector<2x96xf32>
    %1517 = tpu.matmul %1512, %1104, %cst_367 {dimension_numbers = #tpu.dot_dimension_numbers<[1], [0], [0], [1], [0, 0, 1, 1], [], []>} : vector<2x32xf32>, vector<32x96xf32>, vector<2x96xf32> -> vector<2x96xf32>
    %1518 = vector.broadcast %1106 : vector<1x96xf32> to vector<2x96xf32>
    %1519 = arith.addf %1517, %1518 : vector<2x96xf32>
    %1520 = vector.extract_strided_slice %1516 {offsets = [0, 0], sizes = [2, 32], strides = [1, 1]} : vector<2x96xf32> to vector<2x32xf32>
    %1521 = vector.extract_strided_slice %1519 {offsets = [0, 0], sizes = [2, 32], strides = [1, 1]} : vector<2x96xf32> to vector<2x32xf32>
    %1522 = arith.addf %1520, %1521 : vector<2x32xf32>
    %1523 = arith.negf %1522 : vector<2x32xf32>
    %1524 = math.exp %1523 : vector<2x32xf32>
    %cst_368 = arith.constant 1.000000e+00 : f32
    %1525 = vector.broadcast %cst_368 : f32 to vector<2x32xf32>
    %1526 = arith.addf %1525, %1524 : vector<2x32xf32>
    %1527 = arith.divf %1525, %1526 : vector<2x32xf32>
    %1528 = vector.extract_strided_slice %1516 {offsets = [0, 32], sizes = [2, 32], strides = [1, 1]} : vector<2x96xf32> to vector<2x32xf32>
    %1529 = vector.extract_strided_slice %1519 {offsets = [0, 32], sizes = [2, 32], strides = [1, 1]} : vector<2x96xf32> to vector<2x32xf32>
    %1530 = arith.addf %1528, %1529 : vector<2x32xf32>
    %1531 = arith.negf %1530 : vector<2x32xf32>
    %1532 = math.exp %1531 : vector<2x32xf32>
    %cst_369 = arith.constant 1.000000e+00 : f32
    %1533 = vector.broadcast %cst_369 : f32 to vector<2x32xf32>
    %1534 = arith.addf %1533, %1532 : vector<2x32xf32>
    %1535 = arith.divf %1533, %1534 : vector<2x32xf32>
    %1536 = vector.extract_strided_slice %1516 {offsets = [0, 64], sizes = [2, 32], strides = [1, 1]} : vector<2x96xf32> to vector<2x32xf32>
    %1537 = vector.extract_strided_slice %1519 {offsets = [0, 64], sizes = [2, 32], strides = [1, 1]} : vector<2x96xf32> to vector<2x32xf32>
    %1538 = arith.mulf %1527, %1537 : vector<2x32xf32>
    %1539 = arith.addf %1536, %1538 : vector<2x32xf32>
    %1540 = math.tanh %1539 : vector<2x32xf32>
    %cst_370 = arith.constant 1.000000e+00 : f32
    %1541 = vector.broadcast %cst_370 : f32 to vector<2x32xf32>
    %1542 = arith.subf %1541, %1535 : vector<2x32xf32>
    %1543 = arith.mulf %1542, %1540 : vector<2x32xf32>
    %1544 = arith.mulf %1535, %1512 : vector<2x32xf32>
    %1545 = arith.addf %1543, %1544 : vector<2x32xf32>
    %1546 = vector.shape_cast %1545 : vector<2x32xf32> to vector<2x1x32xf32>
    %c0_371 = arith.constant 0 : index
    %c3_372 = arith.constant 3 : index
    %c32_373 = arith.constant 32 : index
    %1547 = vector.load %arg34[%c0_371, %c3_372, %c32_373] : memref<2x8x64xf32, #tpu.memory_space<vmem>>, vector<2x1x32xf32>
    tpu.vector_store %arg34[%c0_371, %c3_372, %c32_373], %1546 {strides = array<i32>} : memref<2x8x64xf32, #tpu.memory_space<vmem>>, vector<2x1x32xf32>,
    %1548 = vector.extract_strided_slice %1381 {offsets = [0, 2, 0], sizes = [2, 1, 96], strides = [1, 1, 1]} : vector<2x8x96xf32> to vector<2x1x96xf32>
    %1549 = vector.shape_cast %1548 : vector<2x1x96xf32> to vector<2x96xf32>
    %cst_374 = arith.constant dense<0.000000e+00> : vector<2x96xf32>
    %1550 = tpu.matmul %1545, %1104, %cst_374 {dimension_numbers = #tpu.dot_dimension_numbers<[1], [0], [0], [1], [0, 0, 1, 1], [], []>} : vector<2x32xf32>, vector<32x96xf32>, vector<2x96xf32> -> vector<2x96xf32>
    %1551 = vector.broadcast %1106 : vector<1x96xf32> to vector<2x96xf32>
    %1552 = arith.addf %1550, %1551 : vector<2x96xf32>
    %1553 = vector.extract_strided_slice %1549 {offsets = [0, 0], sizes = [2, 32], strides = [1, 1]} : vector<2x96xf32> to vector<2x32xf32>
    %1554 = vector.extract_strided_slice %1552 {offsets = [0, 0], sizes = [2, 32], strides = [1, 1]} : vector<2x96xf32> to vector<2x32xf32>
    %1555 = arith.addf %1553, %1554 : vector<2x32xf32>
    %1556 = arith.negf %1555 : vector<2x32xf32>
    %1557 = math.exp %1556 : vector<2x32xf32>
    %cst_375 = arith.constant 1.000000e+00 : f32
    %1558 = vector.broadcast %cst_375 : f32 to vector<2x32xf32>
    %1559 = arith.addf %1558, %1557 : vector<2x32xf32>
    %1560 = arith.divf %1558, %1559 : vector<2x32xf32>
    %1561 = vector.extract_strided_slice %1549 {offsets = [0, 32], sizes = [2, 32], strides = [1, 1]} : vector<2x96xf32> to vector<2x32xf32>
    %1562 = vector.extract_strided_slice %1552 {offsets = [0, 32], sizes = [2, 32], strides = [1, 1]} : vector<2x96xf32> to vector<2x32xf32>
    %1563 = arith.addf %1561, %1562 : vector<2x32xf32>
    %1564 = arith.negf %1563 : vector<2x32xf32>
    %1565 = math.exp %1564 : vector<2x32xf32>
    %cst_376 = arith.constant 1.000000e+00 : f32
    %1566 = vector.broadcast %cst_376 : f32 to vector<2x32xf32>
    %1567 = arith.addf %1566, %1565 : vector<2x32xf32>
    %1568 = arith.divf %1566, %1567 : vector<2x32xf32>
    %1569 = vector.extract_strided_slice %1549 {offsets = [0, 64], sizes = [2, 32], strides = [1, 1]} : vector<2x96xf32> to vector<2x32xf32>
    %1570 = vector.extract_strided_slice %1552 {offsets = [0, 64], sizes = [2, 32], strides = [1, 1]} : vector<2x96xf32> to vector<2x32xf32>
    %1571 = arith.mulf %1560, %1570 : vector<2x32xf32>
    %1572 = arith.addf %1569, %1571 : vector<2x32xf32>
    %1573 = math.tanh %1572 : vector<2x32xf32>
    %cst_377 = arith.constant 1.000000e+00 : f32
    %1574 = vector.broadcast %cst_377 : f32 to vector<2x32xf32>
    %1575 = arith.subf %1574, %1568 : vector<2x32xf32>
    %1576 = arith.mulf %1575, %1573 : vector<2x32xf32>
    %1577 = arith.mulf %1568, %1545 : vector<2x32xf32>
    %1578 = arith.addf %1576, %1577 : vector<2x32xf32>
    %1579 = vector.shape_cast %1578 : vector<2x32xf32> to vector<2x1x32xf32>
    %c0_378 = arith.constant 0 : index
    %c2_379 = arith.constant 2 : index
    %c32_380 = arith.constant 32 : index
    %1580 = vector.load %arg34[%c0_378, %c2_379, %c32_380] : memref<2x8x64xf32, #tpu.memory_space<vmem>>, vector<2x1x32xf32>
    tpu.vector_store %arg34[%c0_378, %c2_379, %c32_380], %1579 {strides = array<i32>} : memref<2x8x64xf32, #tpu.memory_space<vmem>>, vector<2x1x32xf32>,
    %1581 = vector.extract_strided_slice %1381 {offsets = [0, 1, 0], sizes = [2, 1, 96], strides = [1, 1, 1]} : vector<2x8x96xf32> to vector<2x1x96xf32>
    %1582 = vector.shape_cast %1581 : vector<2x1x96xf32> to vector<2x96xf32>
    %cst_381 = arith.constant dense<0.000000e+00> : vector<2x96xf32>
    %1583 = tpu.matmul %1578, %1104, %cst_381 {dimension_numbers = #tpu.dot_dimension_numbers<[1], [0], [0], [1], [0, 0, 1, 1], [], []>} : vector<2x32xf32>, vector<32x96xf32>, vector<2x96xf32> -> vector<2x96xf32>
    %1584 = vector.broadcast %1106 : vector<1x96xf32> to vector<2x96xf32>
    %1585 = arith.addf %1583, %1584 : vector<2x96xf32>
    %1586 = vector.extract_strided_slice %1582 {offsets = [0, 0], sizes = [2, 32], strides = [1, 1]} : vector<2x96xf32> to vector<2x32xf32>
    %1587 = vector.extract_strided_slice %1585 {offsets = [0, 0], sizes = [2, 32], strides = [1, 1]} : vector<2x96xf32> to vector<2x32xf32>
    %1588 = arith.addf %1586, %1587 : vector<2x32xf32>
    %1589 = arith.negf %1588 : vector<2x32xf32>
    %1590 = math.exp %1589 : vector<2x32xf32>
    %cst_382 = arith.constant 1.000000e+00 : f32
    %1591 = vector.broadcast %cst_382 : f32 to vector<2x32xf32>
    %1592 = arith.addf %1591, %1590 : vector<2x32xf32>
    %1593 = arith.divf %1591, %1592 : vector<2x32xf32>
    %1594 = vector.extract_strided_slice %1582 {offsets = [0, 32], sizes = [2, 32], strides = [1, 1]} : vector<2x96xf32> to vector<2x32xf32>
    %1595 = vector.extract_strided_slice %1585 {offsets = [0, 32], sizes = [2, 32], strides = [1, 1]} : vector<2x96xf32> to vector<2x32xf32>
    %1596 = arith.addf %1594, %1595 : vector<2x32xf32>
    %1597 = arith.negf %1596 : vector<2x32xf32>
    %1598 = math.exp %1597 : vector<2x32xf32>
    %cst_383 = arith.constant 1.000000e+00 : f32
    %1599 = vector.broadcast %cst_383 : f32 to vector<2x32xf32>
    %1600 = arith.addf %1599, %1598 : vector<2x32xf32>
    %1601 = arith.divf %1599, %1600 : vector<2x32xf32>
    %1602 = vector.extract_strided_slice %1582 {offsets = [0, 64], sizes = [2, 32], strides = [1, 1]} : vector<2x96xf32> to vector<2x32xf32>
    %1603 = vector.extract_strided_slice %1585 {offsets = [0, 64], sizes = [2, 32], strides = [1, 1]} : vector<2x96xf32> to vector<2x32xf32>
    %1604 = arith.mulf %1593, %1603 : vector<2x32xf32>
    %1605 = arith.addf %1602, %1604 : vector<2x32xf32>
    %1606 = math.tanh %1605 : vector<2x32xf32>
    %cst_384 = arith.constant 1.000000e+00 : f32
    %1607 = vector.broadcast %cst_384 : f32 to vector<2x32xf32>
    %1608 = arith.subf %1607, %1601 : vector<2x32xf32>
    %1609 = arith.mulf %1608, %1606 : vector<2x32xf32>
    %1610 = arith.mulf %1601, %1578 : vector<2x32xf32>
    %1611 = arith.addf %1609, %1610 : vector<2x32xf32>
    %1612 = vector.shape_cast %1611 : vector<2x32xf32> to vector<2x1x32xf32>
    %c0_385 = arith.constant 0 : index
    %c1_386 = arith.constant 1 : index
    %c32_387 = arith.constant 32 : index
    %1613 = vector.load %arg34[%c0_385, %c1_386, %c32_387] : memref<2x8x64xf32, #tpu.memory_space<vmem>>, vector<2x1x32xf32>
    tpu.vector_store %arg34[%c0_385, %c1_386, %c32_387], %1612 {strides = array<i32>} : memref<2x8x64xf32, #tpu.memory_space<vmem>>, vector<2x1x32xf32>,
    %1614 = vector.extract_strided_slice %1381 {offsets = [0, 0, 0], sizes = [2, 1, 96], strides = [1, 1, 1]} : vector<2x8x96xf32> to vector<2x1x96xf32>
    %1615 = vector.shape_cast %1614 : vector<2x1x96xf32> to vector<2x96xf32>
    %cst_388 = arith.constant dense<0.000000e+00> : vector<2x96xf32>
    %1616 = tpu.matmul %1611, %1104, %cst_388 {dimension_numbers = #tpu.dot_dimension_numbers<[1], [0], [0], [1], [0, 0, 1, 1], [], []>} : vector<2x32xf32>, vector<32x96xf32>, vector<2x96xf32> -> vector<2x96xf32>
    %1617 = vector.broadcast %1106 : vector<1x96xf32> to vector<2x96xf32>
    %1618 = arith.addf %1616, %1617 : vector<2x96xf32>
    %1619 = vector.extract_strided_slice %1615 {offsets = [0, 0], sizes = [2, 32], strides = [1, 1]} : vector<2x96xf32> to vector<2x32xf32>
    %1620 = vector.extract_strided_slice %1618 {offsets = [0, 0], sizes = [2, 32], strides = [1, 1]} : vector<2x96xf32> to vector<2x32xf32>
    %1621 = arith.addf %1619, %1620 : vector<2x32xf32>
    %1622 = arith.negf %1621 : vector<2x32xf32>
    %1623 = math.exp %1622 : vector<2x32xf32>
    %cst_389 = arith.constant 1.000000e+00 : f32
    %1624 = vector.broadcast %cst_389 : f32 to vector<2x32xf32>
    %1625 = arith.addf %1624, %1623 : vector<2x32xf32>
    %1626 = arith.divf %1624, %1625 : vector<2x32xf32>
    %1627 = vector.extract_strided_slice %1615 {offsets = [0, 32], sizes = [2, 32], strides = [1, 1]} : vector<2x96xf32> to vector<2x32xf32>
    %1628 = vector.extract_strided_slice %1618 {offsets = [0, 32], sizes = [2, 32], strides = [1, 1]} : vector<2x96xf32> to vector<2x32xf32>
    %1629 = arith.addf %1627, %1628 : vector<2x32xf32>
    %1630 = arith.negf %1629 : vector<2x32xf32>
    %1631 = math.exp %1630 : vector<2x32xf32>
    %cst_390 = arith.constant 1.000000e+00 : f32
    %1632 = vector.broadcast %cst_390 : f32 to vector<2x32xf32>
    %1633 = arith.addf %1632, %1631 : vector<2x32xf32>
    %1634 = arith.divf %1632, %1633 : vector<2x32xf32>
    %1635 = vector.extract_strided_slice %1615 {offsets = [0, 64], sizes = [2, 32], strides = [1, 1]} : vector<2x96xf32> to vector<2x32xf32>
    %1636 = vector.extract_strided_slice %1618 {offsets = [0, 64], sizes = [2, 32], strides = [1, 1]} : vector<2x96xf32> to vector<2x32xf32>
    %1637 = arith.mulf %1626, %1636 : vector<2x32xf32>
    %1638 = arith.addf %1635, %1637 : vector<2x32xf32>
    %1639 = math.tanh %1638 : vector<2x32xf32>
    %cst_391 = arith.constant 1.000000e+00 : f32
    %1640 = vector.broadcast %cst_391 : f32 to vector<2x32xf32>
    %1641 = arith.subf %1640, %1634 : vector<2x32xf32>
    %1642 = arith.mulf %1641, %1639 : vector<2x32xf32>
    %1643 = arith.mulf %1634, %1611 : vector<2x32xf32>
    %1644 = arith.addf %1642, %1643 : vector<2x32xf32>
    %1645 = vector.shape_cast %1644 : vector<2x32xf32> to vector<2x1x32xf32>
    %c0_392 = arith.constant 0 : index
    %c0_393 = arith.constant 0 : index
    %c32_394 = arith.constant 32 : index
    %1646 = vector.load %arg34[%c0_392, %c0_393, %c32_394] : memref<2x8x64xf32, #tpu.memory_space<vmem>>, vector<2x1x32xf32>
    tpu.vector_store %arg34[%c0_392, %c0_393, %c32_394], %1645 {strides = array<i32>} : memref<2x8x64xf32, #tpu.memory_space<vmem>>, vector<2x1x32xf32>,
    %c0_395 = arith.constant 0 : index
    %c0_396 = arith.constant 0 : index
    %c0_397 = arith.constant 0 : index
    %1647 = vector.load %arg34[%c0_395, %c0_396, %c0_397] : memref<2x8x64xf32, #tpu.memory_space<vmem>>, vector<2x8x64xf32>
    %1648 = vector.shape_cast %1647 : vector<2x8x64xf32> to vector<16x64xf32>
    %c0_398 = arith.constant 0 : index
    %c0_399 = arith.constant 0 : index
    %1649 = vector.load %arg25[%c0_398, %c0_399] : memref<64x32xf32, #tpu.memory_space<vmem>>, vector<64x32xf32>
    %cst_400 = arith.constant dense<0.000000e+00> : vector<16x32xf32>
    %1650 = tpu.matmul %1648, %1649, %cst_400 {dimension_numbers = #tpu.dot_dimension_numbers<[1], [0], [0], [1], [0, 0, 1, 1], [], []>} : vector<16x64xf32>, vector<64x32xf32>, vector<16x32xf32> -> vector<16x32xf32>
    %c0_401 = arith.constant 0 : index
    %c0_402 = arith.constant 0 : index
    %1651 = vector.load %arg26[%c0_401, %c0_402] : memref<1x32xf32, #tpu.memory_space<vmem>>, vector<1x32xf32>
    %1652 = vector.broadcast %1651 : vector<1x32xf32> to vector<16x32xf32>
    %1653 = arith.addf %1650, %1652 : vector<16x32xf32>
    %1654 = math.tanh %1653 : vector<16x32xf32>
    %1655 = vector.shape_cast %1654 : vector<16x32xf32> to vector<2x8x32xf32>
    %c0_403 = arith.constant 0 : index
    %c0_404 = arith.constant 0 : index
    %1656 = vector.load %arg27[%c0_403, %c0_404] : memref<1x32xf32, #tpu.memory_space<vmem>>, vector<1x32xf32>
    %1657 = vector.shape_cast %1656 : vector<1x32xf32> to vector<1x1x32xf32>
    %1658 = vector.broadcast %1657 : vector<1x1x32xf32> to vector<2x8x32xf32>
    %1659 = arith.mulf %1655, %1658 : vector<2x8x32xf32>
    %cst_405 = arith.constant dense<0.000000e+00> : vector<2x8xf32>
    %1660 = vector.multi_reduction <add>, %1659, %cst_405 [2] : vector<2x8x32xf32> to vector<2x8xf32>
    %1661 = vector.shape_cast %1660 : vector<2x8xf32> to vector<2x8x1xf32>
    %c0_406 = arith.constant 0 : index
    %c0_407 = arith.constant 0 : index
    %1662 = vector.load %arg28[%c0_406, %c0_407] : memref<1x1xf32, #tpu.memory_space<vmem>>, vector<1x1xf32>
    %1663 = vector.shape_cast %1662 : vector<1x1xf32> to vector<1x1x1xf32>
    %1664 = vector.broadcast %1663 : vector<1x1x1xf32> to vector<2x8x1xf32>
    %1665 = arith.addf %1661, %1664 : vector<2x8x1xf32>
    %cst_408 = arith.constant dense<0xFF800000> : vector<2x1xf32>
    %1666 = vector.multi_reduction <maximumf>, %1665, %cst_408 [1] : vector<2x8x1xf32> to vector<2x1xf32>
    %1667 = vector.shape_cast %1666 : vector<2x1xf32> to vector<2x1x1xf32>
    %1668 = vector.broadcast %1667 : vector<2x1x1xf32> to vector<2x8x1xf32>
    %1669 = arith.subf %1665, %1668 : vector<2x8x1xf32>
    %1670 = math.exp %1669 : vector<2x8x1xf32>
    %cst_409 = arith.constant dense<0.000000e+00> : vector<2x1xf32>
    %1671 = vector.multi_reduction <add>, %1670, %cst_409 [1] : vector<2x8x1xf32> to vector<2x1xf32>
    %1672 = vector.shape_cast %1671 : vector<2x1xf32> to vector<2x1x1xf32>
    %1673 = vector.broadcast %1672 : vector<2x1x1xf32> to vector<2x8x1xf32>
    %1674 = arith.divf %1670, %1673 : vector<2x8x1xf32>
    %1675 = vector.broadcast %1674 : vector<2x8x1xf32> to vector<2x8x64xf32>
    %1676 = arith.mulf %1647, %1675 : vector<2x8x64xf32>
    %cst_410 = arith.constant dense<0.000000e+00> : vector<2x64xf32>
    %1677 = vector.multi_reduction <add>, %1676, %cst_410 [1] : vector<2x8x64xf32> to vector<2x64xf32>
    %c0_411 = arith.constant 0 : index
    %c0_412 = arith.constant 0 : index
    %1678 = vector.load %arg29[%c0_411, %c0_412] : memref<64x8xf32, #tpu.memory_space<vmem>>, vector<64x8xf32>
    %cst_413 = arith.constant dense<0.000000e+00> : vector<2x8xf32>
    %1679 = tpu.matmul %1677, %1678, %cst_413 {dimension_numbers = #tpu.dot_dimension_numbers<[1], [0], [0], [1], [0, 0, 1, 1], [], []>} : vector<2x64xf32>, vector<64x8xf32>, vector<2x8xf32> -> vector<2x8xf32>
    %c0_414 = arith.constant 0 : index
    %c0_415 = arith.constant 0 : index
    %1680 = vector.load %arg30[%c0_414, %c0_415] : memref<1x8xf32, #tpu.memory_space<vmem>>, vector<1x8xf32>
    %1681 = vector.broadcast %1680 : vector<1x8xf32> to vector<2x8xf32>
    %1682 = arith.addf %1679, %1681 : vector<2x8xf32>
    %c0_416 = arith.constant 0 : index
    %c0_417 = arith.constant 0 : index
    %1683 = vector.load %arg31[%c0_416, %c0_417] : memref<2x8xf32, #tpu.memory_space<vmem>>, vector<2x8xf32>
    tpu.vector_store %arg31[%c0_416, %c0_417], %1682 {strides = array<i32>} : memref<2x8xf32, #tpu.memory_space<vmem>>, vector<2x8xf32>,
    return
  }
}

</mosaic_0001>

<bundles_post_ra>
// kernel: tpu_custom_call.1
= control target key start
LH: loop header
LB: loop body
LE: loop exit
PB: predicated region body
PF: predicated region fallthrough
CT: control target
= control target key end

     0   :  { %s10263_s6 = smov 1   ;;  %s10264_s10 = smov 2   ;;  %s12502_s0 = inlined_call_operand.smem [shape: u32[32], index: -1, kind: input, shape index: {}] }
   0x1   :  { %s10327_s5 = sld [smem:[%s12502_s0]]   ;;  %s10265_s14 = smov 3  }
   0x2   :  { %s10332_s9 = sld [smem:[%s12502_s0 + %s10263_s6]]   ;;  %s10266_s18 = smov 4  }
   0x3   :  { %s10337_s13 = sld [smem:[%s12502_s0 + %s10264_s10]]   ;;  %s10267_s22 = smov 5  }
   0x4   :  { %s10342_s17 = sld [smem:[%s12502_s0 + %s10265_s14]]   ;;  %s10268_s26 = smov 6  }
   0x5   :  { %s10347_s21 = sld [smem:[%s12502_s0 + %s10266_s18]]   ;;  %s10269_s30 = smov 7  }
   0x6   :  { %s10352_s25 = sld [smem:[%s12502_s0 + %s10267_s22]]   ;;  %s10270_s4 = smov 8  }
   0x7   :  { %s10357_s29 = sld [smem:[%s12502_s0 + %s10268_s26]]   ;;  %s10271_s10 = smov 9  }
   0x8   :  { %s10362_s3 = sld [smem:[%s12502_s0 + %s10269_s30]]   ;;  %s10272_s15 = smov 10  }
   0x9   :  { %s10367_s8 = sld [smem:[%s12502_s0 + %s10270_s4]]   ;;  %s10273_s20 = smov 11  }
   0xa   :  { %12514 = sst [smem:[#allocation44_spill]] %s10342_s17  ;;  %s10274_s26 = smov 12  }
   0xb   :  { %s10372_s14 = sld [smem:[%s12502_s0 + %s10271_s10]]   ;;  %s10275_s1 = smov 13  }
   0xc   :  { %s10377_s19 = sld [smem:[%s12502_s0 + %s10272_s15]]   ;;  %s10276_s7 = smov 14  }
   0xd   :  { %s10382_s24 = sld [smem:[%s12502_s0 + %s10273_s20]]   ;;  %s10277_s15 = smov 15  }
   0xe   :  { %s10387_s30 = sld [smem:[%s12502_s0 + %s10274_s26]]   ;;  %s10278_s22 = smov 16  }
   0xf   :  { %s10392_s6 = sld [smem:[%s12502_s0 + %s10275_s1]]   ;;  %s10279_s28 = smov 17  }
  0x10   :  { %s10397_s12 = sld [smem:[%s12502_s0 + %s10276_s7]]   ;;  %s10280_s7 = smov 18  }
  0x11   :  { %12515 = sst [smem:[#allocation45_spill]] %s10372_s14  ;;  %s10291_s1 = smov 29  }
  0x12   :  { %s10402_s20 = sld [smem:[%s12502_s0 + %s10277_s15]]   ;;  %s10281_s15 = smov 19  }
  0x13   :  { %s10407_s27 = sld [smem:[%s12502_s0 + %s10278_s22]]   ;;  %s10282_s22 = smov 20  }
  0x14   :  { %s10412_s4 = sld [smem:[%s12502_s0 + %s10279_s28]]   ;;  %s10283_s28 = smov 21  }
  0x15   :  { %12516 = sst [smem:[#allocation46_spill]] %s10392_s6  ;;  %s10292_s10 = smov 30  }
  0x16   :  { %s10417_s6 = sld [smem:[%s12502_s0 + %s10280_s7]]   ;;  %s10284_s7 = smov 22  }
  0x17   :  { %s10422_s14 = sld [smem:[%s12502_s0 + %s10281_s15]]   ;;  %s10285_s15 = smov 23  }
  0x18   :  { %12517 = sst [smem:[#allocation47_spill]] %s10402_s20  ;;  %s10293_s16 = smov 31  }
  0x19   :  { %s10427_s17 = sld [smem:[%s12502_s0 + %s10282_s22]]   ;;  %s10286_s22 = smov 24  }
  0x1a   :  { %12518 = sst [smem:[#allocation48_spill]] %s10412_s4 }
  0x1b   :  { %s10432_s4 = sld [smem:[%s12502_s0 + %s10283_s28]]   ;;  %s10287_s28 = smov 25  }
  0x1c   :  { %12519 = sst [smem:[#allocation49_spill]] %s10417_s6 }
  0x1d   :  { %12520 = sst [smem:[#allocation50_spill]] %s10422_s14 }
  0x1e   :  { %s10437_s6 = sld [smem:[%s12502_s0 + %s10284_s7]]   ;;  %s10288_s7 = smov 26  }
  0x1f   :  { %12521 = sst [smem:[#allocation51_spill]] %s10427_s17 }
  0x20   :  { %s10442_s14 = sld [smem:[%s12502_s0 + %s10285_s15]]   ;;  %s10289_s15 = smov 27  }
  0x21   :  { %s10447_s17 = sld [smem:[%s12502_s0 + %s10286_s22]]   ;;  %s10290_s22 = smov 28  }
  0x22   :  { %s10452_s20 = sld [smem:[%s12502_s0 + %s10287_s28]]  }
  0x24   :  { %12522 = sst [smem:[#allocation52_spill]] %s10437_s6 }
  0x25   :  { %s10457_s6 = sld [smem:[%s12502_s0 + %s10288_s7]]  }
  0x26   :  { %12523 = sst [smem:[#allocation53_spill]] %s10442_s14 }
  0x27   :  { %12524 = sst [smem:[#allocation54_spill]] %s10447_s17 }
  0x28   :  { %12525 = sst [smem:[#allocation55_spill]] %s10452_s20 }
  0x29   :  { %s10462_s14 = sld [smem:[%s12502_s0 + %s10289_s15]]  }
  0x2a   :  { %s8086_s17 = sld [smem:[%s12502_s0 + %s10290_s22]]  }
  0x2b   :  { %12526 = sst [smem:[#allocation56_spill]] %s10457_s6 }
  0x2c   :  { %s10470_s20 = sld [smem:[%s12502_s0 + %s10291_s1]]  }
  0x2d   :  { %s10475_s6 = sld [smem:[%s12502_s0 + %s10292_s10]]  }
  0x2f   :  { %12527 = sst [smem:[#allocation57_spill]] %s10462_s14 }
  0x30   :  { %s10480_s14 = sld [smem:[%s12502_s0 + %s10293_s16]]   ;;  %v68_v0 = vstv %s8086_s17 }
  0x31   :  { %69 = vst [vmem:[#allocation5] sm:$0x1] %v68_v0 }
  0x32   :  { %70 = vsyncpa [#allocation7], 0 }
  0x33   :  { %71 = vsyncpa [#allocation10], 0 }
  0x34   :  { %72 = vsyncpa [#allocation13], 0 }
  0x35   :  { %73 = vsyncpa [#allocation16], 0 }
  0x36   :  { %74 = vsyncpa [#allocation19], 0 }
  0x37   :  { %75 = vsyncpa [#allocation22], 0 }
  0x38   :  { %76 = vsyncpa [#allocation25], 0 }
  0x39   :  { %77 = vsyncpa [#allocation28], 0 }
  0x3a   :  { %78 = vsyncpa [#allocation31], 0 }
  0x3b   :  { %79 = vsyncpa [#allocation8], 0  ;;  %s10294_s22 = smov [#allocation9]   ;;  %s10295_s26 = smov [#allocation12]  }
  0x3c   :  { %s97_s23 = sshll.u32 %s10294_s22, 4  ;;  %s124_s1 = sshll.u32 %s10295_s26, 4  ;;  %s98_s23 = int_to_ptr.vmem [resolvable:$true] %s97_s23  ;;  %s125_s1 = int_to_ptr.vmem [resolvable:$true] %s124_s1 }
  0x3d   :  { %s9891_s0 = scalar_lea.vmem %s98_s23, 512  ;;  %p9896_p1 = scmp.lt.s32.totalorder %s98_s23, %s98_s23 }
  0x3e   :  { %p9892_p0 = scmp.ne.s32.totalorder %s98_s23, %s9891_s0  ;;  %p9897_p2 = scmp.lt.s32.totalorder %s9891_s0, %s9891_s0 }
  0x40   :  { %p9898_p3 = por %p9897_p2, %p9896_p1 }
  0x42   :  { %p9899_p4 = pnand %p9898_p3, %p9892_p0 }
  0x44   :  { %9902 = shalt.err (!%p9899_p4)
}
  0x45   :  { %s10296_s17 = smov 128   ;;  %s10297_s28 = smov 8  }
  0x46   :  { %103 = dma.hbm_to_vmem [thread:$0]  %s10332_s9, 512, %s98_s23, [#allocation10], %s10296_s17, %s10296_s17, %s10297_s28  }
  0x47   :  { %s9911_s2 = scalar_lea.vmem %s125_s1, 16  ;;  %s9915_s10 = scalar_lea.vmem %s125_s1, 32 }
  0x48   :  { %p9912_p5 = scmp.ne.s32.totalorder %s125_s1, %s9911_s2  ;;  %p9916_p6 = scmp.lt.s32.totalorder %s125_s1, %s125_s1 }
  0x49   :  { %p9917_p7 = scmp.lt.s32.totalorder %s9915_s10, %s9911_s2 }
  0x4b   :  { %p9918_p8 = por %p9917_p7, %p9916_p6 }
  0x4d   :  { %p9919_p9 = pnand %p9918_p8, %p9912_p5 }
  0x4f   :  { %9922 = shalt.err (!%p9919_p9)
}
  0x50   :  { %127 = dma.hbm_to_vmem [thread:$0]  %s10347_s21, 16, %s125_s1, [#allocation13]  }
  0x51   :  { %s10298_s7 = smov [#allocation15]   ;;  %s10299_s16 = smov [#allocation18]  }
  0x52   :  { %s145_s11 = sshll.u32 %s10298_s7, 4  ;;  %s168_s15 = sshll.u32 %s10299_s16, 4  ;;  %s146_s11 = int_to_ptr.vmem [resolvable:$true] %s145_s11  ;;  %s169_s15 = int_to_ptr.vmem [resolvable:$true] %s168_s15 }
  0x53   :  { %s9931_s18 = scalar_lea.vmem %s146_s11, 512  ;;  %p9936_p11 = scmp.lt.s32.totalorder %s146_s11, %s146_s11 }
  0x54   :  { %p9932_p10 = scmp.ne.s32.totalorder %s146_s11, %s9931_s18  ;;  %p9937_p12 = scmp.lt.s32.totalorder %s9931_s18, %s9931_s18 }
  0x56   :  { %p9938_p13 = por %p9937_p12, %p9936_p11 }
  0x58   :  { %p9939_p0 = pnand %p9938_p13, %p9932_p10 }
  0x5a   :  { %9942 = shalt.err (!%p9939_p0)
}
  0x5b   :  { %151 = dma.hbm_to_vmem [thread:$0]  %s10357_s29, 512, %s146_s11, [#allocation16], %s10296_s17, %s10296_s17, %s10297_s28  }
  0x5c   :  { %s9951_s9 = scalar_lea.vmem %s169_s15, 16  ;;  %s9955_s21 = scalar_lea.vmem %s169_s15, 32 }
  0x5d   :  { %p9952_p1 = scmp.ne.s32.totalorder %s169_s15, %s9951_s9  ;;  %p9956_p2 = scmp.lt.s32.totalorder %s169_s15, %s169_s15 }
  0x5e   :  { %p9957_p3 = scmp.lt.s32.totalorder %s9955_s21, %s9951_s9 }
  0x60   :  { %p9958_p4 = por %p9957_p3, %p9956_p2 }
  0x62   :  { %p9959_p5 = pnand %p9958_p4, %p9952_p1 }
  0x64   :  { %9962 = shalt.err (!%p9959_p5)
}
  0x65   :  { %171 = dma.hbm_to_vmem [thread:$0]  %s10367_s8, 16, %s169_s15, [#allocation19]  }
  0x66   :  { %s10300_s22 = smov [#allocation21]   ;;  %s10301_s26 = smov [#allocation24]  }
  0x67   :  { %s192_s23 = sshll.u32 %s10300_s22, 4  ;;  %s213_s1 = sshll.u32 %s10301_s26, 4  ;;  %s193_s23 = int_to_ptr.vmem [resolvable:$true] %s192_s23  ;;  %s214_s1 = int_to_ptr.vmem [resolvable:$true] %s213_s1 }
  0x68   :  { %s9971_s0 = scalar_lea.vmem %s193_s23, 16  ;;  %s9975_s2 = scalar_lea.vmem %s193_s23, 32 }
  0x69   :  { %p9972_p6 = scmp.ne.s32.totalorder %s193_s23, %s9971_s0  ;;  %p9976_p7 = scmp.lt.s32.totalorder %s193_s23, %s193_s23 }
  0x6a   :  { %p9977_p8 = scmp.lt.s32.totalorder %s9975_s2, %s9971_s0 }
  0x6c   :  { %p9978_p9 = por %p9977_p8, %p9976_p7 }
  0x6e   :  { %p9979_p10 = pnand %p9978_p9, %p9972_p6 }
  0x70   :  { %9982 = shalt.err (!%p9979_p10)
}
  0x71   :  { %195 = dma.hbm_to_vmem [thread:$0]  %s10382_s24, 16, %s193_s23, [#allocation22]  }
  0x72   :  { %s9991_s29 = scalar_lea.vmem %s214_s1, 512  ;;  %p9996_p12 = scmp.lt.s32.totalorder %s214_s1, %s214_s1 }
  0x73   :  { %p9992_p11 = scmp.ne.s32.totalorder %s214_s1, %s9991_s29  ;;  %p9997_p13 = scmp.lt.s32.totalorder %s9991_s29, %s9991_s29 }
  0x75   :  { %p9998_p0 = por %p9997_p13, %p9996_p12 }
  0x77   :  { %p9999_p1 = pnand %p9998_p0, %p9992_p11 }
  0x79   :  { %10002 = shalt.err (!%p9999_p1)
}
  0x7a   :  { %219 = dma.hbm_to_vmem [thread:$0]  %s10397_s12, 512, %s214_s1, [#allocation25], %s10296_s17, %s10296_s17, %s10297_s28  }
  0x7b   :  { %s10302_s8 = smov [#allocation27]   ;;  %s10303_s7 = smov [#allocation30]  }
  0x7c   :  { %s236_s10 = sshll.u32 %s10302_s8, 4  ;;  %s263_s11 = sshll.u32 %s10303_s7, 4  ;;  %s237_s10 = int_to_ptr.vmem [resolvable:$true] %s236_s10  ;;  %s264_s11 = int_to_ptr.vmem [resolvable:$true] %s263_s11 }
  0x7d   :  { %s10011_s16 = scalar_lea.vmem %s237_s10, 16  ;;  %s10015_s24 = scalar_lea.vmem %s237_s10, 32 }
  0x7e   :  { %p10012_p2 = scmp.ne.s32.totalorder %s237_s10, %s10011_s16  ;;  %p10016_p3 = scmp.lt.s32.totalorder %s237_s10, %s237_s10 }
  0x7f   :  { %p10017_p4 = scmp.lt.s32.totalorder %s10015_s24, %s10011_s16 }
  0x81   :  { %p10018_p5 = por %p10017_p4, %p10016_p3 }
  0x83   :  { %p10019_p6 = pnand %p10018_p5, %p10012_p2 }
  0x85   :  { %10022 = shalt.err (!%p10019_p6)
}
  0x86   :  { %239 = dma.hbm_to_vmem [thread:$0]  %s10407_s27, 16, %s237_s10, [#allocation28]  }
  0x87   :  { %s10031_s15 = scalar_lea.vmem %s264_s11, 1024  ;;  %p10036_p8 = scmp.lt.s32.totalorder %s264_s11, %s264_s11 }
  0x88   :  { %p10032_p7 = scmp.ne.s32.totalorder %s264_s11, %s10031_s15  ;;  %p10037_p9 = scmp.lt.s32.totalorder %s10031_s15, %s10031_s15 }
  0x8a   :  { %p10038_p10 = por %p10037_p9, %p10036_p8 }
  0x8c   :  { %p10039_p11 = pnand %p10038_p10, %p10032_p7 }
  0x8e   :  { %10042 = shalt.err (!%p10039_p11)
}
  0x8f   :  { %269 = dma.hbm_to_vmem [thread:$0]  %s10432_s4, 1024, %s264_s11, [#allocation31], %s10296_s17, %s10296_s17, %s10297_s28  }
  0x90   :  { %s10304_s12 = smov [#allocation6]   ;;  %s10305_s9 = smov [#allocation11]  }
  0x91   :  { %s85_s18 = sshll.u32 %s10304_s12, 4  ;;  %s109_s21 = sshll.u32 %s10305_s9, 4  ;;  %s86_s18 = int_to_ptr.vmem [resolvable:$true] %s85_s18  ;;  %s110_s21 = int_to_ptr.vmem [resolvable:$true] %s109_s21 }
  0x92   :  { %s10051_s22 = scalar_lea.vmem %s86_s18, 256  ;;  %p10056_p13 = scmp.lt.s32.totalorder %s86_s18, %s86_s18 }
  0x93   :  { %p10052_p12 = scmp.ne.s32.totalorder %s86_s18, %s10051_s22  ;;  %p10057_p0 = scmp.lt.s32.totalorder %s10051_s22, %s10051_s22 }
  0x95   :  { %p10058_p1 = por %p10057_p0, %p10056_p13 }
  0x97   :  { %p10059_p2 = pnand %p10058_p1, %p10052_p12 }
  0x99   :  { %10062 = shalt.err (!%p10059_p2)
}
  0x9a   :  { %91 = dma.hbm_to_vmem [thread:$0]  %s10327_s5, 256, %s86_s18, [#allocation7], %s10296_s17, %s10296_s17, %s10297_s28  }
  0x9b   :  { %s10071_s27 = scalar_lea.vmem %s110_s21, 512  ;;  %p10076_p4 = scmp.lt.s32.totalorder %s110_s21, %s110_s21 }
  0x9c   :  { %p10072_p3 = scmp.ne.s32.totalorder %s110_s21, %s10071_s27  ;;  %p10077_p5 = scmp.lt.s32.totalorder %s10071_s27, %s10071_s27 }
  0x9e   :  { %p10078_p6 = por %p10077_p5, %p10076_p4 }
  0xa0   :  { %p10079_p7 = pnand %p10078_p6, %p10072_p3 }
  0xa2   :  { %10082 = shalt.err (!%p10079_p7)
}
  0xa3   :  { %115 = dma.hbm_to_vmem [thread:$0]  %s10337_s13, 512, %s110_s21, [#allocation10], %s10296_s17, %s10296_s17, %s10297_s28  }
  0xa4   :  { %s10306_s4 = smov [#allocation14]   ;;  %s10307_s26 = smov [#allocation17]  }
  0xa5   :  { %s133_s23 = sshll.u32 %s10306_s4, 4  ;;  %s158_s1 = sshll.u32 %s10307_s26, 4  ;;  %s134_s23 = int_to_ptr.vmem [resolvable:$true] %s133_s23  ;;  %s159_s1 = int_to_ptr.vmem [resolvable:$true] %s158_s1 }
  0xa6   :  { %s10091_s0 = scalar_lea.vmem %s134_s23, 512  ;;  %p10096_p9 = scmp.lt.s32.totalorder %s134_s23, %s134_s23 }
  0xa7   :  { %p10092_p8 = scmp.ne.s32.totalorder %s134_s23, %s10091_s0  ;;  %p10097_p10 = scmp.lt.s32.totalorder %s10091_s0, %s10091_s0 }
  0xa9   :  { %p10098_p11 = por %p10097_p10, %p10096_p9 }
  0xab   :  { %p10099_p12 = pnand %p10098_p11, %p10092_p8 }
  0xad   :  { %10102 = shalt.err (!%p10099_p12)
}
  0xae   :  { %139 = dma.hbm_to_vmem [thread:$0]  %s10352_s25, 512, %s134_s23, [#allocation13], %s10296_s17, %s10296_s17, %s10297_s28  }
  0xaf   :  { %s10111_s5 = scalar_lea.vmem %s159_s1, 16  ;;  %s10115_s13 = scalar_lea.vmem %s159_s1, 32 }
  0xb0   :  { %p10112_p13 = scmp.ne.s32.totalorder %s159_s1, %s10111_s5  ;;  %p10116_p0 = scmp.lt.s32.totalorder %s159_s1, %s159_s1 }
  0xb1   :  { %p10117_p1 = scmp.lt.s32.totalorder %s10115_s13, %s10111_s5 }
  0xb3   :  { %p10118_p2 = por %p10117_p1, %p10116_p0 }
  0xb5   :  { %p10119_p3 = pnand %p10118_p2, %p10112_p13 }
  0xb7   :  { %10122 = shalt.err (!%p10119_p3)
}
  0xb8   :  { %161 = dma.hbm_to_vmem [thread:$0]  %s10362_s3, 16, %s159_s1, [#allocation16]  }
  0xb9   :  { %s10308_s2 = smov [#allocation20]   ;;  %s10309_s8 = smov [#allocation23]  }
  0xba   :  { %s179_s29 = sshll.u32 %s10308_s2, 4  ;;  %s202_s10 = sshll.u32 %s10309_s8, 4  ;;  %s180_s29 = int_to_ptr.vmem [resolvable:$true] %s179_s29  ;;  %s203_s10 = int_to_ptr.vmem [resolvable:$true] %s202_s10 }
  0xbb   :  { %s10131_s7 = scalar_lea.vmem %s180_s29, 512  ;;  %p10136_p5 = scmp.lt.s32.totalorder %s180_s29, %s180_s29 }
  0xbc   :  { %p10132_p4 = scmp.ne.s32.totalorder %s180_s29, %s10131_s7  ;;  %p10137_p6 = scmp.lt.s32.totalorder %s10131_s7, %s10131_s7 }
  0xbe   :  { %p10138_p7 = por %p10137_p6, %p10136_p5 }
  0xc0   :  { %p10139_p8 = pnand %p10138_p7, %p10132_p4 }
  0xc2   :  { %10142 = shalt.err (!%p10139_p8)
}
  0xc3   :  { %185 = dma.hbm_to_vmem [thread:$0]  %s10377_s19, 512, %s180_s29, [#allocation19], %s10296_s17, %s10296_s17, %s10297_s28  }
  0xc4   :  { %s10151_s25 = scalar_lea.vmem %s203_s10, 16  ;;  %s10155_s3 = scalar_lea.vmem %s203_s10, 32 }
  0xc5   :  { %p10152_p9 = scmp.ne.s32.totalorder %s203_s10, %s10151_s25  ;;  %p10156_p10 = scmp.lt.s32.totalorder %s203_s10, %s203_s10 }
  0xc6   :  { %p10157_p11 = scmp.lt.s32.totalorder %s10155_s3, %s10151_s25 }
  0xc8   :  { %p10158_p12 = por %p10157_p11, %p10156_p10 }
  0xca   :  { %p10159_p13 = pnand %p10158_p12, %p10152_p9 }
  0xcc   :  { %10162 = shalt.err (!%p10159_p13)
}
  0xcd   :  { %205 = dma.hbm_to_vmem [thread:$0]  %s10387_s30, 16, %s203_s10, [#allocation22]  }
  0xce   :  { %s10310_s11 = smov [#allocation26]   ;;  %s10311_s24 = smov [#allocation29]  }
  0xcf   :  { %s226_s16 = sshll.u32 %s10310_s11, 4  ;;  %s247_s15 = sshll.u32 %s10311_s24, 4  ;;  %s227_s16 = int_to_ptr.vmem [resolvable:$true] %s226_s16  ;;  %s248_s15 = int_to_ptr.vmem [resolvable:$true] %s247_s15 }
  0xd0   :  { %s10171_s12 = scalar_lea.vmem %s227_s16, 16  ;;  %s10175_s18 = scalar_lea.vmem %s227_s16, 32 }
  0xd1   :  { %p10172_p0 = scmp.ne.s32.totalorder %s227_s16, %s10171_s12  ;;  %p10176_p1 = scmp.lt.s32.totalorder %s227_s16, %s227_s16 }
  0xd2   :  { %p10177_p2 = scmp.lt.s32.totalorder %s10175_s18, %s10171_s12 }
  0xd4   :  { %p10178_p3 = por %p10177_p2, %p10176_p1 }
  0xd6   :  { %p10179_p4 = pnand %p10178_p3, %p10172_p0 }
  0xd8   :  { %10182 = shalt.err (!%p10179_p4)
}
  0xd9   :  { %s12528_s19 = sld [smem:[#allocation47_spill]]  ;;  %s10191_s9 = scalar_lea.vmem %s248_s15, 512 }
  0xda   :  { %p10192_p5 = scmp.ne.s32.totalorder %s248_s15, %s10191_s9  ;;  %p10196_p6 = scmp.lt.s32.totalorder %s248_s15, %s248_s15 }
  0xdb   :  { %p10197_p7 = scmp.lt.s32.totalorder %s10191_s9, %s10191_s9 }
  0xdd   :  { %p10198_p8 = por %p10197_p7, %p10196_p6 }
  0xdf   :  { %229 = dma.hbm_to_vmem [thread:$0]  %s12528_s19, 16, %s227_s16, [#allocation25]  }
  0xe0   :  { %p10199_p9 = pnand %p10198_p8, %p10192_p5 }
  0xe2   :  { %10202 = shalt.err (!%p10199_p9)
}
  0xe3   :  { %s12529_s30 = sld [smem:[#allocation49_spill]]  ;;  %s10312_s21 = smov [#allocation32]  }
  0xe4   :  { %s275_s22 = sshll.u32 %s10312_s21, 4  ;;  %s276_s22 = int_to_ptr.vmem [resolvable:$true] %s275_s22 }
  0xe5   :  { %s10211_s27 = scalar_lea.vmem %s276_s22, 512  ;;  %p10216_p11 = scmp.lt.s32.totalorder %s276_s22, %s276_s22 }
  0xe6   :  { %p10212_p10 = scmp.ne.s32.totalorder %s276_s22, %s10211_s27  ;;  %p10217_p12 = scmp.lt.s32.totalorder %s10211_s27, %s10211_s27 }
  0xe8   :  { %p10218_p13 = por %p10217_p12, %p10216_p11 }
  0xe9   :  { %253 = dma.hbm_to_vmem [thread:$0]  %s12529_s30, 512, %s248_s15, [#allocation28], %s10296_s17, %s10296_s17, %s10297_s28  }
  0xea   :  { %p10219_p0 = pnand %p10218_p13, %p10212_p10 }
  0xec   :  { %10222 = shalt.err (!%p10219_p0)
}
  0xed   :  { %s12530_s4 = sld [smem:[#allocation52_spill]] }
  0xf3   :  { %281 = dma.hbm_to_vmem [thread:$0]  %s12530_s4, 512, %s276_s22, [#allocation31], %s10296_s17, %s10296_s17, %s10297_s28  }
  0xf4   :  { %10243 = dma.done.wait [#allocation7], 256  }
  0xf5   :  { %10244 = vsyncadd [#allocation7], 4294967040 }
  0xf6   :  { %10245 = dma.done.wait [#allocation10], 1024  }
  0xf7   :  { %10246 = vsyncadd [#allocation10], 4294966272 }
  0xf8   :  { %10247 = dma.done.wait [#allocation13], 528  }
  0xf9   :  { %10248 = vsyncadd [#allocation13], 4294966768 }
  0xfa   :  { %10249 = dma.done.wait [#allocation16], 528  }
  0xfb   :  { %10250 = vsyncadd [#allocation16], 4294966768 }
  0xfc   :  { %10251 = dma.done.wait [#allocation19], 528  }
  0xfd   :  { %10252 = vsyncadd [#allocation19], 4294966768 }
  0xfe   :  { %10253 = dma.done.wait [#allocation22], 32  }
  0xff   :  { %10254 = vsyncadd [#allocation22], 4294967264 }
 0x100   :  { %10255 = dma.done.wait [#allocation25], 528  }
 0x101   :  { %10256 = vsyncadd [#allocation25], 4294966768 }
 0x102   :  { %10257 = dma.done.wait [#allocation28], 528  }
 0x103   :  { %10258 = vsyncadd [#allocation28], 4294966768 }
 0x104   :  { %10259 = dma.done.wait [#allocation31], 1536  }
 0x105   :  { %10260 = vsyncadd [#allocation31], 4294965760  ;;  %v10313_v1 = vmov 0.0   ;;  %vm10314_vm0 = vmmov 0   ;;  %v354_v2 = vld [vmem:[#allocation9 + $0x18] sm:$0xff]  ;;  %v353_v4 = vld [vmem:[#allocation9 + $0x10] sm:$0xff] }
 0x106   :  { %8581 = vmatprep.subr.mxu1 %v10313_v1  ;;  %8589 = vmatprep.mubr.msk.f32.mxu1 %vm10314_vm0, %v10313_v1  ;;  %v10532_v3 = vld [vmem:[#allocation11 + $0x18] sm:$0xff]  ;;  %v10535_v5 = vld [vmem:[#allocation11 + $0x10] sm:$0xff]  ;;  %v352_v6 = vld [vmem:[#allocation9 + $0x8] sm:$0xff]  ;;  %vm12512_vm1 = vcmask 261120   ;;  %s12531_s17 = sld [smem:[#allocation44_spill]]  ;;  %s10315_s28 = smov 64  }
 0x107   :  { %8570 = vmatprep.subr.mxu0 %v354_v2  ;;  %8582 = vmatpush3.msra.mxu1 %v10532_v3  ;;  %v10538_v7 = vld [vmem:[#allocation11 + $0x8] sm:$0xff]  ;;  %v351_v8 = vld [vmem:[#allocation9] sm:$0xff]  ;;  %v10545_v10 = vld [vmem:[#allocation6] sm:$0xff]  ;;  %s10316_s23 = smov 96   ;;  %vm12513_vm2 = vcmask 1041409   ;;  %s12532_s26 = sld [smem:[#allocation45_spill]] }
 0x108   :  { %8571 = vmatpush3.msra.mxu0 %v354_v2  ;;  %8583 = vmatprep.subr.mxu1 %v10313_v1  ;;  %v10542_v9 = vld [vmem:[#allocation11] sm:$0xff]  ;;  %v10548_v11 = vld [vmem:[#allocation6 + $0x8] sm:$0xff]  ;;  %vm12509_vm3 = vcmask 253952   ;;  %vm12508_vm4 = vcmask 256002   ;;  %vm745_vm5 = vcmask 254977   ;;  %vm2546_vm6 = vcmask 518402  }
 0x109   :  { %8572 = vmatprep.subr.mxu0 %v353_v4  ;;  %8584 = vmatpush3.msra.mxu1 %v10535_v5  ;;  %v10578_v12 = vld [vmem:[#allocation12] ss:$0 sm:$0xff]  ;;  %vm2685_vm7 = vcmask 517377   ;;  %vm1185_vm8 = vcmask 258052   ;;  %vm1038_vm9 = vcmask 257027   ;;  %vm12510_vm10 = vcmask 520452  }
 0x10a   :  { %8573 = vmatpush3.msra.mxu0 %v353_v4  ;;  %8585 = vmatprep.subr.mxu1 %v10313_v1  ;;  %vm12511_vm11 = vcmask 519427   ;;  %vm1479_vm12 = vcmask 260102   ;;  %vm1332_vm13 = vcmask 259077   ;;  %vm1982_vm14 = vcmask 522502   ;;  %s12533_s1 = sld [smem:[#allocation46_spill]] }
 0x10b   :  { %8574 = vmatprep.subr.mxu0 %v352_v6  ;;  %8586 = vmatpush3.msra.mxu1 %v10538_v7  ;;  %vm2123_vm15 = vcmask 521477   ;;  %s12534_s0 = sld [smem:[#allocation48_spill]] }
 0x10c   :  { %8575 = vmatpush3.msra.mxu0 %v352_v6  ;;  %8587 = vmatprep.subr.mxu1 %v10313_v1  ;;  %v8090_v18 = vld [vmem:[%s12531_s17] ss:$0 sm:$0xff]  ;;  %s12539_s5 = sld [smem:[#allocation51_spill]] }
 0x10d   :  { %8576 = vmatprep.subr.mxu0 %v351_v8  ;;  %8588 = vmatpush3.msra.mxu1 %v10542_v9  ;;  %s12544_s13 = sld [smem:[#allocation50_spill]] }
 0x10e   :  { %8577 = vmatpush3.msra.mxu0 %v351_v8  ;;  %8578 = vmatprep.mubr.msk.f32.mxu0 %vm12512_vm1, %v10545_v10  ;;  %s12547_s2 = sld [smem:[#allocation54_spill]] }
 0x10f   :  { %8590 = vmatmul.mubr.f32.vlgmr.msra.gmra.mxu1 %v10313_v1  ;;  %8579 = vmatmul.mubr.msk.f32.vlgmr.msra.gmra.mxu0 %vm12512_vm1, %v10548_v11  ;;  %s12548_s29 = sld [smem:[#allocation53_spill]] }
 0x110   :  { %8592 = vmatprep.subr.mxu0 %v10313_v1  ;;  %8600 = vmatprep.mubr.msk.f32.mxu0 %vm10314_vm0, %v10313_v1  ;;  %s12549_s8 = sld [smem:[#allocation55_spill]] }
 0x111   :  { %8593 = vmatpush3.msra.mxu0 %v10532_v3  ;;  %8603 = vmatprep.subr.mxu1 %v10313_v1  ;;  %s12558_s10 = sld [smem:[#allocation56_spill]] }
 0x112   :  { %8594 = vmatprep.subr.mxu0 %v10313_v1  ;;  %8604 = vmatpush3.msra.mxu1 %v10532_v3  ;;  %s12559_s7 = sld [smem:[#allocation57_spill]] }
 0x113   :  { %8595 = vmatpush3.msra.mxu0 %v10535_v5  ;;  %8605 = vmatprep.subr.mxu1 %v10313_v1 }
 0x114   :  { %8596 = vmatprep.subr.mxu0 %v10313_v1  ;;  %8606 = vmatpush3.msra.mxu1 %v10535_v5 }
 0x115   :  { %8597 = vmatpush3.msra.mxu0 %v10538_v7  ;;  %8607 = vmatprep.subr.mxu1 %v10313_v1 }
 0x116   :  { %8598 = vmatprep.subr.mxu0 %v10313_v1  ;;  %8608 = vmatpush3.msra.mxu1 %v10538_v7 }
 0x117   :  { %8599 = vmatpush3.msra.mxu0 %v10542_v9  ;;  %8609 = vmatprep.subr.mxu1 %v10313_v1 }
 0x118   :  { %8610 = vmatpush3.msra.mxu1 %v10542_v9  ;;  %8611 = vmatprep.mubr.msk.f32.mxu1 %vm10314_vm0, %v10313_v1 }
 0x119   :  { %8614 = vmatprep.subr.mxu0 %v10313_v1  ;;  %8625 = vmatprep.subr.mxu1 %v10313_v1 }
 0x1cf   :  { %v534_v13 = vpop.f32.mrf.mxu1  ;;  %v8580_v17 = vpop.f32.mrf.mxu0 }
 0x1d0   :  { %v535_v14 = vadd.f32 %v10578_v12, %v534_v13  ;;  %v10584_v19 = vadd.f32 %v8580_v17, %v8090_v18 }
 0x1d1   :  { %v8591_v15 = vpop.f32.mrf.mxu1  ;;  %v450_v20 = vpop.f32.mrf.mxu0 }
 0x1d2   :  { %v539_v16 = vrot.slane %v535_v14, 1  ;;  %v10586_v21 = vadd.f32 %v8090_v18, %v450_v20 }
 0x1d4   :  { %558 = vrot.lane.b32.xlu0 %v539_v16, %s10315_s28  ;;  %v543_v22 = vadd.f32 %v539_v16, %v10584_v19  ;;  %v542_v24 = vadd.f32 %v535_v14, %v10586_v21 }
 0x1d6   :  { %v8095_v23 = vmul.f32 -1.442695, %v543_v22  ;;  %v8094_v25 = vmul.f32 -1.442695, %v542_v24 }
 0x1d8   :  { %556 = vrot.lane.b32.xlu0 %v535_v14, %s10315_s28  ;;  %9292 = vpow2.f32 %v8095_v23 }
 0x1d9   :  { %9294 = vpow2.f32 %v8094_v25 }
 0x1e5   :  { %v9293_v26 = vpop.eup %9292 }
 0x1e6   :  { %v551_v27 = vadd.f32 1.0, %v9293_v26  ;;  %v9295_v28 = vpop.eup %9294 }
 0x1e7   :  { %v550_v29 = vadd.f32 1.0, %v9295_v28 }
 0x1e8   :  { %9296 = vrcp.f32 %v551_v27 }
 0x1e9   :  { %9298 = vrcp.f32 %v550_v29 }
 0x1f5   :  { %v9297_v30 = vpop.eup %9296 }
 0x1f6   :  { %v9299_v33 = vpop.eup %9298  ;;  %v577_v42 = vsub.f32 1.0, %v9297_v30  ;;  %v589_v44 = vmul.f32 0.0, %v9297_v30 }
 0x1f7   :  { %v576_v47 = vsub.f32 1.0, %v9299_v33  ;;  %v588_v49 = vmul.f32 0.0, %v9299_v33 }
 0x246   :  { %v559_v31 = vpop.permute.xlu0 %558 }
 0x247   :  { %v563_v32 = vmul.f32 %v9297_v30, %v559_v31 }
 0x249   :  { %568 = vrot.lane.b32.xlu1 %v563_v32, %s10315_s28 }
 0x24a   :  { %v557_v34 = vpop.permute.xlu0 %556 }
 0x24b   :  { %v562_v35 = vmul.f32 %v9299_v33, %v557_v34 }
 0x24d   :  { %566 = vrot.lane.b32.xlu1 %v562_v35, %s10315_s28 }
 0x2bb   :  { %v569_v36 = vpop.permute.xlu1 %568 }
 0x2bc   :  { %v573_v37 = vadd.f32 %v569_v36, %v10584_v19 }
 0x2be   :  { %9300 = vtanh.f32 %v573_v37 }
 0x2bf   :  { %v567_v38 = vpop.permute.xlu1 %566 }
 0x2c0   :  { %v572_v39 = vadd.f32 %v567_v38, %v10586_v21 }
 0x2c2   :  { %9302 = vtanh.f32 %v572_v39 }
 0x2cb   :  { %v9301_v40 = vpop.eup %9300 }
 0x2cc   :  { %582 = vrot.lane.b32.xlu0 %v9301_v40, %s10316_s23 }
 0x2cf   :  { %v9303_v41 = vpop.eup %9302 }
 0x2d0   :  { %580 = vrot.lane.b32.xlu1 %v9303_v41, %s10316_s23 }
 0x33e   :  { %v583_v43 = vpop.permute.xlu0 %582 }
 0x33f   :  { %v587_v45 = vmul.f32 %v583_v43, %v577_v42 }
 0x341   :  { %v10596_v46 = vadd.f32 %v589_v44, %v587_v45 }
 0x342   :  { %v581_v48 = vpop.permute.xlu1 %580 }
 0x343   :  { %v586_v50 = vmul.f32 %v581_v48, %v576_v47  ;;  %v603_v51 = vrot.slane %v10596_v46, 7 }
 0x345   :  { %v10599_v52 = vadd.f32 %v588_v49, %v586_v50 }
 0x347   :  { %v605_v53 = vsel %vm12513_vm2, %v603_v51, %v10599_v52  ;;  %v730_v28 = vrot.slane %v10599_v52, 7 }
 0x348   :  { %606 = vrot.lane.b32.xlu0 %v605_v53, %s10316_s23 }
 0x3ba   :  { %v607_v54 = vpop.permute.xlu0 %606 }
 0x3bb   :  { %8601 = vmatmul.mubr.msk.f32.vlgmr.msra.gmra.mxu0 %vm12512_vm1, %v607_v54 }
 0x3bc   :  { %8615 = vmatpush3.msra.mxu0 %v10532_v3  ;;  %8622 = vmatprep.mubr.msk.f32.mxu0 %vm10314_vm0, %v10313_v1 }
 0x3bd   :  { %8616 = vmatprep.subr.mxu0 %v10313_v1 }
 0x3be   :  { %8617 = vmatpush3.msra.mxu0 %v10535_v5 }
 0x3bf   :  { %8618 = vmatprep.subr.mxu0 %v10313_v1 }
 0x3c0   :  { %8619 = vmatpush3.msra.mxu0 %v10538_v7 }
 0x3c1   :  { %8620 = vmatprep.subr.mxu0 %v10313_v1 }
 0x3c2   :  { %8621 = vmatpush3.msra.mxu0 %v10542_v9 }
 0x3c3   :  { %8636 = vmatprep.subr.mxu0 %v10313_v1 }
 0x47b   :  { %v676_v55 = vpop.f32.mrf.mxu0 }
 0x47c   :  { %v677_v56 = vadd.f32 %v10578_v12, %v676_v55 }
 0x47d   :  { %v8602_v57 = vpop.f32.mrf.mxu0 }
 0x47e   :  { %700 = vrot.lane.b32.xlu0 %v677_v56, %s10315_s28  ;;  %v681_v58 = vrot.slane %v677_v56, 7  ;;  %v685_v59 = vadd.f32 %v677_v56, %v10584_v19 }
 0x480   :  { %698 = vrot.lane.b32.xlu1 %v681_v58, %s10315_s28  ;;  %v684_v60 = vadd.f32 %v681_v58, %v10586_v21  ;;  %v8098_v61 = vmul.f32 -1.442695, %v685_v59 }
 0x482   :  { %v8097_v62 = vmul.f32 -1.442695, %v684_v60  ;;  %9304 = vpow2.f32 %v8098_v61 }
 0x484   :  { %9306 = vpow2.f32 %v8097_v62 }
 0x48f   :  { %v9305_v63 = vpop.eup %9304 }
 0x490   :  { %v693_v2 = vadd.f32 1.0, %v9305_v63 }
 0x491   :  { %v9307_v0 = vpop.eup %9306 }
 0x492   :  { %v692_v4 = vadd.f32 1.0, %v9307_v0  ;;  %9308 = vrcp.f32 %v693_v2 }
 0x494   :  { %9310 = vrcp.f32 %v692_v4 }
 0x49f   :  { %v9309_v6 = vpop.eup %9308 }
 0x4a0   :  { %v719_v26 = vsub.f32 1.0, %v9309_v6  ;;  %v734_v33 = vmul.f32 %v9309_v6, %v603_v51 }
 0x4a1   :  { %v9311_v14 = vpop.eup %9310 }
 0x4a2   :  { %v718_v27 = vsub.f32 1.0, %v9311_v14  ;;  %v733_v31 = vmul.f32 %v9311_v14, %v730_v28 }
 0x4f0   :  { %v701_v8 = vpop.permute.xlu0 %700 }
 0x4f1   :  { %v705_v13 = vmul.f32 %v9309_v6, %v701_v8 }
 0x4f2   :  { %v699_v15 = vpop.permute.xlu1 %698 }
 0x4f3   :  { %v704_v16 = vmul.f32 %v9311_v14, %v699_v15  ;;  %710 = vrot.lane.b32.xlu0 %v705_v13, %s10315_s28 }
 0x4f5   :  { %708 = vrot.lane.b32.xlu1 %v704_v16, %s10315_s28 }
 0x565   :  { %v711_v17 = vpop.permute.xlu0 %710 }
 0x566   :  { %v715_v18 = vadd.f32 %v711_v17, %v10584_v19 }
 0x567   :  { %v709_v20 = vpop.permute.xlu1 %708 }
 0x568   :  { %9312 = vtanh.f32 %v715_v18  ;;  %v714_v22 = vadd.f32 %v709_v20, %v10586_v21 }
 0x56a   :  { %9314 = vtanh.f32 %v714_v22 }
 0x575   :  { %v9313_v23 = vpop.eup %9312 }
 0x576   :  { %724 = vrot.lane.b32.xlu0 %v9313_v23, %s10316_s23 }
 0x577   :  { %v9315_v24 = vpop.eup %9314 }
 0x578   :  { %722 = vrot.lane.b32.xlu1 %v9315_v24, %s10316_s23 }
 0x5e8   :  { %v725_v25 = vpop.permute.xlu0 %724 }
 0x5e9   :  { %v729_v30 = vmul.f32 %v725_v25, %v719_v26 }
 0x5ea   :  { %v723_v29 = vpop.permute.xlu1 %722 }
 0x5eb   :  { %v728_v32 = vmul.f32 %v723_v29, %v718_v27  ;;  %v10629_v35 = vadd.f32 %v734_v33, %v729_v30 }
 0x5ed   :  { %v10627_v34 = vadd.f32 %v733_v31, %v728_v32  ;;  %v876_v6 = vrot.slane %v10629_v35, 7 }
 0x5ef   :  { %v748_v36 = vrot.slane %v10627_v34, 1  ;;  %v875_v14 = vrot.slane %v10627_v34, 7 }
 0x5f1   :  { %v749_v37 = vsel %vm12513_vm2, %v10629_v35, %v748_v36 }
 0x5f2   :  { %750 = vrot.lane.b32.xlu1 %v749_v37, %s10316_s23 }
 0x664   :  { %v751_v38 = vpop.permute.xlu1 %750 }
 0x665   :  { %8612 = vmatmul.mubr.msk.f32.vlgmr.msra.gmra.mxu1 %vm12512_vm1, %v751_v38 }
 0x666   :  { %8626 = vmatpush3.msra.mxu1 %v10532_v3  ;;  %8633 = vmatprep.mubr.msk.f32.mxu1 %vm10314_vm0, %v10313_v1 }
 0x667   :  { %8627 = vmatprep.subr.mxu1 %v10313_v1 }
 0x668   :  { %8628 = vmatpush3.msra.mxu1 %v10535_v5 }
 0x669   :  { %8629 = vmatprep.subr.mxu1 %v10313_v1 }
 0x66a   :  { %8630 = vmatpush3.msra.mxu1 %v10538_v7 }
 0x66b   :  { %8631 = vmatprep.subr.mxu1 %v10313_v1 }
 0x66c   :  { %8632 = vmatpush3.msra.mxu1 %v10542_v9 }
 0x66d   :  { %8647 = vmatprep.subr.mxu1 %v10313_v1 }
 0x725   :  { %v820_v39 = vpop.f32.mrf.mxu1 }
 0x726   :  { %v821_v40 = vadd.f32 %v10578_v12, %v820_v39 }
 0x727   :  { %v8613_v41 = vpop.f32.mrf.mxu1 }
 0x728   :  { %v825_v42 = vrot.slane %v821_v40, 6  ;;  %v826_v43 = vrot.slane %v821_v40, 7 }
 0x72a   :  { %845 = vrot.lane.b32.xlu1 %v826_v43, %s10315_s28  ;;  %843 = vrot.lane.b32.xlu0 %v825_v42, %s10315_s28  ;;  %v829_v44 = vadd.f32 %v825_v42, %v10586_v21  ;;  %v830_v45 = vadd.f32 %v826_v43, %v10584_v19 }
 0x72c   :  { %v8100_v47 = vmul.f32 -1.442695, %v829_v44  ;;  %v8101_v48 = vmul.f32 -1.442695, %v830_v45 }
 0x72e   :  { %9316 = vpow2.f32 %v8100_v47 }
 0x72f   :  { %9318 = vpow2.f32 %v8101_v48 }
 0x73b   :  { %v9317_v49 = vpop.eup %9316 }
 0x73c   :  { %v9319_v50 = vpop.eup %9318  ;;  %v837_v51 = vadd.f32 1.0, %v9317_v49 }
 0x73d   :  { %v838_v53 = vadd.f32 1.0, %v9319_v50 }
 0x73e   :  { %9320 = vrcp.f32 %v837_v51 }
 0x73f   :  { %9322 = vrcp.f32 %v838_v53 }
 0x74b   :  { %v9321_v54 = vpop.eup %9320 }
 0x74c   :  { %v9323_v55 = vpop.eup %9322  ;;  %v863_v13 = vsub.f32 1.0, %v9321_v54  ;;  %v879_v18 = vmul.f32 %v9321_v54, %v875_v14 }
 0x74d   :  { %v864_v4 = vsub.f32 1.0, %v9323_v55  ;;  %v880_v15 = vmul.f32 %v9323_v55, %v876_v6 }
 0x79c   :  { %v846_v56 = vpop.permute.xlu1 %845  ;;  %v844_v57 = vpop.permute.xlu0 %843 }
 0x79d   :  { %v850_v58 = vmul.f32 %v9323_v55, %v846_v56  ;;  %v849_v59 = vmul.f32 %v9321_v54, %v844_v57 }
 0x79f   :  { %855 = vrot.lane.b32.xlu1 %v850_v58, %s10315_s28  ;;  %853 = vrot.lane.b32.xlu0 %v849_v59, %s10315_s28 }
 0x811   :  { %v856_v60 = vpop.permute.xlu1 %855  ;;  %v854_v61 = vpop.permute.xlu0 %853 }
 0x812   :  { %v860_v62 = vadd.f32 %v856_v60, %v10584_v19  ;;  %v859_v63 = vadd.f32 %v854_v61, %v10586_v21 }
 0x814   :  { %9324 = vtanh.f32 %v860_v62 }
 0x815   :  { %9326 = vtanh.f32 %v859_v63 }
 0x821   :  { %v9325_v0 = vpop.eup %9324 }
 0x822   :  { %v9327_v2 = vpop.eup %9326  ;;  %869 = vrot.lane.b32.xlu1 %v9325_v0, %s10316_s23 }
 0x823   :  { %867 = vrot.lane.b32.xlu0 %v9327_v2, %s10316_s23 }
 0x894   :  { %v870_v8 = vpop.permute.xlu1 %869 }
 0x895   :  { %v874_v16 = vmul.f32 %v870_v8, %v864_v4  ;;  %v868_v17 = vpop.permute.xlu0 %867 }
 0x896   :  { %v873_v20 = vmul.f32 %v868_v17, %v863_v13 }
 0x897   :  { %v10659_v22 = vadd.f32 %v880_v15, %v874_v16 }
 0x898   :  { %v10661_v23 = vadd.f32 %v879_v18, %v873_v20 }
 0x899   :  { %v895_v24 = vrot.slane %v10659_v22, 1  ;;  %v1023_v58 = vrot.slane %v10659_v22, 7 }
 0x89a   :  { %v894_v25 = vrot.slane %v10661_v23, 2  ;;  %v1022_v61 = vrot.slane %v10661_v23, 7 }
 0x89c   :  { %v896_v26 = vsel %vm12513_vm2, %v895_v24, %v894_v25 }
 0x89d   :  { %897 = vrot.lane.b32.xlu0 %v896_v26, %s10316_s23 }
 0x90f   :  { %v898_v27 = vpop.permute.xlu0 %897 }
 0x910   :  { %8623 = vmatmul.mubr.msk.f32.vlgmr.msra.gmra.mxu0 %vm12512_vm1, %v898_v27 }
 0x911   :  { %8637 = vmatpush3.msra.mxu0 %v10532_v3  ;;  %8644 = vmatprep.mubr.msk.f32.mxu0 %vm10314_vm0, %v10313_v1 }
 0x912   :  { %8638 = vmatprep.subr.mxu0 %v10313_v1 }
 0x913   :  { %8639 = vmatpush3.msra.mxu0 %v10535_v5 }
 0x914   :  { %8640 = vmatprep.subr.mxu0 %v10313_v1 }
 0x915   :  { %8641 = vmatpush3.msra.mxu0 %v10538_v7 }
 0x916   :  { %8642 = vmatprep.subr.mxu0 %v10313_v1 }
 0x917   :  { %8643 = vmatpush3.msra.mxu0 %v10542_v9 }
 0x918   :  { %8658 = vmatprep.subr.mxu0 %v10313_v1 }
 0x9d0   :  { %v967_v28 = vpop.f32.mrf.mxu0 }
 0x9d1   :  { %v968_v29 = vadd.f32 %v10578_v12, %v967_v28 }
 0x9d2   :  { %v8624_v30 = vpop.f32.mrf.mxu0 }
 0x9d3   :  { %v972_v31 = vrot.slane %v968_v29, 5  ;;  %v973_v32 = vrot.slane %v968_v29, 6 }
 0x9d5   :  { %992 = vrot.lane.b32.xlu0 %v973_v32, %s10315_s28  ;;  %990 = vrot.lane.b32.xlu1 %v972_v31, %s10315_s28  ;;  %v976_v33 = vadd.f32 %v972_v31, %v10586_v21  ;;  %v977_v36 = vadd.f32 %v973_v32, %v10584_v19 }
 0x9d7   :  { %v8103_v37 = vmul.f32 -1.442695, %v976_v33  ;;  %v8104_v38 = vmul.f32 -1.442695, %v977_v36 }
 0x9d9   :  { %9328 = vpow2.f32 %v8103_v37 }
 0x9da   :  { %9330 = vpow2.f32 %v8104_v38 }
 0x9e6   :  { %v9329_v39 = vpop.eup %9328 }
 0x9e7   :  { %v9331_v40 = vpop.eup %9330  ;;  %v984_v41 = vadd.f32 1.0, %v9329_v39 }
 0x9e8   :  { %v985_v42 = vadd.f32 1.0, %v9331_v40 }
 0x9e9   :  { %9332 = vrcp.f32 %v984_v41 }
 0x9ea   :  { %9334 = vrcp.f32 %v985_v42 }
 0x9f6   :  { %v9333_v43 = vpop.eup %9332 }
 0x9f7   :  { %v9335_v44 = vpop.eup %9334  ;;  %v1010_v60 = vsub.f32 1.0, %v9333_v43  ;;  %v1026_v2 = vmul.f32 %v9333_v43, %v1022_v61 }
 0x9f8   :  { %v1011_v57 = vsub.f32 1.0, %v9335_v44  ;;  %v1027_v62 = vmul.f32 %v9335_v44, %v1023_v58 }
 0xa47   :  { %v993_v45 = vpop.permute.xlu0 %992  ;;  %v991_v47 = vpop.permute.xlu1 %990 }
 0xa48   :  { %v997_v48 = vmul.f32 %v9335_v44, %v993_v45  ;;  %v996_v49 = vmul.f32 %v9333_v43, %v991_v47 }
 0xa4a   :  { %1002 = vrot.lane.b32.xlu0 %v997_v48, %s10315_s28  ;;  %1000 = vrot.lane.b32.xlu1 %v996_v49, %s10315_s28 }
 0xabc   :  { %v1003_v50 = vpop.permute.xlu0 %1002  ;;  %v1001_v51 = vpop.permute.xlu1 %1000 }
 0xabd   :  { %v1007_v53 = vadd.f32 %v1003_v50, %v10584_v19  ;;  %v1006_v54 = vadd.f32 %v1001_v51, %v10586_v21 }
 0xabf   :  { %9336 = vtanh.f32 %v1007_v53 }
 0xac0   :  { %9338 = vtanh.f32 %v1006_v54 }
 0xacc   :  { %v9337_v55 = vpop.eup %9336 }
 0xacd   :  { %v9339_v56 = vpop.eup %9338  ;;  %1016 = vrot.lane.b32.xlu0 %v9337_v55, %s10316_s23 }
 0xace   :  { %1014 = vrot.lane.b32.xlu1 %v9339_v56, %s10316_s23 }
 0xb3f   :  { %v1017_v59 = vpop.permute.xlu0 %1016 }
 0xb40   :  { %v1021_v63 = vmul.f32 %v1017_v59, %v1011_v57  ;;  %v1015_v0 = vpop.permute.xlu1 %1014 }
 0xb41   :  { %v1020_v4 = vmul.f32 %v1015_v0, %v1010_v60 }
 0xb42   :  { %v10691_v6 = vadd.f32 %v1027_v62, %v1021_v63 }
 0xb43   :  { %v10693_v8 = vadd.f32 %v1026_v2, %v1020_v4 }
 0xb44   :  { %v1042_v13 = vrot.slane %v10691_v6, 2  ;;  %v1170_v50 = vrot.slane %v10691_v6, 7 }
 0xb45   :  { %v1041_v14 = vrot.slane %v10693_v8, 3  ;;  %v1169_v54 = vrot.slane %v10693_v8, 7 }
 0xb47   :  { %v1043_v15 = vsel %vm12513_vm2, %v1042_v13, %v1041_v14 }
 0xb48   :  { %1044 = vrot.lane.b32.xlu1 %v1043_v15, %s10316_s23 }
 0xbba   :  { %v1045_v16 = vpop.permute.xlu1 %1044 }
 0xbbb   :  { %8634 = vmatmul.mubr.msk.f32.vlgmr.msra.gmra.mxu1 %vm12512_vm1, %v1045_v16 }
 0xbbc   :  { %8648 = vmatpush3.msra.mxu1 %v10532_v3  ;;  %8655 = vmatprep.mubr.msk.f32.mxu1 %vm10314_vm0, %v10313_v1 }
 0xbbd   :  { %8649 = vmatprep.subr.mxu1 %v10313_v1 }
 0xbbe   :  { %8650 = vmatpush3.msra.mxu1 %v10535_v5 }
 0xbbf   :  { %8651 = vmatprep.subr.mxu1 %v10313_v1 }
 0xbc0   :  { %8652 = vmatpush3.msra.mxu1 %v10538_v7 }
 0xbc1   :  { %8653 = vmatprep.subr.mxu1 %v10313_v1 }
 0xbc2   :  { %8654 = vmatpush3.msra.mxu1 %v10542_v9 }
 0xc7b   :  { %v1114_v17 = vpop.f32.mrf.mxu1 }
 0xc7c   :  { %v1115_v18 = vadd.f32 %v10578_v12, %v1114_v17 }
 0xc7d   :  { %v8635_v20 = vpop.f32.mrf.mxu1 }
 0xc7e   :  { %v1119_v24 = vrot.slane %v1115_v18, 4  ;;  %v1120_v25 = vrot.slane %v1115_v18, 5 }
 0xc80   :  { %1139 = vrot.lane.b32.xlu1 %v1120_v25, %s10315_s28  ;;  %1137 = vrot.lane.b32.xlu0 %v1119_v24, %s10315_s28  ;;  %v1123_v26 = vadd.f32 %v1119_v24, %v10586_v21  ;;  %v1124_v27 = vadd.f32 %v1120_v25, %v10584_v19 }
 0xc82   :  { %v8106_v28 = vmul.f32 -1.442695, %v1123_v26  ;;  %v8107_v29 = vmul.f32 -1.442695, %v1124_v27 }
 0xc84   :  { %9340 = vpow2.f32 %v8106_v28 }
 0xc85   :  { %9342 = vpow2.f32 %v8107_v29 }
 0xc91   :  { %v9341_v30 = vpop.eup %9340 }
 0xc92   :  { %v9343_v31 = vpop.eup %9342  ;;  %v1131_v32 = vadd.f32 1.0, %v9341_v30 }
 0xc93   :  { %v1132_v33 = vadd.f32 1.0, %v9343_v31 }
 0xc94   :  { %9344 = vrcp.f32 %v1131_v32 }
 0xc95   :  { %9346 = vrcp.f32 %v1132_v33 }
 0xca1   :  { %v9345_v36 = vpop.eup %9344 }
 0xca2   :  { %v9347_v37 = vpop.eup %9346  ;;  %v1157_v53 = vsub.f32 1.0, %v9345_v36  ;;  %v1173_v58 = vmul.f32 %v9345_v36, %v1169_v54 }
 0xca3   :  { %v1158_v49 = vsub.f32 1.0, %v9347_v37  ;;  %v1174_v55 = vmul.f32 %v9347_v37, %v1170_v50 }
 0xcf2   :  { %v1140_v38 = vpop.permute.xlu1 %1139  ;;  %v1138_v39 = vpop.permute.xlu0 %1137 }
 0xcf3   :  { %v1144_v40 = vmul.f32 %v9347_v37, %v1140_v38  ;;  %v1143_v41 = vmul.f32 %v9345_v36, %v1138_v39 }
 0xcf5   :  { %1149 = vrot.lane.b32.xlu1 %v1144_v40, %s10315_s28  ;;  %1147 = vrot.lane.b32.xlu0 %v1143_v41, %s10315_s28 }
 0xd67   :  { %v1150_v42 = vpop.permute.xlu1 %1149  ;;  %v1148_v43 = vpop.permute.xlu0 %1147 }
 0xd68   :  { %v1154_v44 = vadd.f32 %v1150_v42, %v10584_v19  ;;  %v1153_v45 = vadd.f32 %v1148_v43, %v10586_v21 }
 0xd6a   :  { %9348 = vtanh.f32 %v1154_v44 }
 0xd6b   :  { %9350 = vtanh.f32 %v1153_v45 }
 0xd77   :  { %v9349_v47 = vpop.eup %9348 }
 0xd78   :  { %v9351_v48 = vpop.eup %9350  ;;  %1163 = vrot.lane.b32.xlu1 %v9349_v47, %s10316_s23 }
 0xd79   :  { %1161 = vrot.lane.b32.xlu0 %v9351_v48, %s10316_s23 }
 0xdea   :  { %v1164_v51 = vpop.permute.xlu1 %1163 }
 0xdeb   :  { %v1168_v56 = vmul.f32 %v1164_v51, %v1158_v49  ;;  %v1162_v57 = vpop.permute.xlu0 %1161 }
 0xdec   :  { %v1167_v59 = vmul.f32 %v1162_v57, %v1157_v53 }
 0xded   :  { %v10722_v60 = vadd.f32 %v1174_v55, %v1168_v56 }
 0xdee   :  { %v10724_v61 = vadd.f32 %v1173_v58, %v1167_v59 }
 0xdef   :  { %v1189_v62 = vrot.slane %v10722_v60, 3  ;;  %v1317_v40 = vrot.slane %v10722_v60, 7 }
 0xdf0   :  { %v1188_v63 = vrot.slane %v10724_v61, 4  ;;  %v1316_v43 = vrot.slane %v10724_v61, 7 }
 0xdf2   :  { %v1190_v0 = vsel %vm12513_vm2, %v1189_v62, %v1188_v63 }
 0xdf3   :  { %1191 = vrot.lane.b32.xlu0 %v1190_v0, %s10316_s23 }
 0xe65   :  { %v1192_v2 = vpop.permute.xlu0 %1191 }
 0xe66   :  { %8645 = vmatmul.mubr.msk.f32.vlgmr.msra.gmra.mxu0 %vm12512_vm1, %v1192_v2 }
 0xe67   :  { %8659 = vmatpush3.msra.mxu0 %v10532_v3  ;;  %8666 = vmatprep.mubr.msk.f32.mxu0 %vm10314_vm0, %v10313_v1 }
 0xe68   :  { %8660 = vmatprep.subr.mxu0 %v10313_v1 }
 0xe69   :  { %8661 = vmatpush3.msra.mxu0 %v10535_v5 }
 0xe6a   :  { %8662 = vmatprep.subr.mxu0 %v10313_v1 }
 0xe6b   :  { %8663 = vmatpush3.msra.mxu0 %v10538_v7 }
 0xe6c   :  { %8664 = vmatprep.subr.mxu0 %v10313_v1 }
 0xe6d   :  { %8665 = vmatpush3.msra.mxu0 %v10542_v9 }
 0xe6e   :  { %8680 = vmatprep.subr.mxu0 %v10313_v1 }
 0xf26   :  { %v1261_v4 = vpop.f32.mrf.mxu0 }
 0xf27   :  { %v1262_v3 = vadd.f32 %v10578_v12, %v1261_v4 }
 0xf28   :  { %v8646_v13 = vpop.f32.mrf.mxu0 }
 0xf29   :  { %v1266_v14 = vrot.slane %v1262_v3, 3  ;;  %v1267_v15 = vrot.slane %v1262_v3, 4 }
 0xf2b   :  { %1286 = vrot.lane.b32.xlu0 %v1267_v15, %s10315_s28  ;;  %1284 = vrot.lane.b32.xlu1 %v1266_v14, %s10315_s28  ;;  %v1270_v5 = vadd.f32 %v1266_v14, %v10586_v21  ;;  %v1271_v7 = vadd.f32 %v1267_v15, %v10584_v19 }
 0xf2d   :  { %v8109_v16 = vmul.f32 -1.442695, %v1270_v5  ;;  %v8110_v17 = vmul.f32 -1.442695, %v1271_v7 }
 0xf2f   :  { %9352 = vpow2.f32 %v8109_v16 }
 0xf30   :  { %9354 = vpow2.f32 %v8110_v17 }
 0xf3c   :  { %v9353_v9 = vpop.eup %9352 }
 0xf3d   :  { %v9355_v18 = vpop.eup %9354  ;;  %v1278_v20 = vadd.f32 1.0, %v9353_v9 }
 0xf3e   :  { %v1279_v24 = vadd.f32 1.0, %v9355_v18 }
 0xf3f   :  { %9356 = vrcp.f32 %v1278_v20 }
 0xf40   :  { %9358 = vrcp.f32 %v1279_v24 }
 0xf4c   :  { %v9357_v25 = vpop.eup %9356 }
 0xf4d   :  { %v9359_v26 = vpop.eup %9358  ;;  %v1304_v42 = vsub.f32 1.0, %v9357_v25  ;;  %v1320_v48 = vmul.f32 %v9357_v25, %v1316_v43 }
 0xf4e   :  { %v1305_v39 = vsub.f32 1.0, %v9359_v26  ;;  %v1321_v44 = vmul.f32 %v9359_v26, %v1317_v40 }
 0xf9d   :  { %v1287_v27 = vpop.permute.xlu0 %1286  ;;  %v1285_v28 = vpop.permute.xlu1 %1284 }
 0xf9e   :  { %v1291_v29 = vmul.f32 %v9359_v26, %v1287_v27  ;;  %v1290_v30 = vmul.f32 %v9357_v25, %v1285_v28  ;;  %v364_v26 = vld [vmem:[#allocation14 + $0x18] sm:$0xff] }
 0xf9f   :  { %8669 = vmatprep.subr.mxu1 %v364_v26 }
 0xfa0   :  { %1296 = vrot.lane.b32.xlu0 %v1291_v29, %s10315_s28  ;;  %1294 = vrot.lane.b32.xlu1 %v1290_v30, %s10315_s28  ;;  %v363_v29 = vld [vmem:[#allocation14 + $0x10] sm:$0xff] }
0x1012   :  { %v1297_v31 = vpop.permute.xlu0 %1296  ;;  %v1295_v32 = vpop.permute.xlu1 %1294 }
0x1013   :  { %v1301_v33 = vadd.f32 %v1297_v31, %v10584_v19  ;;  %v1300_v36 = vadd.f32 %v1295_v32, %v10586_v21  ;;  %v362_v32 = vld [vmem:[#allocation14 + $0x8] sm:$0xff] }
0x1015   :  { %9360 = vtanh.f32 %v1301_v33 }
0x1016   :  { %9362 = vtanh.f32 %v1300_v36 }
0x1022   :  { %v9361_v37 = vpop.eup %9360 }
0x1023   :  { %v9363_v38 = vpop.eup %9362  ;;  %1310 = vrot.lane.b32.xlu0 %v9361_v37, %s10316_s23 }
0x1024   :  { %1308 = vrot.lane.b32.xlu1 %v9363_v38, %s10316_s23 }
0x1095   :  { %v1311_v41 = vpop.permute.xlu0 %1310 }
0x1096   :  { %v1315_v45 = vmul.f32 %v1311_v41, %v1305_v39  ;;  %v1309_v47 = vpop.permute.xlu1 %1308  ;;  %v361_v41 = vld [vmem:[#allocation14] sm:$0xff] }
0x1097   :  { %v1314_v49 = vmul.f32 %v1309_v47, %v1304_v42  ;;  %v10782_v47 = vld [vmem:[#allocation15 + $0x18] sm:$0xff] }
0x1098   :  { %v10754_v50 = vadd.f32 %v1321_v44, %v1315_v45 }
0x1099   :  { %v10756_v51 = vadd.f32 %v1320_v48, %v1314_v49 }
0x109a   :  { %v1336_v53 = vrot.slane %v10754_v50, 4  ;;  %v1464_v31 = vrot.slane %v10754_v50, 7 }
0x109b   :  { %v1335_v54 = vrot.slane %v10756_v51, 5  ;;  %v1463_v37 = vrot.slane %v10756_v51, 7 }
0x109d   :  { %v1337_v55 = vsel %vm12513_vm2, %v1336_v53, %v1335_v54  ;;  %v10792_v53 = vld [vmem:[#allocation15 + $0x10] sm:$0xff] }
0x109e   :  { %1338 = vrot.lane.b32.xlu1 %v1337_v55, %s10316_s23  ;;  %v10802_v55 = vld [vmem:[#allocation15] sm:$0xff] }
0x1110   :  { %v1339_v56 = vpop.permute.xlu1 %1338 }
0x1111   :  { %8656 = vmatmul.mubr.msk.f32.vlgmr.msra.gmra.mxu1 %vm12512_vm1, %v1339_v56 }
0x1112   :  { %8677 = vmatprep.mubr.msk.f32.mxu1 %vm12512_vm1, %v10545_v10  ;;  %8670 = vmatpush3.msra.mxu1 %v364_v26 }
0x1113   :  { %8671 = vmatprep.subr.mxu1 %v363_v29 }
0x1114   :  { %8672 = vmatpush3.msra.mxu1 %v363_v29 }
0x1115   :  { %8673 = vmatprep.subr.mxu1 %v362_v32 }
0x1116   :  { %8674 = vmatpush3.msra.mxu1 %v362_v32 }
0x1117   :  { %8675 = vmatprep.subr.mxu1 %v361_v41 }
0x1118   :  { %8676 = vmatpush3.msra.mxu1 %v361_v41 }
0x1119   :  { %8678 = vmatmul.mubr.msk.f32.vlgmr.msra.gmra.mxu1 %vm12512_vm1, %v10548_v11  ;;  %8691 = vmatprep.subr.mxu1 %v10313_v1  ;;  %v10797_v11 = vld [vmem:[#allocation15 + $0x8] sm:$0xff] }
0x111a   :  { %8692 = vmatpush3.msra.mxu1 %v10782_v47  ;;  %8699 = vmatprep.mubr.msk.f32.mxu1 %vm10314_vm0, %v10313_v1 }
0x111b   :  { %8693 = vmatprep.subr.mxu1 %v10313_v1 }
0x111c   :  { %8694 = vmatpush3.msra.mxu1 %v10792_v53 }
0x111d   :  { %8695 = vmatprep.subr.mxu1 %v10313_v1 }
0x111e   :  { %8696 = vmatpush3.msra.mxu1 %v10797_v11 }
0x111f   :  { %8697 = vmatprep.subr.mxu1 %v10313_v1 }
0x1120   :  { %8698 = vmatpush3.msra.mxu1 %v10802_v55 }
0x1121   :  { %8713 = vmatprep.subr.mxu1 %v10313_v1 }
0x11d1   :  { %v1408_v57 = vpop.f32.mrf.mxu1 }
0x11d2   :  { %v1409_v58 = vadd.f32 %v10578_v12, %v1408_v57 }
0x11d3   :  { %v8657_v59 = vpop.f32.mrf.mxu1 }
0x11d4   :  { %v1413_v62 = vrot.slane %v1409_v58, 2  ;;  %v1414_v63 = vrot.slane %v1409_v58, 3  ;;  %v10831_v59 = vld [vmem:[#allocation18] ss:$0 sm:$0xff] }
0x11d6   :  { %1433 = vrot.lane.b32.xlu1 %v1414_v63, %s10315_s28  ;;  %1431 = vrot.lane.b32.xlu0 %v1413_v62, %s10315_s28  ;;  %v1417_v0 = vadd.f32 %v1413_v62, %v10586_v21  ;;  %v1418_v2 = vadd.f32 %v1414_v63, %v10584_v19 }
0x11d8   :  { %v8112_v4 = vmul.f32 -1.442695, %v1417_v0  ;;  %v8113_v3 = vmul.f32 -1.442695, %v1418_v2 }
0x11da   :  { %9364 = vpow2.f32 %v8112_v4 }
0x11db   :  { %9366 = vpow2.f32 %v8113_v3  ;;  %v8679_v3 = vpop.f32.mrf.mxu1 }
0x11e7   :  { %v9365_v13 = vpop.eup %9364 }
0x11e8   :  { %v9367_v10 = vpop.eup %9366  ;;  %v1425_v14 = vadd.f32 1.0, %v9365_v13  ;;  %v8117_v13 = vld [vmem:[#allocation17] ss:$0 sm:$0xff] }
0x11e9   :  { %v1426_v15 = vadd.f32 1.0, %v9367_v10  ;;  %v1701_v10 = vpop.f32.mrf.mxu1 }
0x11ea   :  { %9368 = vrcp.f32 %v1425_v14  ;;  %v10836_v14 = vadd.f32 %v8679_v3, %v8117_v13 }
0x11eb   :  { %9370 = vrcp.f32 %v1426_v15  ;;  %v10838_v15 = vadd.f32 %v8117_v13, %v1701_v10 }
0x11f7   :  { %v9369_v12 = vpop.eup %9368 }
0x11f8   :  { %v9371_v5 = vpop.eup %9370  ;;  %v1451_v36 = vsub.f32 1.0, %v9369_v12  ;;  %v1467_v42 = vmul.f32 %v9369_v12, %v1463_v37 }
0x11f9   :  { %v1452_v30 = vsub.f32 1.0, %v9371_v5  ;;  %v1468_v38 = vmul.f32 %v9371_v5, %v1464_v31 }
0x1248   :  { %v1434_v7 = vpop.permute.xlu1 %1433  ;;  %v1432_v16 = vpop.permute.xlu0 %1431 }
0x1249   :  { %v1438_v17 = vmul.f32 %v9371_v5, %v1434_v7  ;;  %v1437_v9 = vmul.f32 %v9369_v12, %v1432_v16 }
0x124b   :  { %1443 = vrot.lane.b32.xlu1 %v1438_v17, %s10315_s28  ;;  %1441 = vrot.lane.b32.xlu0 %v1437_v9, %s10315_s28 }
0x12bd   :  { %v1444_v18 = vpop.permute.xlu1 %1443  ;;  %v1442_v20 = vpop.permute.xlu0 %1441 }
0x12be   :  { %v1448_v24 = vadd.f32 %v1444_v18, %v10584_v19  ;;  %v1447_v25 = vadd.f32 %v1442_v20, %v10586_v21 }
0x12c0   :  { %9372 = vtanh.f32 %v1448_v24 }
0x12c1   :  { %9374 = vtanh.f32 %v1447_v25 }
0x12cd   :  { %v9373_v27 = vpop.eup %9372 }
0x12ce   :  { %v9375_v28 = vpop.eup %9374  ;;  %1457 = vrot.lane.b32.xlu1 %v9373_v27, %s10316_s23 }
0x12cf   :  { %1455 = vrot.lane.b32.xlu0 %v9375_v28, %s10316_s23 }
0x1340   :  { %v1458_v33 = vpop.permute.xlu1 %1457 }
0x1341   :  { %v1462_v39 = vmul.f32 %v1458_v33, %v1452_v30  ;;  %v1456_v40 = vpop.permute.xlu0 %1455 }
0x1342   :  { %v1461_v43 = vmul.f32 %v1456_v40, %v1451_v36 }
0x1343   :  { %v10778_v44 = vadd.f32 %v1468_v38, %v1462_v39 }
0x1344   :  { %v10780_v45 = vadd.f32 %v1467_v42, %v1461_v43 }
0x1345   :  { %v1483_v48 = vrot.slane %v10778_v44, 5 }
0x1346   :  { %v1482_v49 = vrot.slane %v10780_v45, 6 }
0x1348   :  { %v1484_v54 = vsel %vm12513_vm2, %v1483_v48, %v1482_v49 }
0x1349   :  { %1485 = vrot.lane.b32.xlu0 %v1484_v54, %s10316_s23 }
0x13bb   :  { %v1486_v56 = vpop.permute.xlu0 %1485 }
0x13bc   :  { %8667 = vmatmul.mubr.msk.f32.vlgmr.msra.gmra.mxu0 %vm12512_vm1, %v1486_v56 }
0x13bd   :  { %8681 = vmatpush3.msra.mxu0 %v10782_v47  ;;  %8688 = vmatprep.mubr.msk.f32.mxu0 %vm10314_vm0, %v10313_v1 }
0x13be   :  { %8682 = vmatprep.subr.mxu0 %v10313_v1 }
0x13bf   :  { %8683 = vmatpush3.msra.mxu0 %v10792_v53 }
0x13c0   :  { %8684 = vmatprep.subr.mxu0 %v10313_v1 }
0x13c1   :  { %8685 = vmatpush3.msra.mxu0 %v10797_v11 }
0x13c2   :  { %8686 = vmatprep.subr.mxu0 %v10313_v1 }
0x13c3   :  { %8687 = vmatpush3.msra.mxu0 %v10802_v55 }
0x13c4   :  { %8689 = vmatmul.mubr.f32.vlgmr.msra.gmra.mxu0 %v10313_v1  ;;  %8702 = vmatprep.subr.mxu0 %v10313_v1 }
0x13c5   :  { %8703 = vmatpush3.msra.mxu0 %v10782_v47  ;;  %8710 = vmatprep.mubr.msk.f32.mxu0 %vm10314_vm0, %v10313_v1 }
0x13c6   :  { %8704 = vmatprep.subr.mxu0 %v10313_v1 }
0x13c7   :  { %8705 = vmatpush3.msra.mxu0 %v10792_v53 }
0x13c8   :  { %8706 = vmatprep.subr.mxu0 %v10313_v1 }
0x13c9   :  { %8707 = vmatpush3.msra.mxu0 %v10797_v11 }
0x13ca   :  { %8708 = vmatprep.subr.mxu0 %v10313_v1 }
0x13cb   :  { %8709 = vmatpush3.msra.mxu0 %v10802_v55 }
0x13cc   :  { %8724 = vmatprep.subr.mxu0 %v10313_v1 }
0x147c   :  { %v10829_v57 = vpop.f32.mrf.mxu0 }
0x147e   :  { %v8668_v58 = vpop.f32.mrf.mxu0 }
0x1484   :  { %v1782_v62 = vpop.f32.mrf.mxu0 }
0x1485   :  { %v1783_v63 = vadd.f32 %v10831_v59, %v1782_v62 }
0x1486   :  { %v8690_v0 = vpop.f32.mrf.mxu0 }
0x1487   :  { %v1787_v2 = vrot.slane %v1783_v63, 1  ;;  %v1788_v4 = vrot.slane %v1783_v63, 2 }
0x1489   :  { %1807 = vrot.lane.b32.xlu0 %v1788_v4, %s10315_s28  ;;  %1805 = vrot.lane.b32.xlu1 %v1787_v2, %s10315_s28  ;;  %v1792_v12 = vadd.f32 %v1788_v4, %v10836_v14  ;;  %v1791_v5 = vadd.f32 %v1787_v2, %v10838_v15 }
0x148b   :  { %v8122_v7 = vmul.f32 -1.442695, %v1792_v12  ;;  %v8121_v16 = vmul.f32 -1.442695, %v1791_v5 }
0x148d   :  { %9376 = vpow2.f32 %v8122_v7 }
0x148e   :  { %9378 = vpow2.f32 %v8121_v16 }
0x149a   :  { %v9377_v17 = vpop.eup %9376 }
0x149b   :  { %v9379_v9 = vpop.eup %9378  ;;  %v1800_v18 = vadd.f32 1.0, %v9377_v17 }
0x149c   :  { %v1799_v20 = vadd.f32 1.0, %v9379_v9 }
0x149d   :  { %9380 = vrcp.f32 %v1800_v18 }
0x149e   :  { %9382 = vrcp.f32 %v1799_v20 }
0x14aa   :  { %v9381_v24 = vpop.eup %9380 }
0x14ab   :  { %v9383_v25 = vpop.eup %9382  ;;  %v1826_v38 = vsub.f32 1.0, %v9381_v24  ;;  %v1838_v41 = vmul.f32 0.0, %v9381_v24 }
0x14ac   :  { %v1825_v40 = vsub.f32 1.0, %v9383_v25  ;;  %v1837_v48 = vmul.f32 0.0, %v9383_v25 }
0x14fb   :  { %v1808_v26 = vpop.permute.xlu0 %1807  ;;  %v1806_v27 = vpop.permute.xlu1 %1805 }
0x14fc   :  { %v1812_v28 = vmul.f32 %v9381_v24, %v1808_v26  ;;  %v1811_v29 = vmul.f32 %v9383_v25, %v1806_v27 }
0x14fe   :  { %1817 = vrot.lane.b32.xlu0 %v1812_v28, %s10315_s28  ;;  %1815 = vrot.lane.b32.xlu1 %v1811_v29, %s10315_s28 }
0x1570   :  { %v1818_v30 = vpop.permute.xlu0 %1817  ;;  %v1816_v31 = vpop.permute.xlu1 %1815 }
0x1571   :  { %v1822_v32 = vadd.f32 %v1818_v30, %v10836_v14  ;;  %v1821_v33 = vadd.f32 %v1816_v31, %v10838_v15 }
0x1573   :  { %9384 = vtanh.f32 %v1822_v32 }
0x1574   :  { %9386 = vtanh.f32 %v1821_v33 }
0x1580   :  { %v9385_v36 = vpop.eup %9384 }
0x1581   :  { %v9387_v37 = vpop.eup %9386  ;;  %1831 = vrot.lane.b32.xlu0 %v9385_v36, %s10316_s23 }
0x1582   :  { %1829 = vrot.lane.b32.xlu1 %v9387_v37, %s10316_s23 }
0x15f3   :  { %v1832_v39 = vpop.permute.xlu0 %1831 }
0x15f4   :  { %v1836_v42 = vmul.f32 %v1832_v39, %v1826_v38  ;;  %v1830_v43 = vpop.permute.xlu1 %1829 }
0x15f5   :  { %v1835_v49 = vmul.f32 %v1830_v43, %v1825_v40 }
0x15f6   :  { %v10848_v54 = vadd.f32 %v1838_v41, %v1836_v42 }
0x15f7   :  { %v10850_v56 = vadd.f32 %v1837_v48, %v1835_v49 }
0x15f8   :  { %v1847_v58 = vrot.slane %v10848_v54, 6  ;;  %v1975_v39 = vrot.slane %v10848_v54, 1 }
0x15f9   :  { %v1846_v62 = vrot.slane %v10850_v56, 7  ;;  %v1974_v42 = vrot.slane %v10850_v56, 1 }
0x15fb   :  { %v1848_v63 = vsel %vm12513_vm2, %v1847_v58, %v1846_v62 }
0x15fc   :  { %1849 = vrot.lane.b32.xlu1 %v1848_v63, %s10316_s23 }
0x166e   :  { %v1850_v0 = vpop.permute.xlu1 %1849 }
0x166f   :  { %8700 = vmatmul.mubr.msk.f32.vlgmr.msra.gmra.mxu1 %vm12512_vm1, %v1850_v0 }
0x1670   :  { %8714 = vmatpush3.msra.mxu1 %v10782_v47  ;;  %8721 = vmatprep.mubr.msk.f32.mxu1 %vm10314_vm0, %v10313_v1 }
0x1671   :  { %8715 = vmatprep.subr.mxu1 %v10313_v1 }
0x1672   :  { %8716 = vmatpush3.msra.mxu1 %v10792_v53 }
0x1673   :  { %8717 = vmatprep.subr.mxu1 %v10313_v1 }
0x1674   :  { %8718 = vmatpush3.msra.mxu1 %v10797_v11 }
0x1675   :  { %8719 = vmatprep.subr.mxu1 %v10313_v1 }
0x1676   :  { %8720 = vmatpush3.msra.mxu1 %v10802_v55 }
0x1677   :  { %8735 = vmatprep.subr.mxu1 %v10313_v1 }
0x172f   :  { %v1919_v2 = vpop.f32.mrf.mxu1 }
0x1730   :  { %v1920_v4 = vadd.f32 %v10831_v59, %v1919_v2 }
0x1731   :  { %v8701_v3 = vpop.f32.mrf.mxu1 }
0x1732   :  { %v1924_v13 = vrot.slane %v1920_v4, 2  ;;  %v1925_v10 = vrot.slane %v1920_v4, 3 }
0x1734   :  { %1944 = vrot.lane.b32.xlu1 %v1925_v10, %s10315_s28  ;;  %1942 = vrot.lane.b32.xlu0 %v1924_v13, %s10315_s28  ;;  %v1928_v12 = vadd.f32 %v1924_v13, %v10838_v15  ;;  %v1929_v5 = vadd.f32 %v1925_v10, %v10836_v14 }
0x1736   :  { %v8124_v7 = vmul.f32 -1.442695, %v1928_v12  ;;  %v8125_v16 = vmul.f32 -1.442695, %v1929_v5 }
0x1738   :  { %9388 = vpow2.f32 %v8124_v7 }
0x1739   :  { %9390 = vpow2.f32 %v8125_v16 }
0x1745   :  { %v9389_v17 = vpop.eup %9388 }
0x1746   :  { %v9391_v9 = vpop.eup %9390  ;;  %v1936_v18 = vadd.f32 1.0, %v9389_v17 }
0x1747   :  { %v1937_v20 = vadd.f32 1.0, %v9391_v9 }
0x1748   :  { %9392 = vrcp.f32 %v1936_v18 }
0x1749   :  { %9394 = vrcp.f32 %v1937_v20 }
0x1755   :  { %v9393_v24 = vpop.eup %9392 }
0x1756   :  { %v9395_v25 = vpop.eup %9394  ;;  %v1962_v41 = vsub.f32 1.0, %v9393_v24  ;;  %v1978_v58 = vmul.f32 %v9393_v24, %v1974_v42 }
0x1757   :  { %v1963_v38 = vsub.f32 1.0, %v9395_v25  ;;  %v1979_v43 = vmul.f32 %v9395_v25, %v1975_v39 }
0x17a6   :  { %v1945_v26 = vpop.permute.xlu1 %1944  ;;  %v1943_v27 = vpop.permute.xlu0 %1942 }
0x17a7   :  { %v1949_v28 = vmul.f32 %v9395_v25, %v1945_v26  ;;  %v1948_v29 = vmul.f32 %v9393_v24, %v1943_v27 }
0x17a9   :  { %1954 = vrot.lane.b32.xlu1 %v1949_v28, %s10315_s28  ;;  %1952 = vrot.lane.b32.xlu0 %v1948_v29, %s10315_s28 }
0x181b   :  { %v1955_v30 = vpop.permute.xlu1 %1954  ;;  %v1953_v31 = vpop.permute.xlu0 %1952 }
0x181c   :  { %v1959_v32 = vadd.f32 %v1955_v30, %v10836_v14  ;;  %v1958_v33 = vadd.f32 %v1953_v31, %v10838_v15 }
0x181e   :  { %9396 = vtanh.f32 %v1959_v32 }
0x181f   :  { %9398 = vtanh.f32 %v1958_v33 }
0x182b   :  { %v9397_v36 = vpop.eup %9396 }
0x182c   :  { %v9399_v37 = vpop.eup %9398  ;;  %1968 = vrot.lane.b32.xlu1 %v9397_v36, %s10316_s23 }
0x182d   :  { %1966 = vrot.lane.b32.xlu0 %v9399_v37, %s10316_s23 }
0x189e   :  { %v1969_v40 = vpop.permute.xlu1 %1968 }
0x189f   :  { %v1973_v48 = vmul.f32 %v1969_v40, %v1963_v38  ;;  %v1967_v49 = vpop.permute.xlu0 %1966 }
0x18a0   :  { %v1972_v62 = vmul.f32 %v1967_v49, %v1962_v41 }
0x18a1   :  { %v10880_v63 = vadd.f32 %v1979_v43, %v1973_v48 }
0x18a2   :  { %v10882_v0 = vadd.f32 %v1978_v58, %v1972_v62 }
0x18a3   :  { %v1988_v2 = vrot.slane %v10880_v63, 5  ;;  %v2116_v43 = vrot.slane %v10880_v63, 1 }
0x18a4   :  { %v1987_v4 = vrot.slane %v10882_v0, 6  ;;  %v2115_v58 = vrot.slane %v10882_v0, 1 }
0x18a6   :  { %v1989_v3 = vsel %vm12513_vm2, %v1988_v2, %v1987_v4 }
0x18a7   :  { %1990 = vrot.lane.b32.xlu0 %v1989_v3, %s10316_s23 }
0x1919   :  { %v1991_v13 = vpop.permute.xlu0 %1990 }
0x191a   :  { %8711 = vmatmul.mubr.msk.f32.vlgmr.msra.gmra.mxu0 %vm12512_vm1, %v1991_v13 }
0x191b   :  { %8725 = vmatpush3.msra.mxu0 %v10782_v47  ;;  %8732 = vmatprep.mubr.msk.f32.mxu0 %vm10314_vm0, %v10313_v1 }
0x191c   :  { %8726 = vmatprep.subr.mxu0 %v10313_v1 }
0x191d   :  { %8727 = vmatpush3.msra.mxu0 %v10792_v53 }
0x191e   :  { %8728 = vmatprep.subr.mxu0 %v10313_v1 }
0x191f   :  { %8729 = vmatpush3.msra.mxu0 %v10797_v11 }
0x1920   :  { %8730 = vmatprep.subr.mxu0 %v10313_v1 }
0x1921   :  { %8731 = vmatpush3.msra.mxu0 %v10802_v55 }
0x1922   :  { %8746 = vmatprep.subr.mxu0 %v10313_v1 }
0x19da   :  { %v2060_v10 = vpop.f32.mrf.mxu0 }
0x19db   :  { %v2061_v12 = vadd.f32 %v10831_v59, %v2060_v10 }
0x19dc   :  { %v8712_v5 = vpop.f32.mrf.mxu0 }
0x19dd   :  { %v2065_v7 = vrot.slane %v2061_v12, 3  ;;  %v2066_v16 = vrot.slane %v2061_v12, 4 }
0x19df   :  { %2085 = vrot.lane.b32.xlu0 %v2066_v16, %s10315_s28  ;;  %2083 = vrot.lane.b32.xlu1 %v2065_v7, %s10315_s28  ;;  %v2069_v17 = vadd.f32 %v2065_v7, %v10838_v15  ;;  %v2070_v9 = vadd.f32 %v2066_v16, %v10836_v14 }
0x19e1   :  { %v8127_v18 = vmul.f32 -1.442695, %v2069_v17  ;;  %v8128_v20 = vmul.f32 -1.442695, %v2070_v9 }
0x19e3   :  { %9400 = vpow2.f32 %v8127_v18 }
0x19e4   :  { %9402 = vpow2.f32 %v8128_v20 }
0x19f0   :  { %v9401_v24 = vpop.eup %9400 }
0x19f1   :  { %v9403_v25 = vpop.eup %9402  ;;  %v2077_v26 = vadd.f32 1.0, %v9401_v24 }
0x19f2   :  { %v2078_v27 = vadd.f32 1.0, %v9403_v25 }
0x19f3   :  { %9404 = vrcp.f32 %v2077_v26 }
0x19f4   :  { %9406 = vrcp.f32 %v2078_v27 }
0x1a00   :  { %v9405_v28 = vpop.eup %9404 }
0x1a01   :  { %v9407_v29 = vpop.eup %9406  ;;  %v2103_v49 = vsub.f32 1.0, %v9405_v28  ;;  %v2119_v3 = vmul.f32 %v9405_v28, %v2115_v58 }
0x1a02   :  { %v2104_v42 = vsub.f32 1.0, %v9407_v29  ;;  %v2120_v62 = vmul.f32 %v9407_v29, %v2116_v43 }
0x1a51   :  { %v2086_v30 = vpop.permute.xlu0 %2085  ;;  %v2084_v31 = vpop.permute.xlu1 %2083 }
0x1a52   :  { %v2090_v32 = vmul.f32 %v9407_v29, %v2086_v30  ;;  %v2089_v33 = vmul.f32 %v9405_v28, %v2084_v31 }
0x1a54   :  { %2095 = vrot.lane.b32.xlu0 %v2090_v32, %s10315_s28  ;;  %2093 = vrot.lane.b32.xlu1 %v2089_v33, %s10315_s28 }
0x1ac6   :  { %v2096_v36 = vpop.permute.xlu0 %2095  ;;  %v2094_v37 = vpop.permute.xlu1 %2093 }
0x1ac7   :  { %v2100_v38 = vadd.f32 %v2096_v36, %v10836_v14  ;;  %v2099_v39 = vadd.f32 %v2094_v37, %v10838_v15 }
0x1ac9   :  { %9408 = vtanh.f32 %v2100_v38 }
0x1aca   :  { %9410 = vtanh.f32 %v2099_v39 }
0x1ad6   :  { %v9409_v40 = vpop.eup %9408 }
0x1ad7   :  { %v9411_v41 = vpop.eup %9410  ;;  %2109 = vrot.lane.b32.xlu0 %v9409_v40, %s10316_s23 }
0x1ad8   :  { %2107 = vrot.lane.b32.xlu1 %v9411_v41, %s10316_s23 }
0x1b49   :  { %v2110_v48 = vpop.permute.xlu0 %2109 }
0x1b4a   :  { %v2114_v2 = vmul.f32 %v2110_v48, %v2104_v42  ;;  %v2108_v4 = vpop.permute.xlu1 %2107 }
0x1b4b   :  { %v2113_v13 = vmul.f32 %v2108_v4, %v2103_v49 }
0x1b4c   :  { %v10912_v10 = vadd.f32 %v2120_v62, %v2114_v2 }
0x1b4d   :  { %v10914_v12 = vadd.f32 %v2119_v3, %v2113_v13 }
0x1b4e   :  { %v2129_v5 = vrot.slane %v10912_v10, 4  ;;  %v2257_v4 = vrot.slane %v10912_v10, 1 }
0x1b4f   :  { %v2128_v7 = vrot.slane %v10914_v12, 5 }
0x1b51   :  { %v2130_v16 = vsel %vm12513_vm2, %v2129_v5, %v2128_v7  ;;  %v2256_v5 = vrot.slane %v10914_v12, 1 }
0x1b52   :  { %2131 = vrot.lane.b32.xlu1 %v2130_v16, %s10316_s23 }
0x1bc4   :  { %v2132_v17 = vpop.permute.xlu1 %2131 }
0x1bc5   :  { %8722 = vmatmul.mubr.msk.f32.vlgmr.msra.gmra.mxu1 %vm12512_vm1, %v2132_v17 }
0x1bc6   :  { %8736 = vmatpush3.msra.mxu1 %v10782_v47  ;;  %8743 = vmatprep.mubr.msk.f32.mxu1 %vm10314_vm0, %v10313_v1 }
0x1bc7   :  { %8737 = vmatprep.subr.mxu1 %v10313_v1 }
0x1bc8   :  { %8738 = vmatpush3.msra.mxu1 %v10792_v53 }
0x1bc9   :  { %8739 = vmatprep.subr.mxu1 %v10313_v1 }
0x1bca   :  { %8740 = vmatpush3.msra.mxu1 %v10797_v11 }
0x1bcb   :  { %8741 = vmatprep.subr.mxu1 %v10313_v1 }
0x1bcc   :  { %8742 = vmatpush3.msra.mxu1 %v10802_v55 }
0x1bcd   :  { %8757 = vmatprep.subr.mxu1 %v10313_v1 }
0x1c85   :  { %v2201_v9 = vpop.f32.mrf.mxu1 }
0x1c86   :  { %v2202_v18 = vadd.f32 %v10831_v59, %v2201_v9 }
0x1c87   :  { %v8723_v20 = vpop.f32.mrf.mxu1 }
0x1c88   :  { %v2206_v24 = vrot.slane %v2202_v18, 4  ;;  %v2207_v25 = vrot.slane %v2202_v18, 5 }
0x1c8a   :  { %2226 = vrot.lane.b32.xlu1 %v2207_v25, %s10315_s28  ;;  %2224 = vrot.lane.b32.xlu0 %v2206_v24, %s10315_s28  ;;  %v2210_v26 = vadd.f32 %v2206_v24, %v10838_v15  ;;  %v2211_v27 = vadd.f32 %v2207_v25, %v10836_v14 }
0x1c8c   :  { %v8130_v28 = vmul.f32 -1.442695, %v2210_v26  ;;  %v8131_v29 = vmul.f32 -1.442695, %v2211_v27 }
0x1c8e   :  { %9412 = vpow2.f32 %v8130_v28 }
0x1c8f   :  { %9414 = vpow2.f32 %v8131_v29 }
0x1c9b   :  { %v9413_v30 = vpop.eup %9412 }
0x1c9c   :  { %v9415_v31 = vpop.eup %9414  ;;  %v2218_v32 = vadd.f32 1.0, %v9413_v30 }
0x1c9d   :  { %v2219_v33 = vadd.f32 1.0, %v9415_v31 }
0x1c9e   :  { %9416 = vrcp.f32 %v2218_v32 }
0x1c9f   :  { %9418 = vrcp.f32 %v2219_v33 }
0x1cab   :  { %v9417_v36 = vpop.eup %9416 }
0x1cac   :  { %v9419_v37 = vpop.eup %9418  ;;  %v2244_v13 = vsub.f32 1.0, %v9417_v36  ;;  %v2260_v9 = vmul.f32 %v9417_v36, %v2256_v5 }
0x1cad   :  { %v2245_v2 = vsub.f32 1.0, %v9419_v37  ;;  %v2261_v7 = vmul.f32 %v9419_v37, %v2257_v4 }
0x1cfc   :  { %v2227_v38 = vpop.permute.xlu1 %2226  ;;  %v2225_v39 = vpop.permute.xlu0 %2224 }
0x1cfd   :  { %v2231_v40 = vmul.f32 %v9419_v37, %v2227_v38  ;;  %v2230_v41 = vmul.f32 %v9417_v36, %v2225_v39 }
0x1cff   :  { %2236 = vrot.lane.b32.xlu1 %v2231_v40, %s10315_s28  ;;  %2234 = vrot.lane.b32.xlu0 %v2230_v41, %s10315_s28 }
0x1d71   :  { %v2237_v42 = vpop.permute.xlu1 %2236  ;;  %v2235_v43 = vpop.permute.xlu0 %2234 }
0x1d72   :  { %v2241_v48 = vadd.f32 %v2237_v42, %v10836_v14  ;;  %v2240_v49 = vadd.f32 %v2235_v43, %v10838_v15 }
0x1d74   :  { %9420 = vtanh.f32 %v2241_v48 }
0x1d75   :  { %9422 = vtanh.f32 %v2240_v49 }
0x1d81   :  { %v9421_v58 = vpop.eup %9420 }
0x1d82   :  { %v9423_v62 = vpop.eup %9422  ;;  %2250 = vrot.lane.b32.xlu1 %v9421_v58, %s10316_s23 }
0x1d83   :  { %2248 = vrot.lane.b32.xlu0 %v9423_v62, %s10316_s23 }
0x1df4   :  { %v2251_v3 = vpop.permute.xlu1 %2250 }
0x1df5   :  { %v2255_v16 = vmul.f32 %v2251_v3, %v2245_v2  ;;  %v2249_v17 = vpop.permute.xlu0 %2248 }
0x1df6   :  { %v2254_v18 = vmul.f32 %v2249_v17, %v2244_v13 }
0x1df7   :  { %v10944_v20 = vadd.f32 %v2261_v7, %v2255_v16 }
0x1df8   :  { %v10946_v24 = vadd.f32 %v2260_v9, %v2254_v18 }
0x1df9   :  { %v2270_v25 = vrot.slane %v10944_v20, 3  ;;  %v2398_v18 = vrot.slane %v10944_v20, 1 }
0x1dfa   :  { %v2269_v26 = vrot.slane %v10946_v24, 4 }
0x1dfc   :  { %v2271_v27 = vsel %vm12513_vm2, %v2270_v25, %v2269_v26 }
0x1dfd   :  { %2272 = vrot.lane.b32.xlu0 %v2271_v27, %s10316_s23  ;;  %v2397_v27 = vrot.slane %v10946_v24, 1 }
0x1e6f   :  { %v2273_v28 = vpop.permute.xlu0 %2272 }
0x1e70   :  { %8733 = vmatmul.mubr.msk.f32.vlgmr.msra.gmra.mxu0 %vm12512_vm1, %v2273_v28 }
0x1e71   :  { %8747 = vmatpush3.msra.mxu0 %v10782_v47  ;;  %8754 = vmatprep.mubr.msk.f32.mxu0 %vm10314_vm0, %v10313_v1 }
0x1e72   :  { %8748 = vmatprep.subr.mxu0 %v10313_v1 }
0x1e73   :  { %8749 = vmatpush3.msra.mxu0 %v10792_v53 }
0x1e74   :  { %8750 = vmatprep.subr.mxu0 %v10313_v1 }
0x1e75   :  { %8751 = vmatpush3.msra.mxu0 %v10797_v11 }
0x1e76   :  { %8752 = vmatprep.subr.mxu0 %v10313_v1 }
0x1e77   :  { %8753 = vmatpush3.msra.mxu0 %v10802_v55 }
0x1f30   :  { %v2342_v29 = vpop.f32.mrf.mxu0 }
0x1f31   :  { %v2343_v30 = vadd.f32 %v10831_v59, %v2342_v29 }
0x1f32   :  { %v8734_v31 = vpop.f32.mrf.mxu0 }
0x1f33   :  { %v2347_v32 = vrot.slane %v2343_v30, 5  ;;  %v2348_v33 = vrot.slane %v2343_v30, 6 }
0x1f35   :  { %2367 = vrot.lane.b32.xlu0 %v2348_v33, %s10315_s28  ;;  %2365 = vrot.lane.b32.xlu1 %v2347_v32, %s10315_s28  ;;  %v2351_v36 = vadd.f32 %v2347_v32, %v10838_v15  ;;  %v2352_v37 = vadd.f32 %v2348_v33, %v10836_v14 }
0x1f37   :  { %v8133_v38 = vmul.f32 -1.442695, %v2351_v36  ;;  %v8134_v39 = vmul.f32 -1.442695, %v2352_v37 }
0x1f39   :  { %9424 = vpow2.f32 %v8133_v38 }
0x1f3a   :  { %9426 = vpow2.f32 %v8134_v39 }
0x1f46   :  { %v9425_v40 = vpop.eup %9424 }
0x1f47   :  { %v9427_v41 = vpop.eup %9426  ;;  %v2359_v42 = vadd.f32 1.0, %v9425_v40 }
0x1f48   :  { %v2360_v43 = vadd.f32 1.0, %v9427_v41 }
0x1f49   :  { %9428 = vrcp.f32 %v2359_v42 }
0x1f4a   :  { %9430 = vrcp.f32 %v2360_v43 }
0x1f56   :  { %v9429_v48 = vpop.eup %9428 }
0x1f57   :  { %v9431_v49 = vpop.eup %9430  ;;  %v2385_v26 = vsub.f32 1.0, %v9429_v48  ;;  %v2401_v31 = vmul.f32 %v9429_v48, %v2397_v27 }
0x1f58   :  { %v2386_v9 = vsub.f32 1.0, %v9431_v49  ;;  %v2402_v28 = vmul.f32 %v9431_v49, %v2398_v18 }
0x1fa7   :  { %v2368_v58 = vpop.permute.xlu0 %2367  ;;  %v2366_v62 = vpop.permute.xlu1 %2365 }
0x1fa8   :  { %v2372_v2 = vmul.f32 %v9431_v49, %v2368_v58  ;;  %v2371_v4 = vmul.f32 %v9429_v48, %v2366_v62 }
0x1faa   :  { %2377 = vrot.lane.b32.xlu0 %v2372_v2, %s10315_s28  ;;  %2375 = vrot.lane.b32.xlu1 %v2371_v4, %s10315_s28 }
0x201c   :  { %v2378_v3 = vpop.permute.xlu0 %2377  ;;  %v2376_v13 = vpop.permute.xlu1 %2375 }
0x201d   :  { %v2382_v5 = vadd.f32 %v2378_v3, %v10836_v14  ;;  %v2381_v7 = vadd.f32 %v2376_v13, %v10838_v15 }
0x201f   :  { %9432 = vtanh.f32 %v2382_v5 }
0x2020   :  { %9434 = vtanh.f32 %v2381_v7 }
0x202c   :  { %v9433_v16 = vpop.eup %9432 }
0x202d   :  { %v9435_v17 = vpop.eup %9434  ;;  %2391 = vrot.lane.b32.xlu0 %v9433_v16, %s10316_s23 }
0x202e   :  { %2389 = vrot.lane.b32.xlu1 %v9435_v17, %s10316_s23 }
0x209f   :  { %v2392_v25 = vpop.permute.xlu0 %2391 }
0x20a0   :  { %v2396_v29 = vmul.f32 %v2392_v25, %v2386_v9  ;;  %v2390_v30 = vpop.permute.xlu1 %2389 }
0x20a1   :  { %v2395_v32 = vmul.f32 %v2390_v30, %v2385_v26 }
0x20a2   :  { %v10975_v33 = vadd.f32 %v2402_v28, %v2396_v29 }
0x20a3   :  { %v10977_v36 = vadd.f32 %v2401_v31, %v2395_v32 }
0x20a4   :  { %v2411_v37 = vrot.slane %v10975_v33, 2  ;;  %v2539_v30 = vrot.slane %v10975_v33, 1 }
0x20a5   :  { %v2410_v38 = vrot.slane %v10977_v36, 3 }
0x20a7   :  { %v2412_v39 = vsel %vm12513_vm2, %v2411_v37, %v2410_v38  ;;  %v2538_v37 = vrot.slane %v10977_v36, 1 }
0x20a8   :  { %2413 = vrot.lane.b32.xlu1 %v2412_v39, %s10316_s23 }
0x211a   :  { %v2414_v40 = vpop.permute.xlu1 %2413 }
0x211b   :  { %8744 = vmatmul.mubr.msk.f32.vlgmr.msra.gmra.mxu1 %vm12512_vm1, %v2414_v40 }
0x211c   :  { %8758 = vmatpush3.msra.mxu1 %v10782_v47  ;;  %8765 = vmatprep.mubr.msk.f32.mxu1 %vm10314_vm0, %v10313_v1 }
0x211d   :  { %8759 = vmatprep.subr.mxu1 %v10313_v1 }
0x211e   :  { %8760 = vmatpush3.msra.mxu1 %v10792_v53 }
0x211f   :  { %8761 = vmatprep.subr.mxu1 %v10313_v1 }
0x2120   :  { %8762 = vmatpush3.msra.mxu1 %v10797_v11 }
0x2121   :  { %8763 = vmatprep.subr.mxu1 %v10313_v1 }
0x2122   :  { %8764 = vmatpush3.msra.mxu1 %v10802_v55 }
0x2123   :  { %8787 = vmatprep.subr.mxu1 %v10313_v1 }
0x21db   :  { %v2483_v41 = vpop.f32.mrf.mxu1 }
0x21dc   :  { %v2484_v47 = vadd.f32 %v10831_v59, %v2483_v41 }
0x21dd   :  { %v8745_v42 = vpop.f32.mrf.mxu1 }
0x21de   :  { %v2488_v43 = vrot.slane %v2484_v47, 6  ;;  %v2489_v48 = vrot.slane %v2484_v47, 7 }
0x21e0   :  { %2508 = vrot.lane.b32.xlu1 %v2489_v48, %s10315_s28  ;;  %2506 = vrot.lane.b32.xlu0 %v2488_v43, %s10315_s28  ;;  %v2492_v53 = vadd.f32 %v2488_v43, %v10838_v15  ;;  %v2493_v11 = vadd.f32 %v2489_v48, %v10836_v14 }
0x21e2   :  { %v8136_v49 = vmul.f32 -1.442695, %v2492_v53  ;;  %v8137_v58 = vmul.f32 -1.442695, %v2493_v11 }
0x21e4   :  { %9436 = vpow2.f32 %v8136_v49 }
0x21e5   :  { %9438 = vpow2.f32 %v8137_v58 }
0x21f1   :  { %v9437_v55 = vpop.eup %9436 }
0x21f2   :  { %v9439_v62 = vpop.eup %9438  ;;  %v2500_v2 = vadd.f32 1.0, %v9437_v55 }
0x21f3   :  { %v2501_v4 = vadd.f32 1.0, %v9439_v62 }
0x21f4   :  { %9440 = vrcp.f32 %v2500_v2 }
0x21f5   :  { %9442 = vrcp.f32 %v2501_v4 }
0x2201   :  { %v9441_v3 = vpop.eup %9440 }
0x2202   :  { %v9443_v13 = vpop.eup %9442  ;;  %v2526_v32 = vsub.f32 1.0, %v9441_v3  ;;  %v2542_v41 = vmul.f32 %v9441_v3, %v2538_v37 }
0x2203   :  { %v2527_v29 = vsub.f32 1.0, %v9443_v13  ;;  %v2543_v38 = vmul.f32 %v9443_v13, %v2539_v30 }
0x2252   :  { %v2509_v5 = vpop.permute.xlu1 %2508  ;;  %v2507_v7 = vpop.permute.xlu0 %2506 }
0x2253   :  { %v2513_v16 = vmul.f32 %v9443_v13, %v2509_v5  ;;  %v2512_v17 = vmul.f32 %v9441_v3, %v2507_v7 }
0x2255   :  { %2518 = vrot.lane.b32.xlu1 %v2513_v16, %s10315_s28  ;;  %2516 = vrot.lane.b32.xlu0 %v2512_v17, %s10315_s28 }
0x22c7   :  { %v2519_v9 = vpop.permute.xlu1 %2518  ;;  %v2517_v18 = vpop.permute.xlu0 %2516 }
0x22c8   :  { %v2523_v25 = vadd.f32 %v2519_v9, %v10836_v14  ;;  %v2522_v26 = vadd.f32 %v2517_v18, %v10838_v15 }
0x22ca   :  { %9444 = vtanh.f32 %v2523_v25 }
0x22cb   :  { %9446 = vtanh.f32 %v2522_v26 }
0x22d7   :  { %v9445_v27 = vpop.eup %9444 }
0x22d8   :  { %v9447_v28 = vpop.eup %9446  ;;  %2532 = vrot.lane.b32.xlu1 %v9445_v27, %s10316_s23 }
0x22d9   :  { %2530 = vrot.lane.b32.xlu0 %v9447_v28, %s10316_s23 }
0x234a   :  { %v2533_v31 = vpop.permute.xlu1 %2532 }
0x234b   :  { %v2537_v39 = vmul.f32 %v2533_v31, %v2527_v29  ;;  %v2531_v40 = vpop.permute.xlu0 %2530 }
0x234c   :  { %v2536_v47 = vmul.f32 %v2531_v40, %v2526_v32 }
0x234d   :  { %v11007_v42 = vadd.f32 %v2543_v38, %v2537_v39  ;;  %v9880_v38 = vld [vmem:[#allocation12] ss:$0 sm:$0xff] }
0x234e   :  { %v11009_v43 = vadd.f32 %v2542_v41, %v2536_v47  ;;  %v1556_v39 = vadd.f32 %v9880_v38, %v10829_v57 }
0x234f   :  { %v2552_v48 = vrot.slane %v11007_v42, 1 }
0x2350   :  { %v2551_v53 = vrot.slane %v11009_v43, 2  ;;  %v1560_v47 = vrot.slane %v1556_v39, 1  ;;  %v2678_v57 = vrot.slane %v11009_v43, 1 }
0x2352   :  { %v2553_v11 = vsel %vm12513_vm2, %v2552_v48, %v2551_v53  ;;  %v1564_v53 = vadd.f32 %v1560_v47, %v10586_v21 }
0x2353   :  { %2554 = vrot.lane.b32.xlu0 %v2553_v11, %s10316_s23 }
0x2354   :  { %v8115_v11 = vmul.f32 -1.442695, %v1564_v53 }
0x23c5   :  { %v2555_v49 = vpop.permute.xlu0 %2554 }
0x23c6   :  { %8755 = vmatmul.mubr.msk.f32.vlgmr.msra.gmra.mxu0 %vm12512_vm1, %v2555_v49 }
0x2486   :  { %v2624_v58 = vpop.f32.mrf.mxu0 }
0x2487   :  { %v2625_v55 = vadd.f32 %v10831_v59, %v2624_v58 }
0x2488   :  { %v8756_v62 = vpop.f32.mrf.mxu0 }
0x2489   :  { %2648 = vrot.lane.b32.xlu0 %v2625_v55, %s10315_s28  ;;  %v2629_v2 = vrot.slane %v2625_v55, 7  ;;  %v2633_v4 = vadd.f32 %v2625_v55, %v10836_v14 }
0x248b   :  { %2646 = vrot.lane.b32.xlu1 %v2629_v2, %s10315_s28  ;;  %v2632_v3 = vadd.f32 %v2629_v2, %v10838_v15  ;;  %v8140_v13 = vmul.f32 -1.442695, %v2633_v4 }
0x248d   :  { %v8139_v5 = vmul.f32 -1.442695, %v2632_v3  ;;  %9448 = vpow2.f32 %v8140_v13 }
0x248f   :  { %9450 = vpow2.f32 %v8139_v5 }
0x249a   :  { %v9449_v7 = vpop.eup %9448 }
0x249b   :  { %v2641_v17 = vadd.f32 1.0, %v9449_v7 }
0x249c   :  { %v9451_v16 = vpop.eup %9450 }
0x249d   :  { %v2640_v9 = vadd.f32 1.0, %v9451_v16  ;;  %9452 = vrcp.f32 %v2641_v17 }
0x249f   :  { %9454 = vrcp.f32 %v2640_v9 }
0x24aa   :  { %v9453_v18 = vpop.eup %9452 }
0x24ab   :  { %v2667_v62 = vsub.f32 1.0, %v9453_v18  ;;  %v2682_v7 = vmul.f32 %v9453_v18, %v2552_v48 }
0x24ac   :  { %v9455_v27 = vpop.eup %9454 }
0x24ad   :  { %v2666_v2 = vsub.f32 1.0, %v9455_v27  ;;  %v2681_v13 = vmul.f32 %v9455_v27, %v2678_v57 }
0x24fb   :  { %v2649_v25 = vpop.permute.xlu0 %2648 }
0x24fc   :  { %v2653_v26 = vmul.f32 %v9453_v18, %v2649_v25 }
0x24fd   :  { %v2647_v28 = vpop.permute.xlu1 %2646 }
0x24fe   :  { %v2652_v29 = vmul.f32 %v9455_v27, %v2647_v28  ;;  %2658 = vrot.lane.b32.xlu0 %v2653_v26, %s10315_s28  ;;  %v1561_v26 = vrot.slane %v1556_v39, 2 }
0x2500   :  { %2656 = vrot.lane.b32.xlu1 %v2652_v29, %s10315_s28  ;;  %v1565_v18 = vadd.f32 %v1561_v26, %v10584_v19 }
0x2502   :  { %v8116_v29 = vmul.f32 -1.442695, %v1565_v18 }
0x2570   :  { %v2659_v30 = vpop.permute.xlu0 %2658 }
0x2571   :  { %v2663_v31 = vadd.f32 %v2659_v30, %v10836_v14 }
0x2572   :  { %v2657_v32 = vpop.permute.xlu1 %2656 }
0x2573   :  { %9456 = vtanh.f32 %v2663_v31  ;;  %v2662_v37 = vadd.f32 %v2657_v32, %v10838_v15 }
0x2575   :  { %9458 = vtanh.f32 %v2662_v37 }
0x2576   :  { %9460 = vpow2.f32 %v8115_v11 }
0x2580   :  { %v9457_v40 = vpop.eup %9456 }
0x2581   :  { %2672 = vrot.lane.b32.xlu0 %v9457_v40, %s10316_s23 }
0x2582   :  { %v9459_v41 = vpop.eup %9458 }
0x2583   :  { %2670 = vrot.lane.b32.xlu1 %v9459_v41, %s10316_s23  ;;  %v9461_v49 = vpop.eup %9460 }
0x2584   :  { %v1572_v58 = vadd.f32 1.0, %v9461_v49 }
0x2585   :  { %1578 = vrot.lane.b32.xlu0 %v1560_v47, %s10315_s28 }
0x2586   :  { %9462 = vrcp.f32 %v1572_v58 }
0x2587   :  { %9464 = vpow2.f32 %v8116_v29 }
0x2593   :  { %v11042_v27 = vpop.eup %9462 }
0x2594   :  { %v9465_v30 = vpop.eup %9464 }
0x2595   :  { %v1573_v31 = vadd.f32 1.0, %v9465_v30 }
0x2597   :  { %9466 = vrcp.f32 %v1573_v31 }
0x25a4   :  { %v11050_v37 = vpop.eup %9466 }
0x25f3   :  { %v2673_v55 = vpop.permute.xlu0 %2672 }
0x25f4   :  { %v2677_v3 = vmul.f32 %v2673_v55, %v2667_v62 }
0x25f5   :  { %v2671_v4 = vpop.permute.xlu1 %2670 }
0x25f6   :  { %v2676_v5 = vmul.f32 %v2671_v4, %v2666_v2  ;;  %v11033_v17 = vadd.f32 %v2682_v7, %v2677_v3 }
0x25f7   :  { %v1579_v28 = vpop.permute.xlu0 %1578 }
0x25f8   :  { %v11031_v16 = vadd.f32 %v2681_v13, %v2676_v5  ;;  %v1584_v48 = vmul.f32 %v11042_v27, %v1579_v28 }
0x25fa   :  { %v2690_v9 = vrot.slane %v11031_v16, 1 }
0x25fc   :  { %v2691_v25 = vsel %vm12513_vm2, %v11033_v17, %v2690_v9 }
0x25fd   :  { %2692 = vrot.lane.b32.xlu1 %v2691_v25, %s10316_s23 }
0x2601   :  { %1580 = vrot.lane.b32.xlu1 %v1561_v26, %s10315_s28 }
0x2605   :  { %1588 = vrot.lane.b32.xlu1 %v1584_v48, %s10315_s28 }
0x266f   :  { %v2693_v32 = vpop.permute.xlu1 %2692 }
0x2670   :  { %8766 = vmatmul.mubr.msk.f32.vlgmr.msra.gmra.mxu1 %vm12512_vm1, %v2693_v32 }
0x2671   :  { %8795 = vmatprep.mubr.msk.f32.mxu1 %vm10314_vm0, %v10313_v1 }
0x2673   :  { %v1581_v38 = vpop.permute.xlu1 %1580 }
0x2674   :  { %v1585_v39 = vmul.f32 %v11050_v37, %v1581_v38 }
0x2676   :  { %1590 = vrot.lane.b32.xlu1 %v1585_v39, %s10315_s28 }
0x2677   :  { %v1589_v4 = vpop.permute.xlu1 %1588 }
0x26e8   :  { %v1591_v13 = vpop.permute.xlu1 %1590 }
0x26e9   :  { %v1595_v5 = vadd.f32 %v1591_v13, %v10584_v19  ;;  %v11085_v19 = vld [vmem:[#allocation20 + $0x18] sm:$0xff] }
0x26ea   :  { %8788 = vmatpush3.msra.mxu1 %v11085_v19 }
0x26eb   :  { %8789 = vmatprep.subr.mxu1 %v10313_v1 }
0x2730   :  { %v2762_v40 = vpop.f32.mrf.mxu1 }
0x2731   :  { %v2763_v41 = vadd.f32 %v10831_v59, %v2762_v40  ;;  %v1594_v59 = vadd.f32 %v1589_v4, %v10586_v21 }
0x2732   :  { %v8767_v47 = vpop.f32.mrf.mxu1 }
0x2733   :  { %2784 = vrot.lane.b32.xlu0 %v2763_v41, %s10315_s28  ;;  %v2767_v53 = vrot.slane %v2763_v41, 1  ;;  %v2770_v11 = vadd.f32 %v2763_v41, %v10838_v15  ;;  %v2835_v41 = vld [vmem:[%s12532_s26 + $0x38] sm:$0xff]  ;;  %v2832_v47 = vld [vmem:[%s12532_s26 + $0x20] sm:$0xff] }
0x2734   :  { %8768 = vmatprep.subr.mxu0 %v2835_v41 }
0x2735   :  { %v2771_v49 = vadd.f32 %v2767_v53, %v10836_v14  ;;  %v8142_v58 = vmul.f32 -1.442695, %v2770_v11  ;;  %8769 = vmatpush3.msra.mxu0 %v2835_v41 }
0x2737   :  { %2786 = vrot.lane.b32.xlu0 %v2767_v53, %s10315_s28  ;;  %9468 = vpow2.f32 %v8142_v58  ;;  %v8143_v55 = vmul.f32 -1.442695, %v2771_v49 }
0x2739   :  { %9470 = vpow2.f32 %v8143_v55 }
0x2744   :  { %v9469_v62 = vpop.eup %9468 }
0x2745   :  { %v2778_v2 = vadd.f32 1.0, %v9469_v62  ;;  %v2829_v62 = vld [vmem:[%s12532_s26 + $0x8] sm:$0xff] }
0x2746   :  { %v9471_v57 = vpop.eup %9470 }
0x2747   :  { %v2779_v3 = vadd.f32 1.0, %v9471_v57  ;;  %9472 = vrcp.f32 %v2778_v2 }
0x2749   :  { %9474 = vrcp.f32 %v2779_v3 }
0x274a   :  { %9476 = vtanh.f32 %v1594_v59 }
0x274b   :  { %9478 = vtanh.f32 %v1595_v5 }
0x2754   :  { %v11061_v7 = vpop.eup %9472 }
0x2756   :  { %v11065_v28 = vpop.eup %9474 }
0x2757   :  { %v9477_v29 = vpop.eup %9476 }
0x2758   :  { %v9479_v21 = vpop.eup %9478 }
0x27a5   :  { %v2785_v25 = vpop.permute.xlu0 %2784 }
0x27a6   :  { %v2790_v26 = vmul.f32 %v11061_v7, %v2785_v25  ;;  %v2804_v25 = vsub.f32 1.0, %v11061_v7 }
0x27a8   :  { %2794 = vrot.lane.b32.xlu0 %v2790_v26, %s10315_s28 }
0x27a9   :  { %v2787_v48 = vpop.permute.xlu0 %2786 }
0x27aa   :  { %v2791_v18 = vmul.f32 %v11065_v28, %v2787_v48 }
0x27ac   :  { %2796 = vrot.lane.b32.xlu1 %v2791_v18, %s10315_s28  ;;  %1602 = vrot.lane.b32.xlu0 %v9477_v29, %s10316_s23  ;;  %v2819_v18 = vmul.f32 %v11061_v7, %v2690_v9  ;;  %v2816_v9 = vrot.slane %v11033_v17, 1 }
0x27ae   :  { %v2820_v7 = vmul.f32 %v11065_v28, %v2816_v9 }
0x27b0   :  { %594 = vrot.lane.b32.xlu0 %v10599_v52, %s10316_s23  ;;  %1604 = vrot.lane.b32.xlu1 %v9479_v21, %s10316_s23  ;;  %v11087_v52 = vld [vmem:[#allocation20 + $0x10] sm:$0xff] }
0x27b1   :  { %8790 = vmatpush3.msra.mxu1 %v11087_v52 }
0x27b2   :  { %8791 = vmatprep.subr.mxu1 %v10313_v1 }
0x27b4   :  { %885 = vrot.lane.b32.xlu0 %v10661_v23, %s10316_s23  ;;  %739 = vrot.lane.b32.xlu1 %v10627_v34, %s10316_s23  ;;  %v11091_v34 = vld [vmem:[#allocation20 + $0x8] sm:$0xff]  ;;  %v11097_v23 = vld [vmem:[#allocation20] sm:$0xff] }
0x27b5   :  { %8792 = vmatpush3.msra.mxu1 %v11091_v34 }
0x27b6   :  { %8793 = vmatprep.subr.mxu1 %v10313_v1 }
0x27b7   :  { %8794 = vmatpush3.msra.mxu1 %v11097_v23 }
0x27b8   :  { %1179 = vrot.lane.b32.xlu0 %v10724_v61, %s10316_s23  ;;  %1032 = vrot.lane.b32.xlu1 %v10693_v8, %s10316_s23  ;;  %v1598_v8 = vsub.f32 1.0, %v11042_v27 }
0x27b9   :  { %8796 = vmatmul.mubr.f32.vlgmr.msra.gmra.mxu1 %v10313_v1  ;;  %8798 = vmatprep.subr.mxu1 %v10313_v1 }
0x27ba   :  { %8806 = vmatprep.mubr.msk.f32.mxu1 %vm10314_vm0, %v10313_v1  ;;  %8799 = vmatpush3.msra.mxu1 %v11085_v19 }
0x27bb   :  { %8800 = vmatprep.subr.mxu1 %v10313_v1 }
0x27bc   :  { %1473 = vrot.lane.b32.xlu0 %v10780_v45, %s10316_s23  ;;  %1326 = vrot.lane.b32.xlu1 %v10756_v51, %s10316_s23 }
0x27bd   :  { %8801 = vmatpush3.msra.mxu1 %v11087_v52 }
0x27be   :  { %8802 = vmatprep.subr.mxu1 %v10313_v1 }
0x27bf   :  { %8803 = vmatpush3.msra.mxu1 %v11091_v34 }
0x27c0   :  { %596 = vrot.lane.b32.xlu0 %v10596_v46, %s10316_s23  ;;  %8804 = vmatprep.subr.mxu1 %v10313_v1 }
0x27c1   :  { %8805 = vmatpush3.msra.mxu1 %v11097_v23 }
0x27c2   :  { %8820 = vmatprep.subr.mxu1 %v10313_v1 }
0x27c4   :  { %887 = vrot.lane.b32.xlu0 %v10659_v22, %s10316_s23 }
0x27c8   :  { %1181 = vrot.lane.b32.xlu0 %v10722_v60, %s10316_s23  ;;  %v1610_v60 = vrot.slane %v10780_v45, 7 }
0x27ca   :  { %v1614_v30 = vmul.f32 %v11042_v27, %v1610_v60  ;;  %v2833_v27 = vld [vmem:[%s12532_s26 + $0x28] sm:$0xff] }
0x281a   :  { %v2795_v46 = vpop.permute.xlu0 %2794 }
0x281b   :  { %v2800_v22 = vadd.f32 %v2795_v46, %v10838_v15  ;;  %v2834_v15 = vld [vmem:[%s12532_s26 + $0x30] sm:$0xff] }
0x281c   :  { %8770 = vmatprep.subr.mxu0 %v2834_v15 }
0x281d   :  { %9480 = vtanh.f32 %v2800_v22  ;;  %8771 = vmatpush3.msra.mxu0 %v2834_v15 }
0x281e   :  { %v1603_v61 = vpop.permute.xlu0 %1602  ;;  %v2797_v51 = vpop.permute.xlu1 %2796  ;;  %8772 = vmatprep.subr.mxu0 %v2833_v27 }
0x281f   :  { %v1608_v31 = vmul.f32 %v1603_v61, %v1598_v8  ;;  %v2801_v38 = vadd.f32 %v2797_v51, %v10836_v14  ;;  %8773 = vmatpush3.msra.mxu0 %v2833_v27 }
0x2820   :  { %8774 = vmatprep.subr.mxu0 %v2832_v47 }
0x2821   :  { %v1616_v32 = vadd.f32 %v1614_v30, %v1608_v31  ;;  %9482 = vtanh.f32 %v2801_v38  ;;  %8775 = vmatpush3.msra.mxu0 %v2832_v47 }
0x2822   :  { %v595_v39 = vpop.permute.xlu0 %594  ;;  %v1605_v40 = vpop.permute.xlu1 %1604 }
0x2823   :  { %601 = vst.msk [vmem:[#allocation2] sm:$0x1] %vm12509_vm3, %v595_v39  ;;  %1620 = vrot.lane.b32.xlu1 %v1616_v32, %s10316_s23 }
0x2826   :  { %v886_v45 = vpop.permute.xlu0 %885  ;;  %v740_v14 = vpop.permute.xlu1 %739 }
0x2827   :  { %892 = vst.msk [vmem:[#allocation2] sm:$0x4] %vm12508_vm4, %v886_v45  ;;  %741 = vrot.lane.b32.xlu1 %v10629_v35, %s10316_s23  ;;  %v2831_v35 = vld [vmem:[%s12532_s26 + $0x18] sm:$0xff] }
0x2828   :  { %746 = vst.msk [vmem:[#allocation2] sm:$0x2] %vm745_vm5, %v740_v14  ;;  %8776 = vmatprep.subr.mxu0 %v2831_v35 }
0x2829   :  { %2547 = vst.msk [vmem:[#allocation2] sm:$0x4] %vm2546_vm6, %v11009_v43  ;;  %v2830_v43 = vld [vmem:[%s12532_s26 + $0x10] sm:$0xff]  ;;  %8777 = vmatpush3.msra.mxu0 %v2831_v35 }
0x282a   :  { %2686 = vst.msk [vmem:[#allocation2] sm:$0x2] %vm2685_vm7, %v11031_v16  ;;  %v9481_v53 = vpop.eup %9480  ;;  %v1180_v11 = vpop.permute.xlu0 %1179  ;;  %8778 = vmatprep.subr.mxu0 %v2830_v43  ;;  %v2805_v16 = vsub.f32 1.0, %v11065_v28 }
0x282b   :  { %v1033_v49 = vpop.permute.xlu1 %1032  ;;  %1186 = vst.msk [vmem:[#allocation2] sm:$0x10] %vm1185_vm8, %v1180_v11  ;;  %2808 = vrot.lane.b32.xlu0 %v9481_v53, %s10316_s23  ;;  %1034 = vrot.lane.b32.xlu1 %v10691_v6, %s10316_s23  ;;  %v1599_v6 = vsub.f32 1.0, %v11050_v37 }
0x282c   :  { %1039 = vst.msk [vmem:[#allocation2] sm:$0x8] %vm1038_vm9, %v1033_v49  ;;  %8779 = vmatpush3.msra.mxu0 %v2830_v43 }
0x282d   :  { %2265 = vst.msk [vmem:[#allocation2] sm:$0x10] %vm12510_vm10, %v10946_v24  ;;  %v2828_v24 = vld [vmem:[%s12532_s26] sm:$0xff]  ;;  %v1609_v2 = vmul.f32 %v1605_v40, %v1599_v6  ;;  %8780 = vmatprep.subr.mxu0 %v2829_v62 }
0x282e   :  { %2406 = vst.msk [vmem:[#allocation2] sm:$0x8] %vm12511_vm11, %v10977_v36  ;;  %v1474_v58 = vpop.permute.xlu0 %1473  ;;  %v1611_v36 = vrot.slane %v10778_v44, 7  ;;  %v9483_v57 = vpop.eup %9482  ;;  %8781 = vmatpush3.msra.mxu0 %v2829_v62 }
0x282f   :  { %v1327_v55 = vpop.permute.xlu1 %1326  ;;  %1480 = vst.msk [vmem:[#allocation2] sm:$0x40] %vm1479_vm12, %v1474_v58  ;;  %1475 = vrot.lane.b32.xlu0 %v10778_v44, %s10316_s23  ;;  %1328 = vrot.lane.b32.xlu1 %v10754_v50, %s10316_s23 }
0x2830   :  { %1333 = vst.msk [vmem:[#allocation2] sm:$0x20] %vm1332_vm13, %v1327_v55  ;;  %v1615_v3 = vmul.f32 %v11050_v37, %v1611_v36  ;;  %8782 = vmatprep.subr.mxu0 %v2828_v24 }
0x2831   :  { %1983 = vst.msk [vmem:[#allocation2] sm:$0x40] %vm1982_vm14, %v10882_v0  ;;  %8783 = vmatpush3.msra.mxu0 %v2828_v24 }
0x2832   :  { %2124 = vst.msk [vmem:[#allocation2] sm:$0x20] %vm2123_vm15, %v10914_v12  ;;  %v597_v4 = vpop.permute.xlu0 %596  ;;  %v1617_v50 = vadd.f32 %v1615_v3, %v1609_v2  ;;  %8809 = vmatprep.subr.mxu0 %v10313_v1  ;;  %v11173_v12 = vld [vmem:[#allocation23] ss:$0 sm:$0xff] }
0x2833   :  { %602 = vst.msk [vmem:[#allocation2 + $0x8] sm:$0x1] %vm12509_vm3, %v597_v4  ;;  %2810 = vrot.lane.b32.xlu1 %v9483_v57, %s10316_s23  ;;  %vm1841_vm3 = vcmask 523527  }
0x2836   :  { %v888_v0 = vpop.permute.xlu0 %887 }
0x2837   :  { %893 = vst.msk [vmem:[#allocation2 + $0x8] sm:$0x4] %vm12508_vm4, %v888_v0  ;;  %1622 = vrot.lane.b32.xlu1 %v1617_v50, %s10316_s23  ;;  %vm1626_vm4 = vcmask 261127  }
0x2838   :  { %2548 = vst.msk [vmem:[#allocation2 + $0x8] sm:$0x4] %vm2546_vm6, %v11007_v42 }
0x283a   :  { %v1182_v44 = vpop.permute.xlu0 %1181 }
0x283b   :  { %1187 = vst.msk [vmem:[#allocation2 + $0x8] sm:$0x10] %vm1185_vm8, %v1182_v44 }
0x283c   :  { %2266 = vst.msk [vmem:[#allocation2 + $0x8] sm:$0x10] %vm12510_vm10, %v10944_v20  ;;  %vm2823_vm10 = vcmask 516352  }
0x2879   :  { %v3016_v37 = vpop.f32.mrf.mxu1 }
0x287a   :  { %v3017_v59 = vadd.f32 %v11173_v12, %v3016_v37 }
0x287b   :  { %v8797_v13 = vpop.f32.mrf.mxu1 }
0x287c   :  { %v3021_v5 = vrot.slane %v3017_v59, 1  ;;  %3038 = vrot.lane.b32.xlu1 %v3017_v59, %s10315_s28 }
0x287e   :  { %3040 = vrot.lane.b32.xlu0 %v3021_v5, %s10315_s28 }
0x2895   :  { %v1621_v42 = vpop.permute.xlu1 %1620 }
0x2896   :  { %1627 = vst.msk [vmem:[#allocation2] sm:$0x80] %vm1626_vm4, %v1621_v42 }
0x2897   :  { %1842 = vst.msk [vmem:[#allocation2] sm:$0x80] %vm1841_vm3, %v10850_v56 }
0x2899   :  { %v742_v20 = vpop.permute.xlu1 %741 }
0x289a   :  { %747 = vst.msk [vmem:[#allocation2 + $0x8] sm:$0x2] %vm745_vm5, %v742_v20 }
0x289b   :  { %2687 = vst.msk [vmem:[#allocation2 + $0x8] sm:$0x2] %vm2685_vm7, %v11033_v17 }
0x289d   :  { %v2809_v26 = vpop.permute.xlu0 %2808  ;;  %v1035_v48 = vpop.permute.xlu1 %1034 }
0x289e   :  { %v2814_v29 = vmul.f32 %v2809_v26, %v2804_v25  ;;  %1040 = vst.msk [vmem:[#allocation2 + $0x8] sm:$0x8] %vm1038_vm9, %v1035_v48 }
0x289f   :  { %2407 = vst.msk [vmem:[#allocation2 + $0x8] sm:$0x8] %vm12511_vm11, %v10975_v33  ;;  %vm2862_vm11 = vcmask 523264  }
0x28a0   :  { %v2821_v56 = vadd.f32 %v2819_v18, %v2814_v29 }
0x28a1   :  { %v1476_v21 = vpop.permute.xlu0 %1475  ;;  %v1329_v46 = vpop.permute.xlu1 %1328 }
0x28a2   :  { %2824 = vst.msk [vmem:[#allocation2] sm:$0x1] %vm2823_vm10, %v2821_v56 }
0x28a3   :  { %1481 = vst.msk [vmem:[#allocation2 + $0x8] sm:$0x40] %vm1479_vm12, %v1476_v21 }
0x28a4   :  { %1334 = vst.msk [vmem:[#allocation2 + $0x8] sm:$0x20] %vm1332_vm13, %v1329_v46 }
0x28a5   :  { %1984 = vst.msk [vmem:[#allocation2 + $0x8] sm:$0x40] %vm1982_vm14, %v10880_v63  ;;  %v2811_v33 = vpop.permute.xlu1 %2810 }
0x28a6   :  { %2125 = vst.msk [vmem:[#allocation2 + $0x8] sm:$0x20] %vm2123_vm15, %v10912_v10  ;;  %v2815_v22 = vmul.f32 %v2811_v33, %v2805_v16 }
0x28a8   :  { %v2822_v8 = vadd.f32 %v2820_v7, %v2815_v22 }
0x28a9   :  { %v1623_v60 = vpop.permute.xlu1 %1622  ;;  %v11201_v61 = vld [vmem:[#allocation2] sm:$0xff] }
0x28aa   :  { %2825 = vst.msk [vmem:[#allocation2 + $0x8] sm:$0x1] %vm2823_vm10, %v2822_v8  ;;  %8784 = vmatprep.mubr.msk.f32.mxu0 %vm2862_vm11, %v11201_v61 }
0x28ab   :  { %1628 = vst.msk [vmem:[#allocation2 + $0x8] sm:$0x80] %vm1626_vm4, %v1623_v60 }
0x28ac   :  { %1843 = vst.msk [vmem:[#allocation2 + $0x8] sm:$0x80] %vm1841_vm3, %v10848_v54  ;;  %v8144_v54 = vld [vmem:[#allocation21] ss:$0 sm:$0xff] }
0x28b3   :  { %v11209_v63 = vld [vmem:[#allocation2 + $0x8] sm:$0xff] }
0x28b4   :  { %8785 = vmatmul.mubr.msk.f32.vlgmr.msra.gmra.mxu0 %vm2862_vm11, %v11209_v63 }
0x28b5   :  { %8810 = vmatpush3.msra.mxu0 %v11085_v19  ;;  %8817 = vmatprep.mubr.msk.f32.mxu0 %vm10314_vm0, %v10313_v1 }
0x28b6   :  { %8811 = vmatprep.subr.mxu0 %v10313_v1 }
0x28b7   :  { %8812 = vmatpush3.msra.mxu0 %v11087_v52 }
0x28b8   :  { %8813 = vmatprep.subr.mxu0 %v10313_v1 }
0x28b9   :  { %8814 = vmatpush3.msra.mxu0 %v11091_v34 }
0x28ba   :  { %8815 = vmatprep.subr.mxu0 %v10313_v1 }
0x28bb   :  { %8816 = vmatpush3.msra.mxu0 %v11097_v23 }
0x28bc   :  { %8831 = vmatprep.subr.mxu0 %v10313_v1 }
0x28ee   :  { %v3039_v53 = vpop.permute.xlu1 %3038 }
0x28f0   :  { %v3041_v45 = vpop.permute.xlu0 %3040 }
0x2974   :  { %v8786_v10 = vpop.f32.mrf.mxu0 }
0x2975   :  { %v11223_v17 = vadd.f32 %v8786_v10, %v8144_v54 }
0x2976   :  { %v2935_v28 = vpop.f32.mrf.mxu0 }
0x2977   :  { %v11225_v51 = vadd.f32 %v8144_v54, %v2935_v28  ;;  %v3025_v30 = vadd.f32 %v3021_v5, %v11223_v17 }
0x2979   :  { %v3024_v31 = vadd.f32 %v3017_v59, %v11225_v51  ;;  %v8149_v32 = vmul.f32 -1.442695, %v3025_v30 }
0x297b   :  { %v8148_v38 = vmul.f32 -1.442695, %v3024_v31  ;;  %9484 = vpow2.f32 %v8149_v32 }
0x297d   :  { %9486 = vpow2.f32 %v8148_v38 }
0x2988   :  { %v9485_v39 = vpop.eup %9484 }
0x2989   :  { %v3033_v40 = vadd.f32 1.0, %v9485_v39 }
0x298a   :  { %v9487_v41 = vpop.eup %9486 }
0x298b   :  { %v3032_v15 = vadd.f32 1.0, %v9487_v41  ;;  %9488 = vrcp.f32 %v3033_v40 }
0x298d   :  { %9490 = vrcp.f32 %v3032_v15 }
0x2998   :  { %v9489_v14 = vpop.eup %9488 }
0x2999   :  { %v3045_v27 = vmul.f32 %v9489_v14, %v3041_v45  ;;  %v3059_v6 = vsub.f32 1.0, %v9489_v14  ;;  %v3071_v36 = vmul.f32 0.0, %v9489_v14 }
0x299a   :  { %v9491_v47 = vpop.eup %9490 }
0x299b   :  { %v3044_v11 = vmul.f32 %v9491_v47, %v3039_v53  ;;  %3050 = vrot.lane.b32.xlu0 %v3045_v27, %s10315_s28  ;;  %v3058_v57 = vsub.f32 1.0, %v9491_v47  ;;  %v3070_v50 = vmul.f32 0.0, %v9491_v47 }
0x299d   :  { %3048 = vrot.lane.b32.xlu1 %v3044_v11, %s10315_s28 }
0x2a0d   :  { %v3051_v49 = vpop.permute.xlu0 %3050 }
0x2a0e   :  { %v3055_v35 = vadd.f32 %v3051_v49, %v11223_v17 }
0x2a0f   :  { %v3049_v43 = vpop.permute.xlu1 %3048 }
0x2a10   :  { %9492 = vtanh.f32 %v3055_v35  ;;  %v3054_v58 = vadd.f32 %v3049_v43, %v11225_v51 }
0x2a12   :  { %9494 = vtanh.f32 %v3054_v58 }
0x2a1d   :  { %v9493_v55 = vpop.eup %9492 }
0x2a1e   :  { %3064 = vrot.lane.b32.xlu0 %v9493_v55, %s10316_s23 }
0x2a1f   :  { %v9495_v62 = vpop.eup %9494 }
0x2a20   :  { %3062 = vrot.lane.b32.xlu1 %v9495_v62, %s10316_s23 }
0x2a90   :  { %v3065_v24 = vpop.permute.xlu0 %3064 }
0x2a91   :  { %v3069_v2 = vmul.f32 %v3065_v24, %v3059_v6 }
0x2a92   :  { %v3063_v4 = vpop.permute.xlu1 %3062 }
0x2a93   :  { %v11235_v3 = vadd.f32 %v3071_v36, %v3069_v2  ;;  %v3068_v0 = vmul.f32 %v3063_v4, %v3058_v57 }
0x2a95   :  { %v3084_v44 = vrot.slane %v11235_v3, 7  ;;  %v11238_v37 = vadd.f32 %v3070_v50, %v3068_v0 }
0x2a97   :  { %v3085_v59 = vsel %vm12513_vm2, %v3084_v44, %v11238_v37  ;;  %v3210_v41 = vrot.slane %v11238_v37, 7 }
0x2a98   :  { %3086 = vrot.lane.b32.xlu0 %v3085_v59, %s10316_s23 }
0x2b0a   :  { %v3087_v13 = vpop.permute.xlu0 %3086 }
0x2b0b   :  { %8807 = vmatmul.mubr.msk.f32.vlgmr.msra.gmra.mxu1 %vm12512_vm1, %v3087_v13 }
0x2b0c   :  { %8821 = vmatpush3.msra.mxu1 %v11085_v19  ;;  %8828 = vmatprep.mubr.msk.f32.mxu1 %vm10314_vm0, %v10313_v1 }
0x2b0d   :  { %8822 = vmatprep.subr.mxu1 %v10313_v1 }
0x2b0e   :  { %8823 = vmatpush3.msra.mxu1 %v11087_v52 }
0x2b0f   :  { %8824 = vmatprep.subr.mxu1 %v10313_v1 }
0x2b10   :  { %8825 = vmatpush3.msra.mxu1 %v11091_v34 }
0x2b11   :  { %8826 = vmatprep.subr.mxu1 %v10313_v1 }
0x2b12   :  { %8827 = vmatpush3.msra.mxu1 %v11097_v23 }
0x2b13   :  { %8842 = vmatprep.subr.mxu1 %v10313_v1 }
0x2bcb   :  { %v3156_v5 = vpop.f32.mrf.mxu1 }
0x2bcc   :  { %v3157_v42 = vadd.f32 %v11173_v12, %v3156_v5 }
0x2bcd   :  { %v8808_v20 = vpop.f32.mrf.mxu1 }
0x2bce   :  { %v3161_v25 = vrot.slane %v3157_v42, 7  ;;  %3180 = vrot.lane.b32.xlu0 %v3157_v42, %s10315_s28  ;;  %v3165_v26 = vadd.f32 %v3157_v42, %v11223_v17 }
0x2bd0   :  { %3178 = vrot.lane.b32.xlu1 %v3161_v25, %s10315_s28  ;;  %v3164_v48 = vadd.f32 %v3161_v25, %v11225_v51  ;;  %v8152_v18 = vmul.f32 -1.442695, %v3165_v26 }
0x2bd2   :  { %v8151_v29 = vmul.f32 -1.442695, %v3164_v48  ;;  %9496 = vpow2.f32 %v8152_v18 }
0x2bd4   :  { %9498 = vpow2.f32 %v8151_v29 }
0x2bdf   :  { %v9497_v56 = vpop.eup %9496 }
0x2be0   :  { %v3173_v46 = vadd.f32 1.0, %v9497_v56 }
0x2be1   :  { %v9499_v21 = vpop.eup %9498 }
0x2be2   :  { %v3172_v16 = vadd.f32 1.0, %v9499_v21  ;;  %9500 = vrcp.f32 %v3173_v46 }
0x2be4   :  { %9502 = vrcp.f32 %v3172_v16 }
0x2bef   :  { %v9501_v9 = vpop.eup %9500 }
0x2bf0   :  { %v3199_v39 = vsub.f32 1.0, %v9501_v9  ;;  %v3214_v47 = vmul.f32 %v9501_v9, %v3084_v44 }
0x2bf1   :  { %v9503_v22 = vpop.eup %9502 }
0x2bf2   :  { %v3198_v40 = vsub.f32 1.0, %v9503_v22  ;;  %v3213_v14 = vmul.f32 %v9503_v22, %v3210_v41 }
0x2c40   :  { %v3181_v33 = vpop.permute.xlu0 %3180 }
0x2c41   :  { %v3185_v7 = vmul.f32 %v9501_v9, %v3181_v33 }
0x2c42   :  { %v3179_v8 = vpop.permute.xlu1 %3178 }
0x2c43   :  { %v3184_v60 = vmul.f32 %v9503_v22, %v3179_v8  ;;  %3190 = vrot.lane.b32.xlu0 %v3185_v7, %s10315_s28 }
0x2c45   :  { %3188 = vrot.lane.b32.xlu1 %v3184_v60, %s10315_s28 }
0x2cb5   :  { %v3191_v54 = vpop.permute.xlu0 %3190 }
0x2cb6   :  { %v3195_v10 = vadd.f32 %v3191_v54, %v11223_v17 }
0x2cb7   :  { %v3189_v28 = vpop.permute.xlu1 %3188 }
0x2cb8   :  { %9504 = vtanh.f32 %v3195_v10  ;;  %v3194_v30 = vadd.f32 %v3189_v28, %v11225_v51 }
0x2cba   :  { %9506 = vtanh.f32 %v3194_v30 }
0x2cc5   :  { %v9505_v31 = vpop.eup %9504 }
0x2cc6   :  { %3204 = vrot.lane.b32.xlu0 %v9505_v31, %s10316_s23 }
0x2cc7   :  { %v9507_v32 = vpop.eup %9506 }
0x2cc8   :  { %3202 = vrot.lane.b32.xlu1 %v9507_v32, %s10316_s23 }
0x2d38   :  { %v3205_v38 = vpop.permute.xlu0 %3204 }
0x2d39   :  { %v3209_v45 = vmul.f32 %v3205_v38, %v3199_v39 }
0x2d3a   :  { %v3203_v15 = vpop.permute.xlu1 %3202 }
0x2d3b   :  { %v3208_v27 = vmul.f32 %v3203_v15, %v3198_v40  ;;  %v11268_v11 = vadd.f32 %v3214_v47, %v3209_v45 }
0x2d3d   :  { %v11266_v53 = vadd.f32 %v3213_v14, %v3208_v27  ;;  %v3355_v9 = vrot.slane %v11268_v11, 7 }
0x2d3f   :  { %v3227_v49 = vrot.slane %v11266_v53, 1  ;;  %v3354_v22 = vrot.slane %v11266_v53, 7 }
0x2d41   :  { %v3228_v35 = vsel %vm12513_vm2, %v11268_v11, %v3227_v49 }
0x2d42   :  { %3229 = vrot.lane.b32.xlu1 %v3228_v35, %s10316_s23 }
0x2db4   :  { %v3230_v43 = vpop.permute.xlu1 %3229 }
0x2db5   :  { %8818 = vmatmul.mubr.msk.f32.vlgmr.msra.gmra.mxu0 %vm12512_vm1, %v3230_v43 }
0x2db6   :  { %8832 = vmatpush3.msra.mxu0 %v11085_v19  ;;  %8839 = vmatprep.mubr.msk.f32.mxu0 %vm10314_vm0, %v10313_v1 }
0x2db7   :  { %8833 = vmatprep.subr.mxu0 %v10313_v1 }
0x2db8   :  { %8834 = vmatpush3.msra.mxu0 %v11087_v52 }
0x2db9   :  { %8835 = vmatprep.subr.mxu0 %v10313_v1 }
0x2dba   :  { %8836 = vmatpush3.msra.mxu0 %v11091_v34 }
0x2dbb   :  { %8837 = vmatprep.subr.mxu0 %v10313_v1 }
0x2dbc   :  { %8838 = vmatpush3.msra.mxu0 %v11097_v23 }
0x2dbd   :  { %8853 = vmatprep.subr.mxu0 %v10313_v1 }
0x2e75   :  { %v3299_v58 = vpop.f32.mrf.mxu0 }
0x2e76   :  { %v3300_v55 = vadd.f32 %v11173_v12, %v3299_v58 }
0x2e77   :  { %v8819_v62 = vpop.f32.mrf.mxu0 }
0x2e78   :  { %v3304_v6 = vrot.slane %v3300_v55, 6  ;;  %v3305_v24 = vrot.slane %v3300_v55, 7 }
0x2e7a   :  { %3324 = vrot.lane.b32.xlu1 %v3305_v24, %s10315_s28  ;;  %3322 = vrot.lane.b32.xlu0 %v3304_v6, %s10315_s28  ;;  %v3308_v36 = vadd.f32 %v3304_v6, %v11225_v51  ;;  %v3309_v2 = vadd.f32 %v3305_v24, %v11223_v17 }
0x2e7c   :  { %v8154_v57 = vmul.f32 -1.442695, %v3308_v36  ;;  %v8155_v4 = vmul.f32 -1.442695, %v3309_v2 }
0x2e7e   :  { %9508 = vpow2.f32 %v8154_v57 }
0x2e7f   :  { %9510 = vpow2.f32 %v8155_v4 }
0x2e8b   :  { %v9509_v50 = vpop.eup %9508 }
0x2e8c   :  { %v9511_v0 = vpop.eup %9510  ;;  %v3316_v44 = vadd.f32 1.0, %v9509_v50 }
0x2e8d   :  { %v3317_v59 = vadd.f32 1.0, %v9511_v0 }
0x2e8e   :  { %9512 = vrcp.f32 %v3316_v44 }
0x2e8f   :  { %9514 = vrcp.f32 %v3317_v59 }
0x2e9b   :  { %v9513_v13 = vpop.eup %9512 }
0x2e9c   :  { %v9515_v5 = vpop.eup %9514  ;;  %v3342_v7 = vsub.f32 1.0, %v9513_v13  ;;  %v3358_v10 = vmul.f32 %v9513_v13, %v3354_v22 }
0x2e9d   :  { %v3343_v16 = vsub.f32 1.0, %v9515_v5  ;;  %v3359_v8 = vmul.f32 %v9515_v5, %v3355_v9 }
0x2eec   :  { %v3325_v42 = vpop.permute.xlu1 %3324  ;;  %v3323_v20 = vpop.permute.xlu0 %3322 }
0x2eed   :  { %v3329_v25 = vmul.f32 %v9515_v5, %v3325_v42  ;;  %v3328_v26 = vmul.f32 %v9513_v13, %v3323_v20 }
0x2eef   :  { %3334 = vrot.lane.b32.xlu1 %v3329_v25, %s10315_s28  ;;  %3332 = vrot.lane.b32.xlu0 %v3328_v26, %s10315_s28 }
0x2f61   :  { %v3335_v48 = vpop.permute.xlu1 %3334  ;;  %v3333_v18 = vpop.permute.xlu0 %3332 }
0x2f62   :  { %v3339_v29 = vadd.f32 %v3335_v48, %v11223_v17  ;;  %v3338_v56 = vadd.f32 %v3333_v18, %v11225_v51 }
0x2f64   :  { %9516 = vtanh.f32 %v3339_v29 }
0x2f65   :  { %9518 = vtanh.f32 %v3338_v56 }
0x2f71   :  { %v9517_v21 = vpop.eup %9516 }
0x2f72   :  { %v9519_v46 = vpop.eup %9518  ;;  %3348 = vrot.lane.b32.xlu1 %v9517_v21, %s10316_s23 }
0x2f73   :  { %3346 = vrot.lane.b32.xlu0 %v9519_v46, %s10316_s23 }
0x2fe4   :  { %v3349_v33 = vpop.permute.xlu1 %3348 }
0x2fe5   :  { %v3353_v60 = vmul.f32 %v3349_v33, %v3343_v16  ;;  %v3347_v54 = vpop.permute.xlu0 %3346 }
0x2fe6   :  { %v3352_v28 = vmul.f32 %v3347_v54, %v3342_v7 }
0x2fe7   :  { %v11298_v30 = vadd.f32 %v3359_v8, %v3353_v60 }
0x2fe8   :  { %v11300_v31 = vadd.f32 %v3358_v10, %v3352_v28 }
0x2fe9   :  { %v3373_v32 = vrot.slane %v11298_v30, 1  ;;  %v3501_v25 = vrot.slane %v11298_v30, 7 }
0x2fea   :  { %v3372_v38 = vrot.slane %v11300_v31, 2  ;;  %v3500_v18 = vrot.slane %v11300_v31, 7 }
0x2fec   :  { %v3374_v39 = vsel %vm12513_vm2, %v3373_v32, %v3372_v38 }
0x2fed   :  { %3375 = vrot.lane.b32.xlu0 %v3374_v39, %s10316_s23 }
0x305f   :  { %v3376_v40 = vpop.permute.xlu0 %3375 }
0x3060   :  { %8829 = vmatmul.mubr.msk.f32.vlgmr.msra.gmra.mxu1 %vm12512_vm1, %v3376_v40 }
0x3061   :  { %8843 = vmatpush3.msra.mxu1 %v11085_v19  ;;  %8850 = vmatprep.mubr.msk.f32.mxu1 %vm10314_vm0, %v10313_v1 }
0x3062   :  { %8844 = vmatprep.subr.mxu1 %v10313_v1 }
0x3063   :  { %8845 = vmatpush3.msra.mxu1 %v11087_v52 }
0x3064   :  { %8846 = vmatprep.subr.mxu1 %v10313_v1 }
0x3065   :  { %8847 = vmatpush3.msra.mxu1 %v11091_v34 }
0x3066   :  { %8848 = vmatprep.subr.mxu1 %v10313_v1 }
0x3067   :  { %8849 = vmatpush3.msra.mxu1 %v11097_v23 }
0x3068   :  { %8864 = vmatprep.subr.mxu1 %v10313_v1 }
0x3120   :  { %v3445_v41 = vpop.f32.mrf.mxu1 }
0x3121   :  { %v3446_v15 = vadd.f32 %v11173_v12, %v3445_v41 }
0x3122   :  { %v8830_v45 = vpop.f32.mrf.mxu1 }
0x3123   :  { %v3450_v14 = vrot.slane %v3446_v15, 5  ;;  %v3451_v27 = vrot.slane %v3446_v15, 6 }
0x3125   :  { %3470 = vrot.lane.b32.xlu0 %v3451_v27, %s10315_s28  ;;  %3468 = vrot.lane.b32.xlu1 %v3450_v14, %s10315_s28  ;;  %v3454_v47 = vadd.f32 %v3450_v14, %v11225_v51  ;;  %v3455_v49 = vadd.f32 %v3451_v27, %v11223_v17 }
0x3127   :  { %v8157_v35 = vmul.f32 -1.442695, %v3454_v47  ;;  %v8158_v43 = vmul.f32 -1.442695, %v3455_v49 }
0x3129   :  { %9520 = vpow2.f32 %v8157_v35 }
0x312a   :  { %9522 = vpow2.f32 %v8158_v43 }
0x3136   :  { %v9521_v58 = vpop.eup %9520 }
0x3137   :  { %v9523_v55 = vpop.eup %9522  ;;  %v3462_v62 = vadd.f32 1.0, %v9521_v58 }
0x3138   :  { %v3463_v6 = vadd.f32 1.0, %v9523_v55 }
0x3139   :  { %9524 = vrcp.f32 %v3462_v62 }
0x313a   :  { %9526 = vrcp.f32 %v3463_v6 }
0x3146   :  { %v9525_v24 = vpop.eup %9524 }
0x3147   :  { %v9527_v36 = vpop.eup %9526  ;;  %v3488_v48 = vsub.f32 1.0, %v9525_v24  ;;  %v3504_v46 = vmul.f32 %v9525_v24, %v3500_v18 }
0x3148   :  { %v3489_v20 = vsub.f32 1.0, %v9527_v36  ;;  %v3505_v29 = vmul.f32 %v9527_v36, %v3501_v25 }
0x3197   :  { %v3471_v2 = vpop.permute.xlu0 %3470  ;;  %v3469_v57 = vpop.permute.xlu1 %3468 }
0x3198   :  { %v3475_v4 = vmul.f32 %v9527_v36, %v3471_v2  ;;  %v3474_v50 = vmul.f32 %v9525_v24, %v3469_v57 }
0x319a   :  { %3480 = vrot.lane.b32.xlu0 %v3475_v4, %s10315_s28  ;;  %3478 = vrot.lane.b32.xlu1 %v3474_v50, %s10315_s28 }
0x320c   :  { %v3481_v0 = vpop.permute.xlu0 %3480  ;;  %v3479_v44 = vpop.permute.xlu1 %3478 }
0x320d   :  { %v3485_v59 = vadd.f32 %v3481_v0, %v11223_v17  ;;  %v3484_v13 = vadd.f32 %v3479_v44, %v11225_v51 }
0x320f   :  { %9528 = vtanh.f32 %v3485_v59 }
0x3210   :  { %9530 = vtanh.f32 %v3484_v13 }
0x321c   :  { %v9529_v5 = vpop.eup %9528 }
0x321d   :  { %v9531_v42 = vpop.eup %9530  ;;  %3494 = vrot.lane.b32.xlu0 %v9529_v5, %s10316_s23 }
0x321e   :  { %3492 = vrot.lane.b32.xlu1 %v9531_v42, %s10316_s23 }
0x328f   :  { %v3495_v26 = vpop.permute.xlu0 %3494 }
0x3290   :  { %v3499_v56 = vmul.f32 %v3495_v26, %v3489_v20  ;;  %v3493_v21 = vpop.permute.xlu1 %3492 }
0x3291   :  { %v3498_v16 = vmul.f32 %v3493_v21, %v3488_v48 }
0x3292   :  { %v11330_v9 = vadd.f32 %v3505_v29, %v3499_v56 }
0x3293   :  { %v11332_v33 = vadd.f32 %v3504_v46, %v3498_v16 }
0x3294   :  { %v3519_v7 = vrot.slane %v11330_v9, 2  ;;  %v3647_v0 = vrot.slane %v11330_v9, 7 }
0x3295   :  { %v3518_v22 = vrot.slane %v11332_v33, 3  ;;  %v3646_v13 = vrot.slane %v11332_v33, 7 }
0x3297   :  { %v3520_v8 = vsel %vm12513_vm2, %v3519_v7, %v3518_v22 }
0x3298   :  { %3521 = vrot.lane.b32.xlu1 %v3520_v8, %s10316_s23 }
0x330a   :  { %v3522_v60 = vpop.permute.xlu1 %3521 }
0x330b   :  { %8840 = vmatmul.mubr.msk.f32.vlgmr.msra.gmra.mxu0 %vm12512_vm1, %v3522_v60 }
0x330c   :  { %8854 = vmatpush3.msra.mxu0 %v11085_v19  ;;  %8861 = vmatprep.mubr.msk.f32.mxu0 %vm10314_vm0, %v10313_v1 }
0x330d   :  { %8855 = vmatprep.subr.mxu0 %v10313_v1 }
0x330e   :  { %8856 = vmatpush3.msra.mxu0 %v11087_v52 }
0x330f   :  { %8857 = vmatprep.subr.mxu0 %v10313_v1 }
0x3310   :  { %8858 = vmatpush3.msra.mxu0 %v11091_v34 }
0x3311   :  { %8859 = vmatprep.subr.mxu0 %v10313_v1 }
0x3312   :  { %8860 = vmatpush3.msra.mxu0 %v11097_v23 }
0x33cb   :  { %v3591_v54 = vpop.f32.mrf.mxu0 }
0x33cc   :  { %v3592_v10 = vadd.f32 %v11173_v12, %v3591_v54 }
0x33cd   :  { %v8841_v28 = vpop.f32.mrf.mxu0 }
0x33ce   :  { %v3596_v32 = vrot.slane %v3592_v10, 4  ;;  %v3597_v38 = vrot.slane %v3592_v10, 5 }
0x33d0   :  { %3616 = vrot.lane.b32.xlu1 %v3597_v38, %s10315_s28  ;;  %3614 = vrot.lane.b32.xlu0 %v3596_v32, %s10315_s28  ;;  %v3600_v39 = vadd.f32 %v3596_v32, %v11225_v51  ;;  %v3601_v40 = vadd.f32 %v3597_v38, %v11223_v17 }
0x33d2   :  { %v8160_v41 = vmul.f32 -1.442695, %v3600_v39  ;;  %v8161_v15 = vmul.f32 -1.442695, %v3601_v40 }
0x33d4   :  { %9532 = vpow2.f32 %v8160_v41 }
0x33d5   :  { %9534 = vpow2.f32 %v8161_v15 }
0x33e1   :  { %v9533_v45 = vpop.eup %9532 }
0x33e2   :  { %v9535_v14 = vpop.eup %9534  ;;  %v3608_v27 = vadd.f32 1.0, %v9533_v45 }
0x33e3   :  { %v3609_v47 = vadd.f32 1.0, %v9535_v14 }
0x33e4   :  { %9536 = vrcp.f32 %v3608_v27 }
0x33e5   :  { %9538 = vrcp.f32 %v3609_v47 }
0x33f1   :  { %v9537_v49 = vpop.eup %9536 }
0x33f2   :  { %v9539_v35 = vpop.eup %9538  ;;  %v3634_v59 = vsub.f32 1.0, %v9537_v49  ;;  %v3650_v25 = vmul.f32 %v9537_v49, %v3646_v13 }
0x33f3   :  { %v3635_v50 = vsub.f32 1.0, %v9539_v35  ;;  %v3651_v5 = vmul.f32 %v9539_v35, %v3647_v0 }
0x3442   :  { %v3617_v43 = vpop.permute.xlu1 %3616  ;;  %v3615_v58 = vpop.permute.xlu0 %3614 }
0x3443   :  { %v3621_v55 = vmul.f32 %v9539_v35, %v3617_v43  ;;  %v3620_v62 = vmul.f32 %v9537_v49, %v3615_v58  ;;  %v2849_v35 = vld [vmem:[%s12533_s1 + $0x38] sm:$0xff] }
0x3444   :  { %8875 = vmatprep.subr.mxu0 %v2849_v35 }
0x3445   :  { %3626 = vrot.lane.b32.xlu1 %v3621_v55, %s10315_s28  ;;  %3624 = vrot.lane.b32.xlu0 %v3620_v62, %s10315_s28 }
0x34b7   :  { %v3627_v6 = vpop.permute.xlu1 %3626  ;;  %v3625_v24 = vpop.permute.xlu0 %3624 }
0x34b8   :  { %v3631_v36 = vadd.f32 %v3627_v6, %v11223_v17  ;;  %v3630_v2 = vadd.f32 %v3625_v24, %v11225_v51 }
0x34ba   :  { %9540 = vtanh.f32 %v3631_v36 }
0x34bb   :  { %9542 = vtanh.f32 %v3630_v2 }
0x34c7   :  { %v9541_v57 = vpop.eup %9540 }
0x34c8   :  { %v9543_v4 = vpop.eup %9542  ;;  %3640 = vrot.lane.b32.xlu1 %v9541_v57, %s10316_s23 }
0x34c9   :  { %3638 = vrot.lane.b32.xlu0 %v9543_v4, %s10316_s23 }
0x353a   :  { %v3641_v44 = vpop.permute.xlu1 %3640 }
0x353b   :  { %v3645_v42 = vmul.f32 %v3641_v44, %v3635_v50  ;;  %v3639_v20 = vpop.permute.xlu0 %3638 }
0x353c   :  { %v3644_v26 = vmul.f32 %v3639_v20, %v3634_v59 }
0x353d   :  { %v11361_v48 = vadd.f32 %v3651_v5, %v3645_v42 }
0x353e   :  { %v11363_v18 = vadd.f32 %v3650_v25, %v3644_v26  ;;  %v2848_v25 = vld [vmem:[%s12533_s1 + $0x30] sm:$0xff]  ;;  %v2847_v26 = vld [vmem:[%s12533_s1 + $0x28] sm:$0xff] }
0x353f   :  { %v3665_v29 = vrot.slane %v11361_v48, 3  ;;  %v3793_v62 = vrot.slane %v11361_v48, 7 }
0x3540   :  { %v3664_v56 = vrot.slane %v11363_v18, 4  ;;  %v3792_v36 = vrot.slane %v11363_v18, 7 }
0x3542   :  { %v3666_v21 = vsel %vm12513_vm2, %v3665_v29, %v3664_v56  ;;  %v2846_v29 = vld [vmem:[%s12533_s1 + $0x20] sm:$0xff]  ;;  %v2845_v56 = vld [vmem:[%s12533_s1 + $0x18] sm:$0xff] }
0x3543   :  { %3667 = vrot.lane.b32.xlu0 %v3666_v21, %s10316_s23  ;;  %v2844_v21 = vld [vmem:[%s12533_s1 + $0x10] sm:$0xff] }
0x35b5   :  { %v3668_v46 = vpop.permute.xlu0 %3667 }
0x35b6   :  { %8851 = vmatmul.mubr.msk.f32.vlgmr.msra.gmra.mxu1 %vm12512_vm1, %v3668_v46  ;;  %v2843_v46 = vld [vmem:[%s12533_s1 + $0x8] sm:$0xff] }
0x35b7   :  { %8865 = vmatpush3.msra.mxu1 %v11085_v19  ;;  %8872 = vmatprep.mubr.msk.f32.mxu1 %vm10314_vm0, %v10313_v1 }
0x35b8   :  { %8866 = vmatprep.subr.mxu1 %v10313_v1 }
0x35b9   :  { %8867 = vmatpush3.msra.mxu1 %v11087_v52 }
0x35ba   :  { %8868 = vmatprep.subr.mxu1 %v10313_v1 }
0x35bb   :  { %8869 = vmatpush3.msra.mxu1 %v11091_v34 }
0x35bc   :  { %8870 = vmatprep.subr.mxu1 %v10313_v1 }
0x35bd   :  { %8871 = vmatpush3.msra.mxu1 %v11097_v23 }
0x35be   :  { %8894 = vmatprep.subr.mxu1 %v10313_v1 }
0x3676   :  { %v3737_v16 = vpop.f32.mrf.mxu1 }
0x3677   :  { %v3738_v19 = vadd.f32 %v11173_v12, %v3737_v16  ;;  %v2842_v16 = vld [vmem:[%s12533_s1] sm:$0xff] }
0x3678   :  { %v8852_v7 = vpop.f32.mrf.mxu1 }
0x3679   :  { %v3742_v22 = vrot.slane %v3738_v19, 3  ;;  %v3743_v8 = vrot.slane %v3738_v19, 4 }
0x367b   :  { %3762 = vrot.lane.b32.xlu0 %v3743_v8, %s10315_s28  ;;  %3760 = vrot.lane.b32.xlu1 %v3742_v22, %s10315_s28  ;;  %v3746_v52 = vadd.f32 %v3742_v22, %v11225_v51  ;;  %v3747_v34 = vadd.f32 %v3743_v8, %v11223_v17 }
0x367d   :  { %v8163_v60 = vmul.f32 -1.442695, %v3746_v52  ;;  %v8164_v54 = vmul.f32 -1.442695, %v3747_v34 }
0x367f   :  { %9544 = vpow2.f32 %v8163_v60 }
0x3680   :  { %9546 = vpow2.f32 %v8164_v54 }
0x368c   :  { %v9545_v23 = vpop.eup %9544 }
0x368d   :  { %v9547_v10 = vpop.eup %9546  ;;  %v3754_v28 = vadd.f32 1.0, %v9545_v23 }
0x368e   :  { %v3755_v32 = vadd.f32 1.0, %v9547_v10 }
0x368f   :  { %9548 = vrcp.f32 %v3754_v28 }
0x3690   :  { %9550 = vrcp.f32 %v3755_v32 }
0x369c   :  { %v9549_v38 = vpop.eup %9548 }
0x369d   :  { %v9551_v39 = vpop.eup %9550  ;;  %v3780_v24 = vsub.f32 1.0, %v9549_v38  ;;  %v3796_v50 = vmul.f32 %v9549_v38, %v3792_v36  ;;  %v11437_v36 = vld [vmem:[#allocation24 + $0x8] sm:$0xff] }
0x369e   :  { %v3781_v55 = vsub.f32 1.0, %v9551_v39  ;;  %v3797_v2 = vmul.f32 %v9551_v39, %v3793_v62 }
0x36ed   :  { %v3763_v40 = vpop.permute.xlu0 %3762  ;;  %v3761_v41 = vpop.permute.xlu1 %3760 }
0x36ee   :  { %v3767_v15 = vmul.f32 %v9551_v39, %v3763_v40  ;;  %v3766_v45 = vmul.f32 %v9549_v38, %v3761_v41 }
0x36f0   :  { %3772 = vrot.lane.b32.xlu0 %v3767_v15, %s10315_s28  ;;  %3770 = vrot.lane.b32.xlu1 %v3766_v45, %s10315_s28 }
0x3762   :  { %v3773_v14 = vpop.permute.xlu0 %3772  ;;  %v3771_v27 = vpop.permute.xlu1 %3770 }
0x3763   :  { %v3777_v47 = vadd.f32 %v3773_v14, %v11223_v17  ;;  %v3776_v49 = vadd.f32 %v3771_v27, %v11225_v51 }
0x3765   :  { %9552 = vtanh.f32 %v3777_v47 }
0x3766   :  { %9554 = vtanh.f32 %v3776_v49 }
0x3772   :  { %v9553_v43 = vpop.eup %9552 }
0x3773   :  { %v9555_v58 = vpop.eup %9554  ;;  %3786 = vrot.lane.b32.xlu0 %v9553_v43, %s10316_s23  ;;  %v11432_v43 = vld [vmem:[#allocation24 + $0x10] sm:$0xff] }
0x3774   :  { %3784 = vrot.lane.b32.xlu1 %v9555_v58, %s10316_s23 }
0x37e5   :  { %v3787_v6 = vpop.permute.xlu0 %3786 }
0x37e6   :  { %v3791_v57 = vmul.f32 %v3787_v6, %v3781_v55  ;;  %v3785_v4 = vpop.permute.xlu1 %3784 }
0x37e7   :  { %v3790_v0 = vmul.f32 %v3785_v4, %v3780_v24 }
0x37e8   :  { %v11394_v44 = vadd.f32 %v3797_v2, %v3791_v57 }
0x37e9   :  { %v11396_v59 = vadd.f32 %v3796_v50, %v3790_v0 }
0x37ea   :  { %v3811_v13 = vrot.slane %v11394_v44, 4  ;;  %v3939_v55 = vrot.slane %v11394_v44, 7 }
0x37eb   :  { %v3810_v5 = vrot.slane %v11396_v59, 5  ;;  %v3938_v24 = vrot.slane %v11396_v59, 7 }
0x37ed   :  { %v3812_v42 = vsel %vm12513_vm2, %v3811_v13, %v3810_v5  ;;  %v11441_v13 = vld [vmem:[#allocation24] sm:$0xff] }
0x37ee   :  { %3813 = vrot.lane.b32.xlu1 %v3812_v42, %s10316_s23 }
0x3860   :  { %v3814_v20 = vpop.permute.xlu1 %3813 }
0x3861   :  { %8862 = vmatmul.mubr.msk.f32.vlgmr.msra.gmra.mxu0 %vm12512_vm1, %v3814_v20 }
0x3862   :  { %8876 = vmatpush3.msra.mxu0 %v2849_v35  ;;  %8891 = vmatprep.mubr.msk.f32.mxu0 %vm2862_vm11, %v11201_v61  ;;  %v11428_v35 = vld [vmem:[#allocation24 + $0x18] sm:$0xff] }
0x3863   :  { %8877 = vmatprep.subr.mxu0 %v2848_v25 }
0x3864   :  { %8878 = vmatpush3.msra.mxu0 %v2848_v25 }
0x3865   :  { %8879 = vmatprep.subr.mxu0 %v2847_v26 }
0x3866   :  { %8880 = vmatpush3.msra.mxu0 %v2847_v26 }
0x3867   :  { %8881 = vmatprep.subr.mxu0 %v2846_v29 }
0x3868   :  { %8882 = vmatpush3.msra.mxu0 %v2846_v29 }
0x3869   :  { %8883 = vmatprep.subr.mxu0 %v2845_v56 }
0x386a   :  { %8884 = vmatpush3.msra.mxu0 %v2845_v56 }
0x386b   :  { %8885 = vmatprep.subr.mxu0 %v2844_v21 }
0x386c   :  { %8886 = vmatpush3.msra.mxu0 %v2844_v21 }
0x386d   :  { %8887 = vmatprep.subr.mxu0 %v2843_v46 }
0x386e   :  { %8888 = vmatpush3.msra.mxu0 %v2843_v46  ;;  %v11478_v46 = vld [vmem:[#allocation27] ss:$0 sm:$0xff] }
0x386f   :  { %8889 = vmatprep.subr.mxu0 %v2842_v16 }
0x3870   :  { %8890 = vmatpush3.msra.mxu0 %v2842_v16 }
0x3871   :  { %8892 = vmatmul.mubr.msk.f32.vlgmr.msra.gmra.mxu0 %vm2862_vm11, %v11209_v63  ;;  %8916 = vmatprep.subr.mxu0 %v10313_v1 }
0x3872   :  { %8924 = vmatprep.mubr.msk.f32.mxu0 %vm10314_vm0, %v10313_v1  ;;  %8917 = vmatpush3.msra.mxu0 %v11428_v35 }
0x3873   :  { %8918 = vmatprep.subr.mxu0 %v10313_v1 }
0x3874   :  { %8919 = vmatpush3.msra.mxu0 %v11432_v43 }
0x3875   :  { %8920 = vmatprep.subr.mxu0 %v10313_v1 }
0x3876   :  { %8921 = vmatpush3.msra.mxu0 %v11437_v36 }
0x3877   :  { %8922 = vmatprep.subr.mxu0 %v10313_v1 }
0x3878   :  { %8923 = vmatpush3.msra.mxu0 %v11441_v13 }
0x3879   :  { %8938 = vmatprep.subr.mxu0 %v10313_v1 }
0x3921   :  { %v3883_v61 = vpop.f32.mrf.mxu0 }
0x3922   :  { %v3884_v19 = vadd.f32 %v11173_v12, %v3883_v61 }
0x3923   :  { %v8863_v7 = vpop.f32.mrf.mxu0 }
0x3924   :  { %v3888_v22 = vrot.slane %v3884_v19, 2  ;;  %v3889_v8 = vrot.slane %v3884_v19, 3 }
0x3926   :  { %3908 = vrot.lane.b32.xlu1 %v3889_v8, %s10315_s28  ;;  %3906 = vrot.lane.b32.xlu0 %v3888_v22, %s10315_s28  ;;  %v3892_v52 = vadd.f32 %v3888_v22, %v11225_v51  ;;  %v3893_v34 = vadd.f32 %v3889_v8, %v11223_v17 }
0x3928   :  { %v8166_v63 = vmul.f32 -1.442695, %v3892_v52  ;;  %v8167_v60 = vmul.f32 -1.442695, %v3893_v34  ;;  %v8171_v34 = vld [vmem:[#allocation26] ss:$0 sm:$0xff] }
0x392a   :  { %9556 = vpow2.f32 %v8166_v63 }
0x392b   :  { %9558 = vpow2.f32 %v8167_v60 }
0x3931   :  { %v8893_v8 = vpop.f32.mrf.mxu0 }
0x3932   :  { %v11485_v60 = vadd.f32 %v8893_v8, %v8171_v34 }
0x3933   :  { %v4174_v52 = vpop.f32.mrf.mxu0 }
0x3934   :  { %v11483_v63 = vadd.f32 %v8171_v34, %v4174_v52 }
0x3937   :  { %v9557_v54 = vpop.eup %9556 }
0x3938   :  { %v9559_v23 = vpop.eup %9558  ;;  %v3900_v10 = vadd.f32 1.0, %v9557_v54 }
0x3939   :  { %v3901_v28 = vadd.f32 1.0, %v9559_v23 }
0x393a   :  { %9560 = vrcp.f32 %v3900_v10 }
0x393b   :  { %9562 = vrcp.f32 %v3901_v28 }
0x3947   :  { %v9561_v12 = vpop.eup %9560 }
0x3948   :  { %v9563_v32 = vpop.eup %9562  ;;  %v3926_v6 = vsub.f32 1.0, %v9561_v12  ;;  %v3942_v50 = vmul.f32 %v9561_v12, %v3938_v24 }
0x3949   :  { %v3927_v58 = vsub.f32 1.0, %v9563_v32  ;;  %v3943_v2 = vmul.f32 %v9563_v32, %v3939_v55 }
0x3998   :  { %v3909_v38 = vpop.permute.xlu1 %3908  ;;  %v3907_v39 = vpop.permute.xlu0 %3906 }
0x3999   :  { %v3913_v40 = vmul.f32 %v9563_v32, %v3909_v38  ;;  %v3912_v41 = vmul.f32 %v9561_v12, %v3907_v39 }
0x399b   :  { %3918 = vrot.lane.b32.xlu1 %v3913_v40, %s10315_s28  ;;  %3916 = vrot.lane.b32.xlu0 %v3912_v41, %s10315_s28 }
0x3a0d   :  { %v3919_v15 = vpop.permute.xlu1 %3918  ;;  %v3917_v45 = vpop.permute.xlu0 %3916 }
0x3a0e   :  { %v3923_v14 = vadd.f32 %v3919_v15, %v11223_v17  ;;  %v3922_v27 = vadd.f32 %v3917_v45, %v11225_v51 }
0x3a10   :  { %9564 = vtanh.f32 %v3923_v14 }
0x3a11   :  { %9566 = vtanh.f32 %v3922_v27 }
0x3a1d   :  { %v9565_v47 = vpop.eup %9564 }
0x3a1e   :  { %v9567_v49 = vpop.eup %9566  ;;  %3932 = vrot.lane.b32.xlu1 %v9565_v47, %s10316_s23 }
0x3a1f   :  { %3930 = vrot.lane.b32.xlu0 %v9567_v49, %s10316_s23 }
0x3a90   :  { %v3933_v62 = vpop.permute.xlu1 %3932 }
0x3a91   :  { %v3937_v57 = vmul.f32 %v3933_v62, %v3927_v58  ;;  %v3931_v4 = vpop.permute.xlu0 %3930 }
0x3a92   :  { %v3936_v0 = vmul.f32 %v3931_v4, %v3926_v6 }
0x3a93   :  { %v11444_v5 = vadd.f32 %v3943_v2, %v3937_v57 }
0x3a94   :  { %v11447_v42 = vadd.f32 %v3942_v50, %v3936_v0 }
0x3a95   :  { %v3957_v20 = vrot.slane %v11444_v5, 5 }
0x3a96   :  { %v3956_v25 = vrot.slane %v11447_v42, 6 }
0x3a98   :  { %v3958_v26 = vsel %vm12513_vm2, %v3957_v20, %v3956_v25 }
0x3a99   :  { %3959 = vrot.lane.b32.xlu0 %v3958_v26, %s10316_s23 }
0x3b0b   :  { %v3960_v29 = vpop.permute.xlu0 %3959 }
0x3b0c   :  { %8873 = vmatmul.mubr.msk.f32.vlgmr.msra.gmra.mxu1 %vm12512_vm1, %v3960_v29 }
0x3b0d   :  { %8895 = vmatpush3.msra.mxu1 %v11428_v35  ;;  %8902 = vmatprep.mubr.msk.f32.mxu1 %vm10314_vm0, %v10313_v1 }
0x3b0e   :  { %8896 = vmatprep.subr.mxu1 %v10313_v1 }
0x3b0f   :  { %8897 = vmatpush3.msra.mxu1 %v11432_v43 }
0x3b10   :  { %8898 = vmatprep.subr.mxu1 %v10313_v1 }
0x3b11   :  { %8899 = vmatpush3.msra.mxu1 %v11437_v36 }
0x3b12   :  { %8900 = vmatprep.subr.mxu1 %v10313_v1 }
0x3b13   :  { %8901 = vmatpush3.msra.mxu1 %v11441_v13 }
0x3b14   :  { %8903 = vmatmul.mubr.f32.vlgmr.msra.gmra.mxu1 %v10313_v1  ;;  %8905 = vmatprep.subr.mxu1 %v10313_v1 }
0x3b15   :  { %8906 = vmatpush3.msra.mxu1 %v11428_v35  ;;  %8913 = vmatprep.mubr.msk.f32.mxu1 %vm10314_vm0, %v10313_v1 }
0x3b16   :  { %8907 = vmatprep.subr.mxu1 %v10313_v1 }
0x3b17   :  { %8908 = vmatpush3.msra.mxu1 %v11432_v43 }
0x3b18   :  { %8909 = vmatprep.subr.mxu1 %v10313_v1 }
0x3b19   :  { %8910 = vmatpush3.msra.mxu1 %v11437_v36 }
0x3b1a   :  { %8911 = vmatprep.subr.mxu1 %v10313_v1 }
0x3b1b   :  { %8912 = vmatpush3.msra.mxu1 %v11441_v13 }
0x3b1c   :  { %8927 = vmatprep.subr.mxu1 %v10313_v1 }
0x3bcc   :  { %v11476_v56 = vpop.f32.mrf.mxu1 }
0x3bce   :  { %v8874_v21 = vpop.f32.mrf.mxu1 }
0x3bd4   :  { %v4255_v16 = vpop.f32.mrf.mxu1 }
0x3bd5   :  { %v4256_v61 = vadd.f32 %v11478_v46, %v4255_v16 }
0x3bd6   :  { %v8904_v19 = vpop.f32.mrf.mxu1 }
0x3bd7   :  { %v4260_v7 = vrot.slane %v4256_v61, 1  ;;  %v4261_v22 = vrot.slane %v4256_v61, 2 }
0x3bd9   :  { %4280 = vrot.lane.b32.xlu0 %v4261_v22, %s10315_s28  ;;  %4278 = vrot.lane.b32.xlu1 %v4260_v7, %s10315_s28  ;;  %v4264_v54 = vadd.f32 %v4260_v7, %v11483_v63  ;;  %v4265_v23 = vadd.f32 %v4261_v22, %v11485_v60 }
0x3bdb   :  { %v8175_v10 = vmul.f32 -1.442695, %v4264_v54  ;;  %v8176_v28 = vmul.f32 -1.442695, %v4265_v23 }
0x3bdd   :  { %9568 = vpow2.f32 %v8175_v10 }
0x3bde   :  { %9570 = vpow2.f32 %v8176_v28 }
0x3bea   :  { %v9569_v12 = vpop.eup %9568 }
0x3beb   :  { %v9571_v32 = vpop.eup %9570  ;;  %v4272_v38 = vadd.f32 1.0, %v9569_v12 }
0x3bec   :  { %v4273_v39 = vadd.f32 1.0, %v9571_v32 }
0x3bed   :  { %9572 = vrcp.f32 %v4272_v38 }
0x3bee   :  { %9574 = vrcp.f32 %v4273_v39 }
0x3bfa   :  { %v9573_v40 = vpop.eup %9572 }
0x3bfb   :  { %v9575_v41 = vpop.eup %9574  ;;  %v4298_v57 = vsub.f32 1.0, %v9573_v40  ;;  %v4310_v20 = vmul.f32 0.0, %v9573_v40 }
0x3bfc   :  { %v4299_v24 = vsub.f32 1.0, %v9575_v41  ;;  %v4311_v4 = vmul.f32 0.0, %v9575_v41 }
0x3c4b   :  { %v4281_v15 = vpop.permute.xlu0 %4280  ;;  %v4279_v45 = vpop.permute.xlu1 %4278 }
0x3c4c   :  { %v4285_v14 = vmul.f32 %v9575_v41, %v4281_v15  ;;  %v4284_v27 = vmul.f32 %v9573_v40, %v4279_v45 }
0x3c4e   :  { %4290 = vrot.lane.b32.xlu0 %v4285_v14, %s10315_s28  ;;  %4288 = vrot.lane.b32.xlu1 %v4284_v27, %s10315_s28 }
0x3cc0   :  { %v4291_v47 = vpop.permute.xlu0 %4290  ;;  %v4289_v49 = vpop.permute.xlu1 %4288 }
0x3cc1   :  { %v4295_v58 = vadd.f32 %v4291_v47, %v11485_v60  ;;  %v4294_v55 = vadd.f32 %v4289_v49, %v11483_v63 }
0x3cc3   :  { %9576 = vtanh.f32 %v4295_v58 }
0x3cc4   :  { %9578 = vtanh.f32 %v4294_v55 }
0x3cd0   :  { %v9577_v62 = vpop.eup %9576 }
0x3cd1   :  { %v9579_v6 = vpop.eup %9578  ;;  %4304 = vrot.lane.b32.xlu0 %v9577_v62, %s10316_s23 }
0x3cd2   :  { %4302 = vrot.lane.b32.xlu1 %v9579_v6, %s10316_s23 }
0x3d43   :  { %v4305_v2 = vpop.permute.xlu0 %4304 }
0x3d44   :  { %v4309_v50 = vmul.f32 %v4305_v2, %v4299_v24  ;;  %v4303_v0 = vpop.permute.xlu1 %4302 }
0x3d45   :  { %v4308_v25 = vmul.f32 %v4303_v0, %v4298_v57 }
0x3d46   :  { %v11495_v26 = vadd.f32 %v4311_v4, %v4309_v50 }
0x3d47   :  { %v11497_v29 = vadd.f32 %v4310_v20, %v4308_v25 }
0x3d48   :  { %v4319_v21 = vrot.slane %v11495_v26, 6  ;;  %v4447_v2 = vrot.slane %v11495_v26, 1 }
0x3d49   :  { %v4318_v16 = vrot.slane %v11497_v29, 7  ;;  %v4446_v50 = vrot.slane %v11497_v29, 1 }
0x3d4b   :  { %v4320_v61 = vsel %vm12513_vm2, %v4319_v21, %v4318_v16 }
0x3d4c   :  { %4321 = vrot.lane.b32.xlu1 %v4320_v61, %s10316_s23 }
0x3dbe   :  { %v4322_v19 = vpop.permute.xlu1 %4321 }
0x3dbf   :  { %8914 = vmatmul.mubr.msk.f32.vlgmr.msra.gmra.mxu1 %vm12512_vm1, %v4322_v19 }
0x3dc0   :  { %8928 = vmatpush3.msra.mxu1 %v11428_v35  ;;  %8935 = vmatprep.mubr.msk.f32.mxu1 %vm10314_vm0, %v10313_v1 }
0x3dc1   :  { %8929 = vmatprep.subr.mxu1 %v10313_v1 }
0x3dc2   :  { %8930 = vmatpush3.msra.mxu1 %v11432_v43 }
0x3dc3   :  { %8931 = vmatprep.subr.mxu1 %v10313_v1 }
0x3dc4   :  { %8932 = vmatpush3.msra.mxu1 %v11437_v36 }
0x3dc5   :  { %8933 = vmatprep.subr.mxu1 %v10313_v1 }
0x3dc6   :  { %8934 = vmatpush3.msra.mxu1 %v11441_v13 }
0x3dc7   :  { %8949 = vmatprep.subr.mxu1 %v10313_v1 }
0x3e7f   :  { %v4391_v7 = vpop.f32.mrf.mxu1 }
0x3e80   :  { %v4392_v22 = vadd.f32 %v11478_v46, %v4391_v7 }
0x3e81   :  { %v8915_v8 = vpop.f32.mrf.mxu1 }
0x3e82   :  { %v4396_v52 = vrot.slane %v4392_v22, 2  ;;  %v4397_v34 = vrot.slane %v4392_v22, 3 }
0x3e84   :  { %4416 = vrot.lane.b32.xlu1 %v4397_v34, %s10315_s28  ;;  %4414 = vrot.lane.b32.xlu0 %v4396_v52, %s10315_s28  ;;  %v4400_v54 = vadd.f32 %v4396_v52, %v11483_v63  ;;  %v4401_v23 = vadd.f32 %v4397_v34, %v11485_v60 }
0x3e86   :  { %v8178_v10 = vmul.f32 -1.442695, %v4400_v54  ;;  %v8179_v28 = vmul.f32 -1.442695, %v4401_v23 }
0x3e88   :  { %9580 = vpow2.f32 %v8178_v10 }
0x3e89   :  { %9582 = vpow2.f32 %v8179_v28 }
0x3e95   :  { %v9581_v12 = vpop.eup %9580 }
0x3e96   :  { %v9583_v32 = vpop.eup %9582  ;;  %v4408_v38 = vadd.f32 1.0, %v9581_v12 }
0x3e97   :  { %v4409_v39 = vadd.f32 1.0, %v9583_v32 }
0x3e98   :  { %9584 = vrcp.f32 %v4408_v38 }
0x3e99   :  { %9586 = vrcp.f32 %v4409_v39 }
0x3ea5   :  { %v9585_v40 = vpop.eup %9584 }
0x3ea6   :  { %v9587_v41 = vpop.eup %9586  ;;  %v4434_v4 = vsub.f32 1.0, %v9585_v40  ;;  %v4450_v21 = vmul.f32 %v9585_v40, %v4446_v50 }
0x3ea7   :  { %v4435_v24 = vsub.f32 1.0, %v9587_v41  ;;  %v4451_v0 = vmul.f32 %v9587_v41, %v4447_v2 }
0x3ef6   :  { %v4417_v15 = vpop.permute.xlu1 %4416  ;;  %v4415_v45 = vpop.permute.xlu0 %4414 }
0x3ef7   :  { %v4421_v14 = vmul.f32 %v9587_v41, %v4417_v15  ;;  %v4420_v27 = vmul.f32 %v9585_v40, %v4415_v45 }
0x3ef9   :  { %4426 = vrot.lane.b32.xlu1 %v4421_v14, %s10315_s28  ;;  %4424 = vrot.lane.b32.xlu0 %v4420_v27, %s10315_s28 }
0x3f6b   :  { %v4427_v47 = vpop.permute.xlu1 %4426  ;;  %v4425_v49 = vpop.permute.xlu0 %4424 }
0x3f6c   :  { %v4431_v58 = vadd.f32 %v4427_v47, %v11485_v60  ;;  %v4430_v55 = vadd.f32 %v4425_v49, %v11483_v63 }
0x3f6e   :  { %9588 = vtanh.f32 %v4431_v58 }
0x3f6f   :  { %9590 = vtanh.f32 %v4430_v55 }
0x3f7b   :  { %v9589_v62 = vpop.eup %9588 }
0x3f7c   :  { %v9591_v6 = vpop.eup %9590  ;;  %4440 = vrot.lane.b32.xlu1 %v9589_v62, %s10316_s23 }
0x3f7d   :  { %4438 = vrot.lane.b32.xlu0 %v9591_v6, %s10316_s23 }
0x3fee   :  { %v4441_v57 = vpop.permute.xlu1 %4440 }
0x3fef   :  { %v4445_v20 = vmul.f32 %v4441_v57, %v4435_v24  ;;  %v4439_v25 = vpop.permute.xlu0 %4438 }
0x3ff0   :  { %v4444_v16 = vmul.f32 %v4439_v25, %v4434_v4 }
0x3ff1   :  { %v11527_v61 = vadd.f32 %v4451_v0, %v4445_v20 }
0x3ff2   :  { %v11529_v19 = vadd.f32 %v4450_v21, %v4444_v16 }
0x3ff3   :  { %v4459_v7 = vrot.slane %v11527_v61, 5  ;;  %v4587_v0 = vrot.slane %v11527_v61, 1 }
0x3ff4   :  { %v4458_v22 = vrot.slane %v11529_v19, 6  ;;  %v4586_v21 = vrot.slane %v11529_v19, 1 }
0x3ff6   :  { %v4460_v8 = vsel %vm12513_vm2, %v4459_v7, %v4458_v22 }
0x3ff7   :  { %4461 = vrot.lane.b32.xlu0 %v4460_v8, %s10316_s23 }
0x4069   :  { %v4462_v52 = vpop.permute.xlu0 %4461 }
0x406a   :  { %8925 = vmatmul.mubr.msk.f32.vlgmr.msra.gmra.mxu0 %vm12512_vm1, %v4462_v52 }
0x406b   :  { %8939 = vmatpush3.msra.mxu0 %v11428_v35  ;;  %8946 = vmatprep.mubr.msk.f32.mxu0 %vm10314_vm0, %v10313_v1 }
0x406c   :  { %8940 = vmatprep.subr.mxu0 %v10313_v1 }
0x406d   :  { %8941 = vmatpush3.msra.mxu0 %v11432_v43 }
0x406e   :  { %8942 = vmatprep.subr.mxu0 %v10313_v1 }
0x406f   :  { %8943 = vmatpush3.msra.mxu0 %v11437_v36 }
0x4070   :  { %8944 = vmatprep.subr.mxu0 %v10313_v1 }
0x4071   :  { %8945 = vmatpush3.msra.mxu0 %v11441_v13 }
0x4072   :  { %8960 = vmatprep.subr.mxu0 %v10313_v1 }
0x412a   :  { %v4531_v34 = vpop.f32.mrf.mxu0 }
0x412b   :  { %v4532_v54 = vadd.f32 %v11478_v46, %v4531_v34 }
0x412c   :  { %v8926_v23 = vpop.f32.mrf.mxu0 }
0x412d   :  { %v4536_v10 = vrot.slane %v4532_v54, 3  ;;  %v4537_v28 = vrot.slane %v4532_v54, 4 }
0x412f   :  { %4556 = vrot.lane.b32.xlu0 %v4537_v28, %s10315_s28  ;;  %4554 = vrot.lane.b32.xlu1 %v4536_v10, %s10315_s28  ;;  %v4540_v12 = vadd.f32 %v4536_v10, %v11483_v63  ;;  %v4541_v32 = vadd.f32 %v4537_v28, %v11485_v60 }
0x4131   :  { %v8181_v38 = vmul.f32 -1.442695, %v4540_v12  ;;  %v8182_v39 = vmul.f32 -1.442695, %v4541_v32 }
0x4133   :  { %9592 = vpow2.f32 %v8181_v38 }
0x4134   :  { %9594 = vpow2.f32 %v8182_v39 }
0x4140   :  { %v9593_v40 = vpop.eup %9592 }
0x4141   :  { %v9595_v41 = vpop.eup %9594  ;;  %v4548_v15 = vadd.f32 1.0, %v9593_v40 }
0x4142   :  { %v4549_v45 = vadd.f32 1.0, %v9595_v41 }
0x4143   :  { %9596 = vrcp.f32 %v4548_v15 }
0x4144   :  { %9598 = vrcp.f32 %v4549_v45 }
0x4150   :  { %v9597_v14 = vpop.eup %9596 }
0x4151   :  { %v9599_v27 = vpop.eup %9598  ;;  %v4574_v25 = vsub.f32 1.0, %v9597_v14  ;;  %v4590_v8 = vmul.f32 %v9597_v14, %v4586_v21 }
0x4152   :  { %v4575_v50 = vsub.f32 1.0, %v9599_v27  ;;  %v4591_v16 = vmul.f32 %v9599_v27, %v4587_v0 }
0x41a1   :  { %v4557_v47 = vpop.permute.xlu0 %4556  ;;  %v4555_v49 = vpop.permute.xlu1 %4554 }
0x41a2   :  { %v4561_v58 = vmul.f32 %v9599_v27, %v4557_v47  ;;  %v4560_v55 = vmul.f32 %v9597_v14, %v4555_v49 }
0x41a4   :  { %4566 = vrot.lane.b32.xlu0 %v4561_v58, %s10315_s28  ;;  %4564 = vrot.lane.b32.xlu1 %v4560_v55, %s10315_s28 }
0x4216   :  { %v4567_v62 = vpop.permute.xlu0 %4566  ;;  %v4565_v6 = vpop.permute.xlu1 %4564 }
0x4217   :  { %v4571_v24 = vadd.f32 %v4567_v62, %v11485_v60  ;;  %v4570_v2 = vadd.f32 %v4565_v6, %v11483_v63 }
0x4219   :  { %9600 = vtanh.f32 %v4571_v24 }
0x421a   :  { %9602 = vtanh.f32 %v4570_v2 }
0x4226   :  { %v9601_v57 = vpop.eup %9600 }
0x4227   :  { %v9603_v4 = vpop.eup %9602  ;;  %4580 = vrot.lane.b32.xlu0 %v9601_v57, %s10316_s23 }
0x4228   :  { %4578 = vrot.lane.b32.xlu1 %v9603_v4, %s10316_s23 }
0x4299   :  { %v4581_v20 = vpop.permute.xlu0 %4580 }
0x429a   :  { %v4585_v7 = vmul.f32 %v4581_v20, %v4575_v50  ;;  %v4579_v22 = vpop.permute.xlu1 %4578 }
0x429b   :  { %v4584_v52 = vmul.f32 %v4579_v22, %v4574_v25 }
0x429c   :  { %v11559_v34 = vadd.f32 %v4591_v16, %v4585_v7 }
0x429d   :  { %v11561_v54 = vadd.f32 %v4590_v8, %v4584_v52 }
0x429e   :  { %v4599_v23 = vrot.slane %v11559_v34, 4  ;;  %v4727_v22 = vrot.slane %v11559_v34, 1 }
0x429f   :  { %v4598_v10 = vrot.slane %v11561_v54, 5 }
0x42a1   :  { %v4600_v28 = vsel %vm12513_vm2, %v4599_v23, %v4598_v10  ;;  %v4726_v23 = vrot.slane %v11561_v54, 1 }
0x42a2   :  { %4601 = vrot.lane.b32.xlu1 %v4600_v28, %s10316_s23 }
0x4314   :  { %v4602_v12 = vpop.permute.xlu1 %4601 }
0x4315   :  { %8936 = vmatmul.mubr.msk.f32.vlgmr.msra.gmra.mxu1 %vm12512_vm1, %v4602_v12 }
0x4316   :  { %8950 = vmatpush3.msra.mxu1 %v11428_v35  ;;  %8957 = vmatprep.mubr.msk.f32.mxu1 %vm10314_vm0, %v10313_v1 }
0x4317   :  { %8951 = vmatprep.subr.mxu1 %v10313_v1 }
0x4318   :  { %8952 = vmatpush3.msra.mxu1 %v11432_v43 }
0x4319   :  { %8953 = vmatprep.subr.mxu1 %v10313_v1 }
0x431a   :  { %8954 = vmatpush3.msra.mxu1 %v11437_v36 }
0x431b   :  { %8955 = vmatprep.subr.mxu1 %v10313_v1 }
0x431c   :  { %8956 = vmatpush3.msra.mxu1 %v11441_v13 }
0x431d   :  { %8971 = vmatprep.subr.mxu1 %v10313_v1 }
0x43d5   :  { %v4671_v32 = vpop.f32.mrf.mxu1 }
0x43d6   :  { %v4672_v38 = vadd.f32 %v11478_v46, %v4671_v32 }
0x43d7   :  { %v8937_v39 = vpop.f32.mrf.mxu1 }
0x43d8   :  { %v4676_v40 = vrot.slane %v4672_v38, 4  ;;  %v4677_v41 = vrot.slane %v4672_v38, 5 }
0x43da   :  { %4696 = vrot.lane.b32.xlu1 %v4677_v41, %s10315_s28  ;;  %4694 = vrot.lane.b32.xlu0 %v4676_v40, %s10315_s28  ;;  %v4680_v15 = vadd.f32 %v4676_v40, %v11483_v63  ;;  %v4681_v45 = vadd.f32 %v4677_v41, %v11485_v60 }
0x43dc   :  { %v8184_v14 = vmul.f32 -1.442695, %v4680_v15  ;;  %v8185_v27 = vmul.f32 -1.442695, %v4681_v45 }
0x43de   :  { %9604 = vpow2.f32 %v8184_v14 }
0x43df   :  { %9606 = vpow2.f32 %v8185_v27 }
0x43eb   :  { %v9605_v47 = vpop.eup %9604 }
0x43ec   :  { %v9607_v49 = vpop.eup %9606  ;;  %v4688_v58 = vadd.f32 1.0, %v9605_v47 }
0x43ed   :  { %v4689_v55 = vadd.f32 1.0, %v9607_v49 }
0x43ee   :  { %9608 = vrcp.f32 %v4688_v58 }
0x43ef   :  { %9610 = vrcp.f32 %v4689_v55 }
0x43fb   :  { %v9609_v62 = vpop.eup %9608 }
0x43fc   :  { %v9611_v6 = vpop.eup %9610  ;;  %v4714_v52 = vsub.f32 1.0, %v9609_v62  ;;  %v4730_v32 = vmul.f32 %v9609_v62, %v4726_v23 }
0x43fd   :  { %v4715_v7 = vsub.f32 1.0, %v9611_v6  ;;  %v4731_v10 = vmul.f32 %v9611_v6, %v4727_v22 }
0x444c   :  { %v4697_v24 = vpop.permute.xlu1 %4696  ;;  %v4695_v2 = vpop.permute.xlu0 %4694 }
0x444d   :  { %v4701_v57 = vmul.f32 %v9611_v6, %v4697_v24  ;;  %v4700_v4 = vmul.f32 %v9609_v62, %v4695_v2 }
0x444f   :  { %4706 = vrot.lane.b32.xlu1 %v4701_v57, %s10315_s28  ;;  %4704 = vrot.lane.b32.xlu0 %v4700_v4, %s10315_s28 }
0x44c1   :  { %v4707_v50 = vpop.permute.xlu1 %4706  ;;  %v4705_v0 = vpop.permute.xlu0 %4704 }
0x44c2   :  { %v4711_v20 = vadd.f32 %v4707_v50, %v11485_v60  ;;  %v4710_v25 = vadd.f32 %v4705_v0, %v11483_v63 }
0x44c4   :  { %9612 = vtanh.f32 %v4711_v20 }
0x44c5   :  { %9614 = vtanh.f32 %v4710_v25 }
0x44d1   :  { %v9613_v21 = vpop.eup %9612 }
0x44d2   :  { %v9615_v16 = vpop.eup %9614  ;;  %4720 = vrot.lane.b32.xlu1 %v9613_v21, %s10316_s23 }
0x44d3   :  { %4718 = vrot.lane.b32.xlu0 %v9615_v16, %s10316_s23 }
0x4544   :  { %v4721_v8 = vpop.permute.xlu1 %4720 }
0x4545   :  { %v4725_v28 = vmul.f32 %v4721_v8, %v4715_v7  ;;  %v4719_v12 = vpop.permute.xlu0 %4718 }
0x4546   :  { %v4724_v38 = vmul.f32 %v4719_v12, %v4714_v52 }
0x4547   :  { %v11591_v39 = vadd.f32 %v4731_v10, %v4725_v28 }
0x4548   :  { %v11593_v40 = vadd.f32 %v4730_v32, %v4724_v38 }
0x4549   :  { %v4739_v41 = vrot.slane %v11591_v39, 3  ;;  %v4867_v38 = vrot.slane %v11591_v39, 1 }
0x454a   :  { %v4738_v15 = vrot.slane %v11593_v40, 4 }
0x454c   :  { %v4740_v45 = vsel %vm12513_vm2, %v4739_v41, %v4738_v15 }
0x454d   :  { %4741 = vrot.lane.b32.xlu0 %v4740_v45, %s10316_s23  ;;  %v4866_v45 = vrot.slane %v11593_v40, 1 }
0x45bf   :  { %v4742_v14 = vpop.permute.xlu0 %4741 }
0x45c0   :  { %8947 = vmatmul.mubr.msk.f32.vlgmr.msra.gmra.mxu0 %vm12512_vm1, %v4742_v14 }
0x45c1   :  { %8961 = vmatpush3.msra.mxu0 %v11428_v35  ;;  %8968 = vmatprep.mubr.msk.f32.mxu0 %vm10314_vm0, %v10313_v1 }
0x45c2   :  { %8962 = vmatprep.subr.mxu0 %v10313_v1 }
0x45c3   :  { %8963 = vmatpush3.msra.mxu0 %v11432_v43 }
0x45c4   :  { %8964 = vmatprep.subr.mxu0 %v10313_v1 }
0x45c5   :  { %8965 = vmatpush3.msra.mxu0 %v11437_v36 }
0x45c6   :  { %8966 = vmatprep.subr.mxu0 %v10313_v1 }
0x45c7   :  { %8967 = vmatpush3.msra.mxu0 %v11441_v13 }
0x4680   :  { %v4811_v27 = vpop.f32.mrf.mxu0 }
0x4681   :  { %v4812_v47 = vadd.f32 %v11478_v46, %v4811_v27 }
0x4682   :  { %v8948_v49 = vpop.f32.mrf.mxu0 }
0x4683   :  { %v4816_v58 = vrot.slane %v4812_v47, 5  ;;  %v4817_v55 = vrot.slane %v4812_v47, 6 }
0x4685   :  { %4836 = vrot.lane.b32.xlu0 %v4817_v55, %s10315_s28  ;;  %4834 = vrot.lane.b32.xlu1 %v4816_v58, %s10315_s28  ;;  %v4820_v62 = vadd.f32 %v4816_v58, %v11483_v63  ;;  %v4821_v6 = vadd.f32 %v4817_v55, %v11485_v60 }
0x4687   :  { %v8187_v24 = vmul.f32 -1.442695, %v4820_v62  ;;  %v8188_v2 = vmul.f32 -1.442695, %v4821_v6 }
0x4689   :  { %9616 = vpow2.f32 %v8187_v24 }
0x468a   :  { %9618 = vpow2.f32 %v8188_v2 }
0x4696   :  { %v9617_v57 = vpop.eup %9616 }
0x4697   :  { %v9619_v4 = vpop.eup %9618  ;;  %v4828_v50 = vadd.f32 1.0, %v9617_v57 }
0x4698   :  { %v4829_v0 = vadd.f32 1.0, %v9619_v4 }
0x4699   :  { %9620 = vrcp.f32 %v4828_v50 }
0x469a   :  { %9622 = vrcp.f32 %v4829_v0 }
0x46a6   :  { %v9621_v20 = vpop.eup %9620 }
0x46a7   :  { %v9623_v25 = vpop.eup %9622  ;;  %v4854_v15 = vsub.f32 1.0, %v9621_v20  ;;  %v4870_v49 = vmul.f32 %v9621_v20, %v4866_v45 }
0x46a8   :  { %v4855_v32 = vsub.f32 1.0, %v9623_v25  ;;  %v4871_v14 = vmul.f32 %v9623_v25, %v4867_v38 }
0x46f7   :  { %v4837_v21 = vpop.permute.xlu0 %4836  ;;  %v4835_v16 = vpop.permute.xlu1 %4834 }
0x46f8   :  { %v4841_v7 = vmul.f32 %v9623_v25, %v4837_v21  ;;  %v4840_v22 = vmul.f32 %v9621_v20, %v4835_v16 }
0x46fa   :  { %4846 = vrot.lane.b32.xlu0 %v4841_v7, %s10315_s28  ;;  %4844 = vrot.lane.b32.xlu1 %v4840_v22, %s10315_s28 }
0x476c   :  { %v4847_v8 = vpop.permute.xlu0 %4846  ;;  %v4845_v52 = vpop.permute.xlu1 %4844 }
0x476d   :  { %v4851_v23 = vadd.f32 %v4847_v8, %v11485_v60  ;;  %v4850_v10 = vadd.f32 %v4845_v52, %v11483_v63 }
0x476f   :  { %9624 = vtanh.f32 %v4851_v23 }
0x4770   :  { %9626 = vtanh.f32 %v4850_v10 }
0x477c   :  { %v9625_v28 = vpop.eup %9624 }
0x477d   :  { %v9627_v12 = vpop.eup %9626  ;;  %4860 = vrot.lane.b32.xlu0 %v9625_v28, %s10316_s23 }
0x477e   :  { %4858 = vrot.lane.b32.xlu1 %v9627_v12, %s10316_s23 }
0x47ef   :  { %v4861_v41 = vpop.permute.xlu0 %4860 }
0x47f0   :  { %v4865_v27 = vmul.f32 %v4861_v41, %v4855_v32  ;;  %v4859_v47 = vpop.permute.xlu1 %4858 }
0x47f1   :  { %v4864_v58 = vmul.f32 %v4859_v47, %v4854_v15 }
0x47f2   :  { %v11622_v55 = vadd.f32 %v4871_v14, %v4865_v27 }
0x47f3   :  { %v11624_v62 = vadd.f32 %v4870_v49, %v4864_v58 }
0x47f4   :  { %v4879_v6 = vrot.slane %v11622_v55, 2  ;;  %v5007_v47 = vrot.slane %v11622_v55, 1 }
0x47f5   :  { %v4878_v24 = vrot.slane %v11624_v62, 3 }
0x47f7   :  { %v4880_v2 = vsel %vm12513_vm2, %v4879_v6, %v4878_v24  ;;  %v5006_v6 = vrot.slane %v11624_v62, 1 }
0x47f8   :  { %4881 = vrot.lane.b32.xlu1 %v4880_v2, %s10316_s23 }
0x486a   :  { %v4882_v57 = vpop.permute.xlu1 %4881 }
0x486b   :  { %8958 = vmatmul.mubr.msk.f32.vlgmr.msra.gmra.mxu1 %vm12512_vm1, %v4882_v57 }
0x486c   :  { %8972 = vmatpush3.msra.mxu1 %v11428_v35  ;;  %8979 = vmatprep.mubr.msk.f32.mxu1 %vm10314_vm0, %v10313_v1 }
0x486d   :  { %8973 = vmatprep.subr.mxu1 %v10313_v1 }
0x486e   :  { %8974 = vmatpush3.msra.mxu1 %v11432_v43 }
0x486f   :  { %8975 = vmatprep.subr.mxu1 %v10313_v1 }
0x4870   :  { %8976 = vmatpush3.msra.mxu1 %v11437_v36 }
0x4871   :  { %8977 = vmatprep.subr.mxu1 %v10313_v1 }
0x4872   :  { %8978 = vmatpush3.msra.mxu1 %v11441_v13 }
0x4873   :  { %9001 = vmatprep.subr.mxu1 %v10313_v1 }
0x492b   :  { %v4951_v4 = vpop.f32.mrf.mxu1 }
0x492c   :  { %v4952_v35 = vadd.f32 %v11478_v46, %v4951_v4 }
0x492d   :  { %v8959_v50 = vpop.f32.mrf.mxu1 }
0x492e   :  { %v4956_v0 = vrot.slane %v4952_v35, 6  ;;  %v4957_v20 = vrot.slane %v4952_v35, 7 }
0x4930   :  { %4976 = vrot.lane.b32.xlu1 %v4957_v20, %s10315_s28  ;;  %4974 = vrot.lane.b32.xlu0 %v4956_v0, %s10315_s28  ;;  %v4960_v43 = vadd.f32 %v4956_v0, %v11483_v63  ;;  %v4961_v36 = vadd.f32 %v4957_v20, %v11485_v60 }
0x4932   :  { %v8190_v25 = vmul.f32 -1.442695, %v4960_v43  ;;  %v8191_v21 = vmul.f32 -1.442695, %v4961_v36 }
0x4934   :  { %9628 = vpow2.f32 %v8190_v25 }
0x4935   :  { %9630 = vpow2.f32 %v8191_v21 }
0x4941   :  { %v9629_v13 = vpop.eup %9628 }
0x4942   :  { %v9631_v16 = vpop.eup %9630  ;;  %v4968_v7 = vadd.f32 1.0, %v9629_v13 }
0x4943   :  { %v4969_v22 = vadd.f32 1.0, %v9631_v16 }
0x4944   :  { %9632 = vrcp.f32 %v4968_v7 }
0x4945   :  { %9634 = vrcp.f32 %v4969_v22 }
0x4951   :  { %v9633_v8 = vpop.eup %9632 }
0x4952   :  { %v9635_v52 = vpop.eup %9634  ;;  %v4994_v58 = vsub.f32 1.0, %v9633_v8  ;;  %v5010_v4 = vmul.f32 %v9633_v8, %v5006_v6 }
0x4953   :  { %v4995_v27 = vsub.f32 1.0, %v9635_v52  ;;  %v5011_v24 = vmul.f32 %v9635_v52, %v5007_v47 }
0x49a2   :  { %v4977_v23 = vpop.permute.xlu1 %4976  ;;  %v4975_v10 = vpop.permute.xlu0 %4974 }
0x49a3   :  { %v4981_v28 = vmul.f32 %v9635_v52, %v4977_v23  ;;  %v4980_v12 = vmul.f32 %v9633_v8, %v4975_v10 }
0x49a5   :  { %4986 = vrot.lane.b32.xlu1 %v4981_v28, %s10315_s28  ;;  %4984 = vrot.lane.b32.xlu0 %v4980_v12, %s10315_s28 }
0x4a17   :  { %v4987_v32 = vpop.permute.xlu1 %4986  ;;  %v4985_v38 = vpop.permute.xlu0 %4984 }
0x4a18   :  { %v4991_v41 = vadd.f32 %v4987_v32, %v11485_v60  ;;  %v4990_v15 = vadd.f32 %v4985_v38, %v11483_v63 }
0x4a1a   :  { %9636 = vtanh.f32 %v4991_v41 }
0x4a1b   :  { %9638 = vtanh.f32 %v4990_v15 }
0x4a27   :  { %v9637_v45 = vpop.eup %9636 }
0x4a28   :  { %v9639_v14 = vpop.eup %9638  ;;  %5000 = vrot.lane.b32.xlu1 %v9637_v45, %s10316_s23 }
0x4a29   :  { %4998 = vrot.lane.b32.xlu0 %v9639_v14, %s10316_s23 }
0x4a9a   :  { %v5001_v49 = vpop.permute.xlu1 %5000 }
0x4a9b   :  { %v5005_v2 = vmul.f32 %v5001_v49, %v4995_v27  ;;  %v4999_v57 = vpop.permute.xlu0 %4998 }
0x4a9c   :  { %v5004_v35 = vmul.f32 %v4999_v57, %v4994_v58 }
0x4a9d   :  { %v11654_v50 = vadd.f32 %v5011_v24, %v5005_v2  ;;  %v9881_v24 = vld [vmem:[#allocation23] ss:$0 sm:$0xff] }
0x4a9e   :  { %v11656_v0 = vadd.f32 %v5010_v4, %v5004_v35  ;;  %v4030_v2 = vadd.f32 %v9881_v24, %v11476_v56 }
0x4a9f   :  { %v5019_v20 = vrot.slane %v11654_v50, 1 }
0x4aa0   :  { %v5018_v43 = vrot.slane %v11656_v0, 2  ;;  %v4034_v35 = vrot.slane %v4030_v2, 1  ;;  %v5145_v56 = vrot.slane %v11656_v0, 1 }
0x4aa2   :  { %v5020_v36 = vsel %vm12513_vm2, %v5019_v20, %v5018_v43  ;;  %v4038_v43 = vadd.f32 %v4034_v35, %v11225_v51 }
0x4aa3   :  { %5021 = vrot.lane.b32.xlu0 %v5020_v36, %s10316_s23 }
0x4aa4   :  { %v8169_v36 = vmul.f32 -1.442695, %v4038_v43 }
0x4b15   :  { %v5022_v25 = vpop.permute.xlu0 %5021 }
0x4b16   :  { %8969 = vmatmul.mubr.msk.f32.vlgmr.msra.gmra.mxu0 %vm12512_vm1, %v5022_v25 }
0x4bd6   :  { %v5091_v21 = vpop.f32.mrf.mxu0 }
0x4bd7   :  { %v5092_v13 = vadd.f32 %v11478_v46, %v5091_v21 }
0x4bd8   :  { %v8970_v16 = vpop.f32.mrf.mxu0 }
0x4bd9   :  { %v5096_v7 = vrot.slane %v5092_v13, 7  ;;  %5115 = vrot.lane.b32.xlu0 %v5092_v13, %s10315_s28  ;;  %v5100_v22 = vadd.f32 %v5092_v13, %v11485_v60 }
0x4bdb   :  { %5113 = vrot.lane.b32.xlu1 %v5096_v7, %s10315_s28  ;;  %v5099_v8 = vadd.f32 %v5096_v7, %v11483_v63  ;;  %v8194_v52 = vmul.f32 -1.442695, %v5100_v22 }
0x4bdd   :  { %v8193_v23 = vmul.f32 -1.442695, %v5099_v8  ;;  %9640 = vpow2.f32 %v8194_v52 }
0x4bdf   :  { %9642 = vpow2.f32 %v8193_v23 }
0x4bea   :  { %v9641_v10 = vpop.eup %9640 }
0x4beb   :  { %v5108_v12 = vadd.f32 1.0, %v9641_v10 }
0x4bec   :  { %v9643_v28 = vpop.eup %9642 }
0x4bed   :  { %v5107_v32 = vadd.f32 1.0, %v9643_v28  ;;  %9644 = vrcp.f32 %v5108_v12 }
0x4bef   :  { %9646 = vrcp.f32 %v5107_v32 }
0x4bfa   :  { %v9645_v38 = vpop.eup %9644 }
0x4bfb   :  { %v5134_v16 = vsub.f32 1.0, %v9645_v38  ;;  %v5149_v10 = vmul.f32 %v9645_v38, %v5019_v20 }
0x4bfc   :  { %v9647_v45 = vpop.eup %9646 }
0x4bfd   :  { %v5133_v7 = vsub.f32 1.0, %v9647_v45  ;;  %v5148_v52 = vmul.f32 %v9647_v45, %v5145_v56 }
0x4c4b   :  { %v5116_v41 = vpop.permute.xlu0 %5115 }
0x4c4c   :  { %v5120_v15 = vmul.f32 %v9645_v38, %v5116_v41 }
0x4c4d   :  { %v5114_v14 = vpop.permute.xlu1 %5113 }
0x4c4e   :  { %v5119_v27 = vmul.f32 %v9647_v45, %v5114_v14  ;;  %5125 = vrot.lane.b32.xlu0 %v5120_v15, %s10315_s28  ;;  %v4035_v15 = vrot.slane %v4030_v2, 2 }
0x4c50   :  { %5123 = vrot.lane.b32.xlu1 %v5119_v27, %s10315_s28  ;;  %v4039_v38 = vadd.f32 %v4035_v15, %v11223_v17 }
0x4c52   :  { %v8170_v27 = vmul.f32 -1.442695, %v4039_v38 }
0x4cc0   :  { %v5126_v47 = vpop.permute.xlu0 %5125 }
0x4cc1   :  { %v5130_v49 = vadd.f32 %v5126_v47, %v11485_v60 }
0x4cc2   :  { %v5124_v58 = vpop.permute.xlu1 %5123 }
0x4cc3   :  { %9648 = vtanh.f32 %v5130_v49  ;;  %v5129_v6 = vadd.f32 %v5124_v58, %v11483_v63 }
0x4cc5   :  { %9650 = vtanh.f32 %v5129_v6 }
0x4cc6   :  { %9652 = vpow2.f32 %v8169_v36 }
0x4cd0   :  { %v9649_v57 = vpop.eup %9648 }
0x4cd1   :  { %5139 = vrot.lane.b32.xlu0 %v9649_v57, %s10316_s23 }
0x4cd2   :  { %v9651_v4 = vpop.eup %9650 }
0x4cd3   :  { %5137 = vrot.lane.b32.xlu1 %v9651_v4, %s10316_s23  ;;  %v9653_v25 = vpop.eup %9652 }
0x4cd4   :  { %v4046_v21 = vadd.f32 1.0, %v9653_v25 }
0x4cd5   :  { %4052 = vrot.lane.b32.xlu0 %v4034_v35, %s10315_s28 }
0x4cd6   :  { %9654 = vrcp.f32 %v4046_v21 }
0x4cd7   :  { %9656 = vpow2.f32 %v8170_v27 }
0x4ce3   :  { %v11689_v45 = vpop.eup %9654 }
0x4ce4   :  { %v9657_v47 = vpop.eup %9656 }
0x4ce5   :  { %v4047_v49 = vadd.f32 1.0, %v9657_v47 }
0x4ce7   :  { %9658 = vrcp.f32 %v4047_v49 }
0x4cf4   :  { %v11697_v6 = vpop.eup %9658 }
0x4d43   :  { %v5140_v13 = vpop.permute.xlu0 %5139 }
0x4d44   :  { %v5144_v8 = vmul.f32 %v5140_v13, %v5134_v16 }
0x4d45   :  { %v5138_v22 = vpop.permute.xlu1 %5137 }
0x4d46   :  { %v5143_v23 = vmul.f32 %v5138_v22, %v5133_v7  ;;  %v11680_v12 = vadd.f32 %v5149_v10, %v5144_v8 }
0x4d47   :  { %v4053_v14 = vpop.permute.xlu0 %4052 }
0x4d48   :  { %v11678_v28 = vadd.f32 %v5148_v52, %v5143_v23  ;;  %v4058_v20 = vmul.f32 %v11689_v45, %v4053_v14 }
0x4d4a   :  { %v5156_v32 = vrot.slane %v11678_v28, 1 }
0x4d4c   :  { %v5157_v41 = vsel %vm12513_vm2, %v11680_v12, %v5156_v32  ;;  %vm12536_vm2 = vcmask 256002  }
0x4d4d   :  { %5158 = vrot.lane.b32.xlu1 %v5157_v41, %s10316_s23 }
0x4d51   :  { %4054 = vrot.lane.b32.xlu1 %v4035_v15, %s10315_s28 }
0x4d55   :  { %4062 = vrot.lane.b32.xlu1 %v4058_v20, %s10315_s28 }
0x4dbf   :  { %v5159_v58 = vpop.permute.xlu1 %5158 }
0x4dc0   :  { %8980 = vmatmul.mubr.msk.f32.vlgmr.msra.gmra.mxu1 %vm12512_vm1, %v5159_v58  ;;  %vm12535_vm1 = vcmask 253952  }
0x4dc1   :  { %9009 = vmatprep.mubr.msk.f32.mxu1 %vm10314_vm0, %v10313_v1 }
0x4dc3   :  { %v4055_v24 = vpop.permute.xlu1 %4054 }
0x4dc4   :  { %v4059_v2 = vmul.f32 %v11697_v6, %v4055_v24 }
0x4dc6   :  { %4064 = vrot.lane.b32.xlu1 %v4059_v2, %s10315_s28 }
0x4dc7   :  { %v4063_v22 = vpop.permute.xlu1 %4062 }
0x4e38   :  { %v4065_v52 = vpop.permute.xlu1 %4064 }
0x4e39   :  { %v4069_v23 = vadd.f32 %v4065_v52, %v11223_v17  ;;  %v11732_v17 = vld [vmem:[#allocation29 + $0x18] sm:$0xff] }
0x4e3a   :  { %9002 = vmatpush3.msra.mxu1 %v11732_v17 }
0x4e3b   :  { %9003 = vmatprep.subr.mxu1 %v10313_v1 }
0x4e80   :  { %v5228_v57 = vpop.f32.mrf.mxu1 }
0x4e81   :  { %v5229_v4 = vadd.f32 %v11478_v46, %v5228_v57  ;;  %v4068_v46 = vadd.f32 %v4063_v22, %v11225_v51 }
0x4e82   :  { %v8981_v35 = vpop.f32.mrf.mxu1 }
0x4e83   :  { %5250 = vrot.lane.b32.xlu0 %v5229_v4, %s10315_s28  ;;  %v5233_v43 = vrot.slane %v5229_v4, 1  ;;  %v5236_v36 = vadd.f32 %v5229_v4, %v11483_v63  ;;  %v5300_v4 = vld [vmem:[%s12534_s0 + $0x38] sm:$0xff]  ;;  %v5298_v35 = vld [vmem:[%s12534_s0 + $0x28] sm:$0xff] }
0x4e84   :  { %8982 = vmatprep.subr.mxu0 %v5300_v4 }
0x4e85   :  { %v5237_v25 = vadd.f32 %v5233_v43, %v11485_v60  ;;  %v8196_v21 = vmul.f32 -1.442695, %v5236_v36  ;;  %8983 = vmatpush3.msra.mxu0 %v5300_v4 }
0x4e87   :  { %5252 = vrot.lane.b32.xlu0 %v5233_v43, %s10315_s28  ;;  %9660 = vpow2.f32 %v8196_v21  ;;  %v8197_v13 = vmul.f32 -1.442695, %v5237_v25  ;;  %v5296_v21 = vld [vmem:[%s12534_s0 + $0x18] sm:$0xff] }
0x4e89   :  { %9662 = vpow2.f32 %v8197_v13 }
0x4e94   :  { %v9661_v16 = vpop.eup %9660 }
0x4e95   :  { %v5244_v7 = vadd.f32 1.0, %v9661_v16  ;;  %v5294_v16 = vld [vmem:[%s12534_s0 + $0x8] sm:$0xff] }
0x4e96   :  { %v9663_v56 = vpop.eup %9662 }
0x4e97   :  { %v5245_v8 = vadd.f32 1.0, %v9663_v56  ;;  %9664 = vrcp.f32 %v5244_v7  ;;  %v4073_v7 = vsub.f32 1.0, %v11697_v6 }
0x4e99   :  { %9666 = vrcp.f32 %v5245_v8 }
0x4e9a   :  { %9668 = vtanh.f32 %v4068_v46 }
0x4e9b   :  { %9670 = vtanh.f32 %v4069_v23 }
0x4ea4   :  { %v11708_v10 = vpop.eup %9664 }
0x4ea6   :  { %v11712_v14 = vpop.eup %9666 }
0x4ea7   :  { %v9669_v27 = vpop.eup %9668 }
0x4ea8   :  { %v9671_v51 = vpop.eup %9670 }
0x4ef5   :  { %v5251_v41 = vpop.permute.xlu0 %5250 }
0x4ef6   :  { %v5256_v15 = vmul.f32 %v11708_v10, %v5251_v41 }
0x4ef8   :  { %5260 = vrot.lane.b32.xlu0 %v5256_v15, %s10315_s28 }
0x4ef9   :  { %v5253_v20 = vpop.permute.xlu0 %5252 }
0x4efa   :  { %v5257_v38 = vmul.f32 %v11712_v14, %v5253_v20 }
0x4efc   :  { %4076 = vrot.lane.b32.xlu0 %v9669_v27, %s10316_s23  ;;  %5262 = vrot.lane.b32.xlu1 %v5257_v38, %s10315_s28  ;;  %v5285_v38 = vmul.f32 %v11708_v10, %v5156_v32  ;;  %v5282_v32 = vrot.slane %v11680_v12, 1 }
0x4f00   :  { %3076 = vrot.lane.b32.xlu0 %v11238_v37, %s10316_s23  ;;  %4078 = vrot.lane.b32.xlu1 %v9671_v51, %s10316_s23  ;;  %v11734_v37 = vld [vmem:[#allocation29 + $0x10] sm:$0xff] }
0x4f01   :  { %9004 = vmatpush3.msra.mxu1 %v11734_v37 }
0x4f02   :  { %9005 = vmatprep.subr.mxu1 %v10313_v1 }
0x4f04   :  { %3364 = vrot.lane.b32.xlu0 %v11300_v31, %s10316_s23  ;;  %3219 = vrot.lane.b32.xlu1 %v11266_v53, %s10316_s23  ;;  %v11738_v53 = vld [vmem:[#allocation29 + $0x8] sm:$0xff]  ;;  %v11744_v31 = vld [vmem:[#allocation29] sm:$0xff] }
0x4f05   :  { %9006 = vmatpush3.msra.mxu1 %v11738_v53 }
0x4f06   :  { %9007 = vmatprep.subr.mxu1 %v10313_v1 }
0x4f07   :  { %9008 = vmatpush3.msra.mxu1 %v11744_v31 }
0x4f08   :  { %3656 = vrot.lane.b32.xlu0 %v11363_v18, %s10316_s23  ;;  %3510 = vrot.lane.b32.xlu1 %v11332_v33, %s10316_s23  ;;  %v4072_v33 = vsub.f32 1.0, %v11689_v45 }
0x4f09   :  { %9010 = vmatmul.mubr.f32.vlgmr.msra.gmra.mxu1 %v10313_v1  ;;  %9012 = vmatprep.subr.mxu1 %v10313_v1 }
0x4f0a   :  { %9020 = vmatprep.mubr.msk.f32.mxu1 %vm10314_vm0, %v10313_v1  ;;  %9013 = vmatpush3.msra.mxu1 %v11732_v17 }
0x4f0b   :  { %9014 = vmatprep.subr.mxu1 %v10313_v1 }
0x4f0c   :  { %3948 = vrot.lane.b32.xlu0 %v11447_v42, %s10316_s23  ;;  %3802 = vrot.lane.b32.xlu1 %v11396_v59, %s10316_s23 }
0x4f0d   :  { %9015 = vmatpush3.msra.mxu1 %v11734_v37 }
0x4f0e   :  { %9016 = vmatprep.subr.mxu1 %v10313_v1 }
0x4f0f   :  { %9017 = vmatpush3.msra.mxu1 %v11738_v53 }
0x4f10   :  { %3078 = vrot.lane.b32.xlu0 %v11235_v3, %s10316_s23  ;;  %9018 = vmatprep.subr.mxu1 %v10313_v1 }
0x4f11   :  { %9019 = vmatpush3.msra.mxu1 %v11744_v31 }
0x4f12   :  { %9034 = vmatprep.subr.mxu1 %v10313_v1 }
0x4f14   :  { %3366 = vrot.lane.b32.xlu0 %v11298_v30, %s10316_s23 }
0x4f18   :  { %3658 = vrot.lane.b32.xlu0 %v11361_v48, %s10316_s23  ;;  %v4084_v48 = vrot.slane %v11447_v42, 7 }
0x4f1a   :  { %v4088_v47 = vmul.f32 %v11689_v45, %v4084_v48 }
0x4f6a   :  { %v5261_v3 = vpop.permute.xlu0 %5260 }
0x4f6b   :  { %v5266_v30 = vadd.f32 %v5261_v3, %v11483_v63  ;;  %v5299_v63 = vld [vmem:[%s12534_s0 + $0x30] sm:$0xff] }
0x4f6c   :  { %8984 = vmatprep.subr.mxu0 %v5299_v63 }
0x4f6d   :  { %9672 = vtanh.f32 %v5266_v30  ;;  %8985 = vmatpush3.msra.mxu0 %v5299_v63 }
0x4f6e   :  { %v4077_v18 = vpop.permute.xlu0 %4076  ;;  %v5263_v59 = vpop.permute.xlu1 %5262  ;;  %8986 = vmatprep.subr.mxu0 %v5298_v35 }
0x4f6f   :  { %v4082_v49 = vmul.f32 %v4077_v18, %v4072_v33  ;;  %v5267_v24 = vadd.f32 %v5263_v59, %v11485_v60  ;;  %8987 = vmatpush3.msra.mxu0 %v5298_v35  ;;  %v5297_v60 = vld [vmem:[%s12534_s0 + $0x20] sm:$0xff] }
0x4f70   :  { %8988 = vmatprep.subr.mxu0 %v5297_v60 }
0x4f71   :  { %v4090_v58 = vadd.f32 %v4088_v47, %v4082_v49  ;;  %9674 = vtanh.f32 %v5267_v24  ;;  %8989 = vmatpush3.msra.mxu0 %v5297_v60 }
0x4f72   :  { %v3077_v2 = vpop.permute.xlu0 %3076  ;;  %v4079_v57 = vpop.permute.xlu1 %4078  ;;  %8990 = vmatprep.subr.mxu0 %v5296_v21 }
0x4f73   :  { %3082 = vst.msk [vmem:[#allocation3] sm:$0x1] %vm12535_vm1, %v3077_v2  ;;  %4094 = vrot.lane.b32.xlu1 %v4090_v58, %s10316_s23  ;;  %vm12537_vm1 = vcmask 520452   ;;  %8991 = vmatpush3.msra.mxu0 %v5296_v21 }
0x4f76   :  { %v3365_v42 = vpop.permute.xlu0 %3364  ;;  %v3220_v45 = vpop.permute.xlu1 %3219 }
0x4f77   :  { %3370 = vst.msk [vmem:[#allocation3] sm:$0x4] %vm12536_vm2, %v3365_v42  ;;  %3221 = vrot.lane.b32.xlu1 %v11268_v11, %s10316_s23  ;;  %v5295_v11 = vld [vmem:[%s12534_s0 + $0x10] sm:$0xff]  ;;  %vm12538_vm2 = vcmask 519427  }
0x4f78   :  { %3225 = vst.msk [vmem:[#allocation3] sm:$0x2] %vm745_vm5, %v3220_v45  ;;  %8992 = vmatprep.subr.mxu0 %v5295_v11 }
0x4f79   :  { %5014 = vst.msk [vmem:[#allocation3] sm:$0x4] %vm2546_vm6, %v11656_v0  ;;  %8993 = vmatpush3.msra.mxu0 %v5295_v11 }
0x4f7a   :  { %5152 = vst.msk [vmem:[#allocation3] sm:$0x2] %vm2685_vm7, %v11678_v28  ;;  %v9673_v43 = vpop.eup %9672  ;;  %v3657_v36 = vpop.permute.xlu0 %3656  ;;  %8994 = vmatprep.subr.mxu0 %v5294_v16  ;;  %v5271_v28 = vsub.f32 1.0, %v11712_v14 }
0x4f7b   :  { %v3511_v25 = vpop.permute.xlu1 %3510  ;;  %3662 = vst.msk [vmem:[#allocation3] sm:$0x10] %vm1185_vm8, %v3657_v36  ;;  %5274 = vrot.lane.b32.xlu0 %v9673_v43, %s10316_s23  ;;  %3512 = vrot.lane.b32.xlu1 %v11330_v9, %s10316_s23  ;;  %v5293_v9 = vld [vmem:[%s12534_s0] sm:$0xff] }
0x4f7c   :  { %3516 = vst.msk [vmem:[#allocation3] sm:$0x8] %vm1038_vm9, %v3511_v25  ;;  %8995 = vmatpush3.msra.mxu0 %v5294_v16 }
0x4f7d   :  { %4734 = vst.msk [vmem:[#allocation3] sm:$0x10] %vm12537_vm1, %v11593_v40  ;;  %v4085_v40 = vrot.slane %v11444_v5, 7  ;;  %vm12540_vm1 = vcmask 253952   ;;  %8996 = vmatprep.subr.mxu0 %v5293_v9 }
0x4f7e   :  { %4874 = vst.msk [vmem:[#allocation3] sm:$0x8] %vm12538_vm2, %v11624_v62  ;;  %v3949_v0 = vpop.permute.xlu0 %3948  ;;  %v4083_v62 = vmul.f32 %v4079_v57, %v4073_v7  ;;  %v9675_v56 = vpop.eup %9674  ;;  %8997 = vmatpush3.msra.mxu0 %v5293_v9  ;;  %vm12541_vm2 = vcmask 256002  }
0x4f7f   :  { %v3803_v13 = vpop.permute.xlu1 %3802  ;;  %3954 = vst.msk [vmem:[#allocation3] sm:$0x40] %vm1479_vm12, %v3949_v0  ;;  %3950 = vrot.lane.b32.xlu0 %v11444_v5, %s10316_s23  ;;  %3804 = vrot.lane.b32.xlu1 %v11394_v44, %s10316_s23  ;;  %v4089_v8 = vmul.f32 %v11697_v6, %v4085_v40 }
0x4f80   :  { %3808 = vst.msk [vmem:[#allocation3] sm:$0x20] %vm1332_vm13, %v3803_v13  ;;  %9023 = vmatprep.subr.mxu0 %v10313_v1 }
0x4f81   :  { %4454 = vst.msk [vmem:[#allocation3] sm:$0x40] %vm1982_vm14, %v11529_v19  ;;  %v4091_v44 = vadd.f32 %v4089_v8, %v4083_v62 }
0x4f82   :  { %4594 = vst.msk [vmem:[#allocation3] sm:$0x20] %vm2123_vm15, %v11561_v54  ;;  %v3079_v22 = vpop.permute.xlu0 %3078  ;;  %v11821_v54 = vld [vmem:[%s12539_s5] ss:$0 sm:$0xff] }
0x4f83   :  { %3083 = vst.msk [vmem:[#allocation3 + $0x8] sm:$0x1] %vm12540_vm1, %v3079_v22  ;;  %5276 = vrot.lane.b32.xlu1 %v9675_v56, %s10316_s23  ;;  %vm12542_vm1 = vcmask 520452  }
0x4f86   :  { %v3367_v19 = vpop.permute.xlu0 %3366 }
0x4f87   :  { %3371 = vst.msk [vmem:[#allocation3 + $0x8] sm:$0x4] %vm12541_vm2, %v3367_v19  ;;  %4096 = vrot.lane.b32.xlu1 %v4091_v44, %s10316_s23  ;;  %vm12543_vm2 = vcmask 519427  }
0x4f88   :  { %5015 = vst.msk [vmem:[#allocation3 + $0x8] sm:$0x4] %vm2546_vm6, %v11654_v50 }
0x4f8a   :  { %v3659_v5 = vpop.permute.xlu0 %3658 }
0x4f8b   :  { %3663 = vst.msk [vmem:[#allocation3 + $0x8] sm:$0x10] %vm1185_vm8, %v3659_v5 }
0x4f8c   :  { %4735 = vst.msk [vmem:[#allocation3 + $0x8] sm:$0x10] %vm12542_vm1, %v11591_v39  ;;  %v5270_v39 = vsub.f32 1.0, %v11708_v10  ;;  %v5286_v10 = vmul.f32 %v11712_v14, %v5282_v32  ;;  %vm12545_vm1 = vcmask 1041409  }
0x4fc9   :  { %v5480_v6 = vpop.f32.mrf.mxu1 }
0x4fca   :  { %v5481_v46 = vadd.f32 %v11821_v54, %v5480_v6 }
0x4fcb   :  { %v9011_v52 = vpop.f32.mrf.mxu1 }
0x4fcc   :  { %v5485_v23 = vrot.slane %v5481_v46, 1  ;;  %5502 = vrot.lane.b32.xlu1 %v5481_v46, %s10315_s28 }
0x4fce   :  { %5504 = vrot.lane.b32.xlu0 %v5485_v23, %s10315_s28 }
0x4fe5   :  { %v4095_v41 = vpop.permute.xlu1 %4094 }
0x4fe6   :  { %4100 = vst.msk [vmem:[#allocation3] sm:$0x80] %vm1626_vm4, %v4095_v41 }
0x4fe7   :  { %4314 = vst.msk [vmem:[#allocation3] sm:$0x80] %vm1841_vm3, %v11497_v29 }
0x4fe9   :  { %v3222_v50 = vpop.permute.xlu1 %3221 }
0x4fea   :  { %3226 = vst.msk [vmem:[#allocation3 + $0x8] sm:$0x2] %vm745_vm5, %v3222_v50 }
0x4feb   :  { %5153 = vst.msk [vmem:[#allocation3 + $0x8] sm:$0x2] %vm2685_vm7, %v11680_v12 }
0x4fed   :  { %v5275_v15 = vpop.permute.xlu0 %5274  ;;  %v3513_v20 = vpop.permute.xlu1 %3512 }
0x4fee   :  { %v5280_v27 = vmul.f32 %v5275_v15, %v5270_v39  ;;  %3517 = vst.msk [vmem:[#allocation3 + $0x8] sm:$0x8] %vm1038_vm9, %v3513_v20 }
0x4fef   :  { %4875 = vst.msk [vmem:[#allocation3 + $0x8] sm:$0x8] %vm12543_vm2, %v11622_v55  ;;  %vm12546_vm2 = vcmask 261120  }
0x4ff0   :  { %v5287_v29 = vadd.f32 %v5285_v38, %v5280_v27 }
0x4ff1   :  { %v3951_v51 = vpop.permute.xlu0 %3950  ;;  %v3805_v3 = vpop.permute.xlu1 %3804 }
0x4ff2   :  { %5289 = vst.msk [vmem:[#allocation3] sm:$0x1] %vm2823_vm10, %v5287_v29 }
0x4ff3   :  { %3955 = vst.msk [vmem:[#allocation3 + $0x8] sm:$0x40] %vm1479_vm12, %v3951_v51 }
0x4ff4   :  { %3809 = vst.msk [vmem:[#allocation3 + $0x8] sm:$0x20] %vm1332_vm13, %v3805_v3 }
0x4ff5   :  { %4455 = vst.msk [vmem:[#allocation3 + $0x8] sm:$0x40] %vm1982_vm14, %v11527_v61  ;;  %v5277_v55 = vpop.permute.xlu1 %5276 }
0x4ff6   :  { %4595 = vst.msk [vmem:[#allocation3 + $0x8] sm:$0x20] %vm2123_vm15, %v11559_v34  ;;  %v5281_v30 = vmul.f32 %v5277_v55, %v5271_v28 }
0x4ff8   :  { %v5288_v33 = vadd.f32 %v5286_v10, %v5281_v30 }
0x4ff9   :  { %v4097_v48 = vpop.permute.xlu1 %4096  ;;  %v11849_v18 = vld [vmem:[#allocation3] sm:$0xff] }
0x4ffa   :  { %5290 = vst.msk [vmem:[#allocation3 + $0x8] sm:$0x1] %vm2823_vm10, %v5288_v33  ;;  %8998 = vmatprep.mubr.msk.f32.mxu0 %vm2862_vm11, %v11849_v18 }
0x4ffb   :  { %4101 = vst.msk [vmem:[#allocation3 + $0x8] sm:$0x80] %vm1626_vm4, %v4097_v48 }
0x4ffc   :  { %4315 = vst.msk [vmem:[#allocation3 + $0x8] sm:$0x80] %vm1841_vm3, %v11495_v26  ;;  %v8198_v26 = vld [vmem:[%s12544_s13] ss:$0 sm:$0xff] }
0x5003   :  { %v11857_v61 = vld [vmem:[#allocation3 + $0x8] sm:$0xff] }
0x5004   :  { %8999 = vmatmul.mubr.msk.f32.vlgmr.msra.gmra.mxu0 %vm2862_vm11, %v11857_v61 }
0x5005   :  { %9024 = vmatpush3.msra.mxu0 %v11732_v17  ;;  %9031 = vmatprep.mubr.msk.f32.mxu0 %vm10314_vm0, %v10313_v1 }
0x5006   :  { %9025 = vmatprep.subr.mxu0 %v10313_v1 }
0x5007   :  { %9026 = vmatpush3.msra.mxu0 %v11734_v37 }
0x5008   :  { %9027 = vmatprep.subr.mxu0 %v10313_v1 }
0x5009   :  { %9028 = vmatpush3.msra.mxu0 %v11738_v53 }
0x500a   :  { %9029 = vmatprep.subr.mxu0 %v10313_v1 }
0x500b   :  { %9030 = vmatpush3.msra.mxu0 %v11744_v31 }
0x500c   :  { %9045 = vmatprep.subr.mxu0 %v10313_v1 }
0x503e   :  { %v5503_v43 = vpop.permute.xlu1 %5502 }
0x5040   :  { %v5505_v42 = vpop.permute.xlu0 %5504 }
0x50c4   :  { %v9000_v34 = vpop.f32.mrf.mxu0 }
0x50c5   :  { %v11872_v12 = vadd.f32 %v9000_v34, %v8198_v26 }
0x50c6   :  { %v5399_v14 = vpop.f32.mrf.mxu0 }
0x50c7   :  { %v11874_v59 = vadd.f32 %v8198_v26, %v5399_v14  ;;  %v5489_v47 = vadd.f32 %v5485_v23, %v11872_v12 }
0x50c9   :  { %v5488_v49 = vadd.f32 %v5481_v46, %v11874_v59  ;;  %v8203_v58 = vmul.f32 -1.442695, %v5489_v47 }
0x50cb   :  { %v8202_v24 = vmul.f32 -1.442695, %v5488_v49  ;;  %9676 = vpow2.f32 %v8203_v58 }
0x50cd   :  { %9678 = vpow2.f32 %v8202_v24 }
0x50d8   :  { %v9677_v2 = vpop.eup %9676 }
0x50d9   :  { %v5497_v57 = vadd.f32 1.0, %v9677_v2 }
0x50da   :  { %v9679_v4 = vpop.eup %9678 }
0x50db   :  { %v5496_v63 = vadd.f32 1.0, %v9679_v4  ;;  %9680 = vrcp.f32 %v5497_v57 }
0x50dd   :  { %9682 = vrcp.f32 %v5496_v63 }
0x50e8   :  { %v9681_v45 = vpop.eup %9680 }
0x50e9   :  { %v5509_v35 = vmul.f32 %v9681_v45, %v5505_v42  ;;  %v5523_v7 = vsub.f32 1.0, %v9681_v45  ;;  %v5535_v40 = vmul.f32 0.0, %v9681_v45 }
0x50ea   :  { %v9683_v60 = vpop.eup %9682 }
0x50eb   :  { %v5508_v36 = vmul.f32 %v9683_v60, %v5503_v43  ;;  %5514 = vrot.lane.b32.xlu0 %v5509_v35, %s10315_s28  ;;  %v5522_v56 = vsub.f32 1.0, %v9683_v60  ;;  %v5534_v44 = vmul.f32 0.0, %v9683_v60 }
0x50ed   :  { %5512 = vrot.lane.b32.xlu1 %v5508_v36, %s10315_s28 }
0x515d   :  { %v5515_v25 = vpop.permute.xlu0 %5514 }
0x515e   :  { %v5519_v21 = vadd.f32 %v5515_v25, %v11872_v12 }
0x515f   :  { %v5513_v11 = vpop.permute.xlu1 %5512 }
0x5160   :  { %9684 = vtanh.f32 %v5519_v21  ;;  %v5518_v0 = vadd.f32 %v5513_v11, %v11874_v59 }
0x5162   :  { %9686 = vtanh.f32 %v5518_v0 }
0x516d   :  { %v9685_v13 = vpop.eup %9684 }
0x516e   :  { %5528 = vrot.lane.b32.xlu0 %v9685_v13, %s10316_s23 }
0x516f   :  { %v9687_v16 = vpop.eup %9686 }
0x5170   :  { %5526 = vrot.lane.b32.xlu1 %v9687_v16, %s10316_s23 }
0x51e0   :  { %v5529_v9 = vpop.permute.xlu0 %5528 }
0x51e1   :  { %v5533_v62 = vmul.f32 %v5529_v9, %v5523_v7 }
0x51e2   :  { %v5527_v22 = vpop.permute.xlu1 %5526 }
0x51e3   :  { %v11884_v8 = vadd.f32 %v5535_v40, %v5533_v62  ;;  %v5532_v19 = vmul.f32 %v5527_v22, %v5522_v56 }
0x51e5   :  { %v5548_v5 = vrot.slane %v11884_v8, 7  ;;  %v11887_v6 = vadd.f32 %v5534_v44, %v5532_v19 }
0x51e7   :  { %v5549_v46 = vsel %vm12545_vm1, %v5548_v5, %v11887_v6  ;;  %v5674_v4 = vrot.slane %v11887_v6, 7 }
0x51e8   :  { %5550 = vrot.lane.b32.xlu0 %v5549_v46, %s10316_s23 }
0x525a   :  { %v5551_v52 = vpop.permute.xlu0 %5550 }
0x525b   :  { %9021 = vmatmul.mubr.msk.f32.vlgmr.msra.gmra.mxu1 %vm12546_vm2, %v5551_v52 }
0x525c   :  { %9035 = vmatpush3.msra.mxu1 %v11732_v17  ;;  %9042 = vmatprep.mubr.msk.f32.mxu1 %vm10314_vm0, %v10313_v1 }
0x525d   :  { %9036 = vmatprep.subr.mxu1 %v10313_v1 }
0x525e   :  { %9037 = vmatpush3.msra.mxu1 %v11734_v37 }
0x525f   :  { %9038 = vmatprep.subr.mxu1 %v10313_v1 }
0x5260   :  { %9039 = vmatpush3.msra.mxu1 %v11738_v53 }
0x5261   :  { %9040 = vmatprep.subr.mxu1 %v10313_v1 }
0x5262   :  { %9041 = vmatpush3.msra.mxu1 %v11744_v31 }
0x5263   :  { %9056 = vmatprep.subr.mxu1 %v10313_v1 }
0x531b   :  { %v5620_v23 = vpop.f32.mrf.mxu1 }
0x531c   :  { %v5621_v41 = vadd.f32 %v11821_v54, %v5620_v23 }
0x531d   :  { %v9022_v50 = vpop.f32.mrf.mxu1 }
0x531e   :  { %v5625_v39 = vrot.slane %v5621_v41, 7  ;;  %5644 = vrot.lane.b32.xlu0 %v5621_v41, %s10315_s28  ;;  %v5629_v15 = vadd.f32 %v5621_v41, %v11872_v12 }
0x5320   :  { %5642 = vrot.lane.b32.xlu1 %v5625_v39, %s10315_s28  ;;  %v5628_v20 = vadd.f32 %v5625_v39, %v11874_v59  ;;  %v8206_v38 = vmul.f32 -1.442695, %v5629_v15 }
0x5322   :  { %v8205_v27 = vmul.f32 -1.442695, %v5628_v20  ;;  %9688 = vpow2.f32 %v8206_v38 }
0x5324   :  { %9690 = vpow2.f32 %v8205_v27 }
0x532f   :  { %v9689_v29 = vpop.eup %9688 }
0x5330   :  { %v5637_v3 = vadd.f32 1.0, %v9689_v29 }
0x5331   :  { %v9691_v51 = vpop.eup %9690 }
0x5332   :  { %v5636_v28 = vadd.f32 1.0, %v9691_v51  ;;  %9692 = vrcp.f32 %v5637_v3 }
0x5334   :  { %9694 = vrcp.f32 %v5636_v28 }
0x533f   :  { %v9693_v32 = vpop.eup %9692 }
0x5340   :  { %v5663_v2 = vsub.f32 1.0, %v9693_v32  ;;  %v5678_v60 = vmul.f32 %v9693_v32, %v5548_v5 }
0x5341   :  { %v9695_v30 = vpop.eup %9694 }
0x5342   :  { %v5662_v57 = vsub.f32 1.0, %v9695_v30  ;;  %v5677_v45 = vmul.f32 %v9695_v30, %v5674_v4 }
0x5390   :  { %v5645_v55 = vpop.permute.xlu0 %5644 }
0x5391   :  { %v5649_v10 = vmul.f32 %v9693_v32, %v5645_v55 }
0x5392   :  { %v5643_v33 = vpop.permute.xlu1 %5642 }
0x5393   :  { %v5648_v48 = vmul.f32 %v9695_v30, %v5643_v33  ;;  %5654 = vrot.lane.b32.xlu0 %v5649_v10, %s10315_s28 }
0x5395   :  { %5652 = vrot.lane.b32.xlu1 %v5648_v48, %s10315_s28 }
0x5405   :  { %v5655_v26 = vpop.permute.xlu0 %5654 }
0x5406   :  { %v5659_v34 = vadd.f32 %v5655_v26, %v11872_v12 }
0x5407   :  { %v5653_v14 = vpop.permute.xlu1 %5652 }
0x5408   :  { %9696 = vtanh.f32 %v5659_v34  ;;  %v5658_v47 = vadd.f32 %v5653_v14, %v11874_v59 }
0x540a   :  { %9698 = vtanh.f32 %v5658_v47 }
0x5415   :  { %v9697_v49 = vpop.eup %9696 }
0x5416   :  { %5668 = vrot.lane.b32.xlu0 %v9697_v49, %s10316_s23 }
0x5417   :  { %v9699_v58 = vpop.eup %9698 }
0x5418   :  { %5666 = vrot.lane.b32.xlu1 %v9699_v58, %s10316_s23 }
0x5488   :  { %v5669_v24 = vpop.permute.xlu0 %5668 }
0x5489   :  { %v5673_v42 = vmul.f32 %v5669_v24, %v5663_v2 }
0x548a   :  { %v5667_v63 = vpop.permute.xlu1 %5666 }
0x548b   :  { %v5672_v35 = vmul.f32 %v5667_v63, %v5662_v57  ;;  %v11917_v36 = vadd.f32 %v5678_v60, %v5673_v42 }
0x548d   :  { %v11915_v43 = vadd.f32 %v5677_v45, %v5672_v35  ;;  %v5819_v32 = vrot.slane %v11917_v36, 7 }
0x548f   :  { %v5691_v25 = vrot.slane %v11915_v43, 1  ;;  %v5818_v30 = vrot.slane %v11915_v43, 7 }
0x5491   :  { %v5692_v21 = vsel %vm12545_vm1, %v11917_v36, %v5691_v25 }
0x5492   :  { %5693 = vrot.lane.b32.xlu1 %v5692_v21, %s10316_s23 }
0x5504   :  { %v5694_v11 = vpop.permute.xlu1 %5693 }
0x5505   :  { %9032 = vmatmul.mubr.msk.f32.vlgmr.msra.gmra.mxu0 %vm12546_vm2, %v5694_v11 }
0x5506   :  { %9046 = vmatpush3.msra.mxu0 %v11732_v17  ;;  %9053 = vmatprep.mubr.msk.f32.mxu0 %vm10314_vm0, %v10313_v1 }
0x5507   :  { %9047 = vmatprep.subr.mxu0 %v10313_v1 }
0x5508   :  { %9048 = vmatpush3.msra.mxu0 %v11734_v37 }
0x5509   :  { %9049 = vmatprep.subr.mxu0 %v10313_v1 }
0x550a   :  { %9050 = vmatpush3.msra.mxu0 %v11738_v53 }
0x550b   :  { %9051 = vmatprep.subr.mxu0 %v10313_v1 }
0x550c   :  { %9052 = vmatpush3.msra.mxu0 %v11744_v31 }
0x550d   :  { %9067 = vmatprep.subr.mxu0 %v10313_v1 }
0x55c5   :  { %v5763_v0 = vpop.f32.mrf.mxu0 }
0x55c6   :  { %v5764_v13 = vadd.f32 %v11821_v54, %v5763_v0 }
0x55c7   :  { %v9033_v16 = vpop.f32.mrf.mxu0 }
0x55c8   :  { %v5768_v7 = vrot.slane %v5764_v13, 6  ;;  %v5769_v9 = vrot.slane %v5764_v13, 7 }
0x55ca   :  { %5788 = vrot.lane.b32.xlu1 %v5769_v9, %s10315_s28  ;;  %5786 = vrot.lane.b32.xlu0 %v5768_v7, %s10315_s28  ;;  %v5772_v40 = vadd.f32 %v5768_v7, %v11874_v59  ;;  %v5773_v62 = vadd.f32 %v5769_v9, %v11872_v12 }
0x55cc   :  { %v8208_v56 = vmul.f32 -1.442695, %v5772_v40  ;;  %v8209_v22 = vmul.f32 -1.442695, %v5773_v62 }
0x55ce   :  { %9700 = vpow2.f32 %v8208_v56 }
0x55cf   :  { %9702 = vpow2.f32 %v8209_v22 }
0x55db   :  { %v9701_v44 = vpop.eup %9700 }
0x55dc   :  { %v9703_v19 = vpop.eup %9702  ;;  %v5780_v5 = vadd.f32 1.0, %v9701_v44 }
0x55dd   :  { %v5781_v46 = vadd.f32 1.0, %v9703_v19 }
0x55de   :  { %9704 = vrcp.f32 %v5780_v5 }
0x55df   :  { %9706 = vrcp.f32 %v5781_v46 }
0x55eb   :  { %v9705_v52 = vpop.eup %9704 }
0x55ec   :  { %v9707_v23 = vpop.eup %9706  ;;  %v5806_v10 = vsub.f32 1.0, %v9705_v52  ;;  %v5822_v34 = vmul.f32 %v9705_v52, %v5818_v30 }
0x55ed   :  { %v5807_v28 = vsub.f32 1.0, %v9707_v23  ;;  %v5823_v33 = vmul.f32 %v9707_v23, %v5819_v32 }
0x563c   :  { %v5789_v41 = vpop.permute.xlu1 %5788  ;;  %v5787_v50 = vpop.permute.xlu0 %5786 }
0x563d   :  { %v5793_v39 = vmul.f32 %v9707_v23, %v5789_v41  ;;  %v5792_v15 = vmul.f32 %v9705_v52, %v5787_v50 }
0x563f   :  { %5798 = vrot.lane.b32.xlu1 %v5793_v39, %s10315_s28  ;;  %5796 = vrot.lane.b32.xlu0 %v5792_v15, %s10315_s28 }
0x56b1   :  { %v5799_v20 = vpop.permute.xlu1 %5798  ;;  %v5797_v38 = vpop.permute.xlu0 %5796 }
0x56b2   :  { %v5803_v27 = vadd.f32 %v5799_v20, %v11872_v12  ;;  %v5802_v29 = vadd.f32 %v5797_v38, %v11874_v59 }
0x56b4   :  { %9708 = vtanh.f32 %v5803_v27 }
0x56b5   :  { %9710 = vtanh.f32 %v5802_v29 }
0x56c1   :  { %v9709_v51 = vpop.eup %9708 }
0x56c2   :  { %v9711_v3 = vpop.eup %9710  ;;  %5812 = vrot.lane.b32.xlu1 %v9709_v51, %s10316_s23 }
0x56c3   :  { %5810 = vrot.lane.b32.xlu0 %v9711_v3, %s10316_s23 }
0x5734   :  { %v5813_v55 = vpop.permute.xlu1 %5812 }
0x5735   :  { %v5817_v48 = vmul.f32 %v5813_v55, %v5807_v28  ;;  %v5811_v26 = vpop.permute.xlu0 %5810 }
0x5736   :  { %v5816_v14 = vmul.f32 %v5811_v26, %v5806_v10 }
0x5737   :  { %v11947_v47 = vadd.f32 %v5823_v33, %v5817_v48 }
0x5738   :  { %v11949_v49 = vadd.f32 %v5822_v34, %v5816_v14 }
0x5739   :  { %v5837_v58 = vrot.slane %v11947_v47, 1  ;;  %v5965_v39 = vrot.slane %v11947_v47, 7 }
0x573a   :  { %v5836_v24 = vrot.slane %v11949_v49, 2  ;;  %v5964_v38 = vrot.slane %v11949_v49, 7 }
0x573c   :  { %v5838_v2 = vsel %vm12545_vm1, %v5837_v58, %v5836_v24 }
0x573d   :  { %5839 = vrot.lane.b32.xlu0 %v5838_v2, %s10316_s23 }
0x57af   :  { %v5840_v57 = vpop.permute.xlu0 %5839 }
0x57b0   :  { %9043 = vmatmul.mubr.msk.f32.vlgmr.msra.gmra.mxu1 %vm12546_vm2, %v5840_v57 }
0x57b1   :  { %9057 = vmatpush3.msra.mxu1 %v11732_v17  ;;  %9064 = vmatprep.mubr.msk.f32.mxu1 %vm10314_vm0, %v10313_v1 }
0x57b2   :  { %9058 = vmatprep.subr.mxu1 %v10313_v1 }
0x57b3   :  { %9059 = vmatpush3.msra.mxu1 %v11734_v37 }
0x57b4   :  { %9060 = vmatprep.subr.mxu1 %v10313_v1 }
0x57b5   :  { %9061 = vmatpush3.msra.mxu1 %v11738_v53 }
0x57b6   :  { %9062 = vmatprep.subr.mxu1 %v10313_v1 }
0x57b7   :  { %9063 = vmatpush3.msra.mxu1 %v11744_v31 }
0x57b8   :  { %9078 = vmatprep.subr.mxu1 %v10313_v1 }
0x5870   :  { %v5909_v4 = vpop.f32.mrf.mxu1 }
0x5871   :  { %v5910_v63 = vadd.f32 %v11821_v54, %v5909_v4 }
0x5872   :  { %v9044_v42 = vpop.f32.mrf.mxu1 }
0x5873   :  { %v5914_v45 = vrot.slane %v5910_v63, 5  ;;  %v5915_v35 = vrot.slane %v5910_v63, 6 }
0x5875   :  { %5934 = vrot.lane.b32.xlu0 %v5915_v35, %s10315_s28  ;;  %5932 = vrot.lane.b32.xlu1 %v5914_v45, %s10315_s28  ;;  %v5918_v60 = vadd.f32 %v5914_v45, %v11874_v59  ;;  %v5919_v25 = vadd.f32 %v5915_v35, %v11872_v12 }
0x5877   :  { %v8211_v21 = vmul.f32 -1.442695, %v5918_v60  ;;  %v8212_v11 = vmul.f32 -1.442695, %v5919_v25 }
0x5879   :  { %9712 = vpow2.f32 %v8211_v21 }
0x587a   :  { %9714 = vpow2.f32 %v8212_v11 }
0x5886   :  { %v9713_v0 = vpop.eup %9712 }
0x5887   :  { %v9715_v13 = vpop.eup %9714  ;;  %v5926_v16 = vadd.f32 1.0, %v9713_v0 }
0x5888   :  { %v5927_v7 = vadd.f32 1.0, %v9715_v13 }
0x5889   :  { %9716 = vrcp.f32 %v5926_v16 }
0x588a   :  { %9718 = vrcp.f32 %v5927_v7 }
0x5896   :  { %v9717_v9 = vpop.eup %9716 }
0x5897   :  { %v9719_v40 = vpop.eup %9718  ;;  %v5952_v20 = vsub.f32 1.0, %v9717_v9  ;;  %v5968_v3 = vmul.f32 %v9717_v9, %v5964_v38 }
0x5898   :  { %v5953_v50 = vsub.f32 1.0, %v9719_v40  ;;  %v5969_v27 = vmul.f32 %v9719_v40, %v5965_v39 }
0x58e7   :  { %v5935_v62 = vpop.permute.xlu0 %5934  ;;  %v5933_v56 = vpop.permute.xlu1 %5932 }
0x58e8   :  { %v5939_v22 = vmul.f32 %v9719_v40, %v5935_v62  ;;  %v5938_v44 = vmul.f32 %v9717_v9, %v5933_v56 }
0x58ea   :  { %5944 = vrot.lane.b32.xlu0 %v5939_v22, %s10315_s28  ;;  %5942 = vrot.lane.b32.xlu1 %v5938_v44, %s10315_s28 }
0x595c   :  { %v5945_v19 = vpop.permute.xlu0 %5944  ;;  %v5943_v5 = vpop.permute.xlu1 %5942 }
0x595d   :  { %v5949_v46 = vadd.f32 %v5945_v19, %v11872_v12  ;;  %v5948_v52 = vadd.f32 %v5943_v5, %v11874_v59 }
0x595f   :  { %9720 = vtanh.f32 %v5949_v46 }
0x5960   :  { %9722 = vtanh.f32 %v5948_v52 }
0x596c   :  { %v9721_v23 = vpop.eup %9720 }
0x596d   :  { %v9723_v41 = vpop.eup %9722  ;;  %5958 = vrot.lane.b32.xlu0 %v9721_v23, %s10316_s23 }
0x596e   :  { %5956 = vrot.lane.b32.xlu1 %v9723_v41, %s10316_s23 }
0x59df   :  { %v5959_v15 = vpop.permute.xlu0 %5958 }
0x59e0   :  { %v5963_v29 = vmul.f32 %v5959_v15, %v5953_v50  ;;  %v5957_v51 = vpop.permute.xlu1 %5956 }
0x59e1   :  { %v5962_v28 = vmul.f32 %v5957_v51, %v5952_v20 }
0x59e2   :  { %v11979_v32 = vadd.f32 %v5969_v27, %v5963_v29 }
0x59e3   :  { %v11981_v55 = vadd.f32 %v5968_v3, %v5962_v28 }
0x59e4   :  { %v5983_v10 = vrot.slane %v11979_v32, 2  ;;  %v6111_v19 = vrot.slane %v11979_v32, 7 }
0x59e5   :  { %v5982_v30 = vrot.slane %v11981_v55, 3  ;;  %v6110_v52 = vrot.slane %v11981_v55, 7 }
0x59e7   :  { %v5984_v33 = vsel %vm12545_vm1, %v5983_v10, %v5982_v30 }
0x59e8   :  { %5985 = vrot.lane.b32.xlu1 %v5984_v33, %s10316_s23 }
0x5a5a   :  { %v5986_v48 = vpop.permute.xlu1 %5985 }
0x5a5b   :  { %9054 = vmatmul.mubr.msk.f32.vlgmr.msra.gmra.mxu0 %vm12546_vm2, %v5986_v48 }
0x5a5c   :  { %9068 = vmatpush3.msra.mxu0 %v11732_v17  ;;  %9075 = vmatprep.mubr.msk.f32.mxu0 %vm10314_vm0, %v10313_v1 }
0x5a5d   :  { %9069 = vmatprep.subr.mxu0 %v10313_v1 }
0x5a5e   :  { %9070 = vmatpush3.msra.mxu0 %v11734_v37 }
0x5a5f   :  { %9071 = vmatprep.subr.mxu0 %v10313_v1 }
0x5a60   :  { %9072 = vmatpush3.msra.mxu0 %v11738_v53 }
0x5a61   :  { %9073 = vmatprep.subr.mxu0 %v10313_v1 }
0x5a62   :  { %9074 = vmatpush3.msra.mxu0 %v11744_v31 }
0x5b1b   :  { %v6055_v26 = vpop.f32.mrf.mxu0 }
0x5b1c   :  { %v6056_v34 = vadd.f32 %v11821_v54, %v6055_v26 }
0x5b1d   :  { %v9055_v14 = vpop.f32.mrf.mxu0 }
0x5b1e   :  { %v6060_v58 = vrot.slane %v6056_v34, 4  ;;  %v6061_v24 = vrot.slane %v6056_v34, 5 }
0x5b20   :  { %6080 = vrot.lane.b32.xlu1 %v6061_v24, %s10315_s28  ;;  %6078 = vrot.lane.b32.xlu0 %v6060_v58, %s10315_s28  ;;  %v6064_v2 = vadd.f32 %v6060_v58, %v11874_v59  ;;  %v6065_v57 = vadd.f32 %v6061_v24, %v11872_v12 }
0x5b22   :  { %v8214_v4 = vmul.f32 -1.442695, %v6064_v2  ;;  %v8215_v63 = vmul.f32 -1.442695, %v6065_v57 }
0x5b24   :  { %9724 = vpow2.f32 %v8214_v4 }
0x5b25   :  { %9726 = vpow2.f32 %v8215_v63 }
0x5b31   :  { %v9725_v42 = vpop.eup %9724 }
0x5b32   :  { %v9727_v45 = vpop.eup %9726  ;;  %v6072_v35 = vadd.f32 1.0, %v9725_v42 }
0x5b33   :  { %v6073_v60 = vadd.f32 1.0, %v9727_v45 }
0x5b34   :  { %9728 = vrcp.f32 %v6072_v35 }
0x5b35   :  { %9730 = vrcp.f32 %v6073_v60 }
0x5b41   :  { %v9729_v25 = vpop.eup %9728 }
0x5b42   :  { %v9731_v21 = vpop.eup %9730  ;;  %v6098_v46 = vsub.f32 1.0, %v9729_v25  ;;  %v6114_v39 = vmul.f32 %v9729_v25, %v6110_v52 }
0x5b43   :  { %v6099_v44 = vsub.f32 1.0, %v9731_v21  ;;  %v6115_v23 = vmul.f32 %v9731_v21, %v6111_v19 }
0x5b92   :  { %v6081_v11 = vpop.permute.xlu1 %6080  ;;  %v6079_v0 = vpop.permute.xlu0 %6078 }
0x5b93   :  { %v6085_v13 = vmul.f32 %v9731_v21, %v6081_v11  ;;  %v6084_v16 = vmul.f32 %v9729_v25, %v6079_v0  ;;  %v5314_v21 = vld [vmem:[#allocation30 + $0x38] sm:$0xff] }
0x5b94   :  { %9089 = vmatprep.subr.mxu0 %v5314_v21 }
0x5b95   :  { %6090 = vrot.lane.b32.xlu1 %v6085_v13, %s10315_s28  ;;  %6088 = vrot.lane.b32.xlu0 %v6084_v16, %s10315_s28 }
0x5c07   :  { %v6091_v7 = vpop.permute.xlu1 %6090  ;;  %v6089_v9 = vpop.permute.xlu0 %6088 }
0x5c08   :  { %v6095_v40 = vadd.f32 %v6091_v7, %v11872_v12  ;;  %v6094_v62 = vadd.f32 %v6089_v9, %v11874_v59 }
0x5c0a   :  { %9732 = vtanh.f32 %v6095_v40 }
0x5c0b   :  { %9734 = vtanh.f32 %v6094_v62 }
0x5c17   :  { %v9733_v56 = vpop.eup %9732 }
0x5c18   :  { %v9735_v22 = vpop.eup %9734  ;;  %6104 = vrot.lane.b32.xlu1 %v9733_v56, %s10316_s23 }
0x5c19   :  { %6102 = vrot.lane.b32.xlu0 %v9735_v22, %s10316_s23 }
0x5c8a   :  { %v6105_v5 = vpop.permute.xlu1 %6104 }
0x5c8b   :  { %v6109_v41 = vmul.f32 %v6105_v5, %v6099_v44  ;;  %v6103_v50 = vpop.permute.xlu0 %6102 }
0x5c8c   :  { %v6108_v15 = vmul.f32 %v6103_v50, %v6098_v46 }
0x5c8d   :  { %v12010_v20 = vadd.f32 %v6115_v23, %v6109_v41 }
0x5c8e   :  { %v12012_v38 = vadd.f32 %v6114_v39, %v6108_v15  ;;  %v5313_v39 = vld [vmem:[#allocation30 + $0x30] sm:$0xff]  ;;  %v5312_v15 = vld [vmem:[#allocation30 + $0x28] sm:$0xff] }
0x5c8f   :  { %v6129_v27 = vrot.slane %v12010_v20, 3  ;;  %v6257_v16 = vrot.slane %v12010_v20, 7 }
0x5c90   :  { %v6128_v29 = vrot.slane %v12012_v38, 4  ;;  %v6256_v40 = vrot.slane %v12012_v38, 7 }
0x5c92   :  { %v6130_v51 = vsel %vm12545_vm1, %v6129_v27, %v6128_v29  ;;  %v5311_v27 = vld [vmem:[#allocation30 + $0x20] sm:$0xff]  ;;  %v5310_v29 = vld [vmem:[#allocation30 + $0x18] sm:$0xff] }
0x5c93   :  { %6131 = vrot.lane.b32.xlu0 %v6130_v51, %s10316_s23  ;;  %v5309_v51 = vld [vmem:[#allocation30 + $0x10] sm:$0xff] }
0x5d05   :  { %v6132_v3 = vpop.permute.xlu0 %6131 }
0x5d06   :  { %9065 = vmatmul.mubr.msk.f32.vlgmr.msra.gmra.mxu1 %vm12546_vm2, %v6132_v3  ;;  %v5308_v3 = vld [vmem:[#allocation30 + $0x8] sm:$0xff] }
0x5d07   :  { %9079 = vmatpush3.msra.mxu1 %v11732_v17  ;;  %9086 = vmatprep.mubr.msk.f32.mxu1 %vm10314_vm0, %v10313_v1 }
0x5d08   :  { %9080 = vmatprep.subr.mxu1 %v10313_v1 }
0x5d09   :  { %9081 = vmatpush3.msra.mxu1 %v11734_v37 }
0x5d0a   :  { %9082 = vmatprep.subr.mxu1 %v10313_v1 }
0x5d0b   :  { %9083 = vmatpush3.msra.mxu1 %v11738_v53 }
0x5d0c   :  { %9084 = vmatprep.subr.mxu1 %v10313_v1 }
0x5d0d   :  { %9085 = vmatpush3.msra.mxu1 %v11744_v31 }
0x5d0e   :  { %9108 = vmatprep.subr.mxu1 %v10313_v1 }
0x5dc6   :  { %v6201_v28 = vpop.f32.mrf.mxu1 }
0x5dc7   :  { %v6202_v17 = vadd.f32 %v11821_v54, %v6201_v28  ;;  %v5307_v28 = vld [vmem:[#allocation30] sm:$0xff] }
0x5dc8   :  { %v9066_v10 = vpop.f32.mrf.mxu1 }
0x5dc9   :  { %v6206_v30 = vrot.slane %v6202_v17, 3  ;;  %v6207_v33 = vrot.slane %v6202_v17, 4 }
0x5dcb   :  { %6226 = vrot.lane.b32.xlu0 %v6207_v33, %s10315_s28  ;;  %6224 = vrot.lane.b32.xlu1 %v6206_v30, %s10315_s28  ;;  %v6210_v37 = vadd.f32 %v6206_v30, %v11874_v59  ;;  %v6211_v53 = vadd.f32 %v6207_v33, %v11872_v12 }
0x5dcd   :  { %v8217_v48 = vmul.f32 -1.442695, %v6210_v37  ;;  %v8218_v26 = vmul.f32 -1.442695, %v6211_v53 }
0x5dcf   :  { %9736 = vpow2.f32 %v8217_v48 }
0x5dd0   :  { %9738 = vpow2.f32 %v8218_v26 }
0x5ddc   :  { %v9737_v31 = vpop.eup %9736 }
0x5ddd   :  { %v9739_v34 = vpop.eup %9738  ;;  %v6218_v14 = vadd.f32 1.0, %v9737_v31 }
0x5dde   :  { %v6219_v58 = vadd.f32 1.0, %v9739_v34 }
0x5ddf   :  { %9740 = vrcp.f32 %v6218_v14 }
0x5de0   :  { %9742 = vrcp.f32 %v6219_v58 }
0x5dec   :  { %v9741_v24 = vpop.eup %9740 }
0x5ded   :  { %v9743_v2 = vpop.eup %9742  ;;  %v6244_v9 = vsub.f32 1.0, %v9741_v24  ;;  %v6260_v44 = vmul.f32 %v9741_v24, %v6256_v40  ;;  %v12078_v40 = vld [vmem:[#allocation32 + $0x8] sm:$0xff] }
0x5dee   :  { %v6245_v13 = vsub.f32 1.0, %v9743_v2  ;;  %v6261_v62 = vmul.f32 %v9743_v2, %v6257_v16 }
0x5e3d   :  { %v6227_v57 = vpop.permute.xlu0 %6226  ;;  %v6225_v4 = vpop.permute.xlu1 %6224 }
0x5e3e   :  { %v6231_v63 = vmul.f32 %v9743_v2, %v6227_v57  ;;  %v6230_v42 = vmul.f32 %v9741_v24, %v6225_v4 }
0x5e40   :  { %6236 = vrot.lane.b32.xlu0 %v6231_v63, %s10315_s28  ;;  %6234 = vrot.lane.b32.xlu1 %v6230_v42, %s10315_s28 }
0x5eb2   :  { %v6237_v45 = vpop.permute.xlu0 %6236  ;;  %v6235_v35 = vpop.permute.xlu1 %6234 }
0x5eb3   :  { %v6241_v60 = vadd.f32 %v6237_v45, %v11872_v12  ;;  %v6240_v25 = vadd.f32 %v6235_v35, %v11874_v59 }
0x5eb5   :  { %9744 = vtanh.f32 %v6241_v60 }
0x5eb6   :  { %9746 = vtanh.f32 %v6240_v25 }
0x5ec2   :  { %v9745_v11 = vpop.eup %9744 }
0x5ec3   :  { %v9747_v0 = vpop.eup %9746  ;;  %6250 = vrot.lane.b32.xlu0 %v9745_v11, %s10316_s23  ;;  %v12073_v11 = vld [vmem:[#allocation32 + $0x10] sm:$0xff] }
0x5ec4   :  { %6248 = vrot.lane.b32.xlu1 %v9747_v0, %s10316_s23 }
0x5f35   :  { %v6251_v7 = vpop.permute.xlu0 %6250 }
0x5f36   :  { %v6255_v56 = vmul.f32 %v6251_v7, %v6245_v13  ;;  %v6249_v22 = vpop.permute.xlu1 %6248 }
0x5f37   :  { %v6254_v19 = vmul.f32 %v6249_v22, %v6244_v9 }
0x5f38   :  { %v12042_v5 = vadd.f32 %v6261_v62, %v6255_v56 }
0x5f39   :  { %v12044_v46 = vadd.f32 %v6260_v44, %v6254_v19 }
0x5f3a   :  { %v6275_v52 = vrot.slane %v12042_v5, 4  ;;  %v6403_v13 = vrot.slane %v12042_v5, 7 }
0x5f3b   :  { %v6274_v23 = vrot.slane %v12044_v46, 5  ;;  %v6402_v9 = vrot.slane %v12044_v46, 7 }
0x5f3d   :  { %v6276_v41 = vsel %vm12545_vm1, %v6275_v52, %v6274_v23  ;;  %v12082_v52 = vld [vmem:[#allocation32] sm:$0xff] }
0x5f3e   :  { %6277 = vrot.lane.b32.xlu1 %v6276_v41, %s10316_s23 }
0x5fb0   :  { %v6278_v50 = vpop.permute.xlu1 %6277 }
0x5fb1   :  { %9076 = vmatmul.mubr.msk.f32.vlgmr.msra.gmra.mxu0 %vm12546_vm2, %v6278_v50 }
0x5fb2   :  { %9090 = vmatpush3.msra.mxu0 %v5314_v21  ;;  %9105 = vmatprep.mubr.msk.f32.mxu0 %vm2862_vm11, %v11849_v18  ;;  %v12069_v21 = vld [vmem:[#allocation32 + $0x18] sm:$0xff] }
0x5fb3   :  { %9091 = vmatprep.subr.mxu0 %v5313_v39 }
0x5fb4   :  { %9092 = vmatpush3.msra.mxu0 %v5313_v39 }
0x5fb5   :  { %9093 = vmatprep.subr.mxu0 %v5312_v15 }
0x5fb6   :  { %9094 = vmatpush3.msra.mxu0 %v5312_v15 }
0x5fb7   :  { %9095 = vmatprep.subr.mxu0 %v5311_v27 }
0x5fb8   :  { %9096 = vmatpush3.msra.mxu0 %v5311_v27 }
0x5fb9   :  { %9097 = vmatprep.subr.mxu0 %v5310_v29 }
0x5fba   :  { %9098 = vmatpush3.msra.mxu0 %v5310_v29 }
0x5fbb   :  { %9099 = vmatprep.subr.mxu0 %v5309_v51 }
0x5fbc   :  { %9100 = vmatpush3.msra.mxu0 %v5309_v51 }
0x5fbd   :  { %9101 = vmatprep.subr.mxu0 %v5308_v3 }
0x5fbe   :  { %9102 = vmatpush3.msra.mxu0 %v5308_v3  ;;  %v12120_v3 = vld [vmem:[%s12547_s2] ss:$0 sm:$0xff] }
0x5fbf   :  { %9103 = vmatprep.subr.mxu0 %v5307_v28 }
0x5fc0   :  { %9104 = vmatpush3.msra.mxu0 %v5307_v28 }
0x5fc1   :  { %9106 = vmatmul.mubr.msk.f32.vlgmr.msra.gmra.mxu0 %vm2862_vm11, %v11857_v61  ;;  %9130 = vmatprep.subr.mxu0 %v10313_v1 }
0x5fc2   :  { %9138 = vmatprep.mubr.msk.f32.mxu0 %vm10314_vm0, %v10313_v1  ;;  %9131 = vmatpush3.msra.mxu0 %v12069_v21 }
0x5fc3   :  { %9132 = vmatprep.subr.mxu0 %v10313_v1 }
0x5fc4   :  { %9133 = vmatpush3.msra.mxu0 %v12073_v11 }
0x5fc5   :  { %9134 = vmatprep.subr.mxu0 %v10313_v1 }
0x5fc6   :  { %9135 = vmatpush3.msra.mxu0 %v12078_v40 }
0x5fc7   :  { %9136 = vmatprep.subr.mxu0 %v10313_v1 }
0x5fc8   :  { %9137 = vmatpush3.msra.mxu0 %v12082_v52 }
0x5fc9   :  { %9152 = vmatprep.subr.mxu0 %v10313_v1 }
0x6071   :  { %v6347_v18 = vpop.f32.mrf.mxu0 }
0x6072   :  { %v6348_v17 = vadd.f32 %v11821_v54, %v6347_v18 }
0x6073   :  { %v9077_v10 = vpop.f32.mrf.mxu0 }
0x6074   :  { %v6352_v30 = vrot.slane %v6348_v17, 2  ;;  %v6353_v33 = vrot.slane %v6348_v17, 3 }
0x6076   :  { %6372 = vrot.lane.b32.xlu1 %v6353_v33, %s10315_s28  ;;  %6370 = vrot.lane.b32.xlu0 %v6352_v30, %s10315_s28  ;;  %v6356_v37 = vadd.f32 %v6352_v30, %v11874_v59  ;;  %v6357_v53 = vadd.f32 %v6353_v33, %v11872_v12 }
0x6078   :  { %v8220_v61 = vmul.f32 -1.442695, %v6356_v37  ;;  %v8221_v48 = vmul.f32 -1.442695, %v6357_v53  ;;  %v8225_v53 = vld [vmem:[%s12548_s29] ss:$0 sm:$0xff] }
0x607a   :  { %9748 = vpow2.f32 %v8220_v61 }
0x607b   :  { %9750 = vpow2.f32 %v8221_v48 }
0x6081   :  { %v9107_v33 = vpop.f32.mrf.mxu0 }
0x6082   :  { %v12128_v48 = vadd.f32 %v9107_v33, %v8225_v53 }
0x6083   :  { %v6638_v37 = vpop.f32.mrf.mxu0 }
0x6084   :  { %v12126_v61 = vadd.f32 %v8225_v53, %v6638_v37 }
0x6087   :  { %v9749_v26 = vpop.eup %9748 }
0x6088   :  { %v9751_v31 = vpop.eup %9750  ;;  %v6364_v34 = vadd.f32 1.0, %v9749_v26 }
0x6089   :  { %v6365_v14 = vadd.f32 1.0, %v9751_v31 }
0x608a   :  { %9752 = vrcp.f32 %v6364_v34 }
0x608b   :  { %9754 = vrcp.f32 %v6365_v14 }
0x6097   :  { %v9753_v54 = vpop.eup %9752 }
0x6098   :  { %v9755_v58 = vpop.eup %9754  ;;  %v6390_v7 = vsub.f32 1.0, %v9753_v54  ;;  %v6406_v44 = vmul.f32 %v9753_v54, %v6402_v9 }
0x6099   :  { %v6391_v0 = vsub.f32 1.0, %v9755_v58  ;;  %v6407_v62 = vmul.f32 %v9755_v58, %v6403_v13 }
0x60e8   :  { %v6373_v24 = vpop.permute.xlu1 %6372  ;;  %v6371_v2 = vpop.permute.xlu0 %6370 }
0x60e9   :  { %v6377_v57 = vmul.f32 %v9755_v58, %v6373_v24  ;;  %v6376_v4 = vmul.f32 %v9753_v54, %v6371_v2 }
0x60eb   :  { %6382 = vrot.lane.b32.xlu1 %v6377_v57, %s10315_s28  ;;  %6380 = vrot.lane.b32.xlu0 %v6376_v4, %s10315_s28 }
0x615d   :  { %v6383_v63 = vpop.permute.xlu1 %6382  ;;  %v6381_v42 = vpop.permute.xlu0 %6380 }
0x615e   :  { %v6387_v45 = vadd.f32 %v6383_v63, %v11872_v12  ;;  %v6386_v35 = vadd.f32 %v6381_v42, %v11874_v59 }
0x6160   :  { %9756 = vtanh.f32 %v6387_v45 }
0x6161   :  { %9758 = vtanh.f32 %v6386_v35 }
0x616d   :  { %v9757_v60 = vpop.eup %9756 }
0x616e   :  { %v9759_v25 = vpop.eup %9758  ;;  %6396 = vrot.lane.b32.xlu1 %v9757_v60, %s10316_s23 }
0x616f   :  { %6394 = vrot.lane.b32.xlu0 %v9759_v25, %s10316_s23 }
0x61e0   :  { %v6397_v16 = vpop.permute.xlu1 %6396 }
0x61e1   :  { %v6401_v56 = vmul.f32 %v6397_v16, %v6391_v0  ;;  %v6395_v22 = vpop.permute.xlu0 %6394 }
0x61e2   :  { %v6400_v19 = vmul.f32 %v6395_v22, %v6390_v7 }
0x61e3   :  { %v12085_v23 = vadd.f32 %v6407_v62, %v6401_v56 }
0x61e4   :  { %v12088_v41 = vadd.f32 %v6406_v44, %v6400_v19 }
0x61e5   :  { %v6421_v50 = vrot.slane %v12085_v23, 5 }
0x61e6   :  { %v6420_v39 = vrot.slane %v12088_v41, 6 }
0x61e8   :  { %v6422_v15 = vsel %vm12545_vm1, %v6421_v50, %v6420_v39 }
0x61e9   :  { %6423 = vrot.lane.b32.xlu0 %v6422_v15, %s10316_s23 }
0x625b   :  { %v6424_v27 = vpop.permute.xlu0 %6423 }
0x625c   :  { %9087 = vmatmul.mubr.msk.f32.vlgmr.msra.gmra.mxu1 %vm12546_vm2, %v6424_v27 }
0x625d   :  { %9109 = vmatpush3.msra.mxu1 %v12069_v21  ;;  %9116 = vmatprep.mubr.msk.f32.mxu1 %vm10314_vm0, %v10313_v1 }
0x625e   :  { %9110 = vmatprep.subr.mxu1 %v10313_v1 }
0x625f   :  { %9111 = vmatpush3.msra.mxu1 %v12073_v11 }
0x6260   :  { %9112 = vmatprep.subr.mxu1 %v10313_v1 }
0x6261   :  { %9113 = vmatpush3.msra.mxu1 %v12078_v40 }
0x6262   :  { %9114 = vmatprep.subr.mxu1 %v10313_v1 }
0x6263   :  { %9115 = vmatpush3.msra.mxu1 %v12082_v52 }
0x6264   :  { %9117 = vmatmul.mubr.f32.vlgmr.msra.gmra.mxu1 %v10313_v1  ;;  %9119 = vmatprep.subr.mxu1 %v10313_v1 }
0x6265   :  { %9120 = vmatpush3.msra.mxu1 %v12069_v21  ;;  %9127 = vmatprep.mubr.msk.f32.mxu1 %vm10314_vm0, %v10313_v1 }
0x6266   :  { %9121 = vmatprep.subr.mxu1 %v10313_v1 }
0x6267   :  { %9122 = vmatpush3.msra.mxu1 %v12073_v11 }
0x6268   :  { %9123 = vmatprep.subr.mxu1 %v10313_v1 }
0x6269   :  { %9124 = vmatpush3.msra.mxu1 %v12078_v40 }
0x626a   :  { %9125 = vmatprep.subr.mxu1 %v10313_v1 }
0x626b   :  { %9126 = vmatpush3.msra.mxu1 %v12082_v52 }
0x626c   :  { %9141 = vmatprep.subr.mxu1 %v10313_v1 }
0x631c   :  { %v12117_v29 = vpop.f32.mrf.mxu1 }
0x631e   :  { %v9088_v51 = vpop.f32.mrf.mxu1 }
0x6324   :  { %v6719_v28 = vpop.f32.mrf.mxu1 }
0x6325   :  { %v6720_v18 = vadd.f32 %v12120_v3, %v6719_v28 }
0x6326   :  { %v9118_v17 = vpop.f32.mrf.mxu1 }
0x6327   :  { %v6724_v10 = vrot.slane %v6720_v18, 1  ;;  %v6725_v30 = vrot.slane %v6720_v18, 2 }
0x6329   :  { %6744 = vrot.lane.b32.xlu0 %v6725_v30, %s10315_s28  ;;  %6742 = vrot.lane.b32.xlu1 %v6724_v10, %s10315_s28  ;;  %v6728_v26 = vadd.f32 %v6724_v10, %v12126_v61  ;;  %v6729_v31 = vadd.f32 %v6725_v30, %v12128_v48 }
0x632b   :  { %v8229_v34 = vmul.f32 -1.442695, %v6728_v26  ;;  %v8230_v14 = vmul.f32 -1.442695, %v6729_v31 }
0x632d   :  { %9760 = vpow2.f32 %v8229_v34 }
0x632e   :  { %9762 = vpow2.f32 %v8230_v14 }
0x633a   :  { %v9761_v54 = vpop.eup %9760 }
0x633b   :  { %v9763_v58 = vpop.eup %9762  ;;  %v6736_v24 = vadd.f32 1.0, %v9761_v54 }
0x633c   :  { %v6737_v2 = vadd.f32 1.0, %v9763_v58 }
0x633d   :  { %9764 = vrcp.f32 %v6736_v24 }
0x633e   :  { %9766 = vrcp.f32 %v6737_v2 }
0x634a   :  { %v9765_v57 = vpop.eup %9764 }
0x634b   :  { %v9767_v4 = vpop.eup %9766  ;;  %v6762_v56 = vsub.f32 1.0, %v9765_v57  ;;  %v6774_v50 = vmul.f32 0.0, %v9765_v57 }
0x634c   :  { %v6763_v9 = vsub.f32 1.0, %v9767_v4  ;;  %v6775_v22 = vmul.f32 0.0, %v9767_v4 }
0x639b   :  { %v6745_v63 = vpop.permute.xlu0 %6744  ;;  %v6743_v42 = vpop.permute.xlu1 %6742 }
0x639c   :  { %v6749_v45 = vmul.f32 %v9767_v4, %v6745_v63  ;;  %v6748_v35 = vmul.f32 %v9765_v57, %v6743_v42 }
0x639e   :  { %6754 = vrot.lane.b32.xlu0 %v6749_v45, %s10315_s28  ;;  %6752 = vrot.lane.b32.xlu1 %v6748_v35, %s10315_s28 }
0x6410   :  { %v6755_v60 = vpop.permute.xlu0 %6754  ;;  %v6753_v25 = vpop.permute.xlu1 %6752 }
0x6411   :  { %v6759_v0 = vadd.f32 %v6755_v60, %v12128_v48  ;;  %v6758_v13 = vadd.f32 %v6753_v25, %v12126_v61 }
0x6413   :  { %9768 = vtanh.f32 %v6759_v0 }
0x6414   :  { %9770 = vtanh.f32 %v6758_v13 }
0x6420   :  { %v9769_v16 = vpop.eup %9768 }
0x6421   :  { %v9771_v7 = vpop.eup %9770  ;;  %6768 = vrot.lane.b32.xlu0 %v9769_v16, %s10316_s23 }
0x6422   :  { %6766 = vrot.lane.b32.xlu1 %v9771_v7, %s10316_s23 }
0x6493   :  { %v6769_v62 = vpop.permute.xlu0 %6768 }
0x6494   :  { %v6773_v44 = vmul.f32 %v6769_v62, %v6763_v9  ;;  %v6767_v19 = vpop.permute.xlu1 %6766 }
0x6495   :  { %v6772_v39 = vmul.f32 %v6767_v19, %v6762_v56 }
0x6496   :  { %v12138_v15 = vadd.f32 %v6775_v22, %v6773_v44 }
0x6497   :  { %v12140_v27 = vadd.f32 %v6774_v50, %v6772_v39 }
0x6498   :  { %v6783_v51 = vrot.slane %v12138_v15, 6  ;;  %v6911_v62 = vrot.slane %v12138_v15, 1 }
0x6499   :  { %v6782_v28 = vrot.slane %v12140_v27, 7  ;;  %v6910_v44 = vrot.slane %v12140_v27, 1 }
0x649b   :  { %v6784_v18 = vsel %vm12545_vm1, %v6783_v51, %v6782_v28 }
0x649c   :  { %6785 = vrot.lane.b32.xlu1 %v6784_v18, %s10316_s23 }
0x650e   :  { %v6786_v17 = vpop.permute.xlu1 %6785 }
0x650f   :  { %9128 = vmatmul.mubr.msk.f32.vlgmr.msra.gmra.mxu1 %vm12546_vm2, %v6786_v17 }
0x6510   :  { %9142 = vmatpush3.msra.mxu1 %v12069_v21  ;;  %9149 = vmatprep.mubr.msk.f32.mxu1 %vm10314_vm0, %v10313_v1 }
0x6511   :  { %9143 = vmatprep.subr.mxu1 %v10313_v1 }
0x6512   :  { %9144 = vmatpush3.msra.mxu1 %v12073_v11 }
0x6513   :  { %9145 = vmatprep.subr.mxu1 %v10313_v1 }
0x6514   :  { %9146 = vmatpush3.msra.mxu1 %v12078_v40 }
0x6515   :  { %9147 = vmatprep.subr.mxu1 %v10313_v1 }
0x6516   :  { %9148 = vmatpush3.msra.mxu1 %v12082_v52 }
0x6517   :  { %9163 = vmatprep.subr.mxu1 %v10313_v1 }
0x65cf   :  { %v6855_v10 = vpop.f32.mrf.mxu1 }
0x65d0   :  { %v6856_v30 = vadd.f32 %v12120_v3, %v6855_v10 }
0x65d1   :  { %v9129_v33 = vpop.f32.mrf.mxu1 }
0x65d2   :  { %v6860_v37 = vrot.slane %v6856_v30, 2  ;;  %v6861_v53 = vrot.slane %v6856_v30, 3 }
0x65d4   :  { %6880 = vrot.lane.b32.xlu1 %v6861_v53, %s10315_s28  ;;  %6878 = vrot.lane.b32.xlu0 %v6860_v37, %s10315_s28  ;;  %v6864_v26 = vadd.f32 %v6860_v37, %v12126_v61  ;;  %v6865_v31 = vadd.f32 %v6861_v53, %v12128_v48 }
0x65d6   :  { %v8232_v34 = vmul.f32 -1.442695, %v6864_v26  ;;  %v8233_v14 = vmul.f32 -1.442695, %v6865_v31 }
0x65d8   :  { %9772 = vpow2.f32 %v8232_v34 }
0x65d9   :  { %9774 = vpow2.f32 %v8233_v14 }
0x65e5   :  { %v9773_v54 = vpop.eup %9772 }
0x65e6   :  { %v9775_v58 = vpop.eup %9774  ;;  %v6872_v24 = vadd.f32 1.0, %v9773_v54 }
0x65e7   :  { %v6873_v2 = vadd.f32 1.0, %v9775_v58 }
0x65e8   :  { %9776 = vrcp.f32 %v6872_v24 }
0x65e9   :  { %9778 = vrcp.f32 %v6873_v2 }
0x65f5   :  { %v9777_v57 = vpop.eup %9776 }
0x65f6   :  { %v9779_v4 = vpop.eup %9778  ;;  %v6898_v22 = vsub.f32 1.0, %v9777_v57  ;;  %v6914_v51 = vmul.f32 %v9777_v57, %v6910_v44 }
0x65f7   :  { %v6899_v9 = vsub.f32 1.0, %v9779_v4  ;;  %v6915_v19 = vmul.f32 %v9779_v4, %v6911_v62 }
0x6646   :  { %v6881_v63 = vpop.permute.xlu1 %6880  ;;  %v6879_v42 = vpop.permute.xlu0 %6878 }
0x6647   :  { %v6885_v45 = vmul.f32 %v9779_v4, %v6881_v63  ;;  %v6884_v35 = vmul.f32 %v9777_v57, %v6879_v42 }
0x6649   :  { %6890 = vrot.lane.b32.xlu1 %v6885_v45, %s10315_s28  ;;  %6888 = vrot.lane.b32.xlu0 %v6884_v35, %s10315_s28 }
0x66bb   :  { %v6891_v60 = vpop.permute.xlu1 %6890  ;;  %v6889_v25 = vpop.permute.xlu0 %6888 }
0x66bc   :  { %v6895_v0 = vadd.f32 %v6891_v60, %v12128_v48  ;;  %v6894_v13 = vadd.f32 %v6889_v25, %v12126_v61 }
0x66be   :  { %9780 = vtanh.f32 %v6895_v0 }
0x66bf   :  { %9782 = vtanh.f32 %v6894_v13 }
0x66cb   :  { %v9781_v16 = vpop.eup %9780 }
0x66cc   :  { %v9783_v7 = vpop.eup %9782  ;;  %6904 = vrot.lane.b32.xlu1 %v9781_v16, %s10316_s23 }
0x66cd   :  { %6902 = vrot.lane.b32.xlu0 %v9783_v7, %s10316_s23 }
0x673e   :  { %v6905_v56 = vpop.permute.xlu1 %6904 }
0x673f   :  { %v6909_v50 = vmul.f32 %v6905_v56, %v6899_v9  ;;  %v6903_v39 = vpop.permute.xlu0 %6902 }
0x6740   :  { %v6908_v28 = vmul.f32 %v6903_v39, %v6898_v22 }
0x6741   :  { %v12170_v18 = vadd.f32 %v6915_v19, %v6909_v50 }
0x6742   :  { %v12172_v17 = vadd.f32 %v6914_v51, %v6908_v28 }
0x6743   :  { %v6923_v10 = vrot.slane %v12170_v18, 5  ;;  %v7051_v19 = vrot.slane %v12170_v18, 1 }
0x6744   :  { %v6922_v30 = vrot.slane %v12172_v17, 6  ;;  %v7050_v51 = vrot.slane %v12172_v17, 1 }
0x6746   :  { %v6924_v33 = vsel %vm12545_vm1, %v6923_v10, %v6922_v30 }
0x6747   :  { %6925 = vrot.lane.b32.xlu0 %v6924_v33, %s10316_s23 }
0x67b9   :  { %v6926_v37 = vpop.permute.xlu0 %6925 }
0x67ba   :  { %9139 = vmatmul.mubr.msk.f32.vlgmr.msra.gmra.mxu0 %vm12546_vm2, %v6926_v37 }
0x67bb   :  { %9153 = vmatpush3.msra.mxu0 %v12069_v21  ;;  %9160 = vmatprep.mubr.msk.f32.mxu0 %vm10314_vm0, %v10313_v1 }
0x67bc   :  { %9154 = vmatprep.subr.mxu0 %v10313_v1 }
0x67bd   :  { %9155 = vmatpush3.msra.mxu0 %v12073_v11 }
0x67be   :  { %9156 = vmatprep.subr.mxu0 %v10313_v1 }
0x67bf   :  { %9157 = vmatpush3.msra.mxu0 %v12078_v40 }
0x67c0   :  { %9158 = vmatprep.subr.mxu0 %v10313_v1 }
0x67c1   :  { %9159 = vmatpush3.msra.mxu0 %v12082_v52 }
0x67c2   :  { %9174 = vmatprep.subr.mxu0 %v10313_v1 }
0x687a   :  { %v6995_v53 = vpop.f32.mrf.mxu0 }
0x687b   :  { %v6996_v26 = vadd.f32 %v12120_v3, %v6995_v53 }
0x687c   :  { %v9140_v31 = vpop.f32.mrf.mxu0 }
0x687d   :  { %v7000_v34 = vrot.slane %v6996_v26, 3  ;;  %v7001_v14 = vrot.slane %v6996_v26, 4 }
0x687f   :  { %7020 = vrot.lane.b32.xlu0 %v7001_v14, %s10315_s28  ;;  %7018 = vrot.lane.b32.xlu1 %v7000_v34, %s10315_s28  ;;  %v7004_v54 = vadd.f32 %v7000_v34, %v12126_v61  ;;  %v7005_v58 = vadd.f32 %v7001_v14, %v12128_v48 }
0x6881   :  { %v8235_v24 = vmul.f32 -1.442695, %v7004_v54  ;;  %v8236_v2 = vmul.f32 -1.442695, %v7005_v58 }
0x6883   :  { %9784 = vpow2.f32 %v8235_v24 }
0x6884   :  { %9786 = vpow2.f32 %v8236_v2 }
0x6890   :  { %v9785_v57 = vpop.eup %9784 }
0x6891   :  { %v9787_v4 = vpop.eup %9786  ;;  %v7012_v63 = vadd.f32 1.0, %v9785_v57 }
0x6892   :  { %v7013_v42 = vadd.f32 1.0, %v9787_v4 }
0x6893   :  { %9788 = vrcp.f32 %v7012_v63 }
0x6894   :  { %9790 = vrcp.f32 %v7013_v42 }
0x68a0   :  { %v9789_v45 = vpop.eup %9788 }
0x68a1   :  { %v9791_v35 = vpop.eup %9790  ;;  %v7038_v39 = vsub.f32 1.0, %v9789_v45  ;;  %v7054_v33 = vmul.f32 %v9789_v45, %v7050_v51 }
0x68a2   :  { %v7039_v44 = vsub.f32 1.0, %v9791_v35  ;;  %v7055_v28 = vmul.f32 %v9791_v35, %v7051_v19 }
0x68f1   :  { %v7021_v60 = vpop.permute.xlu0 %7020  ;;  %v7019_v25 = vpop.permute.xlu1 %7018 }
0x68f2   :  { %v7025_v0 = vmul.f32 %v9791_v35, %v7021_v60  ;;  %v7024_v13 = vmul.f32 %v9789_v45, %v7019_v25 }
0x68f4   :  { %7030 = vrot.lane.b32.xlu0 %v7025_v0, %s10315_s28  ;;  %7028 = vrot.lane.b32.xlu1 %v7024_v13, %s10315_s28 }
0x6966   :  { %v7031_v16 = vpop.permute.xlu0 %7030  ;;  %v7029_v7 = vpop.permute.xlu1 %7028 }
0x6967   :  { %v7035_v9 = vadd.f32 %v7031_v16, %v12128_v48  ;;  %v7034_v62 = vadd.f32 %v7029_v7, %v12126_v61 }
0x6969   :  { %9792 = vtanh.f32 %v7035_v9 }
0x696a   :  { %9794 = vtanh.f32 %v7034_v62 }
0x6976   :  { %v9793_v56 = vpop.eup %9792 }
0x6977   :  { %v9795_v22 = vpop.eup %9794  ;;  %7044 = vrot.lane.b32.xlu0 %v9793_v56, %s10316_s23 }
0x6978   :  { %7042 = vrot.lane.b32.xlu1 %v9795_v22, %s10316_s23 }
0x69e9   :  { %v7045_v50 = vpop.permute.xlu0 %7044 }
0x69ea   :  { %v7049_v10 = vmul.f32 %v7045_v50, %v7039_v44  ;;  %v7043_v30 = vpop.permute.xlu1 %7042 }
0x69eb   :  { %v7048_v37 = vmul.f32 %v7043_v30, %v7038_v39 }
0x69ec   :  { %v12202_v53 = vadd.f32 %v7055_v28, %v7049_v10 }
0x69ed   :  { %v12204_v26 = vadd.f32 %v7054_v33, %v7048_v37 }
0x69ee   :  { %v7063_v31 = vrot.slane %v12202_v53, 4  ;;  %v7191_v30 = vrot.slane %v12202_v53, 1 }
0x69ef   :  { %v7062_v34 = vrot.slane %v12204_v26, 5 }
0x69f1   :  { %v7064_v14 = vsel %vm12545_vm1, %v7063_v31, %v7062_v34  ;;  %v7190_v31 = vrot.slane %v12204_v26, 1 }
0x69f2   :  { %7065 = vrot.lane.b32.xlu1 %v7064_v14, %s10316_s23 }
0x6a64   :  { %v7066_v54 = vpop.permute.xlu1 %7065 }
0x6a65   :  { %9150 = vmatmul.mubr.msk.f32.vlgmr.msra.gmra.mxu1 %vm12546_vm2, %v7066_v54 }
0x6a66   :  { %9164 = vmatpush3.msra.mxu1 %v12069_v21  ;;  %9171 = vmatprep.mubr.msk.f32.mxu1 %vm10314_vm0, %v10313_v1 }
0x6a67   :  { %9165 = vmatprep.subr.mxu1 %v10313_v1 }
0x6a68   :  { %9166 = vmatpush3.msra.mxu1 %v12073_v11 }
0x6a69   :  { %9167 = vmatprep.subr.mxu1 %v10313_v1 }
0x6a6a   :  { %9168 = vmatpush3.msra.mxu1 %v12078_v40 }
0x6a6b   :  { %9169 = vmatprep.subr.mxu1 %v10313_v1 }
0x6a6c   :  { %9170 = vmatpush3.msra.mxu1 %v12082_v52 }
0x6a6d   :  { %9185 = vmatprep.subr.mxu1 %v10313_v1 }
0x6b25   :  { %v7135_v58 = vpop.f32.mrf.mxu1 }
0x6b26   :  { %v7136_v24 = vadd.f32 %v12120_v3, %v7135_v58 }
0x6b27   :  { %v9151_v2 = vpop.f32.mrf.mxu1 }
0x6b28   :  { %v7140_v57 = vrot.slane %v7136_v24, 4  ;;  %v7141_v4 = vrot.slane %v7136_v24, 5 }
0x6b2a   :  { %7160 = vrot.lane.b32.xlu1 %v7141_v4, %s10315_s28  ;;  %7158 = vrot.lane.b32.xlu0 %v7140_v57, %s10315_s28  ;;  %v7144_v63 = vadd.f32 %v7140_v57, %v12126_v61  ;;  %v7145_v42 = vadd.f32 %v7141_v4, %v12128_v48 }
0x6b2c   :  { %v8238_v45 = vmul.f32 -1.442695, %v7144_v63  ;;  %v8239_v35 = vmul.f32 -1.442695, %v7145_v42 }
0x6b2e   :  { %9796 = vpow2.f32 %v8238_v45 }
0x6b2f   :  { %9798 = vpow2.f32 %v8239_v35 }
0x6b3b   :  { %v9797_v60 = vpop.eup %9796 }
0x6b3c   :  { %v9799_v25 = vpop.eup %9798  ;;  %v7152_v0 = vadd.f32 1.0, %v9797_v60 }
0x6b3d   :  { %v7153_v13 = vadd.f32 1.0, %v9799_v25 }
0x6b3e   :  { %9800 = vrcp.f32 %v7152_v0 }
0x6b3f   :  { %9802 = vrcp.f32 %v7153_v13 }
0x6b4b   :  { %v9801_v16 = vpop.eup %9800 }
0x6b4c   :  { %v9803_v7 = vpop.eup %9802  ;;  %v7178_v37 = vsub.f32 1.0, %v9801_v16  ;;  %v7194_v58 = vmul.f32 %v9801_v16, %v7190_v31 }
0x6b4d   :  { %v7179_v10 = vsub.f32 1.0, %v9803_v7  ;;  %v7195_v34 = vmul.f32 %v9803_v7, %v7191_v30 }
0x6b9c   :  { %v7161_v9 = vpop.permute.xlu1 %7160  ;;  %v7159_v62 = vpop.permute.xlu0 %7158 }
0x6b9d   :  { %v7165_v56 = vmul.f32 %v9803_v7, %v7161_v9  ;;  %v7164_v22 = vmul.f32 %v9801_v16, %v7159_v62 }
0x6b9f   :  { %7170 = vrot.lane.b32.xlu1 %v7165_v56, %s10315_s28  ;;  %7168 = vrot.lane.b32.xlu0 %v7164_v22, %s10315_s28 }
0x6c11   :  { %v7171_v44 = vpop.permute.xlu1 %7170  ;;  %v7169_v19 = vpop.permute.xlu0 %7168 }
0x6c12   :  { %v7175_v50 = vadd.f32 %v7171_v44, %v12128_v48  ;;  %v7174_v39 = vadd.f32 %v7169_v19, %v12126_v61 }
0x6c14   :  { %9804 = vtanh.f32 %v7175_v50 }
0x6c15   :  { %9806 = vtanh.f32 %v7174_v39 }
0x6c21   :  { %v9805_v51 = vpop.eup %9804 }
0x6c22   :  { %v9807_v28 = vpop.eup %9806  ;;  %7184 = vrot.lane.b32.xlu1 %v9805_v51, %s10316_s23 }
0x6c23   :  { %7182 = vrot.lane.b32.xlu0 %v9807_v28, %s10316_s23 }
0x6c94   :  { %v7185_v33 = vpop.permute.xlu1 %7184 }
0x6c95   :  { %v7189_v14 = vmul.f32 %v7185_v33, %v7179_v10  ;;  %v7183_v54 = vpop.permute.xlu0 %7182 }
0x6c96   :  { %v7188_v24 = vmul.f32 %v7183_v54, %v7178_v37 }
0x6c97   :  { %v12234_v2 = vadd.f32 %v7195_v34, %v7189_v14 }
0x6c98   :  { %v12236_v57 = vadd.f32 %v7194_v58, %v7188_v24 }
0x6c99   :  { %v7203_v4 = vrot.slane %v12234_v2, 3  ;;  %v7331_v24 = vrot.slane %v12234_v2, 1 }
0x6c9a   :  { %v7202_v63 = vrot.slane %v12236_v57, 4 }
0x6c9c   :  { %v7204_v42 = vsel %vm12545_vm1, %v7203_v4, %v7202_v63 }
0x6c9d   :  { %7205 = vrot.lane.b32.xlu0 %v7204_v42, %s10316_s23  ;;  %v7330_v42 = vrot.slane %v12236_v57, 1 }
0x6d0f   :  { %v7206_v45 = vpop.permute.xlu0 %7205 }
0x6d10   :  { %9161 = vmatmul.mubr.msk.f32.vlgmr.msra.gmra.mxu0 %vm12546_vm2, %v7206_v45 }
0x6d11   :  { %9175 = vmatpush3.msra.mxu0 %v12069_v21  ;;  %9182 = vmatprep.mubr.msk.f32.mxu0 %vm10314_vm0, %v10313_v1 }
0x6d12   :  { %9176 = vmatprep.subr.mxu0 %v10313_v1 }
0x6d13   :  { %9177 = vmatpush3.msra.mxu0 %v12073_v11 }
0x6d14   :  { %9178 = vmatprep.subr.mxu0 %v10313_v1 }
0x6d15   :  { %9179 = vmatpush3.msra.mxu0 %v12078_v40 }
0x6d16   :  { %9180 = vmatprep.subr.mxu0 %v10313_v1 }
0x6d17   :  { %9181 = vmatpush3.msra.mxu0 %v12082_v52 }
0x6dd0   :  { %v7275_v35 = vpop.f32.mrf.mxu0 }
0x6dd1   :  { %v7276_v60 = vadd.f32 %v12120_v3, %v7275_v35 }
0x6dd2   :  { %v9162_v25 = vpop.f32.mrf.mxu0 }
0x6dd3   :  { %v7280_v0 = vrot.slane %v7276_v60, 5  ;;  %v7281_v13 = vrot.slane %v7276_v60, 6 }
0x6dd5   :  { %7300 = vrot.lane.b32.xlu0 %v7281_v13, %s10315_s28  ;;  %7298 = vrot.lane.b32.xlu1 %v7280_v0, %s10315_s28  ;;  %v7284_v16 = vadd.f32 %v7280_v0, %v12126_v61  ;;  %v7285_v7 = vadd.f32 %v7281_v13, %v12128_v48 }
0x6dd7   :  { %v8241_v9 = vmul.f32 -1.442695, %v7284_v16  ;;  %v8242_v62 = vmul.f32 -1.442695, %v7285_v7 }
0x6dd9   :  { %9808 = vpow2.f32 %v8241_v9 }
0x6dda   :  { %9810 = vpow2.f32 %v8242_v62 }
0x6de6   :  { %v9809_v56 = vpop.eup %9808 }
0x6de7   :  { %v9811_v22 = vpop.eup %9810  ;;  %v7292_v44 = vadd.f32 1.0, %v9809_v56 }
0x6de8   :  { %v7293_v19 = vadd.f32 1.0, %v9811_v22 }
0x6de9   :  { %9812 = vrcp.f32 %v7292_v44 }
0x6dea   :  { %9814 = vrcp.f32 %v7293_v19 }
0x6df6   :  { %v9813_v50 = vpop.eup %9812 }
0x6df7   :  { %v9815_v39 = vpop.eup %9814  ;;  %v7318_v63 = vsub.f32 1.0, %v9813_v50  ;;  %v7334_v25 = vmul.f32 %v9813_v50, %v7330_v42 }
0x6df8   :  { %v7319_v58 = vsub.f32 1.0, %v9815_v39  ;;  %v7335_v45 = vmul.f32 %v9815_v39, %v7331_v24 }
0x6e47   :  { %v7301_v51 = vpop.permute.xlu0 %7300  ;;  %v7299_v28 = vpop.permute.xlu1 %7298 }
0x6e48   :  { %v7305_v10 = vmul.f32 %v9815_v39, %v7301_v51  ;;  %v7304_v30 = vmul.f32 %v9813_v50, %v7299_v28 }
0x6e4a   :  { %7310 = vrot.lane.b32.xlu0 %v7305_v10, %s10315_s28  ;;  %7308 = vrot.lane.b32.xlu1 %v7304_v30, %s10315_s28 }
0x6ebc   :  { %v7311_v33 = vpop.permute.xlu0 %7310  ;;  %v7309_v37 = vpop.permute.xlu1 %7308 }
0x6ebd   :  { %v7315_v31 = vadd.f32 %v7311_v33, %v12128_v48  ;;  %v7314_v34 = vadd.f32 %v7309_v37, %v12126_v61 }
0x6ebf   :  { %9816 = vtanh.f32 %v7315_v31 }
0x6ec0   :  { %9818 = vtanh.f32 %v7314_v34 }
0x6ecc   :  { %v9817_v14 = vpop.eup %9816 }
0x6ecd   :  { %v9819_v54 = vpop.eup %9818  ;;  %7324 = vrot.lane.b32.xlu0 %v9817_v14, %s10316_s23 }
0x6ece   :  { %7322 = vrot.lane.b32.xlu1 %v9819_v54, %s10316_s23 }
0x6f3f   :  { %v7325_v4 = vpop.permute.xlu0 %7324 }
0x6f40   :  { %v7329_v35 = vmul.f32 %v7325_v4, %v7319_v58  ;;  %v7323_v60 = vpop.permute.xlu1 %7322 }
0x6f41   :  { %v7328_v0 = vmul.f32 %v7323_v60, %v7318_v63 }
0x6f42   :  { %v12265_v13 = vadd.f32 %v7335_v45, %v7329_v35 }
0x6f43   :  { %v12267_v16 = vadd.f32 %v7334_v25, %v7328_v0 }
0x6f44   :  { %v7343_v7 = vrot.slane %v12265_v13, 2  ;;  %v7471_v60 = vrot.slane %v12265_v13, 1 }
0x6f45   :  { %v7342_v9 = vrot.slane %v12267_v16, 3 }
0x6f47   :  { %v7344_v62 = vsel %vm12545_vm1, %v7343_v7, %v7342_v9  ;;  %v7470_v7 = vrot.slane %v12267_v16, 1 }
0x6f48   :  { %7345 = vrot.lane.b32.xlu1 %v7344_v62, %s10316_s23 }
0x6fba   :  { %v7346_v56 = vpop.permute.xlu1 %7345 }
0x6fbb   :  { %9172 = vmatmul.mubr.msk.f32.vlgmr.msra.gmra.mxu1 %vm12546_vm2, %v7346_v56 }
0x6fbc   :  { %9186 = vmatpush3.msra.mxu1 %v12069_v21  ;;  %9193 = vmatprep.mubr.msk.f32.mxu1 %vm10314_vm0, %v10313_v1 }
0x6fbd   :  { %9187 = vmatprep.subr.mxu1 %v10313_v1 }
0x6fbe   :  { %9188 = vmatpush3.msra.mxu1 %v12073_v11 }
0x6fbf   :  { %9189 = vmatprep.subr.mxu1 %v10313_v1 }
0x6fc0   :  { %9190 = vmatpush3.msra.mxu1 %v12078_v40 }
0x6fc1   :  { %9191 = vmatprep.subr.mxu1 %v10313_v1 }
0x6fc2   :  { %9192 = vmatpush3.msra.mxu1 %v12082_v52 }
0x6fc3   :  { %9215 = vmatprep.subr.mxu1 %v10313_v1 }
0x707b   :  { %v7415_v22 = vpop.f32.mrf.mxu1 }
0x707c   :  { %v7416_v21 = vadd.f32 %v12120_v3, %v7415_v22 }
0x707d   :  { %v9173_v44 = vpop.f32.mrf.mxu1 }
0x707e   :  { %v7420_v19 = vrot.slane %v7416_v21, 6  ;;  %v7421_v50 = vrot.slane %v7416_v21, 7 }
0x7080   :  { %7440 = vrot.lane.b32.xlu1 %v7421_v50, %s10315_s28  ;;  %7438 = vrot.lane.b32.xlu0 %v7420_v19, %s10315_s28  ;;  %v7424_v11 = vadd.f32 %v7420_v19, %v12126_v61  ;;  %v7425_v40 = vadd.f32 %v7421_v50, %v12128_v48 }
0x7082   :  { %v8244_v39 = vmul.f32 -1.442695, %v7424_v11  ;;  %v8245_v51 = vmul.f32 -1.442695, %v7425_v40 }
0x7084   :  { %9820 = vpow2.f32 %v8244_v39 }
0x7085   :  { %9822 = vpow2.f32 %v8245_v51 }
0x7091   :  { %v9821_v52 = vpop.eup %9820 }
0x7092   :  { %v9823_v28 = vpop.eup %9822  ;;  %v7432_v10 = vadd.f32 1.0, %v9821_v52 }
0x7093   :  { %v7433_v30 = vadd.f32 1.0, %v9823_v28 }
0x7094   :  { %9824 = vrcp.f32 %v7432_v10 }
0x7095   :  { %9826 = vrcp.f32 %v7433_v30 }
0x70a1   :  { %v9825_v33 = vpop.eup %9824 }
0x70a2   :  { %v9827_v37 = vpop.eup %9826  ;;  %v7458_v0 = vsub.f32 1.0, %v9825_v33  ;;  %v7474_v22 = vmul.f32 %v9825_v33, %v7470_v7 }
0x70a3   :  { %v7459_v35 = vsub.f32 1.0, %v9827_v37  ;;  %v7475_v9 = vmul.f32 %v9827_v37, %v7471_v60 }
0x70f2   :  { %v7441_v31 = vpop.permute.xlu1 %7440  ;;  %v7439_v34 = vpop.permute.xlu0 %7438 }
0x70f3   :  { %v7445_v14 = vmul.f32 %v9827_v37, %v7441_v31  ;;  %v7444_v54 = vmul.f32 %v9825_v33, %v7439_v34 }
0x70f5   :  { %7450 = vrot.lane.b32.xlu1 %v7445_v14, %s10315_s28  ;;  %7448 = vrot.lane.b32.xlu0 %v7444_v54, %s10315_s28 }
0x7167   :  { %v7451_v58 = vpop.permute.xlu1 %7450  ;;  %v7449_v24 = vpop.permute.xlu0 %7448 }
0x7168   :  { %v7455_v4 = vadd.f32 %v7451_v58, %v12128_v48  ;;  %v7454_v63 = vadd.f32 %v7449_v24, %v12126_v61 }
0x716a   :  { %9828 = vtanh.f32 %v7455_v4 }
0x716b   :  { %9830 = vtanh.f32 %v7454_v63 }
0x7177   :  { %v9829_v42 = vpop.eup %9828 }
0x7178   :  { %v9831_v45 = vpop.eup %9830  ;;  %7464 = vrot.lane.b32.xlu1 %v9829_v42, %s10316_s23 }
0x7179   :  { %7462 = vrot.lane.b32.xlu0 %v9831_v45, %s10316_s23 }
0x71ea   :  { %v7465_v25 = vpop.permute.xlu1 %7464 }
0x71eb   :  { %v7469_v62 = vmul.f32 %v7465_v25, %v7459_v35  ;;  %v7463_v56 = vpop.permute.xlu0 %7462 }
0x71ec   :  { %v7468_v21 = vmul.f32 %v7463_v56, %v7458_v0 }
0x71ed   :  { %v12297_v44 = vadd.f32 %v7475_v9, %v7469_v62  ;;  %v9882_v9 = vld [vmem:[%s12539_s5] ss:$0 sm:$0xff] }
0x71ee   :  { %v12299_v19 = vadd.f32 %v7474_v22, %v7468_v21  ;;  %v6494_v62 = vadd.f32 %v9882_v9, %v12117_v29 }
0x71ef   :  { %v7483_v50 = vrot.slane %v12297_v44, 1 }
0x71f0   :  { %v7482_v11 = vrot.slane %v12299_v19, 2  ;;  %v6498_v21 = vrot.slane %v6494_v62, 1  ;;  %v7609_v29 = vrot.slane %v12299_v19, 1 }
0x71f2   :  { %v7484_v40 = vsel %vm12545_vm1, %v7483_v50, %v7482_v11  ;;  %v6502_v11 = vadd.f32 %v6498_v21, %v11874_v59 }
0x71f3   :  { %7485 = vrot.lane.b32.xlu0 %v7484_v40, %s10316_s23 }
0x71f4   :  { %v8223_v40 = vmul.f32 -1.442695, %v6502_v11 }
0x7265   :  { %v7486_v39 = vpop.permute.xlu0 %7485 }
0x7266   :  { %9183 = vmatmul.mubr.msk.f32.vlgmr.msra.gmra.mxu0 %vm12546_vm2, %v7486_v39 }
0x7326   :  { %v7555_v51 = vpop.f32.mrf.mxu0 }
0x7327   :  { %v7556_v52 = vadd.f32 %v12120_v3, %v7555_v51 }
0x7328   :  { %v9184_v28 = vpop.f32.mrf.mxu0 }
0x7329   :  { %v7560_v10 = vrot.slane %v7556_v52, 7  ;;  %7579 = vrot.lane.b32.xlu0 %v7556_v52, %s10315_s28  ;;  %v7564_v30 = vadd.f32 %v7556_v52, %v12128_v48 }
0x732b   :  { %7577 = vrot.lane.b32.xlu1 %v7560_v10, %s10315_s28  ;;  %v7563_v33 = vadd.f32 %v7560_v10, %v12126_v61  ;;  %v8248_v37 = vmul.f32 -1.442695, %v7564_v30 }
0x732d   :  { %v8247_v31 = vmul.f32 -1.442695, %v7563_v33  ;;  %9832 = vpow2.f32 %v8248_v37 }
0x732f   :  { %9834 = vpow2.f32 %v8247_v31 }
0x733a   :  { %v9833_v34 = vpop.eup %9832 }
0x733b   :  { %v7572_v54 = vadd.f32 1.0, %v9833_v34 }
0x733c   :  { %v9835_v14 = vpop.eup %9834 }
0x733d   :  { %v7571_v58 = vadd.f32 1.0, %v9835_v14  ;;  %9836 = vrcp.f32 %v7572_v54 }
0x733f   :  { %9838 = vrcp.f32 %v7571_v58 }
0x734a   :  { %v9837_v24 = vpop.eup %9836 }
0x734b   :  { %v7598_v28 = vsub.f32 1.0, %v9837_v24  ;;  %v7613_v34 = vmul.f32 %v9837_v24, %v7483_v50 }
0x734c   :  { %v9839_v42 = vpop.eup %9838 }
0x734d   :  { %v7597_v10 = vsub.f32 1.0, %v9839_v42  ;;  %v7612_v37 = vmul.f32 %v9839_v42, %v7609_v29 }
0x739b   :  { %v7580_v4 = vpop.permute.xlu0 %7579 }
0x739c   :  { %v7584_v63 = vmul.f32 %v9837_v24, %v7580_v4 }
0x739d   :  { %v7578_v45 = vpop.permute.xlu1 %7577 }
0x739e   :  { %v7583_v35 = vmul.f32 %v9839_v42, %v7578_v45  ;;  %7589 = vrot.lane.b32.xlu0 %v7584_v63, %s10315_s28  ;;  %v6499_v63 = vrot.slane %v6494_v62, 2 }
0x73a0   :  { %7587 = vrot.lane.b32.xlu1 %v7583_v35, %s10315_s28  ;;  %v6503_v24 = vadd.f32 %v6499_v63, %v11872_v12 }
0x73a2   :  { %v8224_v35 = vmul.f32 -1.442695, %v6503_v24 }
0x7410   :  { %v7590_v60 = vpop.permute.xlu0 %7589 }
0x7411   :  { %v7594_v25 = vadd.f32 %v7590_v60, %v12128_v48 }
0x7412   :  { %v7588_v0 = vpop.permute.xlu1 %7587 }
0x7413   :  { %9840 = vtanh.f32 %v7594_v25  ;;  %v7593_v7 = vadd.f32 %v7588_v0, %v12126_v61 }
0x7415   :  { %9842 = vtanh.f32 %v7593_v7 }
0x7416   :  { %9844 = vpow2.f32 %v8223_v40 }
0x7420   :  { %v9841_v56 = vpop.eup %9840 }
0x7421   :  { %7603 = vrot.lane.b32.xlu0 %v9841_v56, %s10316_s23 }
0x7422   :  { %v9843_v22 = vpop.eup %9842 }
0x7423   :  { %7601 = vrot.lane.b32.xlu1 %v9843_v22, %s10316_s23  ;;  %v9845_v39 = vpop.eup %9844 }
0x7424   :  { %v6510_v51 = vadd.f32 1.0, %v9845_v39 }
0x7425   :  { %6516 = vrot.lane.b32.xlu0 %v6498_v21, %s10315_s28 }
0x7426   :  { %9846 = vrcp.f32 %v6510_v51 }
0x7427   :  { %9848 = vpow2.f32 %v8224_v35 }
0x7433   :  { %v12333_v42 = vpop.eup %9846 }
0x7434   :  { %v9849_v60 = vpop.eup %9848 }
0x7435   :  { %v6511_v25 = vadd.f32 1.0, %v9849_v60 }
0x7437   :  { %9850 = vrcp.f32 %v6511_v25 }
0x7444   :  { %v12341_v7 = vpop.eup %9850 }
0x7493   :  { %v7604_v52 = vpop.permute.xlu0 %7603 }
0x7494   :  { %v7608_v33 = vmul.f32 %v7604_v52, %v7598_v28 }
0x7495   :  { %v7602_v30 = vpop.permute.xlu1 %7601 }
0x7496   :  { %v7607_v31 = vmul.f32 %v7602_v30, %v7597_v10  ;;  %v12324_v54 = vadd.f32 %v7613_v34, %v7608_v33 }
0x7497   :  { %v6517_v45 = vpop.permute.xlu0 %6516 }
0x7498   :  { %v12322_v14 = vadd.f32 %v7612_v37, %v7607_v31  ;;  %v6522_v50 = vmul.f32 %v12333_v42, %v6517_v45 }
0x749a   :  { %v7620_v58 = vrot.slane %v12322_v14, 1 }
0x749c   :  { %v7621_v4 = vsel %vm12545_vm1, %v12324_v54, %v7620_v58  ;;  %vm12551_vm1 = vcmask 256002  }
0x749d   :  { %7622 = vrot.lane.b32.xlu1 %v7621_v4, %s10316_s23 }
0x74a1   :  { %6518 = vrot.lane.b32.xlu1 %v6499_v63, %s10315_s28 }
0x74a5   :  { %6526 = vrot.lane.b32.xlu1 %v6522_v50, %s10315_s28 }
0x750f   :  { %v7623_v0 = vpop.permute.xlu1 %7622 }
0x7510   :  { %9194 = vmatmul.mubr.msk.f32.vlgmr.msra.gmra.mxu1 %vm12546_vm2, %v7623_v0  ;;  %v7764_v0 = vld [vmem:[%s12549_s8 + $0x38] sm:$0xff]  ;;  %vm12552_vm2 = vcmask 520452  }
0x7511   :  { %9231 = vmatprep.mubr.msk.f32.mxu1 %vm10314_vm0, %v10313_v1  ;;  %vm12550_vm0 = vcmask 253952   ;;  %9196 = vmatprep.subr.mxu0 %v7764_v0 }
0x7512   :  { %9197 = vmatpush3.msra.mxu0 %v7764_v0 }
0x7513   :  { %v6519_v9 = vpop.permute.xlu1 %6518 }
0x7514   :  { %v6523_v62 = vmul.f32 %v12341_v7, %v6519_v9  ;;  %v7762_v9 = vld [vmem:[%s12549_s8 + $0x28] sm:$0xff] }
0x7516   :  { %6528 = vrot.lane.b32.xlu1 %v6523_v62, %s10315_s28 }
0x7517   :  { %v6527_v30 = vpop.permute.xlu1 %6526 }
0x7588   :  { %v6529_v37 = vpop.permute.xlu1 %6528 }
0x7589   :  { %v6533_v31 = vadd.f32 %v6529_v37, %v11872_v12 }
0x75d0   :  { %v7692_v56 = vpop.f32.mrf.mxu1 }
0x75d1   :  { %v7693_v22 = vadd.f32 %v12120_v3, %v7692_v56  ;;  %v6532_v3 = vadd.f32 %v6527_v30, %v11874_v59 }
0x75d2   :  { %v9195_v21 = vpop.f32.mrf.mxu1 }
0x75d3   :  { %7714 = vrot.lane.b32.xlu0 %v7693_v22, %s10315_s28  ;;  %v7697_v11 = vrot.slane %v7693_v22, 1  ;;  %v7700_v40 = vadd.f32 %v7693_v22, %v12126_v61  ;;  %v7760_v21 = vld [vmem:[%s12549_s8 + $0x18] sm:$0xff] }
0x75d5   :  { %v7701_v39 = vadd.f32 %v7697_v11, %v12128_v48  ;;  %v8250_v51 = vmul.f32 -1.442695, %v7700_v40  ;;  %v7758_v40 = vld [vmem:[%s12549_s8 + $0x8] sm:$0xff] }
0x75d7   :  { %7716 = vrot.lane.b32.xlu0 %v7697_v11, %s10315_s28  ;;  %9852 = vpow2.f32 %v8250_v51  ;;  %v8251_v52 = vmul.f32 -1.442695, %v7701_v39  ;;  %v6537_v39 = vsub.f32 1.0, %v12341_v7 }
0x75d9   :  { %9854 = vpow2.f32 %v8251_v52 }
0x75e4   :  { %v9853_v28 = vpop.eup %9852 }
0x75e5   :  { %v7708_v10 = vadd.f32 1.0, %v9853_v28 }
0x75e6   :  { %v9855_v29 = vpop.eup %9854 }
0x75e7   :  { %v7709_v33 = vadd.f32 1.0, %v9855_v29  ;;  %9856 = vrcp.f32 %v7708_v10 }
0x75e9   :  { %9858 = vrcp.f32 %v7709_v33 }
0x75ea   :  { %9860 = vtanh.f32 %v6532_v3 }
0x75eb   :  { %9862 = vtanh.f32 %v6533_v31 }
0x75f4   :  { %v12352_v34 = vpop.eup %9856 }
0x75f6   :  { %v12356_v45 = vpop.eup %9858 }
0x75f7   :  { %v9861_v35 = vpop.eup %9860 }
0x75f8   :  { %v9863_v59 = vpop.eup %9862 }
0x7645   :  { %v7715_v4 = vpop.permute.xlu0 %7714 }
0x7646   :  { %v7720_v63 = vmul.f32 %v12352_v34, %v7715_v4 }
0x7648   :  { %7724 = vrot.lane.b32.xlu0 %v7720_v63, %s10315_s28 }
0x7649   :  { %v7717_v50 = vpop.permute.xlu0 %7716 }
0x764a   :  { %v7721_v24 = vmul.f32 %v12356_v45, %v7717_v50 }
0x764c   :  { %6540 = vrot.lane.b32.xlu0 %v9861_v35, %s10316_s23  ;;  %7726 = vrot.lane.b32.xlu1 %v7721_v24, %s10315_s28  ;;  %v8255_v35 = vld [vmem:[%s12559_s7] ss:$0 sm:$0xff] }
0x7650   :  { %5540 = vrot.lane.b32.xlu0 %v11887_v6, %s10316_s23  ;;  %6542 = vrot.lane.b32.xlu1 %v9863_v59, %s10316_s23 }
0x7654   :  { %5828 = vrot.lane.b32.xlu0 %v11949_v49, %s10316_s23  ;;  %5683 = vrot.lane.b32.xlu1 %v11915_v43, %s10316_s23  ;;  %v6536_v43 = vsub.f32 1.0, %v12333_v42  ;;  %v6548_v49 = vrot.slane %v12088_v41, 7 }
0x7658   :  { %6120 = vrot.lane.b32.xlu0 %v12012_v38, %s10316_s23  ;;  %5974 = vrot.lane.b32.xlu1 %v11981_v55, %s10316_s23 }
0x765c   :  { %6412 = vrot.lane.b32.xlu0 %v12088_v41, %s10316_s23  ;;  %6266 = vrot.lane.b32.xlu1 %v12044_v46, %s10316_s23 }
0x7660   :  { %5542 = vrot.lane.b32.xlu0 %v11884_v8, %s10316_s23  ;;  %v6552_v8 = vmul.f32 %v12333_v42, %v6548_v49 }
0x7664   :  { %5830 = vrot.lane.b32.xlu0 %v11947_v47, %s10316_s23 }
0x7668   :  { %6122 = vrot.lane.b32.xlu0 %v12010_v20, %s10316_s23 }
0x76ba   :  { %v7725_v12 = vpop.permute.xlu0 %7724 }
0x76bb   :  { %v7730_v6 = vadd.f32 %v7725_v12, %v12126_v61  ;;  %v7763_v61 = vld [vmem:[%s12549_s8 + $0x30] sm:$0xff] }
0x76bc   :  { %9198 = vmatprep.subr.mxu0 %v7763_v61 }
0x76bd   :  { %9864 = vtanh.f32 %v7730_v6  ;;  %9199 = vmatpush3.msra.mxu0 %v7763_v61 }
0x76be   :  { %v6541_v55 = vpop.permute.xlu0 %6540  ;;  %v7727_v38 = vpop.permute.xlu1 %7726  ;;  %9200 = vmatprep.subr.mxu0 %v7762_v9 }
0x76bf   :  { %v6546_v46 = vmul.f32 %v6541_v55, %v6536_v43  ;;  %v7731_v47 = vadd.f32 %v7727_v38, %v12128_v48  ;;  %9201 = vmatpush3.msra.mxu0 %v7762_v9  ;;  %v7761_v48 = vld [vmem:[%s12549_s8 + $0x20] sm:$0xff]  ;;  %v10317_v55 = vmov 0   ;;  %v8256_v38 = vld [vmem:[#allocation5] ss:$0 sm:$0xff] }
0x76c0   :  { %9202 = vmatprep.subr.mxu0 %v7761_v48  ;;  %9291 = vset.pattern.permute.xlu1 %v10317_v55 }
0x76c1   :  { %v6554_v60 = vadd.f32 %v6552_v8, %v6546_v46  ;;  %9866 = vtanh.f32 %v7731_v47  ;;  %9203 = vmatpush3.msra.mxu0 %v7761_v48  ;;  %9290 = vset.pattern.permute.xlu0 %v10317_v55 }
0x76c2   :  { %v5541_v25 = vpop.permute.xlu0 %5540  ;;  %v6543_v20 = vpop.permute.xlu1 %6542  ;;  %9204 = vmatprep.subr.mxu0 %v7760_v21 }
0x76c3   :  { %5546 = vst.msk [vmem:[#allocation4] sm:$0x1] %vm12550_vm0, %v5541_v25  ;;  %6558 = vrot.lane.b32.xlu1 %v6554_v60, %s10316_s23  ;;  %vm12553_vm0 = vcmask 519427   ;;  %9205 = vmatpush3.msra.mxu0 %v7760_v21 }
0x76c6   :  { %v5829_v41 = vpop.permute.xlu0 %5828  ;;  %v5684_v42 = vpop.permute.xlu1 %5683 }
0x76c7   :  { %5834 = vst.msk [vmem:[#allocation4] sm:$0x4] %vm12551_vm1, %v5829_v41  ;;  %5685 = vrot.lane.b32.xlu1 %v11917_v36, %s10316_s23  ;;  %v7759_v36 = vld [vmem:[%s12549_s8 + $0x10] sm:$0xff]  ;;  %vm12554_vm1 = vcmask 253952  }
0x76c8   :  { %5689 = vst.msk [vmem:[#allocation4] sm:$0x2] %vm745_vm5, %v5684_v42  ;;  %9206 = vmatprep.subr.mxu0 %v7759_v36 }
0x76c9   :  { %7478 = vst.msk [vmem:[#allocation4] sm:$0x4] %vm2546_vm6, %v12299_v19  ;;  %9207 = vmatpush3.msra.mxu0 %v7759_v36 }
0x76ca   :  { %7616 = vst.msk [vmem:[#allocation4] sm:$0x2] %vm2685_vm7, %v12322_v14  ;;  %v9865_v62 = vpop.eup %9864  ;;  %v6121_v56 = vpop.permute.xlu0 %6120  ;;  %9208 = vmatprep.subr.mxu0 %v7758_v40  ;;  %v7735_v14 = vsub.f32 1.0, %v12356_v45 }
0x76cb   :  { %v5975_v22 = vpop.permute.xlu1 %5974  ;;  %6126 = vst.msk [vmem:[#allocation4] sm:$0x10] %vm1185_vm8, %v6121_v56  ;;  %7738 = vrot.lane.b32.xlu0 %v9865_v62, %s10316_s23  ;;  %5976 = vrot.lane.b32.xlu1 %v11979_v32, %s10316_s23  ;;  %v7757_v32 = vld [vmem:[%s12549_s8] sm:$0xff] }
0x76cc   :  { %5980 = vst.msk [vmem:[#allocation4] sm:$0x8] %vm1038_vm9, %v5975_v22  ;;  %9209 = vmatpush3.msra.mxu0 %v7758_v40 }
0x76cd   :  { %7198 = vst.msk [vmem:[#allocation4] sm:$0x10] %vm12552_vm2, %v12236_v57  ;;  %v6549_v57 = vrot.slane %v12085_v23, 7  ;;  %9210 = vmatprep.subr.mxu0 %v7757_v32  ;;  %vm12555_vm2 = vcmask 256002  }
0x76ce   :  { %7338 = vst.msk [vmem:[#allocation4] sm:$0x8] %vm12553_vm0, %v12267_v16  ;;  %v6413_v19 = vpop.permute.xlu0 %6412  ;;  %v6547_v16 = vmul.f32 %v6543_v20, %v6537_v39  ;;  %v9867_v51 = vpop.eup %9866  ;;  %9211 = vmatpush3.msra.mxu0 %v7757_v32  ;;  %vm12556_vm0 = vcmask 520452  }
0x76cf   :  { %v6267_v11 = vpop.permute.xlu1 %6266  ;;  %6418 = vst.msk [vmem:[#allocation4] sm:$0x40] %vm1479_vm12, %v6413_v19  ;;  %6414 = vrot.lane.b32.xlu0 %v12085_v23, %s10316_s23  ;;  %6268 = vrot.lane.b32.xlu1 %v12042_v5, %s10316_s23  ;;  %v6553_v28 = vmul.f32 %v12341_v7, %v6549_v57 }
0x76d0   :  { %6272 = vst.msk [vmem:[#allocation4] sm:$0x20] %vm1332_vm13, %v6267_v11 }
0x76d1   :  { %6918 = vst.msk [vmem:[#allocation4] sm:$0x40] %vm1982_vm14, %v12172_v17  ;;  %v6555_v5 = vadd.f32 %v6553_v28, %v6547_v16 }
0x76d2   :  { %7058 = vst.msk [vmem:[#allocation4] sm:$0x20] %vm2123_vm15, %v12204_v26  ;;  %v5543_v52 = vpop.permute.xlu0 %5542 }
0x76d3   :  { %5547 = vst.msk [vmem:[#allocation4 + $0x8] sm:$0x1] %vm12554_vm1, %v5543_v52  ;;  %7740 = vrot.lane.b32.xlu1 %v9867_v51, %s10316_s23 }
0x76d6   :  { %v5831_v17 = vpop.permute.xlu0 %5830 }
0x76d7   :  { %5835 = vst.msk [vmem:[#allocation4 + $0x8] sm:$0x4] %vm12555_vm2, %v5831_v17  ;;  %6560 = vrot.lane.b32.xlu1 %v6555_v5, %s10316_s23 }
0x76d8   :  { %7479 = vst.msk [vmem:[#allocation4 + $0x8] sm:$0x4] %vm2546_vm6, %v12297_v44  ;;  %v7734_v44 = vsub.f32 1.0, %v12352_v34  ;;  %vm12557_vm6 = vcmask 519427  }
0x76da   :  { %v6123_v23 = vpop.permute.xlu0 %6122 }
0x76db   :  { %6127 = vst.msk [vmem:[#allocation4 + $0x8] sm:$0x10] %vm1185_vm8, %v6123_v23  ;;  %vm8034_vm8 = vcmask 58368  }
0x76dc   :  { %7199 = vst.msk [vmem:[#allocation4 + $0x8] sm:$0x10] %vm12556_vm0, %v12234_v2  ;;  %v7749_v2 = vmul.f32 %v12352_v34, %v7620_v58 }
0x7735   :  { %v6559_v26 = vpop.permute.xlu1 %6558 }
0x7736   :  { %6564 = vst.msk [vmem:[#allocation4] sm:$0x80] %vm1626_vm4, %v6559_v26 }
0x7737   :  { %6778 = vst.msk [vmem:[#allocation4] sm:$0x80] %vm1841_vm3, %v12140_v27 }
0x7739   :  { %v5686_v7 = vpop.permute.xlu1 %5685 }
0x773a   :  { %5690 = vst.msk [vmem:[#allocation4 + $0x8] sm:$0x2] %vm745_vm5, %v5686_v7  ;;  %vm7879_vm5 = vcmask 7168  }
0x773b   :  { %7617 = vst.msk [vmem:[#allocation4 + $0x8] sm:$0x2] %vm2685_vm7, %v12324_v54  ;;  %vm12562_vm7 = vcmask 1041409  }
0x773d   :  { %v7739_v10 = vpop.permute.xlu0 %7738  ;;  %v5977_v29 = vpop.permute.xlu1 %5976 }
0x773e   :  { %v7744_v30 = vmul.f32 %v7739_v10, %v7734_v44  ;;  %5981 = vst.msk [vmem:[#allocation4 + $0x8] sm:$0x8] %vm1038_vm9, %v5977_v29 }
0x773f   :  { %7339 = vst.msk [vmem:[#allocation4 + $0x8] sm:$0x8] %vm12557_vm6, %v12265_v13  ;;  %v7746_v13 = vrot.slane %v12324_v54, 1 }
0x7740   :  { %v7751_v27 = vadd.f32 %v7749_v2, %v7744_v30 }
0x7741   :  { %v6415_v33 = vpop.permute.xlu0 %6414  ;;  %v6269_v3 = vpop.permute.xlu1 %6268  ;;  %v7750_v37 = vmul.f32 %v12356_v45, %v7746_v13 }
0x7742   :  { %7753 = vst.msk [vmem:[#allocation4] sm:$0x1] %vm2823_vm10, %v7751_v27 }
0x7743   :  { %6419 = vst.msk [vmem:[#allocation4 + $0x8] sm:$0x40] %vm1479_vm12, %v6415_v33 }
0x7744   :  { %6273 = vst.msk [vmem:[#allocation4 + $0x8] sm:$0x20] %vm1332_vm13, %v6269_v3 }
0x7745   :  { %6919 = vst.msk [vmem:[#allocation4 + $0x8] sm:$0x40] %vm1982_vm14, %v12170_v18  ;;  %v7741_v58 = vpop.permute.xlu1 %7740 }
0x7746   :  { %7059 = vst.msk [vmem:[#allocation4 + $0x8] sm:$0x20] %vm2123_vm15, %v12202_v53  ;;  %v7745_v31 = vmul.f32 %v7741_v58, %v7735_v14  ;;  %v8252_v53 = vld [vmem:[%s12558_s10] ss:$0 sm:$0xff]  ;;  %v7951_v14 = vld [vmem:[%s10470_s20 + $0x38] sm:$0xff] }
0x7747   :  { %9216 = vmatpush3.msra.mxu1 %v7951_v14 }
0x7748   :  { %v7752_v34 = vadd.f32 %v7750_v37, %v7745_v31  ;;  %9217 = vmatprep.subr.mxu1 %v10313_v1  ;;  %v7950_v37 = vld [vmem:[%s10470_s20 + $0x30] sm:$0xff]  ;;  %v7949_v31 = vld [vmem:[%s10470_s20 + $0x28] sm:$0xff] }
0x7749   :  { %v6561_v4 = vpop.permute.xlu1 %6560  ;;  %v12459_v63 = vld [vmem:[#allocation4] sm:$0xff]  ;;  %9218 = vmatpush3.msra.mxu1 %v7950_v37 }
0x774a   :  { %7754 = vst.msk [vmem:[#allocation4 + $0x8] sm:$0x1] %vm2823_vm10, %v7752_v34  ;;  %9212 = vmatprep.mubr.msk.f32.mxu0 %vm2862_vm11, %v12459_v63  ;;  %9219 = vmatprep.subr.mxu1 %v10313_v1  ;;  %v7948_v34 = vld [vmem:[%s10470_s20 + $0x20] sm:$0xff] }
0x774b   :  { %6565 = vst.msk [vmem:[#allocation4 + $0x8] sm:$0x80] %vm1626_vm4, %v6561_v4  ;;  %vm12560_vm4 = vcmask 261120   ;;  %9220 = vmatpush3.msra.mxu1 %v7949_v31  ;;  %v7947_v4 = vld [vmem:[%s10470_s20 + $0x18] sm:$0xff] }
0x774c   :  { %6779 = vst.msk [vmem:[#allocation4 + $0x8] sm:$0x80] %vm1841_vm3, %v12138_v15  ;;  %vm12561_vm3 = vmmov %vm12560_vm4  ;;  %9221 = vmatprep.subr.mxu1 %v10313_v1 }
0x774d   :  { %9222 = vmatpush3.msra.mxu1 %v7948_v34 }
0x774e   :  { %9223 = vmatprep.subr.mxu1 %v10313_v1 }
0x774f   :  { %9224 = vmatpush3.msra.mxu1 %v7947_v4 }
0x7750   :  { %9225 = vmatprep.subr.mxu1 %v10313_v1 }
0x7753   :  { %v12467_v18 = vld [vmem:[#allocation4 + $0x8] sm:$0xff] }
0x7754   :  { %9213 = vmatmul.mubr.msk.f32.vlgmr.msra.gmra.mxu0 %vm2862_vm11, %v12467_v18 }
0x7814   :  { %v9214_v54 = vpop.f32.mrf.mxu0 }
0x7815   :  { %v7850_v45 = vadd.f32 %v9214_v54, %v8252_v53  ;;  %v7945_v54 = vld [vmem:[%s10470_s20 + $0x8] sm:$0xff] }
0x7816   :  { %v7844_v50 = vpop.f32.mrf.mxu0 }
0x7817   :  { %9868 = vtanh.f32 %v7850_v45  ;;  %v7845_v24 = vadd.f32 %v8252_v53, %v7844_v50  ;;  %v7946_v53 = vld [vmem:[%s10470_s20 + $0x10] sm:$0xff]  ;;  %v7944_v45 = vld [vmem:[%s10470_s20] sm:$0xff]  ;;  %s10318_s20 = smov [#allocation33]  }
0x7818   :  { %9226 = vmatpush3.msra.mxu1 %v7946_v53  ;;  %s8042_s25 = sshll.u32 %s10318_s20, 4  ;;  %s8043_s25 = int_to_ptr.vmem [resolvable:$true] %s8042_s25 }
0x7819   :  { %9870 = vtanh.f32 %v7845_v24  ;;  %9227 = vmatprep.subr.mxu1 %v10313_v1  ;;  %s10223_s3 = scalar_lea.vmem %s8043_s25, 32  ;;  %p10228_p2 = scmp.lt.s32.totalorder %s8043_s25, %s8043_s25 }
0x781a   :  { %9228 = vmatpush3.msra.mxu1 %v7945_v54  ;;  %p10224_p1 = scmp.ne.s32.totalorder %s8043_s25, %s10223_s3  ;;  %p10229_p3 = scmp.lt.s32.totalorder %s10223_s3, %s10223_s3 }
0x781b   :  { %9229 = vmatprep.subr.mxu1 %v10313_v1 }
0x781c   :  { %9230 = vmatpush3.msra.mxu1 %v7944_v45  ;;  %p10230_p4 = por %p10229_p3, %p10228_p2 }
0x781e   :  { %p10231_p5 = pnand %p10230_p4, %p10224_p1 }
0x7824   :  { %v9869_v59 = vpop.eup %9868 }
0x7825   :  { %v7863_v12 = vmul.f32 %v9869_v59, %v8255_v35 }
0x7826   :  { %v9871_v6 = vpop.eup %9870 }
0x7827   :  { %v7867_v43 = vsel %vm12560_vm4, %v7863_v12, 0.0  ;;  %v7862_v49 = vmul.f32 %v9871_v6, %v8255_v35 }
0x7828   :  { %7868 = vadd.xlane.f32.xlu1 %v7867_v43 }
0x7829   :  { %v7864_v15 = vsel %vm12561_vm3, %v7862_v49, 0.0 }
0x782a   :  { %7865 = vadd.xlane.f32.xlu0 %v7864_v15 }
0x78b1   :  { %v7869_v8 = vpop.xlane.xlu1 %7868 }
0x78b2   :  { %v7878_v46 = vadd.f32 %v8256_v38, %v7869_v8 }
0x78b3   :  { %v7866_v60 = vpop.xlane.xlu0 %7865 }
0x78b4   :  { %v7887_v47 = vsel %vm7879_vm5, %v7878_v46, -inf  ;;  %v7877_v25 = vadd.f32 %v8256_v38, %v7866_v60 }
0x78b5   :  { %v7888_v20 = vrot.slane %v7887_v47, 4 }
0x78b6   :  { %v7880_v0 = vsel %vm7879_vm5, %v7877_v25, -inf }
0x78b7   :  { %v7889_v61 = vmax.f32 %v7887_v47, %v7888_v20  ;;  %v7881_v41 = vrot.slane %v7880_v0, 4 }
0x78b9   :  { %v7890_v42 = vrot.slane %v7889_v61, 2  ;;  %v7882_v9 = vmax.f32 %v7880_v0, %v7881_v41 }
0x78bb   :  { %v7891_v48 = vmax.f32 %v7889_v61, %v7890_v42  ;;  %v7883_v62 = vrot.slane %v7882_v9, 2 }
0x78bd   :  { %v7892_v56 = vrot.slane %v7891_v48, 1  ;;  %v7884_v22 = vmax.f32 %v7882_v9, %v7883_v62 }
0x78bf   :  { %v7893_v21 = vmax.f32 %v7891_v48, %v7892_v56  ;;  %v7885_v36 = vrot.slane %v7884_v22, 1 }
0x78c1   :  { %v7895_v19 = vsub.f32 %v7878_v46, %v7893_v21  ;;  %v7886_v11 = vmax.f32 %v7884_v22, %v7885_v36 }
0x78c3   :  { %v7898_v40 = vmul.f32 1.442695, %v7895_v19  ;;  %v7894_v39 = vsub.f32 %v7877_v25, %v7886_v11 }
0x78c5   :  { %9872 = vpow2.f32 %v7898_v40  ;;  %v7896_v32 = vmul.f32 1.442695, %v7894_v39 }
0x78c7   :  { %9874 = vpow2.f32 %v7896_v32 }
0x78d2   :  { %v9873_v57 = vpop.eup %9872 }
0x78d3   :  { %v7907_v16 = vsel %vm7879_vm5, %v9873_v57, 0.0 }
0x78d4   :  { %v9875_v51 = vpop.eup %9874  ;;  %v7908_v52 = vrot.slane %v7907_v16, 4 }
0x78d5   :  { %v7900_v28 = vsel %vm7879_vm5, %v9875_v51, 0.0 }
0x78d6   :  { %v7909_v5 = vadd.f32 %v7908_v52, %v7907_v16  ;;  %v7901_v17 = vrot.slane %v7900_v28, 4 }
0x78d8   :  { %v7910_v23 = vrot.slane %v7909_v5, 2  ;;  %v7902_v26 = vadd.f32 %v7901_v17, %v7900_v28 }
0x78da   :  { %v7911_v7 = vadd.f32 %v7910_v23, %v7909_v5  ;;  %v7903_v44 = vrot.slane %v7902_v26, 2 }
0x78dc   :  { %v7912_v10 = vrot.slane %v7911_v7, 1  ;;  %v7904_v29 = vadd.f32 %v7903_v44, %v7902_v26 }
0x78de   :  { %v7913_v2 = vadd.f32 %v7912_v10, %v7911_v7  ;;  %v7905_v30 = vrot.slane %v7904_v29, 1 }
0x78e0   :  { %9876 = vrcp.f32 %v7913_v2  ;;  %v7906_v27 = vadd.f32 %v7905_v30, %v7904_v29 }
0x78e2   :  { %9878 = vrcp.f32 %v7906_v27 }
0x78ed   :  { %v9877_v33 = vpop.eup %9876 }
0x78ee   :  { %v7917_v3 = vmul.f32 %v9877_v33, %v9873_v57 }
0x78ef   :  { %v9879_v13 = vpop.eup %9878 }
0x78f0   :  { %7925 = vperm.xlu1 %9291, %v7917_v3   ;;  %v7915_v58 = vmul.f32 %v9879_v13, %v9875_v51 }
0x78f2   :  { %7920 = vperm.xlu0 %9290, %v7915_v58  }
0x796b   :  { %v7926_v50 = vpop.permute.xlu1 %7925 }
0x796c   :  { %v7929_v24 = vmul.f32 %v7926_v50, %v12467_v18 }
0x796d   :  { %v7921_v35 = vpop.permute.xlu0 %7920 }
0x796e   :  { %v7937_v59 = vsel %vm2862_vm11, %v7929_v24, 0.0  ;;  %v7928_v12 = vmul.f32 %v7921_v35, %v12459_v63  ;;  %v8257_v63 = vld [vmem:[%s10475_s6] ss:$0 sm:$0xff] }
0x796f   :  { %v7938_v6 = vrot.slane %v7937_v59, 4 }
0x7970   :  { %v7930_v43 = vsel %vm2862_vm11, %v7928_v12, 0.0 }
0x7971   :  { %v7939_v49 = vadd.f32 %v7938_v6, %v7937_v59  ;;  %v7931_v15 = vrot.slane %v7930_v43, 4 }
0x7973   :  { %v7940_v55 = vrot.slane %v7939_v49, 2  ;;  %v7932_v38 = vadd.f32 %v7931_v15, %v7930_v43 }
0x7975   :  { %v7941_v8 = vadd.f32 %v7940_v55, %v7939_v49  ;;  %v7933_v46 = vrot.slane %v7932_v38, 2 }
0x7977   :  { %v7942_v1 = vrot.slane %v7941_v8, 1  ;;  %v7934_v60 = vadd.f32 %v7933_v46, %v7932_v38 }
0x7979   :  { %v7935_v47 = vrot.slane %v7934_v60, 1  ;;  %v7943_v25 = vadd.f32 %v7942_v1, %v7941_v8 }
0x797b   :  { %v7936_v18 = vadd.f32 %v7935_v47, %v7934_v60 }
0x797d   :  { %v7961_v20 = vsel %vm12562_vm7, %v7943_v25, %v7936_v18 }
0x797e   :  { %9232 = vmatmul.mubr.msk.f32.vlgmr.msra.gmra.mxu1 %vm2862_vm11, %v7961_v20 }
0x7a3e   :  { %v8030_v0 = vpop.f32.mrf.mxu1 }
0x7a3f   :  { %v8031_v61 = vadd.f32 %v8257_v63, %v8030_v0 }
0x7a40   :  { %v9233_v41 = vpop.f32.mrf.mxu1 }
0x7a41   :  { %8035 = vst.msk [vmem:[#allocation33] sm:$0x3] %vm8034_vm8, %v8031_v61 }
0x7a42   :  { %10234 = shalt.err (!%p10231_p5)
}
0x7a43   :  { %8045 = dma.vmem_to_hbm [thread:$0]  %s8043_s25, 32, %s10480_s14, [#allocation8]  }
0x7a44   :  { %10261 = dma.done.wait [#allocation8], 32  }
0x7a45   :  { %10262 = vsyncadd [#allocation8], 4294967264 }
0x7a46   :  { %8049 = vsyncpa [#allocation7], 1 }
0x7a47   :  { %8050 = vsyncpa [#allocation10], 1 }
0x7a48   :  { %8051 = vsyncpa [#allocation13], 1 }
0x7a49   :  { %8052 = vsyncpa [#allocation16], 1 }
0x7a4a   :  { %8053 = vsyncpa [#allocation19], 1 }
0x7a4b   :  { %8054 = vsyncpa [#allocation22], 1 }
0x7a4c   :  { %8055 = vsyncpa [#allocation25], 1 }
0x7a4d   :  { %8056 = vsyncpa [#allocation28], 1 }
0x7a4e   :  { %8057 = vsyncpa [#allocation31], 1 }
0x7a4f   :  { %8058 = vsyncpa [#allocation8], 1 }

</bundles_post_ra>
